<compile_context>
chip_gen: v7x
topology: tpu7x:2x2x1
jax: 0.10.0
libtpu: 0.0.40
codegen_flags: <defaults>
</compile_context>

<pallas_src>
import math

import jax
import jax.numpy as jnp
from jax.experimental import pallas as pl
from jax.experimental.pallas import tpu as pltpu

# ----------------------- config (small, module-consistent) -----------------------
B = 2                       # batch
H_IMG = W_IMG = 16          # image spatial size (scaled down from 224)
PATCH = 4                   # patch size (scaled down from 14)
S = (H_IMG // PATCH) * (W_IMG // PATCH)   # 16 patches / tokens
BASE_DIM = 16               # vision_backbone.get_head_feature_dim()
FUSED_DIM = 16              # vision_backbone.get_fused_head_feature_dim()
VIS_DIM = BASE_DIM + FUSED_DIM            # 32 (= mask-encoder hidden)
LLM_DIM = 32
HEADS = 8                   # all MHA blocks in the module use 8 heads
N_MASKS = 3                 # number of seg masks per sample
N_LAYERS = 4                # TransformerEncoder num_layers
FF_DIM = 4 * VIS_DIM        # 128
PP = PATCH * PATCH          # 16


# ============================ in-kernel helper math ============================

def _ln(x, g, b, eps=1e-5):
    """LayerNorm over the last dim (f32), matching PyTorch eps=1e-5."""
    mu = jnp.mean(x, axis=-1, keepdims=True)
    var = jnp.mean(jnp.square(x - mu), axis=-1, keepdims=True)
    return (x - mu) * jax.lax.rsqrt(var + eps) * g + b


def _gelu(x):
    # TODO(synk): PyTorch nn.GELU() is exact erf-GELU; tanh approximation used in-kernel.
    return jax.nn.gelu(x, approximate=True)


def _mha(q, k, v, num_heads):
    """Head-batched multi-head attention core. q,k,v: [S, D] -> [S, D]."""
    _, D = q.shape
    dh = D // num_heads
    scale = 1.0 / math.sqrt(dh)

    def split_heads(z):
        # [S, D] -> [H, S, dh] via lane slices stacked on a new leading axis.
        return jnp.stack([z[:, h * dh:(h + 1) * dh] for h in range(num_heads)], axis=0)

    qh = split_heads(q) * scale                       # [H, S, dh]
    kh = split_heads(k)                               # [H, S, dh]
    vh = split_heads(v)                               # [H, S, dh]

    # One batched contraction for all heads (scores), one for the values.
    s = jnp.einsum("hqd,hkd->hqk", qh, kh, preferred_element_type=jnp.float32)
    s = s - jnp.max(s, axis=-1, keepdims=True)
    p = jnp.exp(s)
    p = p * pl.reciprocal(jnp.sum(p, axis=-1, keepdims=True), approx=True)
    o = jnp.einsum("hqk,hkd->hqd", p, vh, preferred_element_type=jnp.float32)  # [H, S, dh]

    # merge heads back onto the lane axis
    return jnp.concatenate([o[h] for h in range(num_heads)], axis=-1)          # [S, D]


# ================================ fused kernel ================================

def _s2a_fused_kernel(
    # per-batch activations (row-blocked by the grid)
    mask_p_ref,      # [S, PP]        patchified merged seg mask
    rgb_p_ref,       # [S, 6*PP]      patchified 6-channel pixel values
    # mask-encoder patch embed / pos
    pos_ref,         # [S, D]
    pe_w_ref, pe_b_ref, pe_g_ref, pe_beta_ref,
    # stacked transformer-layer weights, all resident in VMEM
    ln1_g_ref, ln1_b_ref, wqkv_ref, bqkv_ref, wo_ref, bo_ref,
    ln2_g_ref, ln2_b_ref, w1_ref, b1_ref, w2_ref, b2_ref,
    # mask projector (fused 3-layer path)
    mp_w1_ref, mp_b1_ref, mp_w2_ref, mp_b2_ref, mp_w3_ref, mp_b3_ref,
    # block-diagonal stand-in featurizer (+ fused featurizer)
    feat_w_ref, feat_b_ref,
    # RGBMFuse
    f_wq_ref, f_bq_ref, f_wkv_ref, f_bkv_ref, f_wo_ref, f_bo_ref, f_g_ref, f_b_ref,
    # outputs
    fused_ref,       # [S, D]
    mllm_ref,        # [S, LLM]
):
    D = VIS_DIM

    # ---- mask encoder: Conv2d-as-matmul patch embed + LayerNorm + pos add ----
    x = jnp.dot(mask_p_ref[...], pe_w_ref[...], preferred_element_type=jnp.float32)
    x = _ln(x + pe_b_ref[...], pe_g_ref[...], pe_beta_ref[...])
    x = x + pos_ref[...]

    # ---- 4 pre-norm transformer layers (fused QKV, folded residuals) ----
    for l in range(N_LAYERS):
        h = _ln(x, ln1_g_ref[l], ln1_b_ref[l])
        qkv = jnp.dot(h, wqkv_ref[l], preferred_element_type=jnp.float32) + bqkv_ref[l]
        a = _mha(qkv[:, :D], qkv[:, D:2 * D], qkv[:, 2 * D:], HEADS)
        x = x + jnp.dot(a, wo_ref[l], preferred_element_type=jnp.float32) + bo_ref[l]

        h = _ln(x, ln2_g_ref[l], ln2_b_ref[l])
        h = _gelu(jnp.dot(h, w1_ref[l], preferred_element_type=jnp.float32) + b1_ref[l])
        x = x + jnp.dot(h, w2_ref[l], preferred_element_type=jnp.float32) + b2_ref[l]
    mask_tokens = x                                                   # [S, D]

    # ---- S2AMaskProjector (fused path): fc1 -> GELU -> fc2 -> GELU -> fc3 ----
    m = _gelu(jnp.dot(mask_tokens, mp_w1_ref[...], preferred_element_type=jnp.float32)
              + mp_b1_ref[...])
    m = _gelu(jnp.dot(m, mp_w2_ref[...], preferred_element_type=jnp.float32)
              + mp_b2_ref[...])
    mllm_ref[...] = (jnp.dot(m, mp_w3_ref[...], preferred_element_type=jnp.float32)
                     + mp_b3_ref[...]).astype(mllm_ref.dtype)

    # ---- _encode_single (fused backbone): both featurizers as ONE block-diag matmul,
    #      output is already lane-contiguous [S, D] (t1 in [:, :16], t2 in [:, 16:]) ----
    # TODO(synk): real SigLIP/DINOv2 featurizers are external; stood in with
    # deterministic patch-embed featurizers of matching output shape.
    rgb = jnp.dot(rgb_p_ref[...], feat_w_ref[...], preferred_element_type=jnp.float32)
    rgb = rgb + feat_b_ref[...]

    # ---- RGBMFuse: MHA(q=rgb, k=v=mask_tokens) -> LayerNorm(rgb + attn) ----
    q = jnp.dot(rgb, f_wq_ref[...], preferred_element_type=jnp.float32) + f_bq_ref[...]
    kv = jnp.dot(mask_tokens, f_wkv_ref[...], preferred_element_type=jnp.float32) + f_bkv_ref[...]
    a = _mha(q, kv[:, :D], kv[:, D:], HEADS)
    a = jnp.dot(a, f_wo_ref[...], preferred_element_type=jnp.float32) + f_bo_ref[...]
    fused_ref[...] = _ln(rgb + a, f_g_ref[...], f_b_ref[...]).astype(fused_ref.dtype)


# ================================= glue (JAX) =================================

def patchify(x_nchw, p):
    """NCHW -> [B, tokens, C*p*p] with (c, kh, kw) ordering (Conv2d weight flattening)."""
    b, c, h, w = x_nchw.shape
    x = x_nchw.reshape(b, c, h // p, p, w // p, p)
    x = x.transpose(0, 2, 4, 1, 3, 5)
    return x.reshape(b, (h // p) * (w // p), c * p * p)


def _full_spec(a):
    nd = a.ndim
    return pl.BlockSpec(a.shape, lambda b, _nd=nd: (0,) * _nd)


def s2a_forward(params, pixel_values, seg_masks):
    """pixel_values: [B, 6, H, W] (RGB + fused-RGB); seg_masks: [B, N, 1, H, W]."""
    b = seg_masks.shape[0]

    # merged_mask = stack([m.amax(dim=0) for m in seg_masks])  -> [B, 1, H, W]
    # (trivial reduction: plain XLA, no dedicated kernel launch)
    merged = jnp.max(seg_masks.astype(jnp.float32), axis=1)

    mask_patches = patchify(merged, PATCH).reshape(b * S, PP)                  # [B*S, 16]
    rgb_patches = patchify(pixel_values, PATCH).reshape(b * S, 6 * PP)         # [B*S, 96]

    me, mp, fu = params["me"], params["mp"], params["fuse"]

    # Block-diagonal featurizer weight: one [96, 32] matmul == cat([t1, t2], -1).
    z_bf = jnp.zeros((3 * PP, FUSED_DIM), jnp.float32)
    z_fb = jnp.zeros((3 * PP, BASE_DIM), jnp.float32)
    feat_w_blk = jnp.concatenate(
        [jnp.concatenate([params["feat_w"], z_bf], axis=1),
         jnp.concatenate([z_fb, params["ffeat_w"]], axis=1)], axis=0)          # [96, 32]
    feat_b_blk = jnp.concatenate([params["feat_b"], params["ffeat_b"]], axis=1)  # [1, 32]

    pos2 = me["pos"].reshape(S, VIS_DIM)

    ops = [
        mask_patches, rgb_patches, pos2,
        me["pe_w"], me["pe_b"], me["pe_ln_g"], me["pe_ln_b"],
        me["ln1_g"], me["ln1_b"], me["wqkv"], me["bqkv"], me["wo"], me["bo"],
        me["ln2_g"], me["ln2_b"], me["w1"], me["b1"], me["w2"], me["b2"],
        mp["w1"], mp["b1"], mp["w2"], mp["b2"], mp["w3"], mp["b3"],
        feat_w_blk, feat_b_blk,
        fu["wq"], fu["bq"], fu["wkv"], fu["bkv"], fu["wo"], fu["bo"],
        fu["ln_g"], fu["ln_b"],
    ]

    in_specs = ([pl.BlockSpec((S, PP), lambda i: (i, 0)),
                 pl.BlockSpec((S, 6 * PP), lambda i: (i, 0))]
                + [_full_spec(a) for a in ops[2:]])

    fused, mask_llm = pl.pallas_call(
        _s2a_fused_kernel,
        out_shape=(jax.ShapeDtypeStruct((b * S, VIS_DIM), jnp.float32),
                   jax.ShapeDtypeStruct((b * S, LLM_DIM), jnp.float32)),
        grid=(b,),
        in_specs=in_specs,
        out_specs=[pl.BlockSpec((S, VIS_DIM), lambda i: (i, 0)),
                   pl.BlockSpec((S, LLM_DIM), lambda i: (i, 0))],
        compiler_params=pltpu.CompilerParams(dimension_semantics=("parallel",)),
    )(*ops)

    return fused.reshape(b, S, VIS_DIM), mask_llm.reshape(b, S, LLM_DIM)


# ============================== parameter init ==============================

def init_params(key):
    keys = iter(jax.random.split(key, 64))

    def rnd(shape, scale=0.02):
        return (scale * jax.random.normal(next(keys), shape)).astype(jnp.float32)

    def zeros(*shape):
        return jnp.zeros(shape, jnp.float32)

    def ones(*shape):
        return jnp.ones(shape, jnp.float32)

    L, D, FF = N_LAYERS, VIS_DIM, FF_DIM

    me = dict(
        pe_w=rnd((PP, D)), pe_b=zeros(1, D),
        pe_ln_g=ones(1, D), pe_ln_b=zeros(1, D),
        pos=rnd((1, S, D), scale=1.0),
        # per-layer weights stacked along a leading L axis (kept resident in VMEM)
        ln1_g=ones(L, 1, D), ln1_b=zeros(L, 1, D),
        wqkv=rnd((L, D, 3 * D)), bqkv=zeros(L, 1, 3 * D),     # fused QKV projection
        wo=rnd((L, D, D)), bo=zeros(L, 1, D),
        ln2_g=ones(L, 1, D), ln2_b=zeros(L, 1, D),
        w1=rnd((L, D, FF)), b1=zeros(L, 1, FF),
        w2=rnd((L, FF, D)), b2=zeros(L, 1, D),
    )
    mp = dict(w1=rnd((D, 4 * D)), b1=zeros(1, 4 * D),
              w2=rnd((4 * D, LLM_DIM)), b2=zeros(1, LLM_DIM),
              w3=rnd((LLM_DIM, LLM_DIM)), b3=zeros(1, LLM_DIM))
    fuse = dict(wq=rnd((D, D)), bq=zeros(1, D),
                wkv=rnd((D, 2 * D)), bkv=zeros(1, 2 * D),     # fused K/V projection
                wo=rnd((D, D)), bo=zeros(1, D),
                ln_g=ones(1, D), ln_b=zeros(1, D))

    return dict(
        # stand-in featurizer / fused_featurizer patch embeds
        feat_w=rnd((3 * PP, BASE_DIM)), feat_b=zeros(1, BASE_DIM),
        ffeat_w=rnd((3 * PP, FUSED_DIM)), ffeat_b=zeros(1, FUSED_DIM),
        me=me, mp=mp, fuse=fuse,
    )


# ==================================== main ====================================

if __name__ == "__main__":
    root = jax.random.PRNGKey(0)
    kp, kx, km = jax.random.split(root, 3)
    params = init_params(kp)

    pixel_values = jax.random.normal(kx, (B, 6, H_IMG, W_IMG), jnp.float32)
    seg_masks = (jax.random.uniform(km, (B, N_MASKS, 1, H_IMG, W_IMG)) > 0.5).astype(jnp.float32)

    fwd = jax.jit(s2a_forward)
    rgb_fused, mask_llm = fwd(params, pixel_values, seg_masks)
    jax.block_until_ready((rgb_fused, mask_llm))

    assert rgb_fused.shape == (B, S, VIS_DIM)
    assert mask_llm.shape == (B, S, LLM_DIM)
    assert bool(jnp.all(jnp.isfinite(rgb_fused))) and bool(jnp.all(jnp.isfinite(mask_llm)))
    print("KERNEL_OK")
</pallas_src>

<mosaic_0001>
module attributes {stable_mosaic.version = 11 : i64} {
  func.func @_s2a_fused_kernel(%arg0: i32, %arg1: memref<16x16xf32, #tpu.memory_space<vmem>>, %arg2: memref<16x96xf32, #tpu.memory_space<vmem>>, %arg3: memref<16x32xf32, #tpu.memory_space<vmem>>, %arg4: memref<16x32xf32, #tpu.memory_space<vmem>>, %arg5: memref<1x32xf32, #tpu.memory_space<vmem>>, %arg6: memref<1x32xf32, #tpu.memory_space<vmem>>, %arg7: memref<1x32xf32, #tpu.memory_space<vmem>>, %arg8: memref<4x1x32xf32, #tpu.memory_space<vmem>>, %arg9: memref<4x1x32xf32, #tpu.memory_space<vmem>>, %arg10: memref<4x32x96xf32, #tpu.memory_space<vmem>>, %arg11: memref<4x1x96xf32, #tpu.memory_space<vmem>>, %arg12: memref<4x32x32xf32, #tpu.memory_space<vmem>>, %arg13: memref<4x1x32xf32, #tpu.memory_space<vmem>>, %arg14: memref<4x1x32xf32, #tpu.memory_space<vmem>>, %arg15: memref<4x1x32xf32, #tpu.memory_space<vmem>>, %arg16: memref<4x32x128xf32, #tpu.memory_space<vmem>>, %arg17: memref<4x1x128xf32, #tpu.memory_space<vmem>>, %arg18: memref<4x128x32xf32, #tpu.memory_space<vmem>>, %arg19: memref<4x1x32xf32, #tpu.memory_space<vmem>>, %arg20: memref<32x128xf32, #tpu.memory_space<vmem>>, %arg21: memref<1x128xf32, #tpu.memory_space<vmem>>, %arg22: memref<128x32xf32, #tpu.memory_space<vmem>>, %arg23: memref<1x32xf32, #tpu.memory_space<vmem>>, %arg24: memref<32x32xf32, #tpu.memory_space<vmem>>, %arg25: memref<1x32xf32, #tpu.memory_space<vmem>>, %arg26: memref<96x32xf32, #tpu.memory_space<vmem>>, %arg27: memref<1x32xf32, #tpu.memory_space<vmem>>, %arg28: memref<32x32xf32, #tpu.memory_space<vmem>>, %arg29: memref<1x32xf32, #tpu.memory_space<vmem>>, %arg30: memref<32x64xf32, #tpu.memory_space<vmem>>, %arg31: memref<1x64xf32, #tpu.memory_space<vmem>>, %arg32: memref<32x32xf32, #tpu.memory_space<vmem>>, %arg33: memref<1x32xf32, #tpu.memory_space<vmem>>, %arg34: memref<1x32xf32, #tpu.memory_space<vmem>>, %arg35: memref<1x32xf32, #tpu.memory_space<vmem>>, %arg36: memref<16x32xf32, #tpu.memory_space<vmem>>, %arg37: memref<16x32xf32, #tpu.memory_space<vmem>>) attributes {dimension_semantics = [#tpu.dimension_semantics<parallel>], iteration_bounds = array<i64: 2>, scalar_prefetch = 0 : i64, scratch_operands = 0 : i64, tpu.core_type = #tpu.core_type<tc>, window_params = [{transform_indices = @transform_0, window_bounds = array<i64: 16, 16>}, {transform_indices = @transform_1, window_bounds = array<i64: 16, 96>}, {pipeline_mode = #tpu.pipeline_mode<synchronous>, transform_indices = @transform_2, window_bounds = array<i64: 16, 32>}, {pipeline_mode = #tpu.pipeline_mode<synchronous>, transform_indices = @transform_3, window_bounds = array<i64: 16, 32>}, {pipeline_mode = #tpu.pipeline_mode<synchronous>, transform_indices = @transform_4, window_bounds = array<i64: 1, 32>}, {pipeline_mode = #tpu.pipeline_mode<synchronous>, transform_indices = @transform_5, window_bounds = array<i64: 1, 32>}, {pipeline_mode = #tpu.pipeline_mode<synchronous>, transform_indices = @transform_6, window_bounds = array<i64: 1, 32>}, {pipeline_mode = #tpu.pipeline_mode<synchronous>, transform_indices = @transform_7, window_bounds = array<i64: 4, 1, 32>}, {pipeline_mode = #tpu.pipeline_mode<synchronous>, transform_indices = @transform_8, window_bounds = array<i64: 4, 1, 32>}, {pipeline_mode = #tpu.pipeline_mode<synchronous>, transform_indices = @transform_9, window_bounds = array<i64: 4, 32, 96>}, {pipeline_mode = #tpu.pipeline_mode<synchronous>, transform_indices = @transform_10, window_bounds = array<i64: 4, 1, 96>}, {pipeline_mode = #tpu.pipeline_mode<synchronous>, transform_indices = @transform_11, window_bounds = array<i64: 4, 32, 32>}, {pipeline_mode = #tpu.pipeline_mode<synchronous>, transform_indices = @transform_12, window_bounds = array<i64: 4, 1, 32>}, {pipeline_mode = #tpu.pipeline_mode<synchronous>, transform_indices = @transform_13, window_bounds = array<i64: 4, 1, 32>}, {pipeline_mode = #tpu.pipeline_mode<synchronous>, transform_indices = @transform_14, window_bounds = array<i64: 4, 1, 32>}, {pipeline_mode = #tpu.pipeline_mode<synchronous>, transform_indices = @transform_15, window_bounds = array<i64: 4, 32, 128>}, {pipeline_mode = #tpu.pipeline_mode<synchronous>, transform_indices = @transform_16, window_bounds = array<i64: 4, 1, 128>}, {pipeline_mode = #tpu.pipeline_mode<synchronous>, transform_indices = @transform_17, window_bounds = array<i64: 4, 128, 32>}, {pipeline_mode = #tpu.pipeline_mode<synchronous>, transform_indices = @transform_18, window_bounds = array<i64: 4, 1, 32>}, {pipeline_mode = #tpu.pipeline_mode<synchronous>, transform_indices = @transform_19, window_bounds = array<i64: 32, 128>}, {pipeline_mode = #tpu.pipeline_mode<synchronous>, transform_indices = @transform_20, window_bounds = array<i64: 1, 128>}, {pipeline_mode = #tpu.pipeline_mode<synchronous>, transform_indices = @transform_21, window_bounds = array<i64: 128, 32>}, {pipeline_mode = #tpu.pipeline_mode<synchronous>, transform_indices = @transform_22, window_bounds = array<i64: 1, 32>}, {pipeline_mode = #tpu.pipeline_mode<synchronous>, transform_indices = @transform_23, window_bounds = array<i64: 32, 32>}, {pipeline_mode = #tpu.pipeline_mode<synchronous>, transform_indices = @transform_24, window_bounds = array<i64: 1, 32>}, {pipeline_mode = #tpu.pipeline_mode<synchronous>, transform_indices = @transform_25, window_bounds = array<i64: 96, 32>}, {pipeline_mode = #tpu.pipeline_mode<synchronous>, transform_indices = @transform_26, window_bounds = array<i64: 1, 32>}, {pipeline_mode = #tpu.pipeline_mode<synchronous>, transform_indices = @transform_27, window_bounds = array<i64: 32, 32>}, {pipeline_mode = #tpu.pipeline_mode<synchronous>, transform_indices = @transform_28, window_bounds = array<i64: 1, 32>}, {pipeline_mode = #tpu.pipeline_mode<synchronous>, transform_indices = @transform_29, window_bounds = array<i64: 32, 64>}, {pipeline_mode = #tpu.pipeline_mode<synchronous>, transform_indices = @transform_30, window_bounds = array<i64: 1, 64>}, {pipeline_mode = #tpu.pipeline_mode<synchronous>, transform_indices = @transform_31, window_bounds = array<i64: 32, 32>}, {pipeline_mode = #tpu.pipeline_mode<synchronous>, transform_indices = @transform_32, window_bounds = array<i64: 1, 32>}, {pipeline_mode = #tpu.pipeline_mode<synchronous>, transform_indices = @transform_33, window_bounds = array<i64: 1, 32>}, {pipeline_mode = #tpu.pipeline_mode<synchronous>, transform_indices = @transform_34, window_bounds = array<i64: 1, 32>}, {transform_indices = @transform_35, window_bounds = array<i64: 16, 32>}, {transform_indices = @transform_36, window_bounds = array<i64: 16, 32>}]} {
    %c0 = arith.constant 0 : index
    %c0_0 = arith.constant 0 : index
    %0 = vector.load %arg1[%c0, %c0_0] : memref<16x16xf32, #tpu.memory_space<vmem>>, vector<16x16xf32>
    %c0_1 = arith.constant 0 : index
    %c0_2 = arith.constant 0 : index
    %1 = vector.load %arg4[%c0_1, %c0_2] : memref<16x32xf32, #tpu.memory_space<vmem>>, vector<16x32xf32>
    %cst = arith.constant dense<0.000000e+00> : vector<16x32xf32>
    %2 = tpu.matmul %0, %1, %cst {dimension_numbers = #tpu.dot_dimension_numbers<[1], [0], [0], [1], [0, 0, 1, 1], [], []>} : vector<16x16xf32>, vector<16x32xf32>, vector<16x32xf32> -> vector<16x32xf32>
    %c0_3 = arith.constant 0 : index
    %c0_4 = arith.constant 0 : index
    %3 = vector.load %arg5[%c0_3, %c0_4] : memref<1x32xf32, #tpu.memory_space<vmem>>, vector<1x32xf32>
    %4 = vector.broadcast %3 : vector<1x32xf32> to vector<16x32xf32>
    %5 = arith.addf %2, %4 : vector<16x32xf32>
    %c0_5 = arith.constant 0 : index
    %c0_6 = arith.constant 0 : index
    %6 = vector.load %arg6[%c0_5, %c0_6] : memref<1x32xf32, #tpu.memory_space<vmem>>, vector<1x32xf32>
    %c0_7 = arith.constant 0 : index
    %c0_8 = arith.constant 0 : index
    %7 = vector.load %arg7[%c0_7, %c0_8] : memref<1x32xf32, #tpu.memory_space<vmem>>, vector<1x32xf32>
    %cst_9 = arith.constant dense<0.000000e+00> : vector<16xf32>
    %8 = vector.multi_reduction <add>, %5, %cst_9 [1] : vector<16x32xf32> to vector<16xf32>
    %9 = vector.shape_cast %8 : vector<16xf32> to vector<16x1xf32>
    %cst_10 = arith.constant 3.200000e+01 : f32
    %10 = vector.broadcast %cst_10 : f32 to vector<16x1xf32>
    %11 = arith.divf %9, %10 : vector<16x1xf32>
    %12 = vector.broadcast %11 : vector<16x1xf32> to vector<16x32xf32>
    %13 = arith.subf %5, %12 : vector<16x32xf32>
    %14 = arith.mulf %13, %13 : vector<16x32xf32>
    %cst_11 = arith.constant dense<0.000000e+00> : vector<16xf32>
    %15 = vector.multi_reduction <add>, %14, %cst_11 [1] : vector<16x32xf32> to vector<16xf32>
    %16 = vector.shape_cast %15 : vector<16xf32> to vector<16x1xf32>
    %cst_12 = arith.constant 3.200000e+01 : f32
    %17 = vector.broadcast %cst_12 : f32 to vector<16x1xf32>
    %18 = arith.divf %16, %17 : vector<16x1xf32>
    %19 = vector.broadcast %11 : vector<16x1xf32> to vector<16x32xf32>
    %20 = arith.subf %5, %19 : vector<16x32xf32>
    %cst_13 = arith.constant 9.99999974E-6 : f32
    %21 = vector.broadcast %cst_13 : f32 to vector<16x1xf32>
    %22 = arith.addf %18, %21 : vector<16x1xf32>
    %23 = math.rsqrt %22 : vector<16x1xf32>
    %24 = vector.broadcast %23 : vector<16x1xf32> to vector<16x32xf32>
    %25 = arith.mulf %20, %24 : vector<16x32xf32>
    %26 = vector.broadcast %6 : vector<1x32xf32> to vector<16x32xf32>
    %27 = arith.mulf %25, %26 : vector<16x32xf32>
    %28 = vector.broadcast %7 : vector<1x32xf32> to vector<16x32xf32>
    %29 = arith.addf %27, %28 : vector<16x32xf32>
    %c0_14 = arith.constant 0 : index
    %c0_15 = arith.constant 0 : index
    %30 = vector.load %arg3[%c0_14, %c0_15] : memref<16x32xf32, #tpu.memory_space<vmem>>, vector<16x32xf32>
    %31 = arith.addf %29, %30 : vector<16x32xf32>
    %c0_16 = arith.constant 0 : index
    %c0_17 = arith.constant 0 : index
    %c0_18 = arith.constant 0 : index
    %32 = vector.load %arg8[%c0_16, %c0_17, %c0_18] : memref<4x1x32xf32, #tpu.memory_space<vmem>>, vector<1x1x32xf32>
    %33 = vector.shape_cast %32 : vector<1x1x32xf32> to vector<1x32xf32>
    %c0_19 = arith.constant 0 : index
    %c0_20 = arith.constant 0 : index
    %c0_21 = arith.constant 0 : index
    %34 = vector.load %arg9[%c0_19, %c0_20, %c0_21] : memref<4x1x32xf32, #tpu.memory_space<vmem>>, vector<1x1x32xf32>
    %35 = vector.shape_cast %34 : vector<1x1x32xf32> to vector<1x32xf32>
    %cst_22 = arith.constant dense<0.000000e+00> : vector<16xf32>
    %36 = vector.multi_reduction <add>, %31, %cst_22 [1] : vector<16x32xf32> to vector<16xf32>
    %37 = vector.shape_cast %36 : vector<16xf32> to vector<16x1xf32>
    %cst_23 = arith.constant 3.200000e+01 : f32
    %38 = vector.broadcast %cst_23 : f32 to vector<16x1xf32>
    %39 = arith.divf %37, %38 : vector<16x1xf32>
    %40 = vector.broadcast %39 : vector<16x1xf32> to vector<16x32xf32>
    %41 = arith.subf %31, %40 : vector<16x32xf32>
    %42 = arith.mulf %41, %41 : vector<16x32xf32>
    %cst_24 = arith.constant dense<0.000000e+00> : vector<16xf32>
    %43 = vector.multi_reduction <add>, %42, %cst_24 [1] : vector<16x32xf32> to vector<16xf32>
    %44 = vector.shape_cast %43 : vector<16xf32> to vector<16x1xf32>
    %cst_25 = arith.constant 3.200000e+01 : f32
    %45 = vector.broadcast %cst_25 : f32 to vector<16x1xf32>
    %46 = arith.divf %44, %45 : vector<16x1xf32>
    %47 = vector.broadcast %39 : vector<16x1xf32> to vector<16x32xf32>
    %48 = arith.subf %31, %47 : vector<16x32xf32>
    %cst_26 = arith.constant 9.99999974E-6 : f32
    %49 = vector.broadcast %cst_26 : f32 to vector<16x1xf32>
    %50 = arith.addf %46, %49 : vector<16x1xf32>
    %51 = math.rsqrt %50 : vector<16x1xf32>
    %52 = vector.broadcast %51 : vector<16x1xf32> to vector<16x32xf32>
    %53 = arith.mulf %48, %52 : vector<16x32xf32>
    %54 = vector.broadcast %33 : vector<1x32xf32> to vector<16x32xf32>
    %55 = arith.mulf %53, %54 : vector<16x32xf32>
    %56 = vector.broadcast %35 : vector<1x32xf32> to vector<16x32xf32>
    %57 = arith.addf %55, %56 : vector<16x32xf32>
    %c0_27 = arith.constant 0 : index
    %c0_28 = arith.constant 0 : index
    %c0_29 = arith.constant 0 : index
    %58 = vector.load %arg10[%c0_27, %c0_28, %c0_29] : memref<4x32x96xf32, #tpu.memory_space<vmem>>, vector<1x32x96xf32>
    %59 = vector.shape_cast %58 : vector<1x32x96xf32> to vector<32x96xf32>
    %cst_30 = arith.constant dense<0.000000e+00> : vector<16x96xf32>
    %60 = tpu.matmul %57, %59, %cst_30 {dimension_numbers = #tpu.dot_dimension_numbers<[1], [0], [0], [1], [0, 0, 1, 1], [], []>} : vector<16x32xf32>, vector<32x96xf32>, vector<16x96xf32> -> vector<16x96xf32>
    %c0_31 = arith.constant 0 : index
    %c0_32 = arith.constant 0 : index
    %c0_33 = arith.constant 0 : index
    %61 = vector.load %arg11[%c0_31, %c0_32, %c0_33] : memref<4x1x96xf32, #tpu.memory_space<vmem>>, vector<1x1x96xf32>
    %62 = vector.shape_cast %61 : vector<1x1x96xf32> to vector<1x96xf32>
    %63 = vector.broadcast %62 : vector<1x96xf32> to vector<16x96xf32>
    %64 = arith.addf %60, %63 : vector<16x96xf32>
    %65 = vector.extract_strided_slice %64 {offsets = [0, 0], sizes = [16, 32], strides = [1, 1]} : vector<16x96xf32> to vector<16x32xf32>
    %66 = vector.extract_strided_slice %64 {offsets = [0, 32], sizes = [16, 32], strides = [1, 1]} : vector<16x96xf32> to vector<16x32xf32>
    %67 = vector.extract_strided_slice %64 {offsets = [0, 64], sizes = [16, 32], strides = [1, 1]} : vector<16x96xf32> to vector<16x32xf32>
    %68 = vector.extract_strided_slice %65 {offsets = [0, 0], sizes = [16, 4], strides = [1, 1]} : vector<16x32xf32> to vector<16x4xf32>
    %69 = vector.extract_strided_slice %65 {offsets = [0, 4], sizes = [16, 4], strides = [1, 1]} : vector<16x32xf32> to vector<16x4xf32>
    %70 = vector.extract_strided_slice %65 {offsets = [0, 8], sizes = [16, 4], strides = [1, 1]} : vector<16x32xf32> to vector<16x4xf32>
    %71 = vector.extract_strided_slice %65 {offsets = [0, 12], sizes = [16, 4], strides = [1, 1]} : vector<16x32xf32> to vector<16x4xf32>
    %72 = vector.extract_strided_slice %65 {offsets = [0, 16], sizes = [16, 4], strides = [1, 1]} : vector<16x32xf32> to vector<16x4xf32>
    %73 = vector.extract_strided_slice %65 {offsets = [0, 20], sizes = [16, 4], strides = [1, 1]} : vector<16x32xf32> to vector<16x4xf32>
    %74 = vector.extract_strided_slice %65 {offsets = [0, 24], sizes = [16, 4], strides = [1, 1]} : vector<16x32xf32> to vector<16x4xf32>
    %75 = vector.extract_strided_slice %65 {offsets = [0, 28], sizes = [16, 4], strides = [1, 1]} : vector<16x32xf32> to vector<16x4xf32>
    %76 = vector.shape_cast %68 : vector<16x4xf32> to vector<1x16x4xf32>
    %77 = vector.shape_cast %69 : vector<16x4xf32> to vector<1x16x4xf32>
    %78 = vector.shape_cast %70 : vector<16x4xf32> to vector<1x16x4xf32>
    %79 = vector.shape_cast %71 : vector<16x4xf32> to vector<1x16x4xf32>
    %80 = vector.shape_cast %72 : vector<16x4xf32> to vector<1x16x4xf32>
    %81 = vector.shape_cast %73 : vector<16x4xf32> to vector<1x16x4xf32>
    %82 = vector.shape_cast %74 : vector<16x4xf32> to vector<1x16x4xf32>
    %83 = vector.shape_cast %75 : vector<16x4xf32> to vector<1x16x4xf32>
    %84 = tpu.concatenate %76, %77, %78, %79, %80, %81, %82, %83 in 0 : vector<1x16x4xf32>, vector<1x16x4xf32>, vector<1x16x4xf32>, vector<1x16x4xf32>, vector<1x16x4xf32>, vector<1x16x4xf32>, vector<1x16x4xf32>, vector<1x16x4xf32> -> vector<8x16x4xf32>
    %cst_34 = arith.constant 5.000000e-01 : f32
    %85 = vector.broadcast %cst_34 : f32 to vector<8x16x4xf32>
    %86 = arith.mulf %84, %85 : vector<8x16x4xf32>
    %87 = vector.extract_strided_slice %66 {offsets = [0, 0], sizes = [16, 4], strides = [1, 1]} : vector<16x32xf32> to vector<16x4xf32>
    %88 = vector.extract_strided_slice %66 {offsets = [0, 4], sizes = [16, 4], strides = [1, 1]} : vector<16x32xf32> to vector<16x4xf32>
    %89 = vector.extract_strided_slice %66 {offsets = [0, 8], sizes = [16, 4], strides = [1, 1]} : vector<16x32xf32> to vector<16x4xf32>
    %90 = vector.extract_strided_slice %66 {offsets = [0, 12], sizes = [16, 4], strides = [1, 1]} : vector<16x32xf32> to vector<16x4xf32>
    %91 = vector.extract_strided_slice %66 {offsets = [0, 16], sizes = [16, 4], strides = [1, 1]} : vector<16x32xf32> to vector<16x4xf32>
    %92 = vector.extract_strided_slice %66 {offsets = [0, 20], sizes = [16, 4], strides = [1, 1]} : vector<16x32xf32> to vector<16x4xf32>
    %93 = vector.extract_strided_slice %66 {offsets = [0, 24], sizes = [16, 4], strides = [1, 1]} : vector<16x32xf32> to vector<16x4xf32>
    %94 = vector.extract_strided_slice %66 {offsets = [0, 28], sizes = [16, 4], strides = [1, 1]} : vector<16x32xf32> to vector<16x4xf32>
    %95 = vector.shape_cast %87 : vector<16x4xf32> to vector<1x16x4xf32>
    %96 = vector.shape_cast %88 : vector<16x4xf32> to vector<1x16x4xf32>
    %97 = vector.shape_cast %89 : vector<16x4xf32> to vector<1x16x4xf32>
    %98 = vector.shape_cast %90 : vector<16x4xf32> to vector<1x16x4xf32>
    %99 = vector.shape_cast %91 : vector<16x4xf32> to vector<1x16x4xf32>
    %100 = vector.shape_cast %92 : vector<16x4xf32> to vector<1x16x4xf32>
    %101 = vector.shape_cast %93 : vector<16x4xf32> to vector<1x16x4xf32>
    %102 = vector.shape_cast %94 : vector<16x4xf32> to vector<1x16x4xf32>
    %103 = tpu.concatenate %95, %96, %97, %98, %99, %100, %101, %102 in 0 : vector<1x16x4xf32>, vector<1x16x4xf32>, vector<1x16x4xf32>, vector<1x16x4xf32>, vector<1x16x4xf32>, vector<1x16x4xf32>, vector<1x16x4xf32>, vector<1x16x4xf32> -> vector<8x16x4xf32>
    %104 = vector.extract_strided_slice %67 {offsets = [0, 0], sizes = [16, 4], strides = [1, 1]} : vector<16x32xf32> to vector<16x4xf32>
    %105 = vector.extract_strided_slice %67 {offsets = [0, 4], sizes = [16, 4], strides = [1, 1]} : vector<16x32xf32> to vector<16x4xf32>
    %106 = vector.extract_strided_slice %67 {offsets = [0, 8], sizes = [16, 4], strides = [1, 1]} : vector<16x32xf32> to vector<16x4xf32>
    %107 = vector.extract_strided_slice %67 {offsets = [0, 12], sizes = [16, 4], strides = [1, 1]} : vector<16x32xf32> to vector<16x4xf32>
    %108 = vector.extract_strided_slice %67 {offsets = [0, 16], sizes = [16, 4], strides = [1, 1]} : vector<16x32xf32> to vector<16x4xf32>
    %109 = vector.extract_strided_slice %67 {offsets = [0, 20], sizes = [16, 4], strides = [1, 1]} : vector<16x32xf32> to vector<16x4xf32>
    %110 = vector.extract_strided_slice %67 {offsets = [0, 24], sizes = [16, 4], strides = [1, 1]} : vector<16x32xf32> to vector<16x4xf32>
    %111 = vector.extract_strided_slice %67 {offsets = [0, 28], sizes = [16, 4], strides = [1, 1]} : vector<16x32xf32> to vector<16x4xf32>
    %112 = vector.shape_cast %104 : vector<16x4xf32> to vector<1x16x4xf32>
    %113 = vector.shape_cast %105 : vector<16x4xf32> to vector<1x16x4xf32>
    %114 = vector.shape_cast %106 : vector<16x4xf32> to vector<1x16x4xf32>
    %115 = vector.shape_cast %107 : vector<16x4xf32> to vector<1x16x4xf32>
    %116 = vector.shape_cast %108 : vector<16x4xf32> to vector<1x16x4xf32>
    %117 = vector.shape_cast %109 : vector<16x4xf32> to vector<1x16x4xf32>
    %118 = vector.shape_cast %110 : vector<16x4xf32> to vector<1x16x4xf32>
    %119 = vector.shape_cast %111 : vector<16x4xf32> to vector<1x16x4xf32>
    %120 = tpu.concatenate %112, %113, %114, %115, %116, %117, %118, %119 in 0 : vector<1x16x4xf32>, vector<1x16x4xf32>, vector<1x16x4xf32>, vector<1x16x4xf32>, vector<1x16x4xf32>, vector<1x16x4xf32>, vector<1x16x4xf32>, vector<1x16x4xf32> -> vector<8x16x4xf32>
    "tpu.trace_start"() <{level = 10 : i32, message = "hqd,hkd->hqk"}> : () -> ()
    %cst_35 = arith.constant dense<0.000000e+00> : vector<8x16x16xf32>
    %121 = tpu.matmul %86, %103, %cst_35 {dimension_numbers = #tpu.dot_dimension_numbers<[2], [2], [1], [1], [0, 0, 0, 1, 1, 1], [0], [0]>} : vector<8x16x4xf32>, vector<8x16x4xf32>, vector<8x16x16xf32> -> vector<8x16x16xf32>
    "tpu.trace_stop"() : () -> ()
    %cst_36 = arith.constant dense<0xFF800000> : vector<8x16xf32>
    %122 = vector.multi_reduction <maximumf>, %121, %cst_36 [2] : vector<8x16x16xf32> to vector<8x16xf32>
    %123 = vector.shape_cast %122 : vector<8x16xf32> to vector<8x16x1xf32>
    %124 = vector.broadcast %123 : vector<8x16x1xf32> to vector<8x16x16xf32>
    %125 = arith.subf %121, %124 : vector<8x16x16xf32>
    %126 = math.exp %125 : vector<8x16x16xf32>
    %cst_37 = arith.constant dense<0.000000e+00> : vector<8x16xf32>
    %127 = vector.multi_reduction <add>, %126, %cst_37 [2] : vector<8x16x16xf32> to vector<8x16xf32>
    %128 = vector.shape_cast %127 : vector<8x16xf32> to vector<8x16x1xf32>
    %129 = tpu.reciprocal %128 {approx = true} : vector<8x16x1xf32> -> vector<8x16x1xf32>
    %130 = vector.broadcast %129 : vector<8x16x1xf32> to vector<8x16x16xf32>
    %131 = arith.mulf %126, %130 : vector<8x16x16xf32>
    "tpu.trace_start"() <{level = 10 : i32, message = "hqk,hkd->hqd"}> : () -> ()
    %cst_38 = arith.constant dense<0.000000e+00> : vector<8x16x4xf32>
    %132 = tpu.matmul %131, %120, %cst_38 {dimension_numbers = #tpu.dot_dimension_numbers<[2], [1], [1], [2], [0, 0, 0, 1, 1, 2], [0], [0]>} : vector<8x16x16xf32>, vector<8x16x4xf32>, vector<8x16x4xf32> -> vector<8x16x4xf32>
    "tpu.trace_stop"() : () -> ()
    %133 = vector.extract_strided_slice %132 {offsets = [0, 0, 0], sizes = [1, 16, 4], strides = [1, 1, 1]} : vector<8x16x4xf32> to vector<1x16x4xf32>
    %134 = vector.shape_cast %133 : vector<1x16x4xf32> to vector<16x4xf32>
    %135 = vector.extract_strided_slice %132 {offsets = [1, 0, 0], sizes = [1, 16, 4], strides = [1, 1, 1]} : vector<8x16x4xf32> to vector<1x16x4xf32>
    %136 = vector.shape_cast %135 : vector<1x16x4xf32> to vector<16x4xf32>
    %137 = vector.extract_strided_slice %132 {offsets = [2, 0, 0], sizes = [1, 16, 4], strides = [1, 1, 1]} : vector<8x16x4xf32> to vector<1x16x4xf32>
    %138 = vector.shape_cast %137 : vector<1x16x4xf32> to vector<16x4xf32>
    %139 = vector.extract_strided_slice %132 {offsets = [3, 0, 0], sizes = [1, 16, 4], strides = [1, 1, 1]} : vector<8x16x4xf32> to vector<1x16x4xf32>
    %140 = vector.shape_cast %139 : vector<1x16x4xf32> to vector<16x4xf32>
    %141 = vector.extract_strided_slice %132 {offsets = [4, 0, 0], sizes = [1, 16, 4], strides = [1, 1, 1]} : vector<8x16x4xf32> to vector<1x16x4xf32>
    %142 = vector.shape_cast %141 : vector<1x16x4xf32> to vector<16x4xf32>
    %143 = vector.extract_strided_slice %132 {offsets = [5, 0, 0], sizes = [1, 16, 4], strides = [1, 1, 1]} : vector<8x16x4xf32> to vector<1x16x4xf32>
    %144 = vector.shape_cast %143 : vector<1x16x4xf32> to vector<16x4xf32>
    %145 = vector.extract_strided_slice %132 {offsets = [6, 0, 0], sizes = [1, 16, 4], strides = [1, 1, 1]} : vector<8x16x4xf32> to vector<1x16x4xf32>
    %146 = vector.shape_cast %145 : vector<1x16x4xf32> to vector<16x4xf32>
    %147 = vector.extract_strided_slice %132 {offsets = [7, 0, 0], sizes = [1, 16, 4], strides = [1, 1, 1]} : vector<8x16x4xf32> to vector<1x16x4xf32>
    %148 = vector.shape_cast %147 : vector<1x16x4xf32> to vector<16x4xf32>
    %149 = tpu.concatenate %134, %136, %138, %140, %142, %144, %146, %148 in 1 : vector<16x4xf32>, vector<16x4xf32>, vector<16x4xf32>, vector<16x4xf32>, vector<16x4xf32>, vector<16x4xf32>, vector<16x4xf32>, vector<16x4xf32> -> vector<16x32xf32>
    %c0_39 = arith.constant 0 : index
    %c0_40 = arith.constant 0 : index
    %c0_41 = arith.constant 0 : index
    %150 = vector.load %arg12[%c0_39, %c0_40, %c0_41] : memref<4x32x32xf32, #tpu.memory_space<vmem>>, vector<1x32x32xf32>
    %151 = vector.shape_cast %150 : vector<1x32x32xf32> to vector<32x32xf32>
    %cst_42 = arith.constant dense<0.000000e+00> : vector<16x32xf32>
    %152 = tpu.matmul %149, %151, %cst_42 {dimension_numbers = #tpu.dot_dimension_numbers<[1], [0], [0], [1], [0, 0, 1, 1], [], []>} : vector<16x32xf32>, vector<32x32xf32>, vector<16x32xf32> -> vector<16x32xf32>
    %153 = arith.addf %31, %152 : vector<16x32xf32>
    %c0_43 = arith.constant 0 : index
    %c0_44 = arith.constant 0 : index
    %c0_45 = arith.constant 0 : index
    %154 = vector.load %arg13[%c0_43, %c0_44, %c0_45] : memref<4x1x32xf32, #tpu.memory_space<vmem>>, vector<1x1x32xf32>
    %155 = vector.shape_cast %154 : vector<1x1x32xf32> to vector<1x32xf32>
    %156 = vector.broadcast %155 : vector<1x32xf32> to vector<16x32xf32>
    %157 = arith.addf %153, %156 : vector<16x32xf32>
    %c0_46 = arith.constant 0 : index
    %c0_47 = arith.constant 0 : index
    %c0_48 = arith.constant 0 : index
    %158 = vector.load %arg14[%c0_46, %c0_47, %c0_48] : memref<4x1x32xf32, #tpu.memory_space<vmem>>, vector<1x1x32xf32>
    %159 = vector.shape_cast %158 : vector<1x1x32xf32> to vector<1x32xf32>
    %c0_49 = arith.constant 0 : index
    %c0_50 = arith.constant 0 : index
    %c0_51 = arith.constant 0 : index
    %160 = vector.load %arg15[%c0_49, %c0_50, %c0_51] : memref<4x1x32xf32, #tpu.memory_space<vmem>>, vector<1x1x32xf32>
    %161 = vector.shape_cast %160 : vector<1x1x32xf32> to vector<1x32xf32>
    %cst_52 = arith.constant dense<0.000000e+00> : vector<16xf32>
    %162 = vector.multi_reduction <add>, %157, %cst_52 [1] : vector<16x32xf32> to vector<16xf32>
    %163 = vector.shape_cast %162 : vector<16xf32> to vector<16x1xf32>
    %cst_53 = arith.constant 3.200000e+01 : f32
    %164 = vector.broadcast %cst_53 : f32 to vector<16x1xf32>
    %165 = arith.divf %163, %164 : vector<16x1xf32>
    %166 = vector.broadcast %165 : vector<16x1xf32> to vector<16x32xf32>
    %167 = arith.subf %157, %166 : vector<16x32xf32>
    %168 = arith.mulf %167, %167 : vector<16x32xf32>
    %cst_54 = arith.constant dense<0.000000e+00> : vector<16xf32>
    %169 = vector.multi_reduction <add>, %168, %cst_54 [1] : vector<16x32xf32> to vector<16xf32>
    %170 = vector.shape_cast %169 : vector<16xf32> to vector<16x1xf32>
    %cst_55 = arith.constant 3.200000e+01 : f32
    %171 = vector.broadcast %cst_55 : f32 to vector<16x1xf32>
    %172 = arith.divf %170, %171 : vector<16x1xf32>
    %173 = vector.broadcast %165 : vector<16x1xf32> to vector<16x32xf32>
    %174 = arith.subf %157, %173 : vector<16x32xf32>
    %cst_56 = arith.constant 9.99999974E-6 : f32
    %175 = vector.broadcast %cst_56 : f32 to vector<16x1xf32>
    %176 = arith.addf %172, %175 : vector<16x1xf32>
    %177 = math.rsqrt %176 : vector<16x1xf32>
    %178 = vector.broadcast %177 : vector<16x1xf32> to vector<16x32xf32>
    %179 = arith.mulf %174, %178 : vector<16x32xf32>
    %180 = vector.broadcast %159 : vector<1x32xf32> to vector<16x32xf32>
    %181 = arith.mulf %179, %180 : vector<16x32xf32>
    %182 = vector.broadcast %161 : vector<1x32xf32> to vector<16x32xf32>
    %183 = arith.addf %181, %182 : vector<16x32xf32>
    %c0_57 = arith.constant 0 : index
    %c0_58 = arith.constant 0 : index
    %c0_59 = arith.constant 0 : index
    %184 = vector.load %arg16[%c0_57, %c0_58, %c0_59] : memref<4x32x128xf32, #tpu.memory_space<vmem>>, vector<1x32x128xf32>
    %185 = vector.shape_cast %184 : vector<1x32x128xf32> to vector<32x128xf32>
    %cst_60 = arith.constant dense<0.000000e+00> : vector<16x128xf32>
    %186 = tpu.matmul %183, %185, %cst_60 {dimension_numbers = #tpu.dot_dimension_numbers<[1], [0], [0], [1], [0, 0, 1, 1], [], []>} : vector<16x32xf32>, vector<32x128xf32>, vector<16x128xf32> -> vector<16x128xf32>
    %c0_61 = arith.constant 0 : index
    %c0_62 = arith.constant 0 : index
    %c0_63 = arith.constant 0 : index
    %187 = vector.load %arg17[%c0_61, %c0_62, %c0_63] : memref<4x1x128xf32, #tpu.memory_space<vmem>>, vector<1x1x128xf32>
    %188 = vector.shape_cast %187 : vector<1x1x128xf32> to vector<1x128xf32>
    %189 = vector.broadcast %188 : vector<1x128xf32> to vector<16x128xf32>
    %190 = arith.addf %186, %189 : vector<16x128xf32>
    %191 = arith.mulf %190, %190 : vector<16x128xf32>
    %192 = arith.mulf %190, %191 : vector<16x128xf32>
    %cst_64 = arith.constant 4.471500e-02 : f32
    %193 = vector.broadcast %cst_64 : f32 to vector<16x128xf32>
    %194 = arith.mulf %193, %192 : vector<16x128xf32>
    %195 = arith.addf %190, %194 : vector<16x128xf32>
    %cst_65 = arith.constant 0.797884583 : f32
    %196 = vector.broadcast %cst_65 : f32 to vector<16x128xf32>
    %197 = arith.mulf %196, %195 : vector<16x128xf32>
    %198 = math.tanh %197 : vector<16x128xf32>
    %cst_66 = arith.constant 1.000000e+00 : f32
    %199 = vector.broadcast %cst_66 : f32 to vector<16x128xf32>
    %200 = arith.addf %199, %198 : vector<16x128xf32>
    %cst_67 = arith.constant 5.000000e-01 : f32
    %201 = vector.broadcast %cst_67 : f32 to vector<16x128xf32>
    %202 = arith.mulf %201, %200 : vector<16x128xf32>
    %203 = arith.mulf %190, %202 : vector<16x128xf32>
    %c0_68 = arith.constant 0 : index
    %c0_69 = arith.constant 0 : index
    %c0_70 = arith.constant 0 : index
    %204 = vector.load %arg18[%c0_68, %c0_69, %c0_70] : memref<4x128x32xf32, #tpu.memory_space<vmem>>, vector<1x128x32xf32>
    %205 = vector.shape_cast %204 : vector<1x128x32xf32> to vector<128x32xf32>
    %cst_71 = arith.constant dense<0.000000e+00> : vector<16x32xf32>
    %206 = tpu.matmul %203, %205, %cst_71 {dimension_numbers = #tpu.dot_dimension_numbers<[1], [0], [0], [1], [0, 0, 1, 1], [], []>} : vector<16x128xf32>, vector<128x32xf32>, vector<16x32xf32> -> vector<16x32xf32>
    %207 = arith.addf %157, %206 : vector<16x32xf32>
    %c0_72 = arith.constant 0 : index
    %c0_73 = arith.constant 0 : index
    %c0_74 = arith.constant 0 : index
    %208 = vector.load %arg19[%c0_72, %c0_73, %c0_74] : memref<4x1x32xf32, #tpu.memory_space<vmem>>, vector<1x1x32xf32>
    %209 = vector.shape_cast %208 : vector<1x1x32xf32> to vector<1x32xf32>
    %210 = vector.broadcast %209 : vector<1x32xf32> to vector<16x32xf32>
    %211 = arith.addf %207, %210 : vector<16x32xf32>
    %c1 = arith.constant 1 : index
    %c0_75 = arith.constant 0 : index
    %c0_76 = arith.constant 0 : index
    %212 = vector.load %arg8[%c1, %c0_75, %c0_76] : memref<4x1x32xf32, #tpu.memory_space<vmem>>, vector<1x1x32xf32>
    %213 = vector.shape_cast %212 : vector<1x1x32xf32> to vector<1x32xf32>
    %c1_77 = arith.constant 1 : index
    %c0_78 = arith.constant 0 : index
    %c0_79 = arith.constant 0 : index
    %214 = vector.load %arg9[%c1_77, %c0_78, %c0_79] : memref<4x1x32xf32, #tpu.memory_space<vmem>>, vector<1x1x32xf32>
    %215 = vector.shape_cast %214 : vector<1x1x32xf32> to vector<1x32xf32>
    %cst_80 = arith.constant dense<0.000000e+00> : vector<16xf32>
    %216 = vector.multi_reduction <add>, %211, %cst_80 [1] : vector<16x32xf32> to vector<16xf32>
    %217 = vector.shape_cast %216 : vector<16xf32> to vector<16x1xf32>
    %cst_81 = arith.constant 3.200000e+01 : f32
    %218 = vector.broadcast %cst_81 : f32 to vector<16x1xf32>
    %219 = arith.divf %217, %218 : vector<16x1xf32>
    %220 = vector.broadcast %219 : vector<16x1xf32> to vector<16x32xf32>
    %221 = arith.subf %211, %220 : vector<16x32xf32>
    %222 = arith.mulf %221, %221 : vector<16x32xf32>
    %cst_82 = arith.constant dense<0.000000e+00> : vector<16xf32>
    %223 = vector.multi_reduction <add>, %222, %cst_82 [1] : vector<16x32xf32> to vector<16xf32>
    %224 = vector.shape_cast %223 : vector<16xf32> to vector<16x1xf32>
    %cst_83 = arith.constant 3.200000e+01 : f32
    %225 = vector.broadcast %cst_83 : f32 to vector<16x1xf32>
    %226 = arith.divf %224, %225 : vector<16x1xf32>
    %227 = vector.broadcast %219 : vector<16x1xf32> to vector<16x32xf32>
    %228 = arith.subf %211, %227 : vector<16x32xf32>
    %cst_84 = arith.constant 9.99999974E-6 : f32
    %229 = vector.broadcast %cst_84 : f32 to vector<16x1xf32>
    %230 = arith.addf %226, %229 : vector<16x1xf32>
    %231 = math.rsqrt %230 : vector<16x1xf32>
    %232 = vector.broadcast %231 : vector<16x1xf32> to vector<16x32xf32>
    %233 = arith.mulf %228, %232 : vector<16x32xf32>
    %234 = vector.broadcast %213 : vector<1x32xf32> to vector<16x32xf32>
    %235 = arith.mulf %233, %234 : vector<16x32xf32>
    %236 = vector.broadcast %215 : vector<1x32xf32> to vector<16x32xf32>
    %237 = arith.addf %235, %236 : vector<16x32xf32>
    %c1_85 = arith.constant 1 : index
    %c0_86 = arith.constant 0 : index
    %c0_87 = arith.constant 0 : index
    %238 = vector.load %arg10[%c1_85, %c0_86, %c0_87] : memref<4x32x96xf32, #tpu.memory_space<vmem>>, vector<1x32x96xf32>
    %239 = vector.shape_cast %238 : vector<1x32x96xf32> to vector<32x96xf32>
    %cst_88 = arith.constant dense<0.000000e+00> : vector<16x96xf32>
    %240 = tpu.matmul %237, %239, %cst_88 {dimension_numbers = #tpu.dot_dimension_numbers<[1], [0], [0], [1], [0, 0, 1, 1], [], []>} : vector<16x32xf32>, vector<32x96xf32>, vector<16x96xf32> -> vector<16x96xf32>
    %c1_89 = arith.constant 1 : index
    %c0_90 = arith.constant 0 : index
    %c0_91 = arith.constant 0 : index
    %241 = vector.load %arg11[%c1_89, %c0_90, %c0_91] : memref<4x1x96xf32, #tpu.memory_space<vmem>>, vector<1x1x96xf32>
    %242 = vector.shape_cast %241 : vector<1x1x96xf32> to vector<1x96xf32>
    %243 = vector.broadcast %242 : vector<1x96xf32> to vector<16x96xf32>
    %244 = arith.addf %240, %243 : vector<16x96xf32>
    %245 = vector.extract_strided_slice %244 {offsets = [0, 0], sizes = [16, 32], strides = [1, 1]} : vector<16x96xf32> to vector<16x32xf32>
    %246 = vector.extract_strided_slice %244 {offsets = [0, 32], sizes = [16, 32], strides = [1, 1]} : vector<16x96xf32> to vector<16x32xf32>
    %247 = vector.extract_strided_slice %244 {offsets = [0, 64], sizes = [16, 32], strides = [1, 1]} : vector<16x96xf32> to vector<16x32xf32>
    %248 = vector.extract_strided_slice %245 {offsets = [0, 0], sizes = [16, 4], strides = [1, 1]} : vector<16x32xf32> to vector<16x4xf32>
    %249 = vector.extract_strided_slice %245 {offsets = [0, 4], sizes = [16, 4], strides = [1, 1]} : vector<16x32xf32> to vector<16x4xf32>
    %250 = vector.extract_strided_slice %245 {offsets = [0, 8], sizes = [16, 4], strides = [1, 1]} : vector<16x32xf32> to vector<16x4xf32>
    %251 = vector.extract_strided_slice %245 {offsets = [0, 12], sizes = [16, 4], strides = [1, 1]} : vector<16x32xf32> to vector<16x4xf32>
    %252 = vector.extract_strided_slice %245 {offsets = [0, 16], sizes = [16, 4], strides = [1, 1]} : vector<16x32xf32> to vector<16x4xf32>
    %253 = vector.extract_strided_slice %245 {offsets = [0, 20], sizes = [16, 4], strides = [1, 1]} : vector<16x32xf32> to vector<16x4xf32>
    %254 = vector.extract_strided_slice %245 {offsets = [0, 24], sizes = [16, 4], strides = [1, 1]} : vector<16x32xf32> to vector<16x4xf32>
    %255 = vector.extract_strided_slice %245 {offsets = [0, 28], sizes = [16, 4], strides = [1, 1]} : vector<16x32xf32> to vector<16x4xf32>
    %256 = vector.shape_cast %248 : vector<16x4xf32> to vector<1x16x4xf32>
    %257 = vector.shape_cast %249 : vector<16x4xf32> to vector<1x16x4xf32>
    %258 = vector.shape_cast %250 : vector<16x4xf32> to vector<1x16x4xf32>
    %259 = vector.shape_cast %251 : vector<16x4xf32> to vector<1x16x4xf32>
    %260 = vector.shape_cast %252 : vector<16x4xf32> to vector<1x16x4xf32>
    %261 = vector.shape_cast %253 : vector<16x4xf32> to vector<1x16x4xf32>
    %262 = vector.shape_cast %254 : vector<16x4xf32> to vector<1x16x4xf32>
    %263 = vector.shape_cast %255 : vector<16x4xf32> to vector<1x16x4xf32>
    %264 = tpu.concatenate %256, %257, %258, %259, %260, %261, %262, %263 in 0 : vector<1x16x4xf32>, vector<1x16x4xf32>, vector<1x16x4xf32>, vector<1x16x4xf32>, vector<1x16x4xf32>, vector<1x16x4xf32>, vector<1x16x4xf32>, vector<1x16x4xf32> -> vector<8x16x4xf32>
    %cst_92 = arith.constant 5.000000e-01 : f32
    %265 = vector.broadcast %cst_92 : f32 to vector<8x16x4xf32>
    %266 = arith.mulf %264, %265 : vector<8x16x4xf32>
    %267 = vector.extract_strided_slice %246 {offsets = [0, 0], sizes = [16, 4], strides = [1, 1]} : vector<16x32xf32> to vector<16x4xf32>
    %268 = vector.extract_strided_slice %246 {offsets = [0, 4], sizes = [16, 4], strides = [1, 1]} : vector<16x32xf32> to vector<16x4xf32>
    %269 = vector.extract_strided_slice %246 {offsets = [0, 8], sizes = [16, 4], strides = [1, 1]} : vector<16x32xf32> to vector<16x4xf32>
    %270 = vector.extract_strided_slice %246 {offsets = [0, 12], sizes = [16, 4], strides = [1, 1]} : vector<16x32xf32> to vector<16x4xf32>
    %271 = vector.extract_strided_slice %246 {offsets = [0, 16], sizes = [16, 4], strides = [1, 1]} : vector<16x32xf32> to vector<16x4xf32>
    %272 = vector.extract_strided_slice %246 {offsets = [0, 20], sizes = [16, 4], strides = [1, 1]} : vector<16x32xf32> to vector<16x4xf32>
    %273 = vector.extract_strided_slice %246 {offsets = [0, 24], sizes = [16, 4], strides = [1, 1]} : vector<16x32xf32> to vector<16x4xf32>
    %274 = vector.extract_strided_slice %246 {offsets = [0, 28], sizes = [16, 4], strides = [1, 1]} : vector<16x32xf32> to vector<16x4xf32>
    %275 = vector.shape_cast %267 : vector<16x4xf32> to vector<1x16x4xf32>
    %276 = vector.shape_cast %268 : vector<16x4xf32> to vector<1x16x4xf32>
    %277 = vector.shape_cast %269 : vector<16x4xf32> to vector<1x16x4xf32>
    %278 = vector.shape_cast %270 : vector<16x4xf32> to vector<1x16x4xf32>
    %279 = vector.shape_cast %271 : vector<16x4xf32> to vector<1x16x4xf32>
    %280 = vector.shape_cast %272 : vector<16x4xf32> to vector<1x16x4xf32>
    %281 = vector.shape_cast %273 : vector<16x4xf32> to vector<1x16x4xf32>
    %282 = vector.shape_cast %274 : vector<16x4xf32> to vector<1x16x4xf32>
    %283 = tpu.concatenate %275, %276, %277, %278, %279, %280, %281, %282 in 0 : vector<1x16x4xf32>, vector<1x16x4xf32>, vector<1x16x4xf32>, vector<1x16x4xf32>, vector<1x16x4xf32>, vector<1x16x4xf32>, vector<1x16x4xf32>, vector<1x16x4xf32> -> vector<8x16x4xf32>
    %284 = vector.extract_strided_slice %247 {offsets = [0, 0], sizes = [16, 4], strides = [1, 1]} : vector<16x32xf32> to vector<16x4xf32>
    %285 = vector.extract_strided_slice %247 {offsets = [0, 4], sizes = [16, 4], strides = [1, 1]} : vector<16x32xf32> to vector<16x4xf32>
    %286 = vector.extract_strided_slice %247 {offsets = [0, 8], sizes = [16, 4], strides = [1, 1]} : vector<16x32xf32> to vector<16x4xf32>
    %287 = vector.extract_strided_slice %247 {offsets = [0, 12], sizes = [16, 4], strides = [1, 1]} : vector<16x32xf32> to vector<16x4xf32>
    %288 = vector.extract_strided_slice %247 {offsets = [0, 16], sizes = [16, 4], strides = [1, 1]} : vector<16x32xf32> to vector<16x4xf32>
    %289 = vector.extract_strided_slice %247 {offsets = [0, 20], sizes = [16, 4], strides = [1, 1]} : vector<16x32xf32> to vector<16x4xf32>
    %290 = vector.extract_strided_slice %247 {offsets = [0, 24], sizes = [16, 4], strides = [1, 1]} : vector<16x32xf32> to vector<16x4xf32>
    %291 = vector.extract_strided_slice %247 {offsets = [0, 28], sizes = [16, 4], strides = [1, 1]} : vector<16x32xf32> to vector<16x4xf32>
    %292 = vector.shape_cast %284 : vector<16x4xf32> to vector<1x16x4xf32>
    %293 = vector.shape_cast %285 : vector<16x4xf32> to vector<1x16x4xf32>
    %294 = vector.shape_cast %286 : vector<16x4xf32> to vector<1x16x4xf32>
    %295 = vector.shape_cast %287 : vector<16x4xf32> to vector<1x16x4xf32>
    %296 = vector.shape_cast %288 : vector<16x4xf32> to vector<1x16x4xf32>
    %297 = vector.shape_cast %289 : vector<16x4xf32> to vector<1x16x4xf32>
    %298 = vector.shape_cast %290 : vector<16x4xf32> to vector<1x16x4xf32>
    %299 = vector.shape_cast %291 : vector<16x4xf32> to vector<1x16x4xf32>
    %300 = tpu.concatenate %292, %293, %294, %295, %296, %297, %298, %299 in 0 : vector<1x16x4xf32>, vector<1x16x4xf32>, vector<1x16x4xf32>, vector<1x16x4xf32>, vector<1x16x4xf32>, vector<1x16x4xf32>, vector<1x16x4xf32>, vector<1x16x4xf32> -> vector<8x16x4xf32>
    "tpu.trace_start"() <{level = 10 : i32, message = "hqd,hkd->hqk"}> : () -> ()
    %cst_93 = arith.constant dense<0.000000e+00> : vector<8x16x16xf32>
    %301 = tpu.matmul %266, %283, %cst_93 {dimension_numbers = #tpu.dot_dimension_numbers<[2], [2], [1], [1], [0, 0, 0, 1, 1, 1], [0], [0]>} : vector<8x16x4xf32>, vector<8x16x4xf32>, vector<8x16x16xf32> -> vector<8x16x16xf32>
    "tpu.trace_stop"() : () -> ()
    %cst_94 = arith.constant dense<0xFF800000> : vector<8x16xf32>
    %302 = vector.multi_reduction <maximumf>, %301, %cst_94 [2] : vector<8x16x16xf32> to vector<8x16xf32>
    %303 = vector.shape_cast %302 : vector<8x16xf32> to vector<8x16x1xf32>
    %304 = vector.broadcast %303 : vector<8x16x1xf32> to vector<8x16x16xf32>
    %305 = arith.subf %301, %304 : vector<8x16x16xf32>
    %306 = math.exp %305 : vector<8x16x16xf32>
    %cst_95 = arith.constant dense<0.000000e+00> : vector<8x16xf32>
    %307 = vector.multi_reduction <add>, %306, %cst_95 [2] : vector<8x16x16xf32> to vector<8x16xf32>
    %308 = vector.shape_cast %307 : vector<8x16xf32> to vector<8x16x1xf32>
    %309 = tpu.reciprocal %308 {approx = true} : vector<8x16x1xf32> -> vector<8x16x1xf32>
    %310 = vector.broadcast %309 : vector<8x16x1xf32> to vector<8x16x16xf32>
    %311 = arith.mulf %306, %310 : vector<8x16x16xf32>
    "tpu.trace_start"() <{level = 10 : i32, message = "hqk,hkd->hqd"}> : () -> ()
    %cst_96 = arith.constant dense<0.000000e+00> : vector<8x16x4xf32>
    %312 = tpu.matmul %311, %300, %cst_96 {dimension_numbers = #tpu.dot_dimension_numbers<[2], [1], [1], [2], [0, 0, 0, 1, 1, 2], [0], [0]>} : vector<8x16x16xf32>, vector<8x16x4xf32>, vector<8x16x4xf32> -> vector<8x16x4xf32>
    "tpu.trace_stop"() : () -> ()
    %313 = vector.extract_strided_slice %312 {offsets = [0, 0, 0], sizes = [1, 16, 4], strides = [1, 1, 1]} : vector<8x16x4xf32> to vector<1x16x4xf32>
    %314 = vector.shape_cast %313 : vector<1x16x4xf32> to vector<16x4xf32>
    %315 = vector.extract_strided_slice %312 {offsets = [1, 0, 0], sizes = [1, 16, 4], strides = [1, 1, 1]} : vector<8x16x4xf32> to vector<1x16x4xf32>
    %316 = vector.shape_cast %315 : vector<1x16x4xf32> to vector<16x4xf32>
    %317 = vector.extract_strided_slice %312 {offsets = [2, 0, 0], sizes = [1, 16, 4], strides = [1, 1, 1]} : vector<8x16x4xf32> to vector<1x16x4xf32>
    %318 = vector.shape_cast %317 : vector<1x16x4xf32> to vector<16x4xf32>
    %319 = vector.extract_strided_slice %312 {offsets = [3, 0, 0], sizes = [1, 16, 4], strides = [1, 1, 1]} : vector<8x16x4xf32> to vector<1x16x4xf32>
    %320 = vector.shape_cast %319 : vector<1x16x4xf32> to vector<16x4xf32>
    %321 = vector.extract_strided_slice %312 {offsets = [4, 0, 0], sizes = [1, 16, 4], strides = [1, 1, 1]} : vector<8x16x4xf32> to vector<1x16x4xf32>
    %322 = vector.shape_cast %321 : vector<1x16x4xf32> to vector<16x4xf32>
    %323 = vector.extract_strided_slice %312 {offsets = [5, 0, 0], sizes = [1, 16, 4], strides = [1, 1, 1]} : vector<8x16x4xf32> to vector<1x16x4xf32>
    %324 = vector.shape_cast %323 : vector<1x16x4xf32> to vector<16x4xf32>
    %325 = vector.extract_strided_slice %312 {offsets = [6, 0, 0], sizes = [1, 16, 4], strides = [1, 1, 1]} : vector<8x16x4xf32> to vector<1x16x4xf32>
    %326 = vector.shape_cast %325 : vector<1x16x4xf32> to vector<16x4xf32>
    %327 = vector.extract_strided_slice %312 {offsets = [7, 0, 0], sizes = [1, 16, 4], strides = [1, 1, 1]} : vector<8x16x4xf32> to vector<1x16x4xf32>
    %328 = vector.shape_cast %327 : vector<1x16x4xf32> to vector<16x4xf32>
    %329 = tpu.concatenate %314, %316, %318, %320, %322, %324, %326, %328 in 1 : vector<16x4xf32>, vector<16x4xf32>, vector<16x4xf32>, vector<16x4xf32>, vector<16x4xf32>, vector<16x4xf32>, vector<16x4xf32>, vector<16x4xf32> -> vector<16x32xf32>
    %c1_97 = arith.constant 1 : index
    %c0_98 = arith.constant 0 : index
    %c0_99 = arith.constant 0 : index
    %330 = vector.load %arg12[%c1_97, %c0_98, %c0_99] : memref<4x32x32xf32, #tpu.memory_space<vmem>>, vector<1x32x32xf32>
    %331 = vector.shape_cast %330 : vector<1x32x32xf32> to vector<32x32xf32>
    %cst_100 = arith.constant dense<0.000000e+00> : vector<16x32xf32>
    %332 = tpu.matmul %329, %331, %cst_100 {dimension_numbers = #tpu.dot_dimension_numbers<[1], [0], [0], [1], [0, 0, 1, 1], [], []>} : vector<16x32xf32>, vector<32x32xf32>, vector<16x32xf32> -> vector<16x32xf32>
    %333 = arith.addf %211, %332 : vector<16x32xf32>
    %c1_101 = arith.constant 1 : index
    %c0_102 = arith.constant 0 : index
    %c0_103 = arith.constant 0 : index
    %334 = vector.load %arg13[%c1_101, %c0_102, %c0_103] : memref<4x1x32xf32, #tpu.memory_space<vmem>>, vector<1x1x32xf32>
    %335 = vector.shape_cast %334 : vector<1x1x32xf32> to vector<1x32xf32>
    %336 = vector.broadcast %335 : vector<1x32xf32> to vector<16x32xf32>
    %337 = arith.addf %333, %336 : vector<16x32xf32>
    %c1_104 = arith.constant 1 : index
    %c0_105 = arith.constant 0 : index
    %c0_106 = arith.constant 0 : index
    %338 = vector.load %arg14[%c1_104, %c0_105, %c0_106] : memref<4x1x32xf32, #tpu.memory_space<vmem>>, vector<1x1x32xf32>
    %339 = vector.shape_cast %338 : vector<1x1x32xf32> to vector<1x32xf32>
    %c1_107 = arith.constant 1 : index
    %c0_108 = arith.constant 0 : index
    %c0_109 = arith.constant 0 : index
    %340 = vector.load %arg15[%c1_107, %c0_108, %c0_109] : memref<4x1x32xf32, #tpu.memory_space<vmem>>, vector<1x1x32xf32>
    %341 = vector.shape_cast %340 : vector<1x1x32xf32> to vector<1x32xf32>
    %cst_110 = arith.constant dense<0.000000e+00> : vector<16xf32>
    %342 = vector.multi_reduction <add>, %337, %cst_110 [1] : vector<16x32xf32> to vector<16xf32>
    %343 = vector.shape_cast %342 : vector<16xf32> to vector<16x1xf32>
    %cst_111 = arith.constant 3.200000e+01 : f32
    %344 = vector.broadcast %cst_111 : f32 to vector<16x1xf32>
    %345 = arith.divf %343, %344 : vector<16x1xf32>
    %346 = vector.broadcast %345 : vector<16x1xf32> to vector<16x32xf32>
    %347 = arith.subf %337, %346 : vector<16x32xf32>
    %348 = arith.mulf %347, %347 : vector<16x32xf32>
    %cst_112 = arith.constant dense<0.000000e+00> : vector<16xf32>
    %349 = vector.multi_reduction <add>, %348, %cst_112 [1] : vector<16x32xf32> to vector<16xf32>
    %350 = vector.shape_cast %349 : vector<16xf32> to vector<16x1xf32>
    %cst_113 = arith.constant 3.200000e+01 : f32
    %351 = vector.broadcast %cst_113 : f32 to vector<16x1xf32>
    %352 = arith.divf %350, %351 : vector<16x1xf32>
    %353 = vector.broadcast %345 : vector<16x1xf32> to vector<16x32xf32>
    %354 = arith.subf %337, %353 : vector<16x32xf32>
    %cst_114 = arith.constant 9.99999974E-6 : f32
    %355 = vector.broadcast %cst_114 : f32 to vector<16x1xf32>
    %356 = arith.addf %352, %355 : vector<16x1xf32>
    %357 = math.rsqrt %356 : vector<16x1xf32>
    %358 = vector.broadcast %357 : vector<16x1xf32> to vector<16x32xf32>
    %359 = arith.mulf %354, %358 : vector<16x32xf32>
    %360 = vector.broadcast %339 : vector<1x32xf32> to vector<16x32xf32>
    %361 = arith.mulf %359, %360 : vector<16x32xf32>
    %362 = vector.broadcast %341 : vector<1x32xf32> to vector<16x32xf32>
    %363 = arith.addf %361, %362 : vector<16x32xf32>
    %c1_115 = arith.constant 1 : index
    %c0_116 = arith.constant 0 : index
    %c0_117 = arith.constant 0 : index
    %364 = vector.load %arg16[%c1_115, %c0_116, %c0_117] : memref<4x32x128xf32, #tpu.memory_space<vmem>>, vector<1x32x128xf32>
    %365 = vector.shape_cast %364 : vector<1x32x128xf32> to vector<32x128xf32>
    %cst_118 = arith.constant dense<0.000000e+00> : vector<16x128xf32>
    %366 = tpu.matmul %363, %365, %cst_118 {dimension_numbers = #tpu.dot_dimension_numbers<[1], [0], [0], [1], [0, 0, 1, 1], [], []>} : vector<16x32xf32>, vector<32x128xf32>, vector<16x128xf32> -> vector<16x128xf32>
    %c1_119 = arith.constant 1 : index
    %c0_120 = arith.constant 0 : index
    %c0_121 = arith.constant 0 : index
    %367 = vector.load %arg17[%c1_119, %c0_120, %c0_121] : memref<4x1x128xf32, #tpu.memory_space<vmem>>, vector<1x1x128xf32>
    %368 = vector.shape_cast %367 : vector<1x1x128xf32> to vector<1x128xf32>
    %369 = vector.broadcast %368 : vector<1x128xf32> to vector<16x128xf32>
    %370 = arith.addf %366, %369 : vector<16x128xf32>
    %371 = arith.mulf %370, %370 : vector<16x128xf32>
    %372 = arith.mulf %370, %371 : vector<16x128xf32>
    %cst_122 = arith.constant 4.471500e-02 : f32
    %373 = vector.broadcast %cst_122 : f32 to vector<16x128xf32>
    %374 = arith.mulf %373, %372 : vector<16x128xf32>
    %375 = arith.addf %370, %374 : vector<16x128xf32>
    %cst_123 = arith.constant 0.797884583 : f32
    %376 = vector.broadcast %cst_123 : f32 to vector<16x128xf32>
    %377 = arith.mulf %376, %375 : vector<16x128xf32>
    %378 = math.tanh %377 : vector<16x128xf32>
    %cst_124 = arith.constant 1.000000e+00 : f32
    %379 = vector.broadcast %cst_124 : f32 to vector<16x128xf32>
    %380 = arith.addf %379, %378 : vector<16x128xf32>
    %cst_125 = arith.constant 5.000000e-01 : f32
    %381 = vector.broadcast %cst_125 : f32 to vector<16x128xf32>
    %382 = arith.mulf %381, %380 : vector<16x128xf32>
    %383 = arith.mulf %370, %382 : vector<16x128xf32>
    %c1_126 = arith.constant 1 : index
    %c0_127 = arith.constant 0 : index
    %c0_128 = arith.constant 0 : index
    %384 = vector.load %arg18[%c1_126, %c0_127, %c0_128] : memref<4x128x32xf32, #tpu.memory_space<vmem>>, vector<1x128x32xf32>
    %385 = vector.shape_cast %384 : vector<1x128x32xf32> to vector<128x32xf32>
    %cst_129 = arith.constant dense<0.000000e+00> : vector<16x32xf32>
    %386 = tpu.matmul %383, %385, %cst_129 {dimension_numbers = #tpu.dot_dimension_numbers<[1], [0], [0], [1], [0, 0, 1, 1], [], []>} : vector<16x128xf32>, vector<128x32xf32>, vector<16x32xf32> -> vector<16x32xf32>
    %387 = arith.addf %337, %386 : vector<16x32xf32>
    %c1_130 = arith.constant 1 : index
    %c0_131 = arith.constant 0 : index
    %c0_132 = arith.constant 0 : index
    %388 = vector.load %arg19[%c1_130, %c0_131, %c0_132] : memref<4x1x32xf32, #tpu.memory_space<vmem>>, vector<1x1x32xf32>
    %389 = vector.shape_cast %388 : vector<1x1x32xf32> to vector<1x32xf32>
    %390 = vector.broadcast %389 : vector<1x32xf32> to vector<16x32xf32>
    %391 = arith.addf %387, %390 : vector<16x32xf32>
    %c2 = arith.constant 2 : index
    %c0_133 = arith.constant 0 : index
    %c0_134 = arith.constant 0 : index
    %392 = vector.load %arg8[%c2, %c0_133, %c0_134] : memref<4x1x32xf32, #tpu.memory_space<vmem>>, vector<1x1x32xf32>
    %393 = vector.shape_cast %392 : vector<1x1x32xf32> to vector<1x32xf32>
    %c2_135 = arith.constant 2 : index
    %c0_136 = arith.constant 0 : index
    %c0_137 = arith.constant 0 : index
    %394 = vector.load %arg9[%c2_135, %c0_136, %c0_137] : memref<4x1x32xf32, #tpu.memory_space<vmem>>, vector<1x1x32xf32>
    %395 = vector.shape_cast %394 : vector<1x1x32xf32> to vector<1x32xf32>
    %cst_138 = arith.constant dense<0.000000e+00> : vector<16xf32>
    %396 = vector.multi_reduction <add>, %391, %cst_138 [1] : vector<16x32xf32> to vector<16xf32>
    %397 = vector.shape_cast %396 : vector<16xf32> to vector<16x1xf32>
    %cst_139 = arith.constant 3.200000e+01 : f32
    %398 = vector.broadcast %cst_139 : f32 to vector<16x1xf32>
    %399 = arith.divf %397, %398 : vector<16x1xf32>
    %400 = vector.broadcast %399 : vector<16x1xf32> to vector<16x32xf32>
    %401 = arith.subf %391, %400 : vector<16x32xf32>
    %402 = arith.mulf %401, %401 : vector<16x32xf32>
    %cst_140 = arith.constant dense<0.000000e+00> : vector<16xf32>
    %403 = vector.multi_reduction <add>, %402, %cst_140 [1] : vector<16x32xf32> to vector<16xf32>
    %404 = vector.shape_cast %403 : vector<16xf32> to vector<16x1xf32>
    %cst_141 = arith.constant 3.200000e+01 : f32
    %405 = vector.broadcast %cst_141 : f32 to vector<16x1xf32>
    %406 = arith.divf %404, %405 : vector<16x1xf32>
    %407 = vector.broadcast %399 : vector<16x1xf32> to vector<16x32xf32>
    %408 = arith.subf %391, %407 : vector<16x32xf32>
    %cst_142 = arith.constant 9.99999974E-6 : f32
    %409 = vector.broadcast %cst_142 : f32 to vector<16x1xf32>
    %410 = arith.addf %406, %409 : vector<16x1xf32>
    %411 = math.rsqrt %410 : vector<16x1xf32>
    %412 = vector.broadcast %411 : vector<16x1xf32> to vector<16x32xf32>
    %413 = arith.mulf %408, %412 : vector<16x32xf32>
    %414 = vector.broadcast %393 : vector<1x32xf32> to vector<16x32xf32>
    %415 = arith.mulf %413, %414 : vector<16x32xf32>
    %416 = vector.broadcast %395 : vector<1x32xf32> to vector<16x32xf32>
    %417 = arith.addf %415, %416 : vector<16x32xf32>
    %c2_143 = arith.constant 2 : index
    %c0_144 = arith.constant 0 : index
    %c0_145 = arith.constant 0 : index
    %418 = vector.load %arg10[%c2_143, %c0_144, %c0_145] : memref<4x32x96xf32, #tpu.memory_space<vmem>>, vector<1x32x96xf32>
    %419 = vector.shape_cast %418 : vector<1x32x96xf32> to vector<32x96xf32>
    %cst_146 = arith.constant dense<0.000000e+00> : vector<16x96xf32>
    %420 = tpu.matmul %417, %419, %cst_146 {dimension_numbers = #tpu.dot_dimension_numbers<[1], [0], [0], [1], [0, 0, 1, 1], [], []>} : vector<16x32xf32>, vector<32x96xf32>, vector<16x96xf32> -> vector<16x96xf32>
    %c2_147 = arith.constant 2 : index
    %c0_148 = arith.constant 0 : index
    %c0_149 = arith.constant 0 : index
    %421 = vector.load %arg11[%c2_147, %c0_148, %c0_149] : memref<4x1x96xf32, #tpu.memory_space<vmem>>, vector<1x1x96xf32>
    %422 = vector.shape_cast %421 : vector<1x1x96xf32> to vector<1x96xf32>
    %423 = vector.broadcast %422 : vector<1x96xf32> to vector<16x96xf32>
    %424 = arith.addf %420, %423 : vector<16x96xf32>
    %425 = vector.extract_strided_slice %424 {offsets = [0, 0], sizes = [16, 32], strides = [1, 1]} : vector<16x96xf32> to vector<16x32xf32>
    %426 = vector.extract_strided_slice %424 {offsets = [0, 32], sizes = [16, 32], strides = [1, 1]} : vector<16x96xf32> to vector<16x32xf32>
    %427 = vector.extract_strided_slice %424 {offsets = [0, 64], sizes = [16, 32], strides = [1, 1]} : vector<16x96xf32> to vector<16x32xf32>
    %428 = vector.extract_strided_slice %425 {offsets = [0, 0], sizes = [16, 4], strides = [1, 1]} : vector<16x32xf32> to vector<16x4xf32>
    %429 = vector.extract_strided_slice %425 {offsets = [0, 4], sizes = [16, 4], strides = [1, 1]} : vector<16x32xf32> to vector<16x4xf32>
    %430 = vector.extract_strided_slice %425 {offsets = [0, 8], sizes = [16, 4], strides = [1, 1]} : vector<16x32xf32> to vector<16x4xf32>
    %431 = vector.extract_strided_slice %425 {offsets = [0, 12], sizes = [16, 4], strides = [1, 1]} : vector<16x32xf32> to vector<16x4xf32>
    %432 = vector.extract_strided_slice %425 {offsets = [0, 16], sizes = [16, 4], strides = [1, 1]} : vector<16x32xf32> to vector<16x4xf32>
    %433 = vector.extract_strided_slice %425 {offsets = [0, 20], sizes = [16, 4], strides = [1, 1]} : vector<16x32xf32> to vector<16x4xf32>
    %434 = vector.extract_strided_slice %425 {offsets = [0, 24], sizes = [16, 4], strides = [1, 1]} : vector<16x32xf32> to vector<16x4xf32>
    %435 = vector.extract_strided_slice %425 {offsets = [0, 28], sizes = [16, 4], strides = [1, 1]} : vector<16x32xf32> to vector<16x4xf32>
    %436 = vector.shape_cast %428 : vector<16x4xf32> to vector<1x16x4xf32>
    %437 = vector.shape_cast %429 : vector<16x4xf32> to vector<1x16x4xf32>
    %438 = vector.shape_cast %430 : vector<16x4xf32> to vector<1x16x4xf32>
    %439 = vector.shape_cast %431 : vector<16x4xf32> to vector<1x16x4xf32>
    %440 = vector.shape_cast %432 : vector<16x4xf32> to vector<1x16x4xf32>
    %441 = vector.shape_cast %433 : vector<16x4xf32> to vector<1x16x4xf32>
    %442 = vector.shape_cast %434 : vector<16x4xf32> to vector<1x16x4xf32>
    %443 = vector.shape_cast %435 : vector<16x4xf32> to vector<1x16x4xf32>
    %444 = tpu.concatenate %436, %437, %438, %439, %440, %441, %442, %443 in 0 : vector<1x16x4xf32>, vector<1x16x4xf32>, vector<1x16x4xf32>, vector<1x16x4xf32>, vector<1x16x4xf32>, vector<1x16x4xf32>, vector<1x16x4xf32>, vector<1x16x4xf32> -> vector<8x16x4xf32>
    %cst_150 = arith.constant 5.000000e-01 : f32
    %445 = vector.broadcast %cst_150 : f32 to vector<8x16x4xf32>
    %446 = arith.mulf %444, %445 : vector<8x16x4xf32>
    %447 = vector.extract_strided_slice %426 {offsets = [0, 0], sizes = [16, 4], strides = [1, 1]} : vector<16x32xf32> to vector<16x4xf32>
    %448 = vector.extract_strided_slice %426 {offsets = [0, 4], sizes = [16, 4], strides = [1, 1]} : vector<16x32xf32> to vector<16x4xf32>
    %449 = vector.extract_strided_slice %426 {offsets = [0, 8], sizes = [16, 4], strides = [1, 1]} : vector<16x32xf32> to vector<16x4xf32>
    %450 = vector.extract_strided_slice %426 {offsets = [0, 12], sizes = [16, 4], strides = [1, 1]} : vector<16x32xf32> to vector<16x4xf32>
    %451 = vector.extract_strided_slice %426 {offsets = [0, 16], sizes = [16, 4], strides = [1, 1]} : vector<16x32xf32> to vector<16x4xf32>
    %452 = vector.extract_strided_slice %426 {offsets = [0, 20], sizes = [16, 4], strides = [1, 1]} : vector<16x32xf32> to vector<16x4xf32>
    %453 = vector.extract_strided_slice %426 {offsets = [0, 24], sizes = [16, 4], strides = [1, 1]} : vector<16x32xf32> to vector<16x4xf32>
    %454 = vector.extract_strided_slice %426 {offsets = [0, 28], sizes = [16, 4], strides = [1, 1]} : vector<16x32xf32> to vector<16x4xf32>
    %455 = vector.shape_cast %447 : vector<16x4xf32> to vector<1x16x4xf32>
    %456 = vector.shape_cast %448 : vector<16x4xf32> to vector<1x16x4xf32>
    %457 = vector.shape_cast %449 : vector<16x4xf32> to vector<1x16x4xf32>
    %458 = vector.shape_cast %450 : vector<16x4xf32> to vector<1x16x4xf32>
    %459 = vector.shape_cast %451 : vector<16x4xf32> to vector<1x16x4xf32>
    %460 = vector.shape_cast %452 : vector<16x4xf32> to vector<1x16x4xf32>
    %461 = vector.shape_cast %453 : vector<16x4xf32> to vector<1x16x4xf32>
    %462 = vector.shape_cast %454 : vector<16x4xf32> to vector<1x16x4xf32>
    %463 = tpu.concatenate %455, %456, %457, %458, %459, %460, %461, %462 in 0 : vector<1x16x4xf32>, vector<1x16x4xf32>, vector<1x16x4xf32>, vector<1x16x4xf32>, vector<1x16x4xf32>, vector<1x16x4xf32>, vector<1x16x4xf32>, vector<1x16x4xf32> -> vector<8x16x4xf32>
    %464 = vector.extract_strided_slice %427 {offsets = [0, 0], sizes = [16, 4], strides = [1, 1]} : vector<16x32xf32> to vector<16x4xf32>
    %465 = vector.extract_strided_slice %427 {offsets = [0, 4], sizes = [16, 4], strides = [1, 1]} : vector<16x32xf32> to vector<16x4xf32>
    %466 = vector.extract_strided_slice %427 {offsets = [0, 8], sizes = [16, 4], strides = [1, 1]} : vector<16x32xf32> to vector<16x4xf32>
    %467 = vector.extract_strided_slice %427 {offsets = [0, 12], sizes = [16, 4], strides = [1, 1]} : vector<16x32xf32> to vector<16x4xf32>
    %468 = vector.extract_strided_slice %427 {offsets = [0, 16], sizes = [16, 4], strides = [1, 1]} : vector<16x32xf32> to vector<16x4xf32>
    %469 = vector.extract_strided_slice %427 {offsets = [0, 20], sizes = [16, 4], strides = [1, 1]} : vector<16x32xf32> to vector<16x4xf32>
    %470 = vector.extract_strided_slice %427 {offsets = [0, 24], sizes = [16, 4], strides = [1, 1]} : vector<16x32xf32> to vector<16x4xf32>
    %471 = vector.extract_strided_slice %427 {offsets = [0, 28], sizes = [16, 4], strides = [1, 1]} : vector<16x32xf32> to vector<16x4xf32>
    %472 = vector.shape_cast %464 : vector<16x4xf32> to vector<1x16x4xf32>
    %473 = vector.shape_cast %465 : vector<16x4xf32> to vector<1x16x4xf32>
    %474 = vector.shape_cast %466 : vector<16x4xf32> to vector<1x16x4xf32>
    %475 = vector.shape_cast %467 : vector<16x4xf32> to vector<1x16x4xf32>
    %476 = vector.shape_cast %468 : vector<16x4xf32> to vector<1x16x4xf32>
    %477 = vector.shape_cast %469 : vector<16x4xf32> to vector<1x16x4xf32>
    %478 = vector.shape_cast %470 : vector<16x4xf32> to vector<1x16x4xf32>
    %479 = vector.shape_cast %471 : vector<16x4xf32> to vector<1x16x4xf32>
    %480 = tpu.concatenate %472, %473, %474, %475, %476, %477, %478, %479 in 0 : vector<1x16x4xf32>, vector<1x16x4xf32>, vector<1x16x4xf32>, vector<1x16x4xf32>, vector<1x16x4xf32>, vector<1x16x4xf32>, vector<1x16x4xf32>, vector<1x16x4xf32> -> vector<8x16x4xf32>
    "tpu.trace_start"() <{level = 10 : i32, message = "hqd,hkd->hqk"}> : () -> ()
    %cst_151 = arith.constant dense<0.000000e+00> : vector<8x16x16xf32>
    %481 = tpu.matmul %446, %463, %cst_151 {dimension_numbers = #tpu.dot_dimension_numbers<[2], [2], [1], [1], [0, 0, 0, 1, 1, 1], [0], [0]>} : vector<8x16x4xf32>, vector<8x16x4xf32>, vector<8x16x16xf32> -> vector<8x16x16xf32>
    "tpu.trace_stop"() : () -> ()
    %cst_152 = arith.constant dense<0xFF800000> : vector<8x16xf32>
    %482 = vector.multi_reduction <maximumf>, %481, %cst_152 [2] : vector<8x16x16xf32> to vector<8x16xf32>
    %483 = vector.shape_cast %482 : vector<8x16xf32> to vector<8x16x1xf32>
    %484 = vector.broadcast %483 : vector<8x16x1xf32> to vector<8x16x16xf32>
    %485 = arith.subf %481, %484 : vector<8x16x16xf32>
    %486 = math.exp %485 : vector<8x16x16xf32>
    %cst_153 = arith.constant dense<0.000000e+00> : vector<8x16xf32>
    %487 = vector.multi_reduction <add>, %486, %cst_153 [2] : vector<8x16x16xf32> to vector<8x16xf32>
    %488 = vector.shape_cast %487 : vector<8x16xf32> to vector<8x16x1xf32>
    %489 = tpu.reciprocal %488 {approx = true} : vector<8x16x1xf32> -> vector<8x16x1xf32>
    %490 = vector.broadcast %489 : vector<8x16x1xf32> to vector<8x16x16xf32>
    %491 = arith.mulf %486, %490 : vector<8x16x16xf32>
    "tpu.trace_start"() <{level = 10 : i32, message = "hqk,hkd->hqd"}> : () -> ()
    %cst_154 = arith.constant dense<0.000000e+00> : vector<8x16x4xf32>
    %492 = tpu.matmul %491, %480, %cst_154 {dimension_numbers = #tpu.dot_dimension_numbers<[2], [1], [1], [2], [0, 0, 0, 1, 1, 2], [0], [0]>} : vector<8x16x16xf32>, vector<8x16x4xf32>, vector<8x16x4xf32> -> vector<8x16x4xf32>
    "tpu.trace_stop"() : () -> ()
    %493 = vector.extract_strided_slice %492 {offsets = [0, 0, 0], sizes = [1, 16, 4], strides = [1, 1, 1]} : vector<8x16x4xf32> to vector<1x16x4xf32>
    %494 = vector.shape_cast %493 : vector<1x16x4xf32> to vector<16x4xf32>
    %495 = vector.extract_strided_slice %492 {offsets = [1, 0, 0], sizes = [1, 16, 4], strides = [1, 1, 1]} : vector<8x16x4xf32> to vector<1x16x4xf32>
    %496 = vector.shape_cast %495 : vector<1x16x4xf32> to vector<16x4xf32>
    %497 = vector.extract_strided_slice %492 {offsets = [2, 0, 0], sizes = [1, 16, 4], strides = [1, 1, 1]} : vector<8x16x4xf32> to vector<1x16x4xf32>
    %498 = vector.shape_cast %497 : vector<1x16x4xf32> to vector<16x4xf32>
    %499 = vector.extract_strided_slice %492 {offsets = [3, 0, 0], sizes = [1, 16, 4], strides = [1, 1, 1]} : vector<8x16x4xf32> to vector<1x16x4xf32>
    %500 = vector.shape_cast %499 : vector<1x16x4xf32> to vector<16x4xf32>
    %501 = vector.extract_strided_slice %492 {offsets = [4, 0, 0], sizes = [1, 16, 4], strides = [1, 1, 1]} : vector<8x16x4xf32> to vector<1x16x4xf32>
    %502 = vector.shape_cast %501 : vector<1x16x4xf32> to vector<16x4xf32>
    %503 = vector.extract_strided_slice %492 {offsets = [5, 0, 0], sizes = [1, 16, 4], strides = [1, 1, 1]} : vector<8x16x4xf32> to vector<1x16x4xf32>
    %504 = vector.shape_cast %503 : vector<1x16x4xf32> to vector<16x4xf32>
    %505 = vector.extract_strided_slice %492 {offsets = [6, 0, 0], sizes = [1, 16, 4], strides = [1, 1, 1]} : vector<8x16x4xf32> to vector<1x16x4xf32>
    %506 = vector.shape_cast %505 : vector<1x16x4xf32> to vector<16x4xf32>
    %507 = vector.extract_strided_slice %492 {offsets = [7, 0, 0], sizes = [1, 16, 4], strides = [1, 1, 1]} : vector<8x16x4xf32> to vector<1x16x4xf32>
    %508 = vector.shape_cast %507 : vector<1x16x4xf32> to vector<16x4xf32>
    %509 = tpu.concatenate %494, %496, %498, %500, %502, %504, %506, %508 in 1 : vector<16x4xf32>, vector<16x4xf32>, vector<16x4xf32>, vector<16x4xf32>, vector<16x4xf32>, vector<16x4xf32>, vector<16x4xf32>, vector<16x4xf32> -> vector<16x32xf32>
    %c2_155 = arith.constant 2 : index
    %c0_156 = arith.constant 0 : index
    %c0_157 = arith.constant 0 : index
    %510 = vector.load %arg12[%c2_155, %c0_156, %c0_157] : memref<4x32x32xf32, #tpu.memory_space<vmem>>, vector<1x32x32xf32>
    %511 = vector.shape_cast %510 : vector<1x32x32xf32> to vector<32x32xf32>
    %cst_158 = arith.constant dense<0.000000e+00> : vector<16x32xf32>
    %512 = tpu.matmul %509, %511, %cst_158 {dimension_numbers = #tpu.dot_dimension_numbers<[1], [0], [0], [1], [0, 0, 1, 1], [], []>} : vector<16x32xf32>, vector<32x32xf32>, vector<16x32xf32> -> vector<16x32xf32>
    %513 = arith.addf %391, %512 : vector<16x32xf32>
    %c2_159 = arith.constant 2 : index
    %c0_160 = arith.constant 0 : index
    %c0_161 = arith.constant 0 : index
    %514 = vector.load %arg13[%c2_159, %c0_160, %c0_161] : memref<4x1x32xf32, #tpu.memory_space<vmem>>, vector<1x1x32xf32>
    %515 = vector.shape_cast %514 : vector<1x1x32xf32> to vector<1x32xf32>
    %516 = vector.broadcast %515 : vector<1x32xf32> to vector<16x32xf32>
    %517 = arith.addf %513, %516 : vector<16x32xf32>
    %c2_162 = arith.constant 2 : index
    %c0_163 = arith.constant 0 : index
    %c0_164 = arith.constant 0 : index
    %518 = vector.load %arg14[%c2_162, %c0_163, %c0_164] : memref<4x1x32xf32, #tpu.memory_space<vmem>>, vector<1x1x32xf32>
    %519 = vector.shape_cast %518 : vector<1x1x32xf32> to vector<1x32xf32>
    %c2_165 = arith.constant 2 : index
    %c0_166 = arith.constant 0 : index
    %c0_167 = arith.constant 0 : index
    %520 = vector.load %arg15[%c2_165, %c0_166, %c0_167] : memref<4x1x32xf32, #tpu.memory_space<vmem>>, vector<1x1x32xf32>
    %521 = vector.shape_cast %520 : vector<1x1x32xf32> to vector<1x32xf32>
    %cst_168 = arith.constant dense<0.000000e+00> : vector<16xf32>
    %522 = vector.multi_reduction <add>, %517, %cst_168 [1] : vector<16x32xf32> to vector<16xf32>
    %523 = vector.shape_cast %522 : vector<16xf32> to vector<16x1xf32>
    %cst_169 = arith.constant 3.200000e+01 : f32
    %524 = vector.broadcast %cst_169 : f32 to vector<16x1xf32>
    %525 = arith.divf %523, %524 : vector<16x1xf32>
    %526 = vector.broadcast %525 : vector<16x1xf32> to vector<16x32xf32>
    %527 = arith.subf %517, %526 : vector<16x32xf32>
    %528 = arith.mulf %527, %527 : vector<16x32xf32>
    %cst_170 = arith.constant dense<0.000000e+00> : vector<16xf32>
    %529 = vector.multi_reduction <add>, %528, %cst_170 [1] : vector<16x32xf32> to vector<16xf32>
    %530 = vector.shape_cast %529 : vector<16xf32> to vector<16x1xf32>
    %cst_171 = arith.constant 3.200000e+01 : f32
    %531 = vector.broadcast %cst_171 : f32 to vector<16x1xf32>
    %532 = arith.divf %530, %531 : vector<16x1xf32>
    %533 = vector.broadcast %525 : vector<16x1xf32> to vector<16x32xf32>
    %534 = arith.subf %517, %533 : vector<16x32xf32>
    %cst_172 = arith.constant 9.99999974E-6 : f32
    %535 = vector.broadcast %cst_172 : f32 to vector<16x1xf32>
    %536 = arith.addf %532, %535 : vector<16x1xf32>
    %537 = math.rsqrt %536 : vector<16x1xf32>
    %538 = vector.broadcast %537 : vector<16x1xf32> to vector<16x32xf32>
    %539 = arith.mulf %534, %538 : vector<16x32xf32>
    %540 = vector.broadcast %519 : vector<1x32xf32> to vector<16x32xf32>
    %541 = arith.mulf %539, %540 : vector<16x32xf32>
    %542 = vector.broadcast %521 : vector<1x32xf32> to vector<16x32xf32>
    %543 = arith.addf %541, %542 : vector<16x32xf32>
    %c2_173 = arith.constant 2 : index
    %c0_174 = arith.constant 0 : index
    %c0_175 = arith.constant 0 : index
    %544 = vector.load %arg16[%c2_173, %c0_174, %c0_175] : memref<4x32x128xf32, #tpu.memory_space<vmem>>, vector<1x32x128xf32>
    %545 = vector.shape_cast %544 : vector<1x32x128xf32> to vector<32x128xf32>
    %cst_176 = arith.constant dense<0.000000e+00> : vector<16x128xf32>
    %546 = tpu.matmul %543, %545, %cst_176 {dimension_numbers = #tpu.dot_dimension_numbers<[1], [0], [0], [1], [0, 0, 1, 1], [], []>} : vector<16x32xf32>, vector<32x128xf32>, vector<16x128xf32> -> vector<16x128xf32>
    %c2_177 = arith.constant 2 : index
    %c0_178 = arith.constant 0 : index
    %c0_179 = arith.constant 0 : index
    %547 = vector.load %arg17[%c2_177, %c0_178, %c0_179] : memref<4x1x128xf32, #tpu.memory_space<vmem>>, vector<1x1x128xf32>
    %548 = vector.shape_cast %547 : vector<1x1x128xf32> to vector<1x128xf32>
    %549 = vector.broadcast %548 : vector<1x128xf32> to vector<16x128xf32>
    %550 = arith.addf %546, %549 : vector<16x128xf32>
    %551 = arith.mulf %550, %550 : vector<16x128xf32>
    %552 = arith.mulf %550, %551 : vector<16x128xf32>
    %cst_180 = arith.constant 4.471500e-02 : f32
    %553 = vector.broadcast %cst_180 : f32 to vector<16x128xf32>
    %554 = arith.mulf %553, %552 : vector<16x128xf32>
    %555 = arith.addf %550, %554 : vector<16x128xf32>
    %cst_181 = arith.constant 0.797884583 : f32
    %556 = vector.broadcast %cst_181 : f32 to vector<16x128xf32>
    %557 = arith.mulf %556, %555 : vector<16x128xf32>
    %558 = math.tanh %557 : vector<16x128xf32>
    %cst_182 = arith.constant 1.000000e+00 : f32
    %559 = vector.broadcast %cst_182 : f32 to vector<16x128xf32>
    %560 = arith.addf %559, %558 : vector<16x128xf32>
    %cst_183 = arith.constant 5.000000e-01 : f32
    %561 = vector.broadcast %cst_183 : f32 to vector<16x128xf32>
    %562 = arith.mulf %561, %560 : vector<16x128xf32>
    %563 = arith.mulf %550, %562 : vector<16x128xf32>
    %c2_184 = arith.constant 2 : index
    %c0_185 = arith.constant 0 : index
    %c0_186 = arith.constant 0 : index
    %564 = vector.load %arg18[%c2_184, %c0_185, %c0_186] : memref<4x128x32xf32, #tpu.memory_space<vmem>>, vector<1x128x32xf32>
    %565 = vector.shape_cast %564 : vector<1x128x32xf32> to vector<128x32xf32>
    %cst_187 = arith.constant dense<0.000000e+00> : vector<16x32xf32>
    %566 = tpu.matmul %563, %565, %cst_187 {dimension_numbers = #tpu.dot_dimension_numbers<[1], [0], [0], [1], [0, 0, 1, 1], [], []>} : vector<16x128xf32>, vector<128x32xf32>, vector<16x32xf32> -> vector<16x32xf32>
    %567 = arith.addf %517, %566 : vector<16x32xf32>
    %c2_188 = arith.constant 2 : index
    %c0_189 = arith.constant 0 : index
    %c0_190 = arith.constant 0 : index
    %568 = vector.load %arg19[%c2_188, %c0_189, %c0_190] : memref<4x1x32xf32, #tpu.memory_space<vmem>>, vector<1x1x32xf32>
    %569 = vector.shape_cast %568 : vector<1x1x32xf32> to vector<1x32xf32>
    %570 = vector.broadcast %569 : vector<1x32xf32> to vector<16x32xf32>
    %571 = arith.addf %567, %570 : vector<16x32xf32>
    %c3 = arith.constant 3 : index
    %c0_191 = arith.constant 0 : index
    %c0_192 = arith.constant 0 : index
    %572 = vector.load %arg8[%c3, %c0_191, %c0_192] : memref<4x1x32xf32, #tpu.memory_space<vmem>>, vector<1x1x32xf32>
    %573 = vector.shape_cast %572 : vector<1x1x32xf32> to vector<1x32xf32>
    %c3_193 = arith.constant 3 : index
    %c0_194 = arith.constant 0 : index
    %c0_195 = arith.constant 0 : index
    %574 = vector.load %arg9[%c3_193, %c0_194, %c0_195] : memref<4x1x32xf32, #tpu.memory_space<vmem>>, vector<1x1x32xf32>
    %575 = vector.shape_cast %574 : vector<1x1x32xf32> to vector<1x32xf32>
    %cst_196 = arith.constant dense<0.000000e+00> : vector<16xf32>
    %576 = vector.multi_reduction <add>, %571, %cst_196 [1] : vector<16x32xf32> to vector<16xf32>
    %577 = vector.shape_cast %576 : vector<16xf32> to vector<16x1xf32>
    %cst_197 = arith.constant 3.200000e+01 : f32
    %578 = vector.broadcast %cst_197 : f32 to vector<16x1xf32>
    %579 = arith.divf %577, %578 : vector<16x1xf32>
    %580 = vector.broadcast %579 : vector<16x1xf32> to vector<16x32xf32>
    %581 = arith.subf %571, %580 : vector<16x32xf32>
    %582 = arith.mulf %581, %581 : vector<16x32xf32>
    %cst_198 = arith.constant dense<0.000000e+00> : vector<16xf32>
    %583 = vector.multi_reduction <add>, %582, %cst_198 [1] : vector<16x32xf32> to vector<16xf32>
    %584 = vector.shape_cast %583 : vector<16xf32> to vector<16x1xf32>
    %cst_199 = arith.constant 3.200000e+01 : f32
    %585 = vector.broadcast %cst_199 : f32 to vector<16x1xf32>
    %586 = arith.divf %584, %585 : vector<16x1xf32>
    %587 = vector.broadcast %579 : vector<16x1xf32> to vector<16x32xf32>
    %588 = arith.subf %571, %587 : vector<16x32xf32>
    %cst_200 = arith.constant 9.99999974E-6 : f32
    %589 = vector.broadcast %cst_200 : f32 to vector<16x1xf32>
    %590 = arith.addf %586, %589 : vector<16x1xf32>
    %591 = math.rsqrt %590 : vector<16x1xf32>
    %592 = vector.broadcast %591 : vector<16x1xf32> to vector<16x32xf32>
    %593 = arith.mulf %588, %592 : vector<16x32xf32>
    %594 = vector.broadcast %573 : vector<1x32xf32> to vector<16x32xf32>
    %595 = arith.mulf %593, %594 : vector<16x32xf32>
    %596 = vector.broadcast %575 : vector<1x32xf32> to vector<16x32xf32>
    %597 = arith.addf %595, %596 : vector<16x32xf32>
    %c3_201 = arith.constant 3 : index
    %c0_202 = arith.constant 0 : index
    %c0_203 = arith.constant 0 : index
    %598 = vector.load %arg10[%c3_201, %c0_202, %c0_203] : memref<4x32x96xf32, #tpu.memory_space<vmem>>, vector<1x32x96xf32>
    %599 = vector.shape_cast %598 : vector<1x32x96xf32> to vector<32x96xf32>
    %cst_204 = arith.constant dense<0.000000e+00> : vector<16x96xf32>
    %600 = tpu.matmul %597, %599, %cst_204 {dimension_numbers = #tpu.dot_dimension_numbers<[1], [0], [0], [1], [0, 0, 1, 1], [], []>} : vector<16x32xf32>, vector<32x96xf32>, vector<16x96xf32> -> vector<16x96xf32>
    %c3_205 = arith.constant 3 : index
    %c0_206 = arith.constant 0 : index
    %c0_207 = arith.constant 0 : index
    %601 = vector.load %arg11[%c3_205, %c0_206, %c0_207] : memref<4x1x96xf32, #tpu.memory_space<vmem>>, vector<1x1x96xf32>
    %602 = vector.shape_cast %601 : vector<1x1x96xf32> to vector<1x96xf32>
    %603 = vector.broadcast %602 : vector<1x96xf32> to vector<16x96xf32>
    %604 = arith.addf %600, %603 : vector<16x96xf32>
    %605 = vector.extract_strided_slice %604 {offsets = [0, 0], sizes = [16, 32], strides = [1, 1]} : vector<16x96xf32> to vector<16x32xf32>
    %606 = vector.extract_strided_slice %604 {offsets = [0, 32], sizes = [16, 32], strides = [1, 1]} : vector<16x96xf32> to vector<16x32xf32>
    %607 = vector.extract_strided_slice %604 {offsets = [0, 64], sizes = [16, 32], strides = [1, 1]} : vector<16x96xf32> to vector<16x32xf32>
    %608 = vector.extract_strided_slice %605 {offsets = [0, 0], sizes = [16, 4], strides = [1, 1]} : vector<16x32xf32> to vector<16x4xf32>
    %609 = vector.extract_strided_slice %605 {offsets = [0, 4], sizes = [16, 4], strides = [1, 1]} : vector<16x32xf32> to vector<16x4xf32>
    %610 = vector.extract_strided_slice %605 {offsets = [0, 8], sizes = [16, 4], strides = [1, 1]} : vector<16x32xf32> to vector<16x4xf32>
    %611 = vector.extract_strided_slice %605 {offsets = [0, 12], sizes = [16, 4], strides = [1, 1]} : vector<16x32xf32> to vector<16x4xf32>
    %612 = vector.extract_strided_slice %605 {offsets = [0, 16], sizes = [16, 4], strides = [1, 1]} : vector<16x32xf32> to vector<16x4xf32>
    %613 = vector.extract_strided_slice %605 {offsets = [0, 20], sizes = [16, 4], strides = [1, 1]} : vector<16x32xf32> to vector<16x4xf32>
    %614 = vector.extract_strided_slice %605 {offsets = [0, 24], sizes = [16, 4], strides = [1, 1]} : vector<16x32xf32> to vector<16x4xf32>
    %615 = vector.extract_strided_slice %605 {offsets = [0, 28], sizes = [16, 4], strides = [1, 1]} : vector<16x32xf32> to vector<16x4xf32>
    %616 = vector.shape_cast %608 : vector<16x4xf32> to vector<1x16x4xf32>
    %617 = vector.shape_cast %609 : vector<16x4xf32> to vector<1x16x4xf32>
    %618 = vector.shape_cast %610 : vector<16x4xf32> to vector<1x16x4xf32>
    %619 = vector.shape_cast %611 : vector<16x4xf32> to vector<1x16x4xf32>
    %620 = vector.shape_cast %612 : vector<16x4xf32> to vector<1x16x4xf32>
    %621 = vector.shape_cast %613 : vector<16x4xf32> to vector<1x16x4xf32>
    %622 = vector.shape_cast %614 : vector<16x4xf32> to vector<1x16x4xf32>
    %623 = vector.shape_cast %615 : vector<16x4xf32> to vector<1x16x4xf32>
    %624 = tpu.concatenate %616, %617, %618, %619, %620, %621, %622, %623 in 0 : vector<1x16x4xf32>, vector<1x16x4xf32>, vector<1x16x4xf32>, vector<1x16x4xf32>, vector<1x16x4xf32>, vector<1x16x4xf32>, vector<1x16x4xf32>, vector<1x16x4xf32> -> vector<8x16x4xf32>
    %cst_208 = arith.constant 5.000000e-01 : f32
    %625 = vector.broadcast %cst_208 : f32 to vector<8x16x4xf32>
    %626 = arith.mulf %624, %625 : vector<8x16x4xf32>
    %627 = vector.extract_strided_slice %606 {offsets = [0, 0], sizes = [16, 4], strides = [1, 1]} : vector<16x32xf32> to vector<16x4xf32>
    %628 = vector.extract_strided_slice %606 {offsets = [0, 4], sizes = [16, 4], strides = [1, 1]} : vector<16x32xf32> to vector<16x4xf32>
    %629 = vector.extract_strided_slice %606 {offsets = [0, 8], sizes = [16, 4], strides = [1, 1]} : vector<16x32xf32> to vector<16x4xf32>
    %630 = vector.extract_strided_slice %606 {offsets = [0, 12], sizes = [16, 4], strides = [1, 1]} : vector<16x32xf32> to vector<16x4xf32>
    %631 = vector.extract_strided_slice %606 {offsets = [0, 16], sizes = [16, 4], strides = [1, 1]} : vector<16x32xf32> to vector<16x4xf32>
    %632 = vector.extract_strided_slice %606 {offsets = [0, 20], sizes = [16, 4], strides = [1, 1]} : vector<16x32xf32> to vector<16x4xf32>
    %633 = vector.extract_strided_slice %606 {offsets = [0, 24], sizes = [16, 4], strides = [1, 1]} : vector<16x32xf32> to vector<16x4xf32>
    %634 = vector.extract_strided_slice %606 {offsets = [0, 28], sizes = [16, 4], strides = [1, 1]} : vector<16x32xf32> to vector<16x4xf32>
    %635 = vector.shape_cast %627 : vector<16x4xf32> to vector<1x16x4xf32>
    %636 = vector.shape_cast %628 : vector<16x4xf32> to vector<1x16x4xf32>
    %637 = vector.shape_cast %629 : vector<16x4xf32> to vector<1x16x4xf32>
    %638 = vector.shape_cast %630 : vector<16x4xf32> to vector<1x16x4xf32>
    %639 = vector.shape_cast %631 : vector<16x4xf32> to vector<1x16x4xf32>
    %640 = vector.shape_cast %632 : vector<16x4xf32> to vector<1x16x4xf32>
    %641 = vector.shape_cast %633 : vector<16x4xf32> to vector<1x16x4xf32>
    %642 = vector.shape_cast %634 : vector<16x4xf32> to vector<1x16x4xf32>
    %643 = tpu.concatenate %635, %636, %637, %638, %639, %640, %641, %642 in 0 : vector<1x16x4xf32>, vector<1x16x4xf32>, vector<1x16x4xf32>, vector<1x16x4xf32>, vector<1x16x4xf32>, vector<1x16x4xf32>, vector<1x16x4xf32>, vector<1x16x4xf32> -> vector<8x16x4xf32>
    %644 = vector.extract_strided_slice %607 {offsets = [0, 0], sizes = [16, 4], strides = [1, 1]} : vector<16x32xf32> to vector<16x4xf32>
    %645 = vector.extract_strided_slice %607 {offsets = [0, 4], sizes = [16, 4], strides = [1, 1]} : vector<16x32xf32> to vector<16x4xf32>
    %646 = vector.extract_strided_slice %607 {offsets = [0, 8], sizes = [16, 4], strides = [1, 1]} : vector<16x32xf32> to vector<16x4xf32>
    %647 = vector.extract_strided_slice %607 {offsets = [0, 12], sizes = [16, 4], strides = [1, 1]} : vector<16x32xf32> to vector<16x4xf32>
    %648 = vector.extract_strided_slice %607 {offsets = [0, 16], sizes = [16, 4], strides = [1, 1]} : vector<16x32xf32> to vector<16x4xf32>
    %649 = vector.extract_strided_slice %607 {offsets = [0, 20], sizes = [16, 4], strides = [1, 1]} : vector<16x32xf32> to vector<16x4xf32>
    %650 = vector.extract_strided_slice %607 {offsets = [0, 24], sizes = [16, 4], strides = [1, 1]} : vector<16x32xf32> to vector<16x4xf32>
    %651 = vector.extract_strided_slice %607 {offsets = [0, 28], sizes = [16, 4], strides = [1, 1]} : vector<16x32xf32> to vector<16x4xf32>
    %652 = vector.shape_cast %644 : vector<16x4xf32> to vector<1x16x4xf32>
    %653 = vector.shape_cast %645 : vector<16x4xf32> to vector<1x16x4xf32>
    %654 = vector.shape_cast %646 : vector<16x4xf32> to vector<1x16x4xf32>
    %655 = vector.shape_cast %647 : vector<16x4xf32> to vector<1x16x4xf32>
    %656 = vector.shape_cast %648 : vector<16x4xf32> to vector<1x16x4xf32>
    %657 = vector.shape_cast %649 : vector<16x4xf32> to vector<1x16x4xf32>
    %658 = vector.shape_cast %650 : vector<16x4xf32> to vector<1x16x4xf32>
    %659 = vector.shape_cast %651 : vector<16x4xf32> to vector<1x16x4xf32>
    %660 = tpu.concatenate %652, %653, %654, %655, %656, %657, %658, %659 in 0 : vector<1x16x4xf32>, vector<1x16x4xf32>, vector<1x16x4xf32>, vector<1x16x4xf32>, vector<1x16x4xf32>, vector<1x16x4xf32>, vector<1x16x4xf32>, vector<1x16x4xf32> -> vector<8x16x4xf32>
    "tpu.trace_start"() <{level = 10 : i32, message = "hqd,hkd->hqk"}> : () -> ()
    %cst_209 = arith.constant dense<0.000000e+00> : vector<8x16x16xf32>
    %661 = tpu.matmul %626, %643, %cst_209 {dimension_numbers = #tpu.dot_dimension_numbers<[2], [2], [1], [1], [0, 0, 0, 1, 1, 1], [0], [0]>} : vector<8x16x4xf32>, vector<8x16x4xf32>, vector<8x16x16xf32> -> vector<8x16x16xf32>
    "tpu.trace_stop"() : () -> ()
    %cst_210 = arith.constant dense<0xFF800000> : vector<8x16xf32>
    %662 = vector.multi_reduction <maximumf>, %661, %cst_210 [2] : vector<8x16x16xf32> to vector<8x16xf32>
    %663 = vector.shape_cast %662 : vector<8x16xf32> to vector<8x16x1xf32>
    %664 = vector.broadcast %663 : vector<8x16x1xf32> to vector<8x16x16xf32>
    %665 = arith.subf %661, %664 : vector<8x16x16xf32>
    %666 = math.exp %665 : vector<8x16x16xf32>
    %cst_211 = arith.constant dense<0.000000e+00> : vector<8x16xf32>
    %667 = vector.multi_reduction <add>, %666, %cst_211 [2] : vector<8x16x16xf32> to vector<8x16xf32>
    %668 = vector.shape_cast %667 : vector<8x16xf32> to vector<8x16x1xf32>
    %669 = tpu.reciprocal %668 {approx = true} : vector<8x16x1xf32> -> vector<8x16x1xf32>
    %670 = vector.broadcast %669 : vector<8x16x1xf32> to vector<8x16x16xf32>
    %671 = arith.mulf %666, %670 : vector<8x16x16xf32>
    "tpu.trace_start"() <{level = 10 : i32, message = "hqk,hkd->hqd"}> : () -> ()
    %cst_212 = arith.constant dense<0.000000e+00> : vector<8x16x4xf32>
    %672 = tpu.matmul %671, %660, %cst_212 {dimension_numbers = #tpu.dot_dimension_numbers<[2], [1], [1], [2], [0, 0, 0, 1, 1, 2], [0], [0]>} : vector<8x16x16xf32>, vector<8x16x4xf32>, vector<8x16x4xf32> -> vector<8x16x4xf32>
    "tpu.trace_stop"() : () -> ()
    %673 = vector.extract_strided_slice %672 {offsets = [0, 0, 0], sizes = [1, 16, 4], strides = [1, 1, 1]} : vector<8x16x4xf32> to vector<1x16x4xf32>
    %674 = vector.shape_cast %673 : vector<1x16x4xf32> to vector<16x4xf32>
    %675 = vector.extract_strided_slice %672 {offsets = [1, 0, 0], sizes = [1, 16, 4], strides = [1, 1, 1]} : vector<8x16x4xf32> to vector<1x16x4xf32>
    %676 = vector.shape_cast %675 : vector<1x16x4xf32> to vector<16x4xf32>
    %677 = vector.extract_strided_slice %672 {offsets = [2, 0, 0], sizes = [1, 16, 4], strides = [1, 1, 1]} : vector<8x16x4xf32> to vector<1x16x4xf32>
    %678 = vector.shape_cast %677 : vector<1x16x4xf32> to vector<16x4xf32>
    %679 = vector.extract_strided_slice %672 {offsets = [3, 0, 0], sizes = [1, 16, 4], strides = [1, 1, 1]} : vector<8x16x4xf32> to vector<1x16x4xf32>
    %680 = vector.shape_cast %679 : vector<1x16x4xf32> to vector<16x4xf32>
    %681 = vector.extract_strided_slice %672 {offsets = [4, 0, 0], sizes = [1, 16, 4], strides = [1, 1, 1]} : vector<8x16x4xf32> to vector<1x16x4xf32>
    %682 = vector.shape_cast %681 : vector<1x16x4xf32> to vector<16x4xf32>
    %683 = vector.extract_strided_slice %672 {offsets = [5, 0, 0], sizes = [1, 16, 4], strides = [1, 1, 1]} : vector<8x16x4xf32> to vector<1x16x4xf32>
    %684 = vector.shape_cast %683 : vector<1x16x4xf32> to vector<16x4xf32>
    %685 = vector.extract_strided_slice %672 {offsets = [6, 0, 0], sizes = [1, 16, 4], strides = [1, 1, 1]} : vector<8x16x4xf32> to vector<1x16x4xf32>
    %686 = vector.shape_cast %685 : vector<1x16x4xf32> to vector<16x4xf32>
    %687 = vector.extract_strided_slice %672 {offsets = [7, 0, 0], sizes = [1, 16, 4], strides = [1, 1, 1]} : vector<8x16x4xf32> to vector<1x16x4xf32>
    %688 = vector.shape_cast %687 : vector<1x16x4xf32> to vector<16x4xf32>
    %689 = tpu.concatenate %674, %676, %678, %680, %682, %684, %686, %688 in 1 : vector<16x4xf32>, vector<16x4xf32>, vector<16x4xf32>, vector<16x4xf32>, vector<16x4xf32>, vector<16x4xf32>, vector<16x4xf32>, vector<16x4xf32> -> vector<16x32xf32>
    %c3_213 = arith.constant 3 : index
    %c0_214 = arith.constant 0 : index
    %c0_215 = arith.constant 0 : index
    %690 = vector.load %arg12[%c3_213, %c0_214, %c0_215] : memref<4x32x32xf32, #tpu.memory_space<vmem>>, vector<1x32x32xf32>
    %691 = vector.shape_cast %690 : vector<1x32x32xf32> to vector<32x32xf32>
    %cst_216 = arith.constant dense<0.000000e+00> : vector<16x32xf32>
    %692 = tpu.matmul %689, %691, %cst_216 {dimension_numbers = #tpu.dot_dimension_numbers<[1], [0], [0], [1], [0, 0, 1, 1], [], []>} : vector<16x32xf32>, vector<32x32xf32>, vector<16x32xf32> -> vector<16x32xf32>
    %693 = arith.addf %571, %692 : vector<16x32xf32>
    %c3_217 = arith.constant 3 : index
    %c0_218 = arith.constant 0 : index
    %c0_219 = arith.constant 0 : index
    %694 = vector.load %arg13[%c3_217, %c0_218, %c0_219] : memref<4x1x32xf32, #tpu.memory_space<vmem>>, vector<1x1x32xf32>
    %695 = vector.shape_cast %694 : vector<1x1x32xf32> to vector<1x32xf32>
    %696 = vector.broadcast %695 : vector<1x32xf32> to vector<16x32xf32>
    %697 = arith.addf %693, %696 : vector<16x32xf32>
    %c3_220 = arith.constant 3 : index
    %c0_221 = arith.constant 0 : index
    %c0_222 = arith.constant 0 : index
    %698 = vector.load %arg14[%c3_220, %c0_221, %c0_222] : memref<4x1x32xf32, #tpu.memory_space<vmem>>, vector<1x1x32xf32>
    %699 = vector.shape_cast %698 : vector<1x1x32xf32> to vector<1x32xf32>
    %c3_223 = arith.constant 3 : index
    %c0_224 = arith.constant 0 : index
    %c0_225 = arith.constant 0 : index
    %700 = vector.load %arg15[%c3_223, %c0_224, %c0_225] : memref<4x1x32xf32, #tpu.memory_space<vmem>>, vector<1x1x32xf32>
    %701 = vector.shape_cast %700 : vector<1x1x32xf32> to vector<1x32xf32>
    %cst_226 = arith.constant dense<0.000000e+00> : vector<16xf32>
    %702 = vector.multi_reduction <add>, %697, %cst_226 [1] : vector<16x32xf32> to vector<16xf32>
    %703 = vector.shape_cast %702 : vector<16xf32> to vector<16x1xf32>
    %cst_227 = arith.constant 3.200000e+01 : f32
    %704 = vector.broadcast %cst_227 : f32 to vector<16x1xf32>
    %705 = arith.divf %703, %704 : vector<16x1xf32>
    %706 = vector.broadcast %705 : vector<16x1xf32> to vector<16x32xf32>
    %707 = arith.subf %697, %706 : vector<16x32xf32>
    %708 = arith.mulf %707, %707 : vector<16x32xf32>
    %cst_228 = arith.constant dense<0.000000e+00> : vector<16xf32>
    %709 = vector.multi_reduction <add>, %708, %cst_228 [1] : vector<16x32xf32> to vector<16xf32>
    %710 = vector.shape_cast %709 : vector<16xf32> to vector<16x1xf32>
    %cst_229 = arith.constant 3.200000e+01 : f32
    %711 = vector.broadcast %cst_229 : f32 to vector<16x1xf32>
    %712 = arith.divf %710, %711 : vector<16x1xf32>
    %713 = vector.broadcast %705 : vector<16x1xf32> to vector<16x32xf32>
    %714 = arith.subf %697, %713 : vector<16x32xf32>
    %cst_230 = arith.constant 9.99999974E-6 : f32
    %715 = vector.broadcast %cst_230 : f32 to vector<16x1xf32>
    %716 = arith.addf %712, %715 : vector<16x1xf32>
    %717 = math.rsqrt %716 : vector<16x1xf32>
    %718 = vector.broadcast %717 : vector<16x1xf32> to vector<16x32xf32>
    %719 = arith.mulf %714, %718 : vector<16x32xf32>
    %720 = vector.broadcast %699 : vector<1x32xf32> to vector<16x32xf32>
    %721 = arith.mulf %719, %720 : vector<16x32xf32>
    %722 = vector.broadcast %701 : vector<1x32xf32> to vector<16x32xf32>
    %723 = arith.addf %721, %722 : vector<16x32xf32>
    %c3_231 = arith.constant 3 : index
    %c0_232 = arith.constant 0 : index
    %c0_233 = arith.constant 0 : index
    %724 = vector.load %arg16[%c3_231, %c0_232, %c0_233] : memref<4x32x128xf32, #tpu.memory_space<vmem>>, vector<1x32x128xf32>
    %725 = vector.shape_cast %724 : vector<1x32x128xf32> to vector<32x128xf32>
    %cst_234 = arith.constant dense<0.000000e+00> : vector<16x128xf32>
    %726 = tpu.matmul %723, %725, %cst_234 {dimension_numbers = #tpu.dot_dimension_numbers<[1], [0], [0], [1], [0, 0, 1, 1], [], []>} : vector<16x32xf32>, vector<32x128xf32>, vector<16x128xf32> -> vector<16x128xf32>
    %c3_235 = arith.constant 3 : index
    %c0_236 = arith.constant 0 : index
    %c0_237 = arith.constant 0 : index
    %727 = vector.load %arg17[%c3_235, %c0_236, %c0_237] : memref<4x1x128xf32, #tpu.memory_space<vmem>>, vector<1x1x128xf32>
    %728 = vector.shape_cast %727 : vector<1x1x128xf32> to vector<1x128xf32>
    %729 = vector.broadcast %728 : vector<1x128xf32> to vector<16x128xf32>
    %730 = arith.addf %726, %729 : vector<16x128xf32>
    %731 = arith.mulf %730, %730 : vector<16x128xf32>
    %732 = arith.mulf %730, %731 : vector<16x128xf32>
    %cst_238 = arith.constant 4.471500e-02 : f32
    %733 = vector.broadcast %cst_238 : f32 to vector<16x128xf32>
    %734 = arith.mulf %733, %732 : vector<16x128xf32>
    %735 = arith.addf %730, %734 : vector<16x128xf32>
    %cst_239 = arith.constant 0.797884583 : f32
    %736 = vector.broadcast %cst_239 : f32 to vector<16x128xf32>
    %737 = arith.mulf %736, %735 : vector<16x128xf32>
    %738 = math.tanh %737 : vector<16x128xf32>
    %cst_240 = arith.constant 1.000000e+00 : f32
    %739 = vector.broadcast %cst_240 : f32 to vector<16x128xf32>
    %740 = arith.addf %739, %738 : vector<16x128xf32>
    %cst_241 = arith.constant 5.000000e-01 : f32
    %741 = vector.broadcast %cst_241 : f32 to vector<16x128xf32>
    %742 = arith.mulf %741, %740 : vector<16x128xf32>
    %743 = arith.mulf %730, %742 : vector<16x128xf32>
    %c3_242 = arith.constant 3 : index
    %c0_243 = arith.constant 0 : index
    %c0_244 = arith.constant 0 : index
    %744 = vector.load %arg18[%c3_242, %c0_243, %c0_244] : memref<4x128x32xf32, #tpu.memory_space<vmem>>, vector<1x128x32xf32>
    %745 = vector.shape_cast %744 : vector<1x128x32xf32> to vector<128x32xf32>
    %cst_245 = arith.constant dense<0.000000e+00> : vector<16x32xf32>
    %746 = tpu.matmul %743, %745, %cst_245 {dimension_numbers = #tpu.dot_dimension_numbers<[1], [0], [0], [1], [0, 0, 1, 1], [], []>} : vector<16x128xf32>, vector<128x32xf32>, vector<16x32xf32> -> vector<16x32xf32>
    %747 = arith.addf %697, %746 : vector<16x32xf32>
    %c3_246 = arith.constant 3 : index
    %c0_247 = arith.constant 0 : index
    %c0_248 = arith.constant 0 : index
    %748 = vector.load %arg19[%c3_246, %c0_247, %c0_248] : memref<4x1x32xf32, #tpu.memory_space<vmem>>, vector<1x1x32xf32>
    %749 = vector.shape_cast %748 : vector<1x1x32xf32> to vector<1x32xf32>
    %750 = vector.broadcast %749 : vector<1x32xf32> to vector<16x32xf32>
    %751 = arith.addf %747, %750 : vector<16x32xf32>
    %c0_249 = arith.constant 0 : index
    %c0_250 = arith.constant 0 : index
    %752 = vector.load %arg20[%c0_249, %c0_250] : memref<32x128xf32, #tpu.memory_space<vmem>>, vector<32x128xf32>
    %cst_251 = arith.constant dense<0.000000e+00> : vector<16x128xf32>
    %753 = tpu.matmul %751, %752, %cst_251 {dimension_numbers = #tpu.dot_dimension_numbers<[1], [0], [0], [1], [0, 0, 1, 1], [], []>} : vector<16x32xf32>, vector<32x128xf32>, vector<16x128xf32> -> vector<16x128xf32>
    %c0_252 = arith.constant 0 : index
    %c0_253 = arith.constant 0 : index
    %754 = vector.load %arg21[%c0_252, %c0_253] : memref<1x128xf32, #tpu.memory_space<vmem>>, vector<1x128xf32>
    %755 = vector.broadcast %754 : vector<1x128xf32> to vector<16x128xf32>
    %756 = arith.addf %753, %755 : vector<16x128xf32>
    %757 = arith.mulf %756, %756 : vector<16x128xf32>
    %758 = arith.mulf %756, %757 : vector<16x128xf32>
    %cst_254 = arith.constant 4.471500e-02 : f32
    %759 = vector.broadcast %cst_254 : f32 to vector<16x128xf32>
    %760 = arith.mulf %759, %758 : vector<16x128xf32>
    %761 = arith.addf %756, %760 : vector<16x128xf32>
    %cst_255 = arith.constant 0.797884583 : f32
    %762 = vector.broadcast %cst_255 : f32 to vector<16x128xf32>
    %763 = arith.mulf %762, %761 : vector<16x128xf32>
    %764 = math.tanh %763 : vector<16x128xf32>
    %cst_256 = arith.constant 1.000000e+00 : f32
    %765 = vector.broadcast %cst_256 : f32 to vector<16x128xf32>
    %766 = arith.addf %765, %764 : vector<16x128xf32>
    %cst_257 = arith.constant 5.000000e-01 : f32
    %767 = vector.broadcast %cst_257 : f32 to vector<16x128xf32>
    %768 = arith.mulf %767, %766 : vector<16x128xf32>
    %769 = arith.mulf %756, %768 : vector<16x128xf32>
    %c0_258 = arith.constant 0 : index
    %c0_259 = arith.constant 0 : index
    %770 = vector.load %arg22[%c0_258, %c0_259] : memref<128x32xf32, #tpu.memory_space<vmem>>, vector<128x32xf32>
    %cst_260 = arith.constant dense<0.000000e+00> : vector<16x32xf32>
    %771 = tpu.matmul %769, %770, %cst_260 {dimension_numbers = #tpu.dot_dimension_numbers<[1], [0], [0], [1], [0, 0, 1, 1], [], []>} : vector<16x128xf32>, vector<128x32xf32>, vector<16x32xf32> -> vector<16x32xf32>
    %c0_261 = arith.constant 0 : index
    %c0_262 = arith.constant 0 : index
    %772 = vector.load %arg23[%c0_261, %c0_262] : memref<1x32xf32, #tpu.memory_space<vmem>>, vector<1x32xf32>
    %773 = vector.broadcast %772 : vector<1x32xf32> to vector<16x32xf32>
    %774 = arith.addf %771, %773 : vector<16x32xf32>
    %775 = arith.mulf %774, %774 : vector<16x32xf32>
    %776 = arith.mulf %774, %775 : vector<16x32xf32>
    %cst_263 = arith.constant 4.471500e-02 : f32
    %777 = vector.broadcast %cst_263 : f32 to vector<16x32xf32>
    %778 = arith.mulf %777, %776 : vector<16x32xf32>
    %779 = arith.addf %774, %778 : vector<16x32xf32>
    %cst_264 = arith.constant 0.797884583 : f32
    %780 = vector.broadcast %cst_264 : f32 to vector<16x32xf32>
    %781 = arith.mulf %780, %779 : vector<16x32xf32>
    %782 = math.tanh %781 : vector<16x32xf32>
    %cst_265 = arith.constant 1.000000e+00 : f32
    %783 = vector.broadcast %cst_265 : f32 to vector<16x32xf32>
    %784 = arith.addf %783, %782 : vector<16x32xf32>
    %cst_266 = arith.constant 5.000000e-01 : f32
    %785 = vector.broadcast %cst_266 : f32 to vector<16x32xf32>
    %786 = arith.mulf %785, %784 : vector<16x32xf32>
    %787 = arith.mulf %774, %786 : vector<16x32xf32>
    %c0_267 = arith.constant 0 : index
    %c0_268 = arith.constant 0 : index
    %788 = vector.load %arg24[%c0_267, %c0_268] : memref<32x32xf32, #tpu.memory_space<vmem>>, vector<32x32xf32>
    %cst_269 = arith.constant dense<0.000000e+00> : vector<16x32xf32>
    %789 = tpu.matmul %787, %788, %cst_269 {dimension_numbers = #tpu.dot_dimension_numbers<[1], [0], [0], [1], [0, 0, 1, 1], [], []>} : vector<16x32xf32>, vector<32x32xf32>, vector<16x32xf32> -> vector<16x32xf32>
    %c0_270 = arith.constant 0 : index
    %c0_271 = arith.constant 0 : index
    %790 = vector.load %arg25[%c0_270, %c0_271] : memref<1x32xf32, #tpu.memory_space<vmem>>, vector<1x32xf32>
    %791 = vector.broadcast %790 : vector<1x32xf32> to vector<16x32xf32>
    %792 = arith.addf %789, %791 : vector<16x32xf32>
    %c0_272 = arith.constant 0 : index
    %c0_273 = arith.constant 0 : index
    %793 = vector.load %arg37[%c0_272, %c0_273] : memref<16x32xf32, #tpu.memory_space<vmem>>, vector<16x32xf32>
    tpu.vector_store %arg37[%c0_272, %c0_273], %792 {strides = array<i32>} : memref<16x32xf32, #tpu.memory_space<vmem>>, vector<16x32xf32>,
    %c0_274 = arith.constant 0 : index
    %c0_275 = arith.constant 0 : index
    %794 = vector.load %arg2[%c0_274, %c0_275] : memref<16x96xf32, #tpu.memory_space<vmem>>, vector<16x96xf32>
    %c0_276 = arith.constant 0 : index
    %c0_277 = arith.constant 0 : index
    %795 = vector.load %arg26[%c0_276, %c0_277] : memref<96x32xf32, #tpu.memory_space<vmem>>, vector<96x32xf32>
    %cst_278 = arith.constant dense<0.000000e+00> : vector<16x32xf32>
    %796 = tpu.matmul %794, %795, %cst_278 {dimension_numbers = #tpu.dot_dimension_numbers<[1], [0], [0], [1], [0, 0, 1, 1], [], []>} : vector<16x96xf32>, vector<96x32xf32>, vector<16x32xf32> -> vector<16x32xf32>
    %c0_279 = arith.constant 0 : index
    %c0_280 = arith.constant 0 : index
    %797 = vector.load %arg27[%c0_279, %c0_280] : memref<1x32xf32, #tpu.memory_space<vmem>>, vector<1x32xf32>
    %798 = vector.broadcast %797 : vector<1x32xf32> to vector<16x32xf32>
    %799 = arith.addf %796, %798 : vector<16x32xf32>
    %c0_281 = arith.constant 0 : index
    %c0_282 = arith.constant 0 : index
    %800 = vector.load %arg28[%c0_281, %c0_282] : memref<32x32xf32, #tpu.memory_space<vmem>>, vector<32x32xf32>
    %cst_283 = arith.constant dense<0.000000e+00> : vector<16x32xf32>
    %801 = tpu.matmul %799, %800, %cst_283 {dimension_numbers = #tpu.dot_dimension_numbers<[1], [0], [0], [1], [0, 0, 1, 1], [], []>} : vector<16x32xf32>, vector<32x32xf32>, vector<16x32xf32> -> vector<16x32xf32>
    %c0_284 = arith.constant 0 : index
    %c0_285 = arith.constant 0 : index
    %802 = vector.load %arg29[%c0_284, %c0_285] : memref<1x32xf32, #tpu.memory_space<vmem>>, vector<1x32xf32>
    %803 = vector.broadcast %802 : vector<1x32xf32> to vector<16x32xf32>
    %804 = arith.addf %801, %803 : vector<16x32xf32>
    %c0_286 = arith.constant 0 : index
    %c0_287 = arith.constant 0 : index
    %805 = vector.load %arg30[%c0_286, %c0_287] : memref<32x64xf32, #tpu.memory_space<vmem>>, vector<32x64xf32>
    %cst_288 = arith.constant dense<0.000000e+00> : vector<16x64xf32>
    %806 = tpu.matmul %751, %805, %cst_288 {dimension_numbers = #tpu.dot_dimension_numbers<[1], [0], [0], [1], [0, 0, 1, 1], [], []>} : vector<16x32xf32>, vector<32x64xf32>, vector<16x64xf32> -> vector<16x64xf32>
    %c0_289 = arith.constant 0 : index
    %c0_290 = arith.constant 0 : index
    %807 = vector.load %arg31[%c0_289, %c0_290] : memref<1x64xf32, #tpu.memory_space<vmem>>, vector<1x64xf32>
    %808 = vector.broadcast %807 : vector<1x64xf32> to vector<16x64xf32>
    %809 = arith.addf %806, %808 : vector<16x64xf32>
    %810 = vector.extract_strided_slice %809 {offsets = [0, 0], sizes = [16, 32], strides = [1, 1]} : vector<16x64xf32> to vector<16x32xf32>
    %811 = vector.extract_strided_slice %809 {offsets = [0, 32], sizes = [16, 32], strides = [1, 1]} : vector<16x64xf32> to vector<16x32xf32>
    %812 = vector.extract_strided_slice %804 {offsets = [0, 0], sizes = [16, 4], strides = [1, 1]} : vector<16x32xf32> to vector<16x4xf32>
    %813 = vector.extract_strided_slice %804 {offsets = [0, 4], sizes = [16, 4], strides = [1, 1]} : vector<16x32xf32> to vector<16x4xf32>
    %814 = vector.extract_strided_slice %804 {offsets = [0, 8], sizes = [16, 4], strides = [1, 1]} : vector<16x32xf32> to vector<16x4xf32>
    %815 = vector.extract_strided_slice %804 {offsets = [0, 12], sizes = [16, 4], strides = [1, 1]} : vector<16x32xf32> to vector<16x4xf32>
    %816 = vector.extract_strided_slice %804 {offsets = [0, 16], sizes = [16, 4], strides = [1, 1]} : vector<16x32xf32> to vector<16x4xf32>
    %817 = vector.extract_strided_slice %804 {offsets = [0, 20], sizes = [16, 4], strides = [1, 1]} : vector<16x32xf32> to vector<16x4xf32>
    %818 = vector.extract_strided_slice %804 {offsets = [0, 24], sizes = [16, 4], strides = [1, 1]} : vector<16x32xf32> to vector<16x4xf32>
    %819 = vector.extract_strided_slice %804 {offsets = [0, 28], sizes = [16, 4], strides = [1, 1]} : vector<16x32xf32> to vector<16x4xf32>
    %820 = vector.shape_cast %812 : vector<16x4xf32> to vector<1x16x4xf32>
    %821 = vector.shape_cast %813 : vector<16x4xf32> to vector<1x16x4xf32>
    %822 = vector.shape_cast %814 : vector<16x4xf32> to vector<1x16x4xf32>
    %823 = vector.shape_cast %815 : vector<16x4xf32> to vector<1x16x4xf32>
    %824 = vector.shape_cast %816 : vector<16x4xf32> to vector<1x16x4xf32>
    %825 = vector.shape_cast %817 : vector<16x4xf32> to vector<1x16x4xf32>
    %826 = vector.shape_cast %818 : vector<16x4xf32> to vector<1x16x4xf32>
    %827 = vector.shape_cast %819 : vector<16x4xf32> to vector<1x16x4xf32>
    %828 = tpu.concatenate %820, %821, %822, %823, %824, %825, %826, %827 in 0 : vector<1x16x4xf32>, vector<1x16x4xf32>, vector<1x16x4xf32>, vector<1x16x4xf32>, vector<1x16x4xf32>, vector<1x16x4xf32>, vector<1x16x4xf32>, vector<1x16x4xf32> -> vector<8x16x4xf32>
    %cst_291 = arith.constant 5.000000e-01 : f32
    %829 = vector.broadcast %cst_291 : f32 to vector<8x16x4xf32>
    %830 = arith.mulf %828, %829 : vector<8x16x4xf32>
    %831 = vector.extract_strided_slice %810 {offsets = [0, 0], sizes = [16, 4], strides = [1, 1]} : vector<16x32xf32> to vector<16x4xf32>
    %832 = vector.extract_strided_slice %810 {offsets = [0, 4], sizes = [16, 4], strides = [1, 1]} : vector<16x32xf32> to vector<16x4xf32>
    %833 = vector.extract_strided_slice %810 {offsets = [0, 8], sizes = [16, 4], strides = [1, 1]} : vector<16x32xf32> to vector<16x4xf32>
    %834 = vector.extract_strided_slice %810 {offsets = [0, 12], sizes = [16, 4], strides = [1, 1]} : vector<16x32xf32> to vector<16x4xf32>
    %835 = vector.extract_strided_slice %810 {offsets = [0, 16], sizes = [16, 4], strides = [1, 1]} : vector<16x32xf32> to vector<16x4xf32>
    %836 = vector.extract_strided_slice %810 {offsets = [0, 20], sizes = [16, 4], strides = [1, 1]} : vector<16x32xf32> to vector<16x4xf32>
    %837 = vector.extract_strided_slice %810 {offsets = [0, 24], sizes = [16, 4], strides = [1, 1]} : vector<16x32xf32> to vector<16x4xf32>
    %838 = vector.extract_strided_slice %810 {offsets = [0, 28], sizes = [16, 4], strides = [1, 1]} : vector<16x32xf32> to vector<16x4xf32>
    %839 = vector.shape_cast %831 : vector<16x4xf32> to vector<1x16x4xf32>
    %840 = vector.shape_cast %832 : vector<16x4xf32> to vector<1x16x4xf32>
    %841 = vector.shape_cast %833 : vector<16x4xf32> to vector<1x16x4xf32>
    %842 = vector.shape_cast %834 : vector<16x4xf32> to vector<1x16x4xf32>
    %843 = vector.shape_cast %835 : vector<16x4xf32> to vector<1x16x4xf32>
    %844 = vector.shape_cast %836 : vector<16x4xf32> to vector<1x16x4xf32>
    %845 = vector.shape_cast %837 : vector<16x4xf32> to vector<1x16x4xf32>
    %846 = vector.shape_cast %838 : vector<16x4xf32> to vector<1x16x4xf32>
    %847 = tpu.concatenate %839, %840, %841, %842, %843, %844, %845, %846 in 0 : vector<1x16x4xf32>, vector<1x16x4xf32>, vector<1x16x4xf32>, vector<1x16x4xf32>, vector<1x16x4xf32>, vector<1x16x4xf32>, vector<1x16x4xf32>, vector<1x16x4xf32> -> vector<8x16x4xf32>
    %848 = vector.extract_strided_slice %811 {offsets = [0, 0], sizes = [16, 4], strides = [1, 1]} : vector<16x32xf32> to vector<16x4xf32>
    %849 = vector.extract_strided_slice %811 {offsets = [0, 4], sizes = [16, 4], strides = [1, 1]} : vector<16x32xf32> to vector<16x4xf32>
    %850 = vector.extract_strided_slice %811 {offsets = [0, 8], sizes = [16, 4], strides = [1, 1]} : vector<16x32xf32> to vector<16x4xf32>
    %851 = vector.extract_strided_slice %811 {offsets = [0, 12], sizes = [16, 4], strides = [1, 1]} : vector<16x32xf32> to vector<16x4xf32>
    %852 = vector.extract_strided_slice %811 {offsets = [0, 16], sizes = [16, 4], strides = [1, 1]} : vector<16x32xf32> to vector<16x4xf32>
    %853 = vector.extract_strided_slice %811 {offsets = [0, 20], sizes = [16, 4], strides = [1, 1]} : vector<16x32xf32> to vector<16x4xf32>
    %854 = vector.extract_strided_slice %811 {offsets = [0, 24], sizes = [16, 4], strides = [1, 1]} : vector<16x32xf32> to vector<16x4xf32>
    %855 = vector.extract_strided_slice %811 {offsets = [0, 28], sizes = [16, 4], strides = [1, 1]} : vector<16x32xf32> to vector<16x4xf32>
    %856 = vector.shape_cast %848 : vector<16x4xf32> to vector<1x16x4xf32>
    %857 = vector.shape_cast %849 : vector<16x4xf32> to vector<1x16x4xf32>
    %858 = vector.shape_cast %850 : vector<16x4xf32> to vector<1x16x4xf32>
    %859 = vector.shape_cast %851 : vector<16x4xf32> to vector<1x16x4xf32>
    %860 = vector.shape_cast %852 : vector<16x4xf32> to vector<1x16x4xf32>
    %861 = vector.shape_cast %853 : vector<16x4xf32> to vector<1x16x4xf32>
    %862 = vector.shape_cast %854 : vector<16x4xf32> to vector<1x16x4xf32>
    %863 = vector.shape_cast %855 : vector<16x4xf32> to vector<1x16x4xf32>
    %864 = tpu.concatenate %856, %857, %858, %859, %860, %861, %862, %863 in 0 : vector<1x16x4xf32>, vector<1x16x4xf32>, vector<1x16x4xf32>, vector<1x16x4xf32>, vector<1x16x4xf32>, vector<1x16x4xf32>, vector<1x16x4xf32>, vector<1x16x4xf32> -> vector<8x16x4xf32>
    "tpu.trace_start"() <{level = 10 : i32, message = "hqd,hkd->hqk"}> : () -> ()
    %cst_292 = arith.constant dense<0.000000e+00> : vector<8x16x16xf32>
    %865 = tpu.matmul %830, %847, %cst_292 {dimension_numbers = #tpu.dot_dimension_numbers<[2], [2], [1], [1], [0, 0, 0, 1, 1, 1], [0], [0]>} : vector<8x16x4xf32>, vector<8x16x4xf32>, vector<8x16x16xf32> -> vector<8x16x16xf32>
    "tpu.trace_stop"() : () -> ()
    %cst_293 = arith.constant dense<0xFF800000> : vector<8x16xf32>
    %866 = vector.multi_reduction <maximumf>, %865, %cst_293 [2] : vector<8x16x16xf32> to vector<8x16xf32>
    %867 = vector.shape_cast %866 : vector<8x16xf32> to vector<8x16x1xf32>
    %868 = vector.broadcast %867 : vector<8x16x1xf32> to vector<8x16x16xf32>
    %869 = arith.subf %865, %868 : vector<8x16x16xf32>
    %870 = math.exp %869 : vector<8x16x16xf32>
    %cst_294 = arith.constant dense<0.000000e+00> : vector<8x16xf32>
    %871 = vector.multi_reduction <add>, %870, %cst_294 [2] : vector<8x16x16xf32> to vector<8x16xf32>
    %872 = vector.shape_cast %871 : vector<8x16xf32> to vector<8x16x1xf32>
    %873 = tpu.reciprocal %872 {approx = true} : vector<8x16x1xf32> -> vector<8x16x1xf32>
    %874 = vector.broadcast %873 : vector<8x16x1xf32> to vector<8x16x16xf32>
    %875 = arith.mulf %870, %874 : vector<8x16x16xf32>
    "tpu.trace_start"() <{level = 10 : i32, message = "hqk,hkd->hqd"}> : () -> ()
    %cst_295 = arith.constant dense<0.000000e+00> : vector<8x16x4xf32>
    %876 = tpu.matmul %875, %864, %cst_295 {dimension_numbers = #tpu.dot_dimension_numbers<[2], [1], [1], [2], [0, 0, 0, 1, 1, 2], [0], [0]>} : vector<8x16x16xf32>, vector<8x16x4xf32>, vector<8x16x4xf32> -> vector<8x16x4xf32>
    "tpu.trace_stop"() : () -> ()
    %877 = vector.extract_strided_slice %876 {offsets = [0, 0, 0], sizes = [1, 16, 4], strides = [1, 1, 1]} : vector<8x16x4xf32> to vector<1x16x4xf32>
    %878 = vector.shape_cast %877 : vector<1x16x4xf32> to vector<16x4xf32>
    %879 = vector.extract_strided_slice %876 {offsets = [1, 0, 0], sizes = [1, 16, 4], strides = [1, 1, 1]} : vector<8x16x4xf32> to vector<1x16x4xf32>
    %880 = vector.shape_cast %879 : vector<1x16x4xf32> to vector<16x4xf32>
    %881 = vector.extract_strided_slice %876 {offsets = [2, 0, 0], sizes = [1, 16, 4], strides = [1, 1, 1]} : vector<8x16x4xf32> to vector<1x16x4xf32>
    %882 = vector.shape_cast %881 : vector<1x16x4xf32> to vector<16x4xf32>
    %883 = vector.extract_strided_slice %876 {offsets = [3, 0, 0], sizes = [1, 16, 4], strides = [1, 1, 1]} : vector<8x16x4xf32> to vector<1x16x4xf32>
    %884 = vector.shape_cast %883 : vector<1x16x4xf32> to vector<16x4xf32>
    %885 = vector.extract_strided_slice %876 {offsets = [4, 0, 0], sizes = [1, 16, 4], strides = [1, 1, 1]} : vector<8x16x4xf32> to vector<1x16x4xf32>
    %886 = vector.shape_cast %885 : vector<1x16x4xf32> to vector<16x4xf32>
    %887 = vector.extract_strided_slice %876 {offsets = [5, 0, 0], sizes = [1, 16, 4], strides = [1, 1, 1]} : vector<8x16x4xf32> to vector<1x16x4xf32>
    %888 = vector.shape_cast %887 : vector<1x16x4xf32> to vector<16x4xf32>
    %889 = vector.extract_strided_slice %876 {offsets = [6, 0, 0], sizes = [1, 16, 4], strides = [1, 1, 1]} : vector<8x16x4xf32> to vector<1x16x4xf32>
    %890 = vector.shape_cast %889 : vector<1x16x4xf32> to vector<16x4xf32>
    %891 = vector.extract_strided_slice %876 {offsets = [7, 0, 0], sizes = [1, 16, 4], strides = [1, 1, 1]} : vector<8x16x4xf32> to vector<1x16x4xf32>
    %892 = vector.shape_cast %891 : vector<1x16x4xf32> to vector<16x4xf32>
    %893 = tpu.concatenate %878, %880, %882, %884, %886, %888, %890, %892 in 1 : vector<16x4xf32>, vector<16x4xf32>, vector<16x4xf32>, vector<16x4xf32>, vector<16x4xf32>, vector<16x4xf32>, vector<16x4xf32>, vector<16x4xf32> -> vector<16x32xf32>
    %c0_296 = arith.constant 0 : index
    %c0_297 = arith.constant 0 : index
    %894 = vector.load %arg32[%c0_296, %c0_297] : memref<32x32xf32, #tpu.memory_space<vmem>>, vector<32x32xf32>
    %cst_298 = arith.constant dense<0.000000e+00> : vector<16x32xf32>
    %895 = tpu.matmul %893, %894, %cst_298 {dimension_numbers = #tpu.dot_dimension_numbers<[1], [0], [0], [1], [0, 0, 1, 1], [], []>} : vector<16x32xf32>, vector<32x32xf32>, vector<16x32xf32> -> vector<16x32xf32>
    %c0_299 = arith.constant 0 : index
    %c0_300 = arith.constant 0 : index
    %896 = vector.load %arg33[%c0_299, %c0_300] : memref<1x32xf32, #tpu.memory_space<vmem>>, vector<1x32xf32>
    %897 = vector.broadcast %896 : vector<1x32xf32> to vector<16x32xf32>
    %898 = arith.addf %895, %897 : vector<16x32xf32>
    %899 = arith.addf %799, %898 : vector<16x32xf32>
    %c0_301 = arith.constant 0 : index
    %c0_302 = arith.constant 0 : index
    %900 = vector.load %arg34[%c0_301, %c0_302] : memref<1x32xf32, #tpu.memory_space<vmem>>, vector<1x32xf32>
    %c0_303 = arith.constant 0 : index
    %c0_304 = arith.constant 0 : index
    %901 = vector.load %arg35[%c0_303, %c0_304] : memref<1x32xf32, #tpu.memory_space<vmem>>, vector<1x32xf32>
    %cst_305 = arith.constant dense<0.000000e+00> : vector<16xf32>
    %902 = vector.multi_reduction <add>, %899, %cst_305 [1] : vector<16x32xf32> to vector<16xf32>
    %903 = vector.shape_cast %902 : vector<16xf32> to vector<16x1xf32>
    %cst_306 = arith.constant 3.200000e+01 : f32
    %904 = vector.broadcast %cst_306 : f32 to vector<16x1xf32>
    %905 = arith.divf %903, %904 : vector<16x1xf32>
    %906 = vector.broadcast %905 : vector<16x1xf32> to vector<16x32xf32>
    %907 = arith.subf %899, %906 : vector<16x32xf32>
    %908 = arith.mulf %907, %907 : vector<16x32xf32>
    %cst_307 = arith.constant dense<0.000000e+00> : vector<16xf32>
    %909 = vector.multi_reduction <add>, %908, %cst_307 [1] : vector<16x32xf32> to vector<16xf32>
    %910 = vector.shape_cast %909 : vector<16xf32> to vector<16x1xf32>
    %cst_308 = arith.constant 3.200000e+01 : f32
    %911 = vector.broadcast %cst_308 : f32 to vector<16x1xf32>
    %912 = arith.divf %910, %911 : vector<16x1xf32>
    %913 = vector.broadcast %905 : vector<16x1xf32> to vector<16x32xf32>
    %914 = arith.subf %899, %913 : vector<16x32xf32>
    %cst_309 = arith.constant 9.99999974E-6 : f32
    %915 = vector.broadcast %cst_309 : f32 to vector<16x1xf32>
    %916 = arith.addf %912, %915 : vector<16x1xf32>
    %917 = math.rsqrt %916 : vector<16x1xf32>
    %918 = vector.broadcast %917 : vector<16x1xf32> to vector<16x32xf32>
    %919 = arith.mulf %914, %918 : vector<16x32xf32>
    %920 = vector.broadcast %900 : vector<1x32xf32> to vector<16x32xf32>
    %921 = arith.mulf %919, %920 : vector<16x32xf32>
    %922 = vector.broadcast %901 : vector<1x32xf32> to vector<16x32xf32>
    %923 = arith.addf %921, %922 : vector<16x32xf32>
    %c0_310 = arith.constant 0 : index
    %c0_311 = arith.constant 0 : index
    %924 = vector.load %arg36[%c0_310, %c0_311] : memref<16x32xf32, #tpu.memory_space<vmem>>, vector<16x32xf32>
    tpu.vector_store %arg36[%c0_310, %c0_311], %923 {strides = array<i32>} : memref<16x32xf32, #tpu.memory_space<vmem>>, vector<16x32xf32>,
    return
  }
  func.func @transform_0(%arg0: i32) -> (i32, i32) {
    %c0_i32 = arith.constant 0 : i32
    %c0_i32_0 = arith.constant 0 : i32
    return %arg0, %c0_i32 : i32, i32
  }
  func.func @transform_1(%arg0: i32) -> (i32, i32) {
    %c0_i32 = arith.constant 0 : i32
    %c0_i32_0 = arith.constant 0 : i32
    return %arg0, %c0_i32 : i32, i32
  }
  func.func @transform_2(%arg0: i32) -> (i32, i32) {
    %c0_i32 = arith.constant 0 : i32
    %c0_i32_0 = arith.constant 0 : i32
    %c0_i32_1 = arith.constant 0 : i32
    return %c0_i32, %c0_i32_0 : i32, i32
  }
  func.func @transform_3(%arg0: i32) -> (i32, i32) {
    %c0_i32 = arith.constant 0 : i32
    %c0_i32_0 = arith.constant 0 : i32
    %c0_i32_1 = arith.constant 0 : i32
    return %c0_i32, %c0_i32_0 : i32, i32
  }
  func.func @transform_4(%arg0: i32) -> (i32, i32) {
    %c0_i32 = arith.constant 0 : i32
    %c0_i32_0 = arith.constant 0 : i32
    %c0_i32_1 = arith.constant 0 : i32
    return %c0_i32, %c0_i32_0 : i32, i32
  }
  func.func @transform_5(%arg0: i32) -> (i32, i32) {
    %c0_i32 = arith.constant 0 : i32
    %c0_i32_0 = arith.constant 0 : i32
    %c0_i32_1 = arith.constant 0 : i32
    return %c0_i32, %c0_i32_0 : i32, i32
  }
  func.func @transform_6(%arg0: i32) -> (i32, i32) {
    %c0_i32 = arith.constant 0 : i32
    %c0_i32_0 = arith.constant 0 : i32
    %c0_i32_1 = arith.constant 0 : i32
    return %c0_i32, %c0_i32_0 : i32, i32
  }
  func.func @transform_7(%arg0: i32) -> (i32, i32, i32) {
    %c0_i32 = arith.constant 0 : i32
    %c0_i32_0 = arith.constant 0 : i32
    %c0_i32_1 = arith.constant 0 : i32
    %c0_i32_2 = arith.constant 0 : i32
    return %c0_i32, %c0_i32_0, %c0_i32_1 : i32, i32, i32
  }
  func.func @transform_8(%arg0: i32) -> (i32, i32, i32) {
    %c0_i32 = arith.constant 0 : i32
    %c0_i32_0 = arith.constant 0 : i32
    %c0_i32_1 = arith.constant 0 : i32
    %c0_i32_2 = arith.constant 0 : i32
    return %c0_i32, %c0_i32_0, %c0_i32_1 : i32, i32, i32
  }
  func.func @transform_9(%arg0: i32) -> (i32, i32, i32) {
    %c0_i32 = arith.constant 0 : i32
    %c0_i32_0 = arith.constant 0 : i32
    %c0_i32_1 = arith.constant 0 : i32
    %c0_i32_2 = arith.constant 0 : i32
    return %c0_i32, %c0_i32_0, %c0_i32_1 : i32, i32, i32
  }
  func.func @transform_10(%arg0: i32) -> (i32, i32, i32) {
    %c0_i32 = arith.constant 0 : i32
    %c0_i32_0 = arith.constant 0 : i32
    %c0_i32_1 = arith.constant 0 : i32
    %c0_i32_2 = arith.constant 0 : i32
    return %c0_i32, %c0_i32_0, %c0_i32_1 : i32, i32, i32
  }
  func.func @transform_11(%arg0: i32) -> (i32, i32, i32) {
    %c0_i32 = arith.constant 0 : i32
    %c0_i32_0 = arith.constant 0 : i32
    %c0_i32_1 = arith.constant 0 : i32
    %c0_i32_2 = arith.constant 0 : i32
    return %c0_i32, %c0_i32_0, %c0_i32_1 : i32, i32, i32
  }
  func.func @transform_12(%arg0: i32) -> (i32, i32, i32) {
    %c0_i32 = arith.constant 0 : i32
    %c0_i32_0 = arith.constant 0 : i32
    %c0_i32_1 = arith.constant 0 : i32
    %c0_i32_2 = arith.constant 0 : i32
    return %c0_i32, %c0_i32_0, %c0_i32_1 : i32, i32, i32
  }
  func.func @transform_13(%arg0: i32) -> (i32, i32, i32) {
    %c0_i32 = arith.constant 0 : i32
    %c0_i32_0 = arith.constant 0 : i32
    %c0_i32_1 = arith.constant 0 : i32
    %c0_i32_2 = arith.constant 0 : i32
    return %c0_i32, %c0_i32_0, %c0_i32_1 : i32, i32, i32
  }
  func.func @transform_14(%arg0: i32) -> (i32, i32, i32) {
    %c0_i32 = arith.constant 0 : i32
    %c0_i32_0 = arith.constant 0 : i32
    %c0_i32_1 = arith.constant 0 : i32
    %c0_i32_2 = arith.constant 0 : i32
    return %c0_i32, %c0_i32_0, %c0_i32_1 : i32, i32, i32
  }
  func.func @transform_15(%arg0: i32) -> (i32, i32, i32) {
    %c0_i32 = arith.constant 0 : i32
    %c0_i32_0 = arith.constant 0 : i32
    %c0_i32_1 = arith.constant 0 : i32
    %c0_i32_2 = arith.constant 0 : i32
    return %c0_i32, %c0_i32_0, %c0_i32_1 : i32, i32, i32
  }
  func.func @transform_16(%arg0: i32) -> (i32, i32, i32) {
    %c0_i32 = arith.constant 0 : i32
    %c0_i32_0 = arith.constant 0 : i32
    %c0_i32_1 = arith.constant 0 : i32
    %c0_i32_2 = arith.constant 0 : i32
    return %c0_i32, %c0_i32_0, %c0_i32_1 : i32, i32, i32
  }
  func.func @transform_17(%arg0: i32) -> (i32, i32, i32) {
    %c0_i32 = arith.constant 0 : i32
    %c0_i32_0 = arith.constant 0 : i32
    %c0_i32_1 = arith.constant 0 : i32
    %c0_i32_2 = arith.constant 0 : i32
    return %c0_i32, %c0_i32_0, %c0_i32_1 : i32, i32, i32
  }
  func.func @transform_18(%arg0: i32) -> (i32, i32, i32) {
    %c0_i32 = arith.constant 0 : i32
    %c0_i32_0 = arith.constant 0 : i32
    %c0_i32_1 = arith.constant 0 : i32
    %c0_i32_2 = arith.constant 0 : i32
    return %c0_i32, %c0_i32_0, %c0_i32_1 : i32, i32, i32
  }
  func.func @transform_19(%arg0: i32) -> (i32, i32) {
    %c0_i32 = arith.constant 0 : i32
    %c0_i32_0 = arith.constant 0 : i32
    %c0_i32_1 = arith.constant 0 : i32
    return %c0_i32, %c0_i32_0 : i32, i32
  }
  func.func @transform_20(%arg0: i32) -> (i32, i32) {
    %c0_i32 = arith.constant 0 : i32
    %c0_i32_0 = arith.constant 0 : i32
    %c0_i32_1 = arith.constant 0 : i32
    return %c0_i32, %c0_i32_0 : i32, i32
  }
  func.func @transform_21(%arg0: i32) -> (i32, i32) {
    %c0_i32 = arith.constant 0 : i32
    %c0_i32_0 = arith.constant 0 : i32
    %c0_i32_1 = arith.constant 0 : i32
    return %c0_i32, %c0_i32_0 : i32, i32
  }
  func.func @transform_22(%arg0: i32) -> (i32, i32) {
    %c0_i32 = arith.constant 0 : i32
    %c0_i32_0 = arith.constant 0 : i32
    %c0_i32_1 = arith.constant 0 : i32
    return %c0_i32, %c0_i32_0 : i32, i32
  }
  func.func @transform_23(%arg0: i32) -> (i32, i32) {
    %c0_i32 = arith.constant 0 : i32
    %c0_i32_0 = arith.constant 0 : i32
    %c0_i32_1 = arith.constant 0 : i32
    return %c0_i32, %c0_i32_0 : i32, i32
  }
  func.func @transform_24(%arg0: i32) -> (i32, i32) {
    %c0_i32 = arith.constant 0 : i32
    %c0_i32_0 = arith.constant 0 : i32
    %c0_i32_1 = arith.constant 0 : i32
    return %c0_i32, %c0_i32_0 : i32, i32
  }
  func.func @transform_25(%arg0: i32) -> (i32, i32) {
    %c0_i32 = arith.constant 0 : i32
    %c0_i32_0 = arith.constant 0 : i32
    %c0_i32_1 = arith.constant 0 : i32
    return %c0_i32, %c0_i32_0 : i32, i32
  }
  func.func @transform_26(%arg0: i32) -> (i32, i32) {
    %c0_i32 = arith.constant 0 : i32
    %c0_i32_0 = arith.constant 0 : i32
    %c0_i32_1 = arith.constant 0 : i32
    return %c0_i32, %c0_i32_0 : i32, i32
  }
  func.func @transform_27(%arg0: i32) -> (i32, i32) {
    %c0_i32 = arith.constant 0 : i32
    %c0_i32_0 = arith.constant 0 : i32
    %c0_i32_1 = arith.constant 0 : i32
    return %c0_i32, %c0_i32_0 : i32, i32
  }
  func.func @transform_28(%arg0: i32) -> (i32, i32) {
    %c0_i32 = arith.constant 0 : i32
    %c0_i32_0 = arith.constant 0 : i32
    %c0_i32_1 = arith.constant 0 : i32
    return %c0_i32, %c0_i32_0 : i32, i32
  }
  func.func @transform_29(%arg0: i32) -> (i32, i32) {
    %c0_i32 = arith.constant 0 : i32
    %c0_i32_0 = arith.constant 0 : i32
    %c0_i32_1 = arith.constant 0 : i32
    return %c0_i32, %c0_i32_0 : i32, i32
  }
  func.func @transform_30(%arg0: i32) -> (i32, i32) {
    %c0_i32 = arith.constant 0 : i32
    %c0_i32_0 = arith.constant 0 : i32
    %c0_i32_1 = arith.constant 0 : i32
    return %c0_i32, %c0_i32_0 : i32, i32
  }
  func.func @transform_31(%arg0: i32) -> (i32, i32) {
    %c0_i32 = arith.constant 0 : i32
    %c0_i32_0 = arith.constant 0 : i32
    %c0_i32_1 = arith.constant 0 : i32
    return %c0_i32, %c0_i32_0 : i32, i32
  }
  func.func @transform_32(%arg0: i32) -> (i32, i32) {
    %c0_i32 = arith.constant 0 : i32
    %c0_i32_0 = arith.constant 0 : i32
    %c0_i32_1 = arith.constant 0 : i32
    return %c0_i32, %c0_i32_0 : i32, i32
  }
  func.func @transform_33(%arg0: i32) -> (i32, i32) {
    %c0_i32 = arith.constant 0 : i32
    %c0_i32_0 = arith.constant 0 : i32
    %c0_i32_1 = arith.constant 0 : i32
    return %c0_i32, %c0_i32_0 : i32, i32
  }
  func.func @transform_34(%arg0: i32) -> (i32, i32) {
    %c0_i32 = arith.constant 0 : i32
    %c0_i32_0 = arith.constant 0 : i32
    %c0_i32_1 = arith.constant 0 : i32
    return %c0_i32, %c0_i32_0 : i32, i32
  }
  func.func @transform_35(%arg0: i32) -> (i32, i32) {
    %c0_i32 = arith.constant 0 : i32
    %c0_i32_0 = arith.constant 0 : i32
    return %arg0, %c0_i32 : i32, i32
  }
  func.func @transform_36(%arg0: i32) -> (i32, i32) {
    %c0_i32 = arith.constant 0 : i32
    %c0_i32_0 = arith.constant 0 : i32
    return %arg0, %c0_i32 : i32, i32
  }
}

</mosaic_0001>

<bundles_post_ra>
// kernel: s2a_forward.1
= control target key start
LH: loop header
LB: loop body
LE: loop exit
PB: predicated region body
PF: predicated region fallthrough
CT: control target
= control target key end

     0   :  { %s16389_s6 = smov 1   ;;  %s16390_s10 = smov 2   ;;  %s18839_s0 = inlined_call_operand.smem [shape: u32[37], index: -1, kind: input, shape index: {}] }
   0x1   :  { %s16452_s5 = sld [smem:[%s18839_s0]]   ;;  %s16391_s14 = smov 3  }
   0x2   :  { %s16457_s9 = sld [smem:[%s18839_s0 + %s16389_s6]]   ;;  %s16392_s18 = smov 4  }
   0x3   :  { %s16462_s13 = sld [smem:[%s18839_s0 + %s16390_s10]]   ;;  %s16393_s22 = smov 5  }
   0x4   :  { %s16467_s17 = sld [smem:[%s18839_s0 + %s16391_s14]]   ;;  %s16394_s26 = smov 6  }
   0x5   :  { %s16472_s21 = sld [smem:[%s18839_s0 + %s16392_s18]]   ;;  %s16395_s30 = smov 7  }
   0x6   :  { %s16477_s25 = sld [smem:[%s18839_s0 + %s16393_s22]]   ;;  %s16396_s4 = smov 8  }
   0x7   :  { %18906 = sst [smem:[#allocation8_spill]] %s16452_s5  ;;  %s16397_s10 = smov 9  }
   0x8   :  { %18907 = sst [smem:[#allocation9_spill]] %s16457_s9  ;;  %s16398_s15 = smov 10  }
   0x9   :  { %18908 = sst [smem:[#allocation10_spill]] %s16462_s13  ;;  %s16399_s20 = smov 11  }
   0xa   :  { %18909 = sst [smem:[#allocation11_spill]] %s16467_s17  ;;  %s16401_s1 = smov 13  }
   0xb   :  { %18910 = sst [smem:[#allocation12_spill]] %s16472_s21  ;;  %s16402_s7 = smov 14  }
   0xc   :  { %18911 = sst [smem:[#allocation13_spill]] %s16477_s25  ;;  %s16404_s22 = smov 16  }
   0xd   :  { %s16482_s29 = sld [smem:[%s18839_s0 + %s16394_s26]]   ;;  %s16400_s26 = smov 12  }
   0xe   :  { %s16487_s3 = sld [smem:[%s18839_s0 + %s16395_s30]]   ;;  %s16405_s28 = smov 17  }
   0xf   :  { %s16492_s8 = sld [smem:[%s18839_s0 + %s16396_s4]]  }
  0x10   :  { %s16497_s14 = sld [smem:[%s18839_s0 + %s16397_s10]]  }
  0x11   :  { %s16502_s19 = sld [smem:[%s18839_s0 + %s16398_s15]]   ;;  %s16403_s15 = smov 15  }
  0x12   :  { %s16507_s24 = sld [smem:[%s18839_s0 + %s16399_s20]]  }
  0x13   :  { %18912 = sst [smem:[#allocation14_spill]] %s16482_s29 }
  0x14   :  { %18913 = sst [smem:[#allocation15_spill]] %s16487_s3 }
  0x15   :  { %18914 = sst [smem:[#allocation16_spill]] %s16492_s8 }
  0x16   :  { %18915 = sst [smem:[#allocation17_spill]] %s16497_s14 }
  0x17   :  { %s16512_s30 = sld [smem:[%s18839_s0 + %s16400_s26]]  }
  0x18   :  { %s16517_s6 = sld [smem:[%s18839_s0 + %s16401_s1]]  }
  0x19   :  { %s16522_s12 = sld [smem:[%s18839_s0 + %s16402_s7]]   ;;  %s16406_s7 = smov 18  }
  0x1a   :  { %s16527_s20 = sld [smem:[%s18839_s0 + %s16403_s15]]   ;;  %s16407_s15 = smov 19  }
  0x1b   :  { %s16532_s27 = sld [smem:[%s18839_s0 + %s16404_s22]]   ;;  %s16408_s22 = smov 20  }
  0x1c   :  { %s16537_s4 = sld [smem:[%s18839_s0 + %s16405_s28]]   ;;  %s16409_s28 = smov 21  }
  0x1d   :  { %s16542_s9 = sld [smem:[%s18839_s0 + %s16406_s7]]   ;;  %s16410_s7 = smov 22  }
  0x1e   :  { %18916 = sst [smem:[#allocation18_spill]] %s16517_s6 }
  0x1f   :  { %18917 = sst [smem:[#allocation19_spill]] %s16522_s12 }
  0x20   :  { %s16547_s12 = sld [smem:[%s18839_s0 + %s16407_s15]]   ;;  %s16411_s15 = smov 23  }
  0x21   :  { %18918 = sst [smem:[#allocation20_spill]] %s16532_s27 }
  0x22   :  { %18919 = sst [smem:[#allocation21_spill]] %s16537_s4 }
  0x23   :  { %18920 = sst [smem:[#allocation22_spill]] %s16542_s9 }
  0x24   :  { %s16552_s27 = sld [smem:[%s18839_s0 + %s16408_s22]]   ;;  %s16412_s22 = smov 24  }
  0x25   :  { %s16557_s4 = sld [smem:[%s18839_s0 + %s16409_s28]]   ;;  %s16413_s28 = smov 25  }
  0x26   :  { %18921 = sst [smem:[#allocation23_spill]] %s16547_s12 }
  0x27   :  { %s16562_s9 = sld [smem:[%s18839_s0 + %s16410_s7]]   ;;  %s16414_s7 = smov 26  }
  0x28   :  { %s16567_s12 = sld [smem:[%s18839_s0 + %s16411_s15]]   ;;  %s16415_s15 = smov 27  }
  0x2a   :  { %18922 = sst [smem:[#allocation24_spill]] %s16552_s27 }
  0x2b   :  { %18923 = sst [smem:[#allocation25_spill]] %s16557_s4 }
  0x2c   :  { %s16572_s27 = sld [smem:[%s18839_s0 + %s16412_s22]]   ;;  %s16416_s22 = smov 28  }
  0x2d   :  { %18924 = sst [smem:[#allocation26_spill]] %s16562_s9 }
  0x2e   :  { %18925 = sst [smem:[#allocation27_spill]] %s16567_s12 }
  0x2f   :  { %s16577_s4 = sld [smem:[%s18839_s0 + %s16413_s28]]   ;;  %s16417_s28 = smov 29  }
  0x30   :  { %s16582_s9 = sld [smem:[%s18839_s0 + %s16414_s7]]   ;;  %s16418_s7 = smov 30  }
  0x31   :  { %s16587_s12 = sld [smem:[%s18839_s0 + %s16415_s15]]   ;;  %s16419_s15 = smov 31  }
  0x32   :  { %18926 = sst [smem:[#allocation28_spill]] %s16572_s27 }
  0x33   :  { %s16592_s27 = sld [smem:[%s18839_s0 + %s16416_s22]]   ;;  %s16420_s22 = smov 32  }
  0x35   :  { %18927 = sst [smem:[#allocation29_spill]] %s16577_s4 }
  0x36   :  { %18928 = sst [smem:[#allocation30_spill]] %s16582_s9 }
  0x37   :  { %18929 = sst [smem:[#allocation31_spill]] %s16587_s12 }
  0x38   :  { %s16597_s4 = sld [smem:[%s18839_s0 + %s16417_s28]]   ;;  %s16421_s28 = smov 33  }
  0x39   :  { %18930 = sst [smem:[#allocation32_spill]] %s16592_s27 }
  0x3a   :  { %s16602_s9 = sld [smem:[%s18839_s0 + %s16418_s7]]   ;;  %s16422_s7 = smov 34  }
  0x3b   :  { %s16607_s12 = sld [smem:[%s18839_s0 + %s16419_s15]]   ;;  %s16423_s15 = smov 35  }
  0x3c   :  { %s16612_s27 = sld [smem:[%s18839_s0 + %s16420_s22]]   ;;  %s16424_s22 = smov 36  }
  0x3e   :  { %18931 = sst [smem:[#allocation33_spill]] %s16597_s4 }
  0x3f   :  { %s16617_s4 = sld [smem:[%s18839_s0 + %s16421_s28]]  }
  0x40   :  { %18932 = sst [smem:[#allocation34_spill]] %s16602_s9 }
  0x41   :  { %18933 = sst [smem:[#allocation35_spill]] %s16607_s12 }
  0x42   :  { %18934 = sst [smem:[#allocation36_spill]] %s16612_s27 }
  0x43   :  { %s16622_s9 = sld [smem:[%s18839_s0 + %s16422_s7]]  }
  0x44   :  { %s16627_s12 = sld [smem:[%s18839_s0 + %s16423_s15]]  }
  0x45   :  { %18935 = sst [smem:[#allocation37_spill]] %s16617_s4 }
  0x46   :  { %s16632_s27 = sld [smem:[%s18839_s0 + %s16424_s22]]  }
  0x49   :  { %18936 = sst [smem:[#allocation38_spill]] %s16622_s9 }
  0x4a   :  { %18937 = sst [smem:[#allocation39_spill]] %s16627_s12 }
  0x4c   :  { %18938 = sst [smem:[#allocation40_spill]] %s16632_s27 }
  0x4d   :  { %79 = vsyncpa [#allocation3], 0 }
  0x4e   :  { %81 = vsyncpa [#allocation3 + $0x1], 0 }
  0x4f   :  { %82 = vsyncpa [#allocation5], 0 }
  0x50   :  { %84 = vsyncpa [#allocation5 + $0x1], 0  ;;  %s16634_s28 = smov 0   ;;  %s16636_s1 = smov 0  }
  0x51   :  { %s16638_s2 = smov 0   ;;  %s16640_s7 = smov 0  }
  0x52 LB: > { %s18939_s14 = sld [smem:[#allocation17_spill]]  ;;  %s18940_s8 = sld [smem:[#allocation16_spill]]  ;;  %s16379_s1 = sphi %s16636_s1, %s19008_s1   ;;  %s16375_s28 = sphi %s16634_s28, %s19007_s28   ;;  %s16387_s7 = sphi %s16640_s7, %s19004_s7   ;;  %s16383_s2 = sphi %s16638_s2, %s19006_s2  }
  0x53   : > { %s18941_s6 = sld [smem:[#allocation18_spill]]  ;;  %s18942_s3 = sld [smem:[#allocation15_spill]] }
  0x54   : > { %s18943_s17 = sld [smem:[#allocation11_spill]]  ;;  %s18944_s13 = sld [smem:[#allocation10_spill]] }
  0x55   : > { %18945 = sst [smem:[#allocation41_spill]] %s16375_s28  ;;  %s16655_s0 = sadd.s32 4294967295, %s16387_s7  }
  0x56   : > { %18946 = sst [smem:[#allocation42_spill]] %s16383_s2  ;;  %s12757_s10 = sadd.s32 4294967294, %s16387_s7  }
  0x57   : > { %18947 = sst [smem:[#allocation43_spill]] %s16387_s7  ;;  %s16659_s11 = sadd.s32 1, %s16387_s7  }
  0x58   : > { %18948 = sst [smem:[#allocation44_spill]] %s16659_s11  ;;  %s842_s15 = sadd.s32 1, %s16383_s2 }
  0x59   : > { %s839_s16 = ssub.s32 %s16387_s7, %s16659_s11  ;;  %p852_p0 = scmp.ne.s32.totalorder %s16383_s2, %s16379_s1 }
  0x5a   : > { %p840_p1 = scmp.eq.s32.totalorder %s839_s16, 0  ;;  %p853_p2 = scmp.eq.s32.totalorder %s16655_s0, 1 }
  0x5b   : > { %p858_p3 = scmp.ne.s32.totalorder %s16379_s1, %s16375_s28  ;;  %p859_p4 = scmp.eq.s32.totalorder %s12757_s10, 1 }
  0x5c   : > { %s16670_s18 = scalar_select %p840_p1, %s16383_s2, %s842_s15  }
  0x5d   : > { %p16672_p5 = por %p853_p2, %p852_p0  ;;  %p16676_p6 = por %p859_p4, %p858_p3 }
  0x5e   : > { %18949 = sst [smem:[#allocation45_spill]] %s16670_s18  ;;  %p12760_p7 = scmp.ge.s32.totalorder %s16387_s7, 1 }
  0x5f   : > { %s18950_s22 = scalar_select %p16672_p5, 1, 0 }
  0x60   : > { %s18952_s23 = scalar_select %p16676_p6, 1, 0 }
  0x61   : > { %18951 = sst [smem:[#allocation46_spill]] %s18950_s22  ;;  %p1020_p8 = scmp.lt.s32.totalorder %s16387_s7, 3 }
  0x62   : > { %18953 = sst [smem:[#allocation47_spill]] %s18952_s23 }
  0x63   : > { %p1021_p9 = pnand %p12760_p7, %p1020_p8 }
  0x64   : > { %s18954_s5 = sld [smem:[#allocation8_spill]] (!%p1021_p9)  ;;  %s18955_s21 = sld [smem:[#allocation12_spill]] (!%p1021_p9)  ;;  %v1136_v0 = vld [vmem:[%s18943_s17] sm:$0xff] (!%p1021_p9)  ;;  %v1137_v1 = vld [vmem:[%s18943_s17 + $0x8] sm:$0xff] (!%p1021_p9)  ;;  %vm1145_vm0 = vcmask (!%p1021_p9), 130048   ;;  %vm1229_vm1 = vcmask (!%p1021_p9), 261120  }
  0x65   : > { %1024 = sbr.rel (%p1021_p9) target bundleno = 13798 (0x35e6), region = 160  ;;  %s12763_s26 = sshll.u32 (!%p1021_p9), %s16655_s0, 1  ;;  %v14693_v2 = vpack.c.bf16 (!%p1021_p9), %v1137_v1, %v1136_v0  ;;  %v1273_v34 = vld [vmem:[%s18944_s13] sm:$0xff] (!%p1021_p9)  ;;  %v1274_v39 = vld [vmem:[%s18944_s13 + $0x8] sm:$0xff] (!%p1021_p9)  ;;  %v1323_v56 = vld [vmem:[%s18939_s14 + $0x10] sm:$0xff] (!%p1021_p9)  ;;  %vm1477_vm2 = vcmask (!%p1021_p9), 31744  }
  0x66   : > { %p1121_p10 = scmp.lt.s32.totalorder (!%p1021_p9), %s12763_s26, 3  ;;  %s18956_s25 = sld [smem:[#allocation13_spill]] (!%p1021_p9)  ;;  %v1321_v54 = vld [vmem:[%s18939_s14] sm:$0xff] (!%p1021_p9)  ;;  %v1322_v55 = vld [vmem:[%s18939_s14 + $0x8] sm:$0xff] (!%p1021_p9)  ;;  %v1324_v58 = vld [vmem:[%s18939_s14 + $0x18] sm:$0xff] (!%p1021_p9)  ;;  %vm3116_vm4 = vcmask (!%p1021_p9), 64512  }
  0x67   : > { %14694 = vmatprep.subr.bf16.mxu0 (!%p1021_p9), %v14693_v2  ;;  %s18957_s29 = sld [smem:[#allocation14_spill]] (!%p1021_p9)  ;;  %v14697_v57 = vpack.c.bf16 (!%p1021_p9), %v1322_v55, %v1321_v54  ;;  %v14701_v59 = vpack.c.bf16 (!%p1021_p9), %v1324_v58, %v1323_v56  ;;  %s18852_s16 = smov (!%p1021_p9), 124   ;;  %vm16793_vm3 = vmpackc.low (!%p1021_p9), %vm1477_vm2, %vm1477_vm2  ;;  %vm3119_vm5 = vcmask (!%p1021_p9), 97280   ;;  %vm3124_vm6 = vcmask (!%p1021_p9), 162816  }
  0x68   : > { %14696 = vmatpush3.bf16.msra.mxu0 (!%p1021_p9), %v14693_v2  ;;  %s18864_s13 = smov (!%p1021_p9), 104   ;;  %s18858_s17 = smov (!%p1021_p9), 100   ;;  %vm3127_vm7 = vcmask (!%p1021_p9), 195584   ;;  %vm3130_vm8 = vcmask (!%p1021_p9), 228352   ;;  %vm10468_vm9 = vcmask (!%p1021_p9), 785408  }
  0x69   : > { %14698 = vmatprep.subr.bf16.mxu1 (!%p1021_p9), %v14697_v57  ;;  %s18969_s18 = smov (!%p1021_p9), 104   ;;  %s18970_s2 = smov (!%p1021_p9), 100  }
  0x6a   : > { %v12767_v5 = vld [vmem:[%s18955_s21] ss:$0 sm:$0xff] (!%p1021_p9)  ;;  %14700 = vmatpush3.bf16.msra.mxu1 (!%p1021_p9), %v14697_v57  ;;  %s18966_s21 = smov (!%p1021_p9), 116   ;;  %s18971_s11 = smov (!%p1021_p9), 96  }
  0x6b   : > { %14702 = vmatprep.subr.bf16.mxu1 (!%p1021_p9), %v14701_v59  ;;  %s18972_s23 = smov (!%p1021_p9), 64   ;;  %s18973_s28 = smov (!%p1021_p9), 4  }
  0x6c   : > { %s19010_s26 = smov (!%p1121_p10, %s12763_s26), 3  ;;  %v12770_v29 = vld [vmem:[%s18956_s25] ss:$0 sm:$0xff]  ;;  %s18967_s25 = smov 112  }
  0x6d   : > { %s18851_s10 = sshll.u32 %s19010_s26, 3  ;;  %v12771_v31 = vld [vmem:[%s18957_s29] ss:$0 sm:$0xff]  ;;  %s18968_s29 = smov 108  }
  0x6e   : > { %s1124_s15 = scalar_lea.vmem %s18954_s5, %s18851_s10  ;;  %14704 = vmatpush3.bf16.msra.mxu1 %v14701_v59  ;;  %s18884_s10 = smov 116  }
  0x6f   : > { %v1134_v3 = vld [vmem:[%s1124_s15] sm:$0xff]  ;;  %v1135_v4 = vld [vmem:[%s1124_s15 + $0x8] sm:$0xff]  ;;  %s18856_s15 = smov 120   ;;  %s18882_s5 = smov 112  }
  0x70   : > { %13741 = vmatprep.mubr.msk.f32.mxu0 %vm1145_vm0, %v1134_v3  ;;  %v12772_v3 = vld [vmem:[%s18942_s3] ss:$0 sm:$0xff]  ;;  %s18974_s7 = smov 12   ;;  %s18975_s12 = smov 8  }
  0x71   : > { %13742 = vmatmul.mubr.msk.f32.vlgmr.msra.gmra.mrb[0].mxu0 %vm1145_vm0, %v1135_v4  ;;  %s18976_s9 = smov 20   ;;  %s18977_s4 = smov 16  }
  0x72   : > { %s18978_s22 = smov 24   ;;  %s18979_s27 = smov 28  }
 0x144   : > { %v13743_v6 = vpop.f32.mrb[0].mxu0 }
 0x145   : > { %v1218_v7 = vpop.f32.mrb[1].mxu0  ;;  %v1224_v9 = vadd.f32 %v13743_v6, %v12767_v5 }
 0x146   : > { %v1219_v8 = vadd.f32 %v12767_v5, %v1218_v7  ;;  %v12773_v5 = vld [vmem:[%s18940_s8] ss:$0 sm:$0xff] }
 0x147   : > { %v1233_v11 = vsel %vm1229_vm1, %v1224_v9, 0.0 }
 0x148   : > { %v1230_v10 = vsel %vm1229_vm1, %v1219_v8, 0.0 }
 0x149   : > { %1231 = vadd.xlane.f32.xlu0 %v1230_v10 }
 0x14d   : > { %1234 = vadd.xlane.f32.xlu0 %v1233_v11 }
 0x1d6   : > { %v1232_v12 = vpop.xlane.xlu0 %1231 }
 0x1d7   : > { %v1237_v13 = vmul.f32 0.03125, %v1232_v12  ;;  %v12774_v12 = vld [vmem:[%s16502_s19] ss:$0 sm:$0xff] }
 0x1d9   : > { %v1239_v14 = vsub.f32 %v1219_v8, %v1237_v13 }
 0x1da   : > { %v1235_v15 = vpop.xlane.xlu0 %1234 }
 0x1db   : > { %v1238_v16 = vmul.f32 0.03125, %v1235_v15  ;;  %v1241_v17 = vmul.f32 %v1239_v14, %v1239_v14 }
 0x1dd   : > { %v1240_v18 = vsub.f32 %v1224_v9, %v1238_v16  ;;  %v1243_v19 = vsel %vm1229_vm1, %v1241_v17, 0.0 }
 0x1de   : > { %1244 = vadd.xlane.f32.xlu1 %v1243_v19 }
 0x1df   : > { %v1242_v20 = vmul.f32 %v1240_v18, %v1240_v18 }
 0x1e1   : > { %v1246_v21 = vsel %vm1229_vm1, %v1242_v20, 0.0 }
 0x1e2   : > { %1247 = vadd.xlane.f32.xlu1 %v1246_v21 }
 0x26b   : > { %v1245_v22 = vpop.xlane.xlu1 %1244 }
 0x26c   : > { %v1249_v23 = vmul.f32 0.03125, %v1245_v22 }
 0x26e   : > { %v1251_v24 = vadd.f32 1e-05, %v1249_v23 }
 0x26f   : > { %v1248_v25 = vpop.xlane.xlu1 %1247 }
 0x270   : > { %15909 = vrsqrt.f32 %v1251_v24  ;;  %v1250_v26 = vmul.f32 0.03125, %v1248_v25 }
 0x272   : > { %v1252_v27 = vadd.f32 1e-05, %v1250_v26 }
 0x274   : > { %15911 = vrsqrt.f32 %v1252_v27 }
 0x27a   : > { %v15910_v28 = vpop.eup %15909 }
 0x27b   : > { %v1255_v30 = vmul.f32 %v15910_v28, %v1239_v14 }
 0x27d   : > { %v1263_v32 = vmul.f32 %v12770_v29, %v1255_v30 }
 0x27e   : > { %v15912_v33 = vpop.eup %15911 }
 0x27f   : > { %v1271_v35 = vadd.f32 %v12771_v31, %v1263_v32  ;;  %v1256_v36 = vmul.f32 %v15912_v33, %v1240_v18 }
 0x281   : > { %v16701_v37 = vadd.f32 %v1273_v34, %v1271_v35  ;;  %v1264_v38 = vmul.f32 %v12770_v29, %v1256_v36 }
 0x283   : > { %v1279_v40 = vsel %vm1229_vm1, %v16701_v37, 0.0  ;;  %v1272_v41 = vadd.f32 %v12771_v31, %v1264_v38 }
 0x284   : > { %1280 = vadd.xlane.f32.xlu0 %v1279_v40 }
 0x285   : > { %v16706_v42 = vadd.f32 %v1274_v39, %v1272_v41 }
 0x287   : > { %v1282_v43 = vsel %vm1229_vm1, %v16706_v42, 0.0 }
 0x288   : > { %1283 = vadd.xlane.f32.xlu1 %v1282_v43 }
 0x311   : > { %v1281_v44 = vpop.xlane.xlu0 %1280 }
 0x312   : > { %v1285_v45 = vmul.f32 0.03125, %v1281_v44 }
 0x314   : > { %v1287_v46 = vsub.f32 %v16701_v37, %v1285_v45 }
 0x315   : > { %v1284_v47 = vpop.xlane.xlu1 %1283 }
 0x316   : > { %v1286_v48 = vmul.f32 0.03125, %v1284_v47  ;;  %v1289_v49 = vmul.f32 %v1287_v46, %v1287_v46 }
 0x318   : > { %v1288_v50 = vsub.f32 %v16706_v42, %v1286_v48  ;;  %v1291_v51 = vsel %vm1229_vm1, %v1289_v49, 0.0 }
 0x319   : > { %1292 = vadd.xlane.f32.xlu0 %v1291_v51 }
 0x31a   : > { %v1290_v52 = vmul.f32 %v1288_v50, %v1288_v50 }
 0x31c   : > { %v1294_v53 = vsel %vm1229_vm1, %v1290_v52, 0.0 }
 0x31d   : > { %1295 = vadd.xlane.f32.xlu1 %v1294_v53 }
 0x3a6   : > { %v1293_v60 = vpop.xlane.xlu0 %1292 }
 0x3a7   : > { %v1297_v61 = vmul.f32 0.03125, %v1293_v60 }
 0x3a9   : > { %v1299_v62 = vadd.f32 1e-05, %v1297_v61 }
 0x3aa   : > { %v1296_v63 = vpop.xlane.xlu1 %1295 }
 0x3ab   : > { %15913 = vrsqrt.f32 %v1299_v62  ;;  %v1298_v0 = vmul.f32 0.03125, %v1296_v63 }
 0x3ad   : > { %v1300_v1 = vadd.f32 1e-05, %v1298_v0 }
 0x3af   : > { %15915 = vrsqrt.f32 %v1300_v1 }
 0x3b5   : > { %v15914_v2 = vpop.eup %15913 }
 0x3b6   : > { %v1303_v4 = vmul.f32 %v15914_v2, %v1287_v46 }
 0x3b8   : > { %v1311_v6 = vmul.f32 %v12772_v3, %v1303_v4 }
 0x3b9   : > { %v15916_v7 = vpop.eup %15915 }
 0x3ba   : > { %v1304_v8 = vmul.f32 %v15916_v7, %v1288_v50  ;;  %v1319_v9 = vadd.f32 %v12773_v5, %v1311_v6 }
 0x3bc   : > { %v1312_v10 = vmul.f32 %v12772_v3, %v1304_v8  ;;  %13752 = vmatprep.mubr.msk.f32.mxu1 %vm1229_vm1, %v1319_v9 }
 0x3be   : > { %v1320_v11 = vadd.f32 %v12773_v5, %v1312_v10 }
 0x3c0   : > { %13753 = vmatmul.mubr.msk.f32.vlgmr.msra.gmra.mrb[0].mxu1 %vm1229_vm1, %v1320_v11 }
 0x493   : > { %v13754_v13 = vpop.f32.mrb[0].mxu1 }
 0x494   : > { %v16723_v14 = vadd.f32 %v13754_v13, %v12774_v12  ;;  %v1404_v15 = vpop.f32.mrb[1].mxu1 }
 0x495   : > { %v1405_v16 = vadd.f32 %v12774_v12, %v1404_v15 }
 0x496   : > { %1417 = vrot.lane.b32.xlu1 %v16723_v14, %s18852_s16  ;;  %v1458_v48 = vmul.f32 0.5, %v16723_v14 }
 0x497   : > { %1415 = vrot.lane.b32.xlu0 %v1405_v16, %s18852_s16  ;;  %v1457_v17 = vmul.f32 0.5, %v1405_v16  ;;  %v15514_v18 = vpack.i.bf16 %v16723_v14, %v1405_v16  ;;  %s18872_s16 = smov 108  }
 0x499   : > { %13759 = vmatprep.mubr.msk.f32.mxu0 %vm1477_vm2, %v1457_v17 }
 0x49a   : > { %1423 = vrot.lane.b32.xlu1 %v16723_v14, %s18856_s15 }
 0x49b   : > { %1427 = vrot.lane.b32.xlu0 %v1405_v16, %s18884_s10 }
 0x49e   : > { %1421 = vrot.lane.b32.xlu1 %v1405_v16, %s18856_s15  ;;  %s18862_s15 = smov 96  }
 0x49f   : > { %1433 = vrot.lane.b32.xlu0 %v1405_v16, %s18882_s5 }
 0x4a2   : > { %1429 = vrot.lane.b32.xlu1 %v16723_v14, %s18884_s10  ;;  %s18965_s10 = smov 120  }
 0x4a3   : > { %1439 = vrot.lane.b32.xlu0 %v1405_v16, %s18872_s16 }
 0x4a6   : > { %1435 = vrot.lane.b32.xlu1 %v16723_v14, %s18882_s5  ;;  %s18964_s5 = smov 124  }
 0x4a7   : > { %1445 = vrot.lane.b32.xlu0 %v1405_v16, %s18864_s13 }
 0x4aa   : > { %1441 = vrot.lane.b32.xlu1 %v16723_v14, %s18872_s16  ;;  %s18874_s16 = smov 28  }
 0x4ab   : > { %1451 = vrot.lane.b32.xlu0 %v1405_v16, %s18858_s17 }
 0x4ae   : > { %1447 = vrot.lane.b32.xlu1 %v16723_v14, %s18864_s13  ;;  %s18870_s13 = smov 12  }
 0x4af   : > { %15515 = vrot.lane.b32.xlu0 %v15514_v18, %s18862_s15 }
 0x4b2   : > { %1453 = vrot.lane.b32.xlu1 %v16723_v14, %s18858_s17  ;;  %s18860_s17 = smov 64  }
 0x508   : > { %v1418_v19 = vpop.permute.xlu1 %1417 }
 0x509   : > { %v1416_v20 = vpop.permute.xlu0 %1415  ;;  %v1460_v58 = vmul.f32 0.5, %v1418_v19 }
 0x50a   : > { %v1459_v21 = vmul.f32 0.5, %v1416_v20  ;;  %v15519_v22 = vpack.i.bf16 %v1418_v19, %v1416_v20 }
 0x50c   : > { %v16749_v23 = vpop.permute.xlu1 %1423  ;;  %13766 = vmatprep.mubr.msk.f32.mxu1 %vm1477_vm2, %v1459_v21  ;;  %15520 = vrot.lane.b32.xlu1 %v15519_v22, %s18862_s15 }
 0x50d   : > { %v1428_v24 = vpop.permute.xlu0 %1427  ;;  %v1462_v3 = vmul.f32 0.5, %v16749_v23 }
 0x50e   : > { %v1463_v60 = vmul.f32 0.5, %v1428_v24 }
 0x510   : > { %v1422_v25 = vpop.permute.xlu1 %1421 }
 0x511   : > { %v16753_v26 = vpop.permute.xlu0 %1433  ;;  %v15524_v27 = vpack.i.bf16 %v16749_v23, %v1422_v25  ;;  %v1461_v49 = vmul.f32 0.5, %v1422_v25 }
 0x512   : > { %v1465_v5 = vmul.f32 0.5, %v16753_v26 }
 0x513   : > { %15525 = vrot.lane.b32.xlu0 %v15524_v27, %s18862_s15 }
 0x514   : > { %v16757_v28 = vpop.permute.xlu1 %1429 }
 0x515   : > { %v16759_v29 = vpop.permute.xlu0 %1439  ;;  %v15529_v30 = vpack.i.bf16 %v16757_v28, %v1428_v24  ;;  %v1464_v9 = vmul.f32 0.5, %v16757_v28 }
 0x516   : > { %v1467_v11 = vmul.f32 0.5, %v16759_v29 }
 0x517   : > { %15530 = vrot.lane.b32.xlu1 %v15529_v30, %s18862_s15 }
 0x518   : > { %v16763_v31 = vpop.permute.xlu1 %1435 }
 0x519   : > { %v16765_v32 = vpop.permute.xlu0 %1445  ;;  %v16769_v33 = vpack.i.bf16 %v16763_v31, %v16753_v26  ;;  %v1466_v15 = vmul.f32 0.5, %v16763_v31 }
 0x51a   : > { %v1469_v17 = vmul.f32 0.5, %v16765_v32 }
 0x51b   : > { %15535 = vrot.lane.b32.xlu0 %v16769_v33, %s18862_s15 }
 0x51c   : > { %v16773_v34 = vpop.permute.xlu1 %1441 }
 0x51d   : > { %v16775_v35 = vpop.permute.xlu0 %1451  ;;  %v16779_v36 = vpack.i.bf16 %v16773_v34, %v16759_v29  ;;  %v1468_v24 = vmul.f32 0.5, %v16773_v34 }
 0x51e   : > { %v1471_v28 = vmul.f32 0.5, %v16775_v35 }
 0x51f   : > { %15540 = vrot.lane.b32.xlu1 %v16779_v36, %s18862_s15 }
 0x520   : > { %v16783_v38 = vpop.permute.xlu1 %1447 }
 0x521   : > { %v15516_v39 = vpop.permute.xlu0 %15515  ;;  %v16787_v40 = vpack.i.bf16 %v16783_v38, %v16765_v32  ;;  %v1470_v31 = vmul.f32 0.5, %v16783_v38 }
 0x522   : > { %v15518_v41 = vunpack.i.h.bf16 %v15516_v39  ;;  %v15517_v43 = vunpack.i.l.bf16 %v15516_v39 }
 0x523   : > { %15545 = vrot.lane.b32.xlu0 %v16787_v40, %s18862_s15 }
 0x524   : > { %v14705_v45 = vpack.c.bf16 %v15518_v41, %v15517_v43  ;;  %v16797_v46 = vpop.permute.xlu1 %1453 }
 0x525   : > { %v16801_v47 = vpack.i.bf16 %v16797_v46, %v16775_v35  ;;  %v1472_v41 = vmul.f32 0.5, %v16797_v46 }
 0x526   : > { %14707 = vmatprep.subr.msk.bf16.mxu0 %vm16793_vm3, %v14705_v45 }
 0x527   : > { %15555 = vrot.lane.b32.xlu0 %v15514_v18, %s18860_s17  ;;  %15550 = vrot.lane.b32.xlu1 %v16801_v47, %s18862_s15  ;;  %s18868_s15 = smov 8  }
 0x528   : > { %14710 = vmatpush3.bf16.xpose.msk.msra.mxu0 %vm16793_vm3, %v14705_v45 }
 0x52b   : > { %15560 = vrot.lane.b32.xlu1 %v15519_v22, %s18860_s17 }
 0x52f   : > { %13760 = vmatmul.mubr.msk.f32.vlgmr.msra.gmra.mrb[2].mxu0 %vm1477_vm2, %v1458_v48  ;;  %15565 = vrot.lane.b32.xlu1 %v15524_v27, %s18860_s17 }
 0x530   : > { %13773 = vmatprep.mubr.msk.f32.mxu0 %vm1477_vm2, %v1461_v49 }
 0x533   : > { %15570 = vrot.lane.b32.xlu1 %v15529_v30, %s18860_s17 }
 0x57e   : > { %v15521_v50 = vpop.permute.xlu1 %15520 }
 0x57f   : > { %v15523_v51 = vunpack.i.h.bf16 %v15521_v50  ;;  %v15522_v52 = vunpack.i.l.bf16 %v15521_v50 }
 0x581   : > { %v14711_v53 = vpack.c.bf16 %v15523_v51, %v15522_v52 }
 0x583   : > { %14713 = vmatprep.subr.msk.bf16.mxu1 %vm16793_vm3, %v14711_v53 }
 0x584   : > { %14716 = vmatpush3.bf16.xpose.msk.msra.mxu1 %vm16793_vm3, %v14711_v53 }
 0x585   : > { %v15526_v54 = vpop.permute.xlu0 %15525 }
 0x586   : > { %v15528_v55 = vunpack.i.h.bf16 %v15526_v54  ;;  %v15527_v56 = vunpack.i.l.bf16 %v15526_v54 }
 0x588   : > { %v14717_v57 = vpack.c.bf16 %v15528_v55, %v15527_v56 }
 0x589   : > { %v15531_v59 = vpop.permute.xlu1 %15530 }
 0x58a   : > { %v15533_v61 = vunpack.i.h.bf16 %v15531_v59  ;;  %v15532_v62 = vunpack.i.l.bf16 %v15531_v59  ;;  %14719 = vmatprep.subr.msk.bf16.mxu0 %vm16793_vm3, %v14717_v57 }
 0x58b   : > { %13767 = vmatmul.mubr.msk.f32.vlgmr.msra.gmra.mrb[2].mxu1 %vm1477_vm2, %v1460_v58  ;;  %14722 = vmatpush3.bf16.xpose.msk.msra.mxu0 %vm16793_vm3, %v14717_v57 }
 0x58c   : > { %v14723_v63 = vpack.c.bf16 %v15533_v61, %v15532_v62  ;;  %13780 = vmatprep.mubr.msk.f32.mxu1 %vm1477_vm2, %v1463_v60 }
 0x58d   : > { %v15536_v0 = vpop.permute.xlu0 %15535 }
 0x58e   : > { %v15538_v1 = vunpack.i.h.bf16 %v15536_v0  ;;  %v15537_v2 = vunpack.i.l.bf16 %v15536_v0  ;;  %14725 = vmatprep.subr.msk.bf16.mxu1 %vm16793_vm3, %v14723_v63 }
 0x58f   : > { %14728 = vmatpush3.bf16.xpose.msk.msra.mxu1 %vm16793_vm3, %v14723_v63 }
 0x590   : > { %v14729_v4 = vpack.c.bf16 %v15538_v1, %v15537_v2 }
 0x591   : > { %v15541_v6 = vpop.permute.xlu1 %15540 }
 0x592   : > { %v15543_v7 = vunpack.i.h.bf16 %v15541_v6  ;;  %v15542_v8 = vunpack.i.l.bf16 %v15541_v6  ;;  %13774 = vmatmul.mubr.msk.f32.vlgmr.msra.gmra.mrb[4].mxu0 %vm1477_vm2, %v1462_v3  ;;  %14731 = vmatprep.subr.msk.bf16.mxu0 %vm16793_vm3, %v14729_v4 }
 0x593   : > { %14734 = vmatpush3.bf16.xpose.msk.msra.mxu0 %vm16793_vm3, %v14729_v4  ;;  %13787 = vmatprep.mubr.msk.f32.mxu0 %vm1477_vm2, %v1465_v5 }
 0x594   : > { %v14735_v10 = vpack.c.bf16 %v15543_v7, %v15542_v8 }
 0x595   : > { %v15546_v12 = vpop.permute.xlu0 %15545 }
 0x596   : > { %v15548_v13 = vunpack.i.h.bf16 %v15546_v12  ;;  %v15547_v14 = vunpack.i.l.bf16 %v15546_v12  ;;  %13781 = vmatmul.mubr.msk.f32.vlgmr.msra.gmra.mrb[4].mxu1 %vm1477_vm2, %v1464_v9  ;;  %14737 = vmatprep.subr.msk.bf16.mxu1 %vm16793_vm3, %v14735_v10 }
 0x597   : > { %14740 = vmatpush3.bf16.xpose.msk.msra.mxu1 %vm16793_vm3, %v14735_v10  ;;  %13794 = vmatprep.mubr.msk.f32.mxu1 %vm1477_vm2, %v1467_v11 }
 0x598   : > { %v14741_v16 = vpack.c.bf16 %v15548_v13, %v15547_v14 }
 0x599   : > { %v15551_v18 = vpop.permute.xlu1 %15550  ;;  %v15556_v19 = vpop.permute.xlu0 %15555 }
 0x59a   : > { %v15553_v20 = vunpack.i.h.bf16 %v15551_v18  ;;  %v15552_v21 = vunpack.i.l.bf16 %v15551_v18  ;;  %v15558_v22 = vunpack.i.h.bf16 %v15556_v19  ;;  %v15557_v23 = vunpack.i.l.bf16 %v15556_v19  ;;  %13788 = vmatmul.mubr.msk.f32.vlgmr.msra.gmra.mrb[6].mxu0 %vm1477_vm2, %v1466_v15  ;;  %14743 = vmatprep.subr.msk.bf16.mxu0 %vm16793_vm3, %v14741_v16 }
 0x59b   : > { %14746 = vmatpush3.bf16.xpose.msk.msra.mxu0 %vm16793_vm3, %v14741_v16  ;;  %13801 = vmatprep.mubr.msk.f32.mxu0 %vm1477_vm2, %v1469_v17 }
 0x59c   : > { %v14747_v25 = vpack.c.bf16 %v15553_v20, %v15552_v21  ;;  %v14753_v26 = vpack.c.bf16 %v15558_v22, %v15557_v23 }
 0x59d   : > { %v15561_v27 = vpop.permute.xlu1 %15560 }
 0x59e   : > { %v15563_v29 = vunpack.i.h.bf16 %v15561_v27  ;;  %v15562_v30 = vunpack.i.l.bf16 %v15561_v27  ;;  %13795 = vmatmul.mubr.msk.f32.vlgmr.msra.gmra.mrb[6].mxu1 %vm1477_vm2, %v1468_v24  ;;  %14749 = vmatprep.subr.msk.bf16.mxu1 %vm16793_vm3, %v14747_v25 }
 0x59f   : > { %14754 = vmatprep.subr.bf16.mxu0 %v14753_v26  ;;  %14752 = vmatpush3.bf16.xpose.msk.msra.mxu1 %vm16793_vm3, %v14747_v25 }
 0x5a0   : > { %13808 = vmatprep.mubr.msk.f32.mxu1 %vm1477_vm2, %v1471_v28  ;;  %v16864_v35 = vpack.c.bf16 %v15563_v29, %v15562_v30 }
 0x5a1   : > { %v15566_v32 = vpop.permute.xlu1 %15565 }
 0x5a2   : > { %v15568_v34 = vunpack.i.h.bf16 %v15566_v32  ;;  %v15567_v39 = vunpack.i.l.bf16 %v15566_v32  ;;  %13802 = vmatmul.mubr.msk.f32.vlgmr.msra.gmra.mrb[8].mxu0 %vm1477_vm2, %v1470_v31 }
 0x5a3   : > { %14756 = vmatpush3.bf16.msra.mxu0 %v14753_v26 }
 0x5a4   : > { %14758 = vmatprep.subr.bf16.mxu0 %v16864_v35  ;;  %v14761_v43 = vpack.c.bf16 %v15568_v34, %v15567_v39 }
 0x5a5   : > { %v16928_v13 = vpop.permute.xlu1 %15570 }
 0x5a6   : > { %13809 = vmatmul.mubr.msk.f32.vlgmr.msra.gmra.mrb[8].mxu1 %vm1477_vm2, %v1472_v41  ;;  %14762 = vmatprep.subr.bf16.mxu1 %v14761_v43 }
 0x5a7   : > { %14764 = vmatpush3.bf16.msra.mxu1 %v14761_v43 }
 0x602   : > { %v13761_v38 = vpop.f32.mrb[2].mxu0 }
 0x603   : > { %v1554_v45 = vpop.f32.mrb[3].mxu0  ;;  %v2189_v48 = vsel %vm1145_vm0, %v13761_v38, -inf }
 0x604   : > { %2190 = vmax.xlane.f32.xlu1 %v2189_v48  ;;  %v2186_v49 = vsel %vm1145_vm0, %v1554_v45, -inf }
 0x605   : > { %2187 = vmax.xlane.f32.xlu0 %v2186_v49 }
 0x65e   : > { %v13768_v50 = vpop.f32.mrb[2].mxu1 }
 0x65f   : > { %v16871_v51 = vpop.f32.mrb[3].mxu1  ;;  %v2195_v46 = vsel %vm1145_vm0, %v13768_v50, -inf }
 0x660   : > { %2196 = vmax.xlane.f32.xlu0 %v2195_v46  ;;  %v2192_v52 = vsel %vm1145_vm0, %v16871_v51, -inf }
 0x664   : > { %2193 = vmax.xlane.f32.xlu0 %v2192_v52 }
 0x665   : > { %v16876_v53 = vpop.f32.mrb[4].mxu0 }
 0x666   : > { %v16878_v54 = vpop.f32.mrb[5].mxu0  ;;  %v2201_v55 = vsel %vm1145_vm0, %v16876_v53, -inf }
 0x667   : > { %2202 = vmax.xlane.f32.xlu1 %v2201_v55  ;;  %v2198_v56 = vsel %vm1145_vm0, %v16878_v54, -inf }
 0x668   : > { %2199 = vmax.xlane.f32.xlu0 %v2198_v56 }
 0x669   : > { %v16884_v57 = vpop.f32.mrb[4].mxu1 }
 0x66a   : > { %v16886_v58 = vpop.f32.mrb[5].mxu1  ;;  %v2207_v59 = vsel %vm1145_vm0, %v16884_v57, -inf }
 0x66b   : > { %2208 = vmax.xlane.f32.xlu1 %v2207_v59  ;;  %v2204_v60 = vsel %vm1145_vm0, %v16886_v58, -inf }
 0x66c   : > { %2205 = vmax.xlane.f32.xlu0 %v2204_v60 }
 0x66d   : > { %v16892_v61 = vpop.f32.mrb[6].mxu0 }
 0x66e   : > { %v16894_v62 = vpop.f32.mrb[7].mxu0  ;;  %v2213_v63 = vsel %vm1145_vm0, %v16892_v61, -inf }
 0x66f   : > { %2214 = vmax.xlane.f32.xlu1 %v2213_v63  ;;  %v2210_v0 = vsel %vm1145_vm0, %v16894_v62, -inf }
 0x670   : > { %2211 = vmax.xlane.f32.xlu0 %v2210_v0 }
 0x671   : > { %v16900_v1 = vpop.f32.mrb[6].mxu1 }
 0x672   : > { %v16902_v2 = vpop.f32.mrb[7].mxu1  ;;  %v2219_v3 = vsel %vm1145_vm0, %v16900_v1, -inf }
 0x673   : > { %2220 = vmax.xlane.f32.xlu1 %v2219_v3  ;;  %v2216_v4 = vsel %vm1145_vm0, %v16902_v2, -inf }
 0x674   : > { %2217 = vmax.xlane.f32.xlu0 %v2216_v4 }
 0x675   : > { %v16908_v5 = vpop.f32.mrb[8].mxu0 }
 0x676   : > { %v16910_v6 = vpop.f32.mrb[9].mxu0  ;;  %v2225_v7 = vsel %vm1145_vm0, %v16908_v5, -inf }
 0x677   : > { %2226 = vmax.xlane.f32.xlu1 %v2225_v7  ;;  %v2222_v8 = vsel %vm1145_vm0, %v16910_v6, -inf }
 0x678   : > { %2223 = vmax.xlane.f32.xlu0 %v2222_v8 }
 0x679   : > { %v16916_v9 = vpop.f32.mrb[8].mxu1 }
 0x67a   : > { %v16918_v10 = vpop.f32.mrb[9].mxu1  ;;  %v2231_v11 = vsel %vm1145_vm0, %v16916_v9, -inf }
 0x67b   : > { %2232 = vmax.xlane.f32.xlu1 %v2231_v11  ;;  %v2228_v12 = vsel %vm1145_vm0, %v16918_v10, -inf }
 0x67c   : > { %2229 = vmax.xlane.f32.xlu0 %v2228_v12 }
 0x68c   : > { %15580 = vrot.lane.b32.xlu1 %v16779_v36, %s18860_s17 }
 0x691   : > { %v2191_v14 = vpop.xlane.xlu1 %2190 }
 0x692   : > { %15575 = vrot.lane.b32.xlu0 %v16769_v33, %s18860_s17  ;;  %v2188_v15 = vpop.xlane.xlu0 %2187  ;;  %v2235_v16 = vsub.f32 %v13761_v38, %v2191_v14 }
 0x693   : > { %v2234_v17 = vsub.f32 %v1554_v45, %v2188_v15 }
 0x694   : > { %v2252_v18 = vmul.f32 1.442695, %v2235_v16 }
 0x695   : > { %v2250_v19 = vmul.f32 1.442695, %v2234_v17 }
 0x696   : > { %15917 = vpow2.f32 %v2252_v18 }
 0x697   : > { %15919 = vpow2.f32 %v2250_v19 }
 0x6a0   : > { %v16930_v20 = vpop.eup %15917 }
 0x6a1   : > { %v16932_v21 = vpop.eup %15919  ;;  %v2285_v36 = vsel %vm1145_vm0, %v16930_v20, 0.0 }
 0x6a2   : > { %v2282_v33 = vsel %vm1145_vm0, %v16932_v21, 0.0 }
 0x6b0   : > { %2286 = vadd.xlane.f32.xlu1 %v2285_v36 }
 0x6b1   : > { %2283 = vadd.xlane.f32.xlu0 %v2282_v33 }
 0x6ed   : > { %v2197_v22 = vpop.xlane.xlu0 %2196 }
 0x6ee   : > { %v2237_v23 = vsub.f32 %v13768_v50, %v2197_v22 }
 0x6f0   : > { %v2256_v24 = vmul.f32 1.442695, %v2237_v23 }
 0x6f1   : > { %v2194_v25 = vpop.xlane.xlu0 %2193 }
 0x6f2   : > { %15921 = vpow2.f32 %v2256_v24  ;;  %v2236_v26 = vsub.f32 %v16871_v51, %v2194_v25 }
 0x6f4   : > { %v2254_v27 = vmul.f32 1.442695, %v2236_v26  ;;  %v2203_v28 = vpop.xlane.xlu1 %2202 }
 0x6f5   : > { %v2239_v29 = vsub.f32 %v16876_v53, %v2203_v28  ;;  %v2200_v30 = vpop.xlane.xlu0 %2199 }
 0x6f6   : > { %15923 = vpow2.f32 %v2254_v27  ;;  %v2238_v31 = vsub.f32 %v16878_v54, %v2200_v30 }
 0x6f7   : > { %v2260_v32 = vmul.f32 1.442695, %v2239_v29 }
 0x6f8   : > { %v2258_v34 = vmul.f32 1.442695, %v2238_v31  ;;  %v2209_v39 = vpop.xlane.xlu1 %2208 }
 0x6f9   : > { %15925 = vpow2.f32 %v2260_v32  ;;  %v2241_v41 = vsub.f32 %v16884_v57, %v2209_v39  ;;  %v2206_v43 = vpop.xlane.xlu0 %2205 }
 0x6fa   : > { %15927 = vpow2.f32 %v2258_v34  ;;  %v2240_v38 = vsub.f32 %v16886_v58, %v2206_v43 }
 0x6fb   : > { %v2264_v45 = vmul.f32 1.442695, %v2241_v41 }
 0x6fc   : > { %v16943_v48 = vpop.eup %15921  ;;  %v2262_v49 = vmul.f32 1.442695, %v2240_v38  ;;  %v2215_v50 = vpop.xlane.xlu1 %2214 }
 0x6fd   : > { %15929 = vpow2.f32 %v2264_v45  ;;  %v2243_v51 = vsub.f32 %v16892_v61, %v2215_v50  ;;  %v2212_v46 = vpop.xlane.xlu0 %2211  ;;  %v2291_v52 = vsel %vm1145_vm0, %v16943_v48, 0.0 }
 0x6fe   : > { %15931 = vpow2.f32 %v2262_v49  ;;  %v2242_v53 = vsub.f32 %v16894_v62, %v2212_v46  ;;  %2292 = vadd.xlane.f32.xlu1 %v2291_v52 }
 0x6ff   : > { %v2268_v54 = vmul.f32 1.442695, %v2243_v51 }
 0x700   : > { %v16949_v55 = vpop.eup %15923  ;;  %v2266_v56 = vmul.f32 1.442695, %v2242_v53  ;;  %v2221_v57 = vpop.xlane.xlu1 %2220 }
 0x701   : > { %15933 = vpow2.f32 %v2268_v54  ;;  %v2245_v58 = vsub.f32 %v16900_v1, %v2221_v57  ;;  %v2218_v59 = vpop.xlane.xlu0 %2217  ;;  %v2288_v60 = vsel %vm1145_vm0, %v16949_v55, 0.0  ;;  %v15572_v57 = vunpack.i.l.bf16 %v16928_v13 }
 0x702   : > { %15935 = vpow2.f32 %v2266_v56  ;;  %v2244_v61 = vsub.f32 %v16902_v2, %v2218_v59  ;;  %2289 = vadd.xlane.f32.xlu0 %v2288_v60  ;;  %v15573_v56 = vunpack.i.h.bf16 %v16928_v13 }
 0x703   : > { %v16955_v63 = vpop.eup %15925  ;;  %v2272_v62 = vmul.f32 1.442695, %v2245_v58 }
 0x704   : > { %v16957_v0 = vpop.eup %15927  ;;  %v2270_v3 = vmul.f32 1.442695, %v2244_v61  ;;  %v2227_v4 = vpop.xlane.xlu1 %2226  ;;  %v2297_v7 = vsel %vm1145_vm0, %v16955_v63, 0.0 }
 0x705   : > { %15937 = vpow2.f32 %v2272_v62  ;;  %v2247_v1 = vsub.f32 %v16908_v5, %v2227_v4  ;;  %2298 = vadd.xlane.f32.xlu1 %v2297_v7  ;;  %v2224_v8 = vpop.xlane.xlu0 %2223  ;;  %v2294_v11 = vsel %vm1145_vm0, %v16957_v0, 0.0 }
 0x706   : > { %15939 = vpow2.f32 %v2270_v3  ;;  %v2246_v2 = vsub.f32 %v16910_v6, %v2224_v8  ;;  %2295 = vadd.xlane.f32.xlu0 %v2294_v11 }
 0x707   : > { %v16965_v12 = vpop.eup %15929  ;;  %v2276_v14 = vmul.f32 1.442695, %v2247_v1 }
 0x708   : > { %v16967_v15 = vpop.eup %15931  ;;  %v2274_v16 = vmul.f32 1.442695, %v2246_v2  ;;  %v2233_v17 = vpop.xlane.xlu1 %2232  ;;  %v2303_v18 = vsel %vm1145_vm0, %v16965_v12, 0.0 }
 0x709   : > { %15941 = vpow2.f32 %v2276_v14  ;;  %v2249_v5 = vsub.f32 %v16916_v9, %v2233_v17  ;;  %2304 = vadd.xlane.f32.xlu1 %v2303_v18  ;;  %v2230_v19 = vpop.xlane.xlu0 %2229  ;;  %v2300_v36 = vsel %vm1145_vm0, %v16967_v15, 0.0 }
 0x70a   : > { %15943 = vpow2.f32 %v2274_v16  ;;  %v2248_v6 = vsub.f32 %v16918_v10, %v2230_v19  ;;  %2301 = vadd.xlane.f32.xlu0 %v2300_v36 }
 0x70b   : > { %v16975_v33 = vpop.eup %15933  ;;  %v2280_v22 = vmul.f32 1.442695, %v2249_v5 }
 0x70c   : > { %v16977_v23 = vpop.eup %15935  ;;  %v2278_v24 = vmul.f32 1.442695, %v2248_v6  ;;  %v2309_v25 = vsel %vm1145_vm0, %v16975_v33, 0.0  ;;  %v15581_v51 = vpop.permute.xlu1 %15580 }
 0x70d   : > { %15945 = vpow2.f32 %v2280_v22  ;;  %2310 = vadd.xlane.f32.xlu1 %v2309_v25  ;;  %v15576_v9 = vpop.permute.xlu0 %15575  ;;  %v2306_v26 = vsel %vm1145_vm0, %v16977_v23, 0.0  ;;  %v15583_v4 = vunpack.i.h.bf16 %v15581_v51  ;;  %v15582_v7 = vunpack.i.l.bf16 %v15581_v51 }
 0x70e   : > { %15947 = vpow2.f32 %v2278_v24  ;;  %v15578_v27 = vunpack.i.h.bf16 %v15576_v9  ;;  %v15577_v28 = vunpack.i.l.bf16 %v15576_v9  ;;  %2307 = vadd.xlane.f32.xlu0 %v2306_v26 }
 0x70f   : > { %v16983_v10 = vpop.eup %15937  ;;  %v14773_v17 = vpack.c.bf16 %v15583_v4, %v15582_v7 }
 0x710   : > { %v16985_v29 = vpop.eup %15939  ;;  %v2315_v30 = vsel %vm1145_vm0, %v16983_v10, 0.0  ;;  %v16989_v31 = vpack.c.bf16 %v15578_v27, %v15577_v28 }
 0x711   : > { %2316 = vadd.xlane.f32.xlu1 %v2315_v30  ;;  %v2312_v32 = vsel %vm1145_vm0, %v16985_v29, 0.0 }
 0x712   : > { %2313 = vadd.xlane.f32.xlu0 %v2312_v32  ;;  %14770 = vmatprep.subr.bf16.mxu1 %v16989_v31 }
 0x713   : > { %v16994_v34 = vpop.eup %15941 }
 0x714   : > { %v16996_v39 = vpop.eup %15943  ;;  %v2321_v41 = vsel %vm1145_vm0, %v16994_v34, 0.0 }
 0x715   : > { %2322 = vadd.xlane.f32.xlu1 %v2321_v41  ;;  %v2318_v43 = vsel %vm1145_vm0, %v16996_v39, 0.0 }
 0x716   : > { %2319 = vadd.xlane.f32.xlu0 %v2318_v43 }
 0x717   : > { %v17002_v38 = vpop.eup %15945 }
 0x718   : > { %v17004_v45 = vpop.eup %15947  ;;  %v2327_v49 = vsel %vm1145_vm0, %v17002_v38, 0.0 }
 0x719   : > { %2328 = vadd.xlane.f32.xlu1 %v2327_v49  ;;  %v2324_v50 = vsel %vm1145_vm0, %v17004_v45, 0.0 }
 0x71a   : > { %2325 = vadd.xlane.f32.xlu0 %v2324_v50 }
 0x72a   : > { %15590 = vrot.lane.b32.xlu1 %v16801_v47, %s18860_s17 }
 0x730   : > { %15585 = vrot.lane.b32.xlu0 %v16787_v40, %s18860_s17  ;;  %v14765_v40 = vpack.c.bf16 %v15573_v56, %v15572_v57  ;;  %s18866_s17 = smov 4  }
 0x73d   : > { %v2287_v46 = vpop.xlane.xlu1 %2286 }
 0x73e   : > { %15949 = vrcp.f32 %v2287_v46  ;;  %v2284_v52 = vpop.xlane.xlu0 %2283 }
 0x73f   : > { %15951 = vrcp.f32 %v2284_v52 }
 0x748   : > { %v15950_v53 = vpop.eup %15949 }
 0x749   : > { %v15952_v54 = vpop.eup %15951  ;;  %v2347_v59 = vmul.f32 %v15950_v53, %v16930_v20 }
 0x74a   : > { %v2346_v58 = vmul.f32 %v15952_v54, %v16932_v21 }
 0x74c   : > { %13815 = vmatprep.mubr.msk.f32.mxu0 %vm1145_vm0, %v2346_v58 }
 0x74d   : > { %13816 = vmatmul.mubr.msk.f32.vlgmr.msra.gmra.mrb[10].mxu0 %vm1145_vm0, %v2347_v59 }
 0x74e   : > { %14760 = vmatpush3.bf16.msra.mxu0 %v16864_v35 }
 0x74f   : > { %14766 = vmatprep.subr.bf16.mxu0 %v14765_v40 }
 0x78b   : > { %v2293_v47 = vpop.xlane.xlu1 %2292 }
 0x78c   : > { %15953 = vrcp.f32 %v2293_v47 }
 0x78f   : > { %v2290_v60 = vpop.xlane.xlu0 %2289 }
 0x790   : > { %15955 = vrcp.f32 %v2290_v60 }
 0x792   : > { %v2299_v61 = vpop.xlane.xlu1 %2298 }
 0x793   : > { %15957 = vrcp.f32 %v2299_v61  ;;  %v2296_v62 = vpop.xlane.xlu0 %2295 }
 0x794   : > { %15959 = vrcp.f32 %v2296_v62  ;;  %v3135_v62 = vld [vmem:[%s16507_s24 + $0x10] sm:$0xff] }
 0x796   : > { %v2305_v13 = vpop.xlane.xlu1 %2304  ;;  %v15954_v20 = vpop.eup %15953 }
 0x797   : > { %15961 = vrcp.f32 %v2305_v13  ;;  %v2302_v21 = vpop.xlane.xlu0 %2301  ;;  %v2349_v11 = vmul.f32 %v15954_v20, %v16943_v48  ;;  %v3136_v13 = vld [vmem:[%s16507_s24 + $0x18] sm:$0xff] }
 0x798   : > { %15963 = vrcp.f32 %v2302_v21  ;;  %v14789_v20 = vpack.c.bf16 %v3136_v13, %v3135_v62 }
 0x79a   : > { %v15956_v3 = vpop.eup %15955  ;;  %v2311_v1 = vpop.xlane.xlu1 %2310 }
 0x79b   : > { %15965 = vrcp.f32 %v2311_v1  ;;  %v2308_v35 = vpop.xlane.xlu0 %2307  ;;  %v2348_v8 = vmul.f32 %v15956_v3, %v16949_v55 }
 0x79c   : > { %15967 = vrcp.f32 %v2308_v35 }
 0x79d   : > { %v15958_v2 = vpop.eup %15957  ;;  %13822 = vmatprep.mubr.msk.f32.mxu0 %vm1145_vm0, %v2348_v8 }
 0x79e   : > { %v15960_v14 = vpop.eup %15959  ;;  %v2317_v16 = vpop.xlane.xlu1 %2316  ;;  %13823 = vmatmul.mubr.msk.f32.vlgmr.msra.gmra.mrb[12].mxu0 %vm1145_vm0, %v2349_v11  ;;  %v2351_v55 = vmul.f32 %v15958_v2, %v16955_v63 }
 0x79f   : > { %15969 = vrcp.f32 %v2317_v16  ;;  %14768 = vmatpush3.bf16.msra.mxu0 %v14765_v40  ;;  %v2314_v18 = vpop.xlane.xlu0 %2313  ;;  %v2350_v5 = vmul.f32 %v15960_v14, %v16957_v0  ;;  %v3134_v40 = vld [vmem:[%s16507_s24 + $0x8] sm:$0xff] }
 0x7a0   : > { %14774 = vmatprep.subr.bf16.mxu0 %v14773_v17  ;;  %15971 = vrcp.f32 %v2314_v18 }
 0x7a1   : > { %v15962_v19 = vpop.eup %15961  ;;  %13829 = vmatprep.mubr.msk.f32.mxu1 %vm1145_vm0, %v2350_v5 }
 0x7a2   : > { %v15964_v48 = vpop.eup %15963  ;;  %v2323_v36 = vpop.xlane.xlu1 %2322  ;;  %13830 = vmatmul.mubr.msk.f32.vlgmr.msra.gmra.mrb[10].mxu1 %vm1145_vm0, %v2351_v55  ;;  %v2353_v24 = vmul.f32 %v15962_v19, %v16965_v12 }
 0x7a3   : > { %14772 = vmatpush3.bf16.msra.mxu1 %v16989_v31  ;;  %v2320_v6 = vpop.xlane.xlu0 %2319  ;;  %v2352_v22 = vmul.f32 %v15964_v48, %v16967_v15 }
 0x7a4   : > { %15973 = vrcp.f32 %v2320_v6 }
 0x7a5   : > { %v15966_v0 = vpop.eup %15965  ;;  %15975 = vrcp.f32 %v2323_v36  ;;  %13836 = vmatprep.mubr.msk.f32.mxu0 %vm1145_vm0, %v2352_v22 }
 0x7a6   : > { %v15968_v63 = vpop.eup %15967  ;;  %v2329_v25 = vpop.xlane.xlu1 %2328  ;;  %13837 = vmatmul.mubr.msk.f32.vlgmr.msra.gmra.mrb[14].mxu0 %vm1145_vm0, %v2353_v24  ;;  %v2355_v27 = vmul.f32 %v15966_v0, %v16975_v33 }
 0x7a7   : > { %15977 = vrcp.f32 %v2329_v25  ;;  %14776 = vmatpush3.bf16.msra.mxu0 %v14773_v17  ;;  %v2326_v9 = vpop.xlane.xlu0 %2325  ;;  %v2354_v26 = vmul.f32 %v15968_v63, %v16977_v23 }
 0x7a8   : > { %15979 = vrcp.f32 %v2326_v9 }
 0x7a9   : > { %v15970_v15 = vpop.eup %15969  ;;  %13843 = vmatprep.mubr.msk.f32.mxu1 %vm1145_vm0, %v2354_v26 }
 0x7aa   : > { %v15972_v12 = vpop.eup %15971  ;;  %v15591_v28 = vpop.permute.xlu1 %15590  ;;  %13844 = vmatmul.mubr.msk.f32.vlgmr.msra.gmra.mrb[12].mxu1 %vm1145_vm0, %v2355_v27  ;;  %v2357_v50 = vmul.f32 %v15970_v15, %v16983_v10 }
 0x7ab   : > { %v15593_v30 = vunpack.i.h.bf16 %v15591_v28  ;;  %v15592_v31 = vunpack.i.l.bf16 %v15591_v28  ;;  %v15586_v32 = vpop.permute.xlu0 %15585  ;;  %v2356_v41 = vmul.f32 %v15972_v12, %v16985_v29 }
 0x7ac   : > { %v15588_v43 = vunpack.i.h.bf16 %v15586_v32  ;;  %v15587_v49 = vunpack.i.l.bf16 %v15586_v32 }
 0x7ad   : > { %13850 = vmatprep.mubr.msk.f32.mxu0 %vm1145_vm0, %v2356_v41  ;;  %v14781_v23 = vpack.c.bf16 %v15593_v30, %v15592_v31 }
 0x7ae   : > { %v15974_v33 = vpop.eup %15973  ;;  %13851 = vmatmul.mubr.msk.f32.vlgmr.msra.gmra.mrb[16].mxu0 %vm1145_vm0, %v2357_v50  ;;  %v14777_v51 = vpack.c.bf16 %v15588_v43, %v15587_v49 }
 0x7af   : > { %v15976_v46 = vpop.eup %15975  ;;  %14782 = vmatprep.subr.bf16.mxu0 %v14781_v23  ;;  %v2358_v52 = vmul.f32 %v15974_v33, %v16996_v39 }
 0x7b0   : > { %14778 = vmatprep.subr.bf16.mxu1 %v14777_v51  ;;  %14784 = vmatpush3.bf16.msra.mxu0 %v14781_v23  ;;  %v2359_v10 = vmul.f32 %v15976_v46, %v16994_v34  ;;  %v12827_v23 = vld [vmem:[%s16512_s30] ss:$0 sm:$0xff] }
 0x7b1   : > { %v15978_v53 = vpop.eup %15977  ;;  %14780 = vmatpush3.bf16.msra.mxu1 %v14777_v51  ;;  %13857 = vmatprep.mubr.msk.f32.mxu1 %vm1145_vm0, %v2358_v52 }
 0x7b2   : > { %v15980_v29 = vpop.eup %15979  ;;  %v2361_v56 = vmul.f32 %v15978_v53, %v17002_v38 }
 0x7b3   : > { %v2360_v54 = vmul.f32 %v15980_v29, %v17004_v45  ;;  %v3133_v45 = vld [vmem:[%s16507_s24] sm:$0xff] }
 0x7b4   : > { %13858 = vmatmul.mubr.msk.f32.vlgmr.msra.gmra.mrb[14].mxu1 %vm1145_vm0, %v2359_v10  ;;  %v14785_v47 = vpack.c.bf16 %v3134_v40, %v3133_v45  ;;  %v3273_v45 = vld [vmem:[%s16527_s20] sm:$0xff]  ;;  %v3274_v40 = vld [vmem:[%s16527_s20 + $0x8] sm:$0xff] }
 0x7b5   : > { %13864 = vmatprep.mubr.msk.f32.mxu0 %vm1145_vm0, %v2360_v54 }
 0x7b6   : > { %13865 = vmatmul.mubr.msk.f32.vlgmr.msra.gmra.mrb[18].mxu0 %vm1145_vm0, %v2361_v56  ;;  %14786 = vmatprep.subr.bf16.mxu1 %v14785_v47 }
 0x7b7   : > { %14788 = vmatpush3.bf16.msra.mxu1 %v14785_v47  ;;  %v3275_v47 = vld [vmem:[%s16527_s20 + $0x10] sm:$0xff] }
 0x7b8   : > { %14790 = vmatprep.subr.bf16.mxu1 %v14789_v20 }
 0x7bb   : > { %14792 = vmatpush3.bf16.msra.mxu1 %v14789_v20 }
 0x820   : > { %v13817_v39 = vpop.f32.mrb[10].mxu0 }
 0x821   : > { %v2440_v57 = vpop.f32.mrb[11].mxu0 }
 0x871   : > { %v13824_v58 = vpop.f32.mrb[12].mxu0 }
 0x872   : > { %3062 = vrot.lane.b32.xlu1 %v13824_v58, %s18866_s17  ;;  %v2527_v59 = vpop.f32.mrb[13].mxu0 }
 0x873   : > { %3060 = vrot.lane.b32.xlu0 %v2527_v59, %s18866_s17  ;;  %s18878_s17 = smov 16  }
 0x875   : > { %v13831_v34 = vpop.f32.mrb[10].mxu1 }
 0x876   : > { %3070 = vrot.lane.b32.xlu1 %v13831_v34, %s18868_s15  ;;  %v2614_v38 = vpop.f32.mrb[11].mxu1 }
 0x877   : > { %3068 = vrot.lane.b32.xlu0 %v2614_v38, %s18868_s15  ;;  %s18880_s15 = smov 20  }
 0x879   : > { %v13838_v60 = vpop.f32.mrb[14].mxu0 }
 0x87a   : > { %3078 = vrot.lane.b32.xlu1 %v13838_v60, %s18870_s13  ;;  %v2701_v61 = vpop.f32.mrb[15].mxu0  ;;  %v14793_v60 = vpack.c.bf16 %v3274_v40, %v3273_v45 }
 0x87b   : > { %3076 = vrot.lane.b32.xlu0 %v2701_v61, %s18870_s13  ;;  %s18876_s13 = smov 24   ;;  %v3276_v61 = vld [vmem:[%s16527_s20 + $0x18] sm:$0xff] }
 0x87c   : > { %v14797_v62 = vpack.c.bf16 %v3276_v61, %v3275_v47  ;;  %14794 = vmatprep.subr.bf16.mxu0 %v14793_v60 }
 0x87d   : > { %v13845_v21 = vpop.f32.mrb[12].mxu1  ;;  %14796 = vmatpush3.bf16.msra.mxu0 %v14793_v60 }
 0x87e   : > { %3086 = vrot.lane.b32.xlu1 %v13845_v21, %s18878_s17  ;;  %v2788_v3 = vpop.f32.mrb[13].mxu1  ;;  %14798 = vmatprep.subr.bf16.mxu0 %v14797_v62 }
 0x87f   : > { %3084 = vrot.lane.b32.xlu0 %v2788_v3, %s18878_s17  ;;  %s18962_s17 = sld [smem:[#allocation20_spill]] }
 0x881   : > { %v13852_v4 = vpop.f32.mrb[16].mxu0  ;;  %14800 = vmatpush3.bf16.msra.mxu0 %v14797_v62 }
 0x882   : > { %v2875_v7 = vpop.f32.mrb[17].mxu0  ;;  %3094 = vrot.lane.b32.xlu1 %v13852_v4, %s18880_s15 }
 0x883   : > { %3092 = vrot.lane.b32.xlu0 %v2875_v7, %s18880_s15  ;;  %s18963_s15 = sld [smem:[#allocation22_spill]] }
 0x887   : > { %v13859_v1 = vpop.f32.mrb[14].mxu1 }
 0x888   : > { %3102 = vrot.lane.b32.xlu1 %v13859_v1, %s18876_s13  ;;  %v2962_v35 = vpop.f32.mrb[15].mxu1 }
 0x889   : > { %v13866_v8 = vpop.f32.mrb[18].mxu0  ;;  %3100 = vrot.lane.b32.xlu0 %v2962_v35, %s18876_s13  ;;  %s18961_s13 = sld [smem:[#allocation21_spill]]  ;;  %v12828_v35 = vld [vmem:[%s18941_s6] ss:$0 sm:$0xff] }
 0x88a   : > { %v3049_v11 = vpop.f32.mrb[19].mxu0 }
 0x88c   : > { %3110 = vrot.lane.b32.xlu1 %v13866_v8, %s18874_s16 }
 0x88d   : > { %3108 = vrot.lane.b32.xlu0 %v3049_v11, %s18874_s16  ;;  %s18960_s16 = sld [smem:[#allocation19_spill]] }
 0x893   : > { %v12829_v11 = vld [vmem:[%s18960_s16] ss:$0 sm:$0xff] }
 0x8e4   : > { %v3063_v2 = vpop.permute.xlu1 %3062 }
 0x8e5   : > { %v3061_v14 = vpop.permute.xlu0 %3060  ;;  %v3115_v24 = vsel %vm1477_vm2, %v13817_v39, %v3063_v2 }
 0x8e6   : > { %v3114_v6 = vsel %vm1477_vm2, %v2440_v57, %v3061_v14 }
 0x8e8   : > { %v3071_v16 = vpop.permute.xlu1 %3070 }
 0x8e9   : > { %v3069_v17 = vpop.permute.xlu0 %3068  ;;  %v3118_v25 = vsel %vm3116_vm4, %v3115_v24, %v3071_v16  ;;  %v3387_v24 = vld [vmem:[%s18961_s13 + $0x20] sm:$0xff] }
 0x8ea   : > { %v3117_v0 = vsel %vm3116_vm4, %v3114_v6, %v3069_v17  ;;  %v3386_v6 = vld [vmem:[%s18961_s13 + $0x18] sm:$0xff] }
 0x8ec   : > { %v3079_v18 = vpop.permute.xlu1 %3078 }
 0x8ed   : > { %v3077_v5 = vpop.permute.xlu0 %3076  ;;  %v3121_v26 = vsel %vm3119_vm5, %v3118_v25, %v3079_v18  ;;  %v3389_v25 = vld [vmem:[%s18961_s13 + $0x30] sm:$0xff] }
 0x8ee   : > { %v3120_v9 = vsel %vm3119_vm5, %v3117_v0, %v3077_v5  ;;  %v3388_v0 = vld [vmem:[%s18961_s13 + $0x28] sm:$0xff] }
 0x8f0   : > { %v3087_v55 = vpop.permute.xlu1 %3086 }
 0x8f1   : > { %v3085_v19 = vpop.permute.xlu0 %3084  ;;  %v3123_v15 = vsel %vm1145_vm0, %v3121_v26, %v3087_v55  ;;  %v3383_v55 = vld [vmem:[%s18961_s13] sm:$0xff] }
 0x8f2   : > { %v3122_v27 = vsel %vm1145_vm0, %v3120_v9, %v3085_v19  ;;  %v3384_v19 = vld [vmem:[%s18961_s13 + $0x8] sm:$0xff]  ;;  %v3390_v9 = vld [vmem:[%s18961_s13 + $0x38] sm:$0xff] }
 0x8f3   : > { %v14813_v26 = vpack.c.bf16 %v3390_v9, %v3389_v25 }
 0x8f4   : > { %v3095_v48 = vpop.permute.xlu1 %3094 }
 0x8f5   : > { %v3093_v36 = vpop.permute.xlu0 %3092  ;;  %v3126_v30 = vsel %vm3124_vm6, %v3123_v15, %v3095_v48  ;;  %v14801_v48 = vpack.c.bf16 %v3384_v19, %v3383_v55  ;;  %v3392_v15 = vld [vmem:[%s18961_s13 + $0x48] sm:$0xff] }
 0x8f6   : > { %v3125_v12 = vsel %vm3124_vm6, %v3122_v27, %v3093_v36  ;;  %v3385_v36 = vld [vmem:[%s18961_s13 + $0x10] sm:$0xff]  ;;  %v3391_v27 = vld [vmem:[%s18961_s13 + $0x40] sm:$0xff] }
 0x8f7   : > { %14802 = vmatprep.subr.bf16.mxu1 %v14801_v48 }
 0x8fa   : > { %v3103_v22 = vpop.permute.xlu1 %3102 }
 0x8fb   : > { %v3101_v63 = vpop.permute.xlu0 %3100  ;;  %v3129_v41 = vsel %vm3127_vm7, %v3126_v30, %v3103_v22  ;;  %v14805_v22 = vpack.c.bf16 %v3386_v6, %v3385_v36  ;;  %v3394_v30 = vld [vmem:[%s18961_s13 + $0x58] sm:$0xff]  ;;  %v12838_v36 = vld [vmem:[%s18939_s14 + $0x20] sm:$0xff]  ;;  %v12839_v6 = vld [vmem:[%s18939_s14 + $0x28] sm:$0xff] }
 0x8fc   : > { %v3128_v31 = vsel %vm3127_vm7, %v3125_v12, %v3101_v63  ;;  %v14809_v63 = vpack.c.bf16 %v3388_v0, %v3387_v24  ;;  %v3393_v12 = vld [vmem:[%s18961_s13 + $0x50] sm:$0xff]  ;;  %v14833_v24 = vpack.c.bf16 %v12839_v6, %v12838_v36  ;;  %v12841_v0 = vld [vmem:[%s18939_s14 + $0x38] sm:$0xff] }
 0x8fe   : > { %v3111_v28 = vpop.permute.xlu1 %3110  ;;  %14834 = vmatprep.subr.bf16.mxu0 %v14833_v24 }
 0x8ff   : > { %v3109_v32 = vpop.permute.xlu0 %3108  ;;  %v3132_v49 = vsel %vm3130_vm8, %v3129_v41, %v3111_v28  ;;  %v14817_v28 = vpack.c.bf16 %v3392_v15, %v3391_v27  ;;  %v3396_v41 = vld [vmem:[%s18961_s13 + $0x68] sm:$0xff] }
 0x900   : > { %v3131_v43 = vsel %vm3130_vm8, %v3128_v31, %v3109_v32  ;;  %v14821_v31 = vpack.c.bf16 %v3394_v30, %v3393_v12  ;;  %v3395_v32 = vld [vmem:[%s18961_s13 + $0x60] sm:$0xff] }
 0x901   : > { %13875 = vmatprep.mubr.msk.f32.mxu1 %vm1229_vm1, %v3131_v43  ;;  %v14825_v43 = vpack.c.bf16 %v3396_v41, %v3395_v32  ;;  %v12836_v30 = vld [vmem:[%s18942_s3 + $0x1] ss:$0 sm:$0xff] }
 0x902   : > { %13876 = vmatmul.mubr.msk.f32.vlgmr.msra.gmra.mrb[16].mxu1 %vm1229_vm1, %v3132_v49  ;;  %v3397_v49 = vld [vmem:[%s18961_s13 + $0x70] sm:$0xff] }
 0x903   : > { %14804 = vmatpush3.bf16.msra.mxu1 %v14801_v48 }
 0x904   : > { %14806 = vmatprep.subr.bf16.mxu1 %v14805_v22 }
 0x907   : > { %14808 = vmatpush3.bf16.msra.mxu1 %v14805_v22  ;;  %v12840_v22 = vld [vmem:[%s18939_s14 + $0x30] sm:$0xff] }
 0x908   : > { %14810 = vmatprep.subr.bf16.mxu1 %v14809_v63 }
 0x90b   : > { %14812 = vmatpush3.bf16.msra.mxu1 %v14809_v63  ;;  %v14837_v63 = vpack.c.bf16 %v12841_v0, %v12840_v22 }
 0x90c   : > { %14814 = vmatprep.subr.bf16.mxu1 %v14813_v26 }
 0x90f   : > { %14816 = vmatpush3.bf16.msra.mxu1 %v14813_v26 }
 0x910   : > { %14818 = vmatprep.subr.bf16.mxu1 %v14817_v28 }
 0x913   : > { %14820 = vmatpush3.bf16.msra.mxu1 %v14817_v28 }
 0x914   : > { %14822 = vmatprep.subr.bf16.mxu1 %v14821_v31 }
 0x917   : > { %14824 = vmatpush3.bf16.msra.mxu1 %v14821_v31 }
 0x918   : > { %14826 = vmatprep.subr.bf16.mxu1 %v14825_v43 }
 0x91b   : > { %14828 = vmatpush3.bf16.msra.mxu1 %v14825_v43  ;;  %v12837_v43 = vld [vmem:[%s18940_s8 + $0x1] ss:$0 sm:$0xff] }
 0x9d5   : > { %v13877_v50 = vpop.f32.mrb[16].mxu1 }
 0x9d6   : > { %v3219_v33 = vadd.f32 %v13877_v50, %v16706_v42  ;;  %v3209_v51 = vpop.f32.mrb[17].mxu1  ;;  %v3398_v50 = vld [vmem:[%s18961_s13 + $0x78] sm:$0xff] }
 0x9d7   : > { %v3218_v46 = vadd.f32 %v3209_v51, %v16701_v37 }
 0x9d8   : > { %v17087_v52 = vadd.f32 %v12827_v23, %v3219_v33  ;;  %v12830_v33 = vld [vmem:[%s18962_s17] ss:$0 sm:$0xff] }
 0x9d9   : > { %v17089_v53 = vadd.f32 %v12827_v23, %v3218_v46  ;;  %v14829_v23 = vpack.c.bf16 %v3398_v50, %v3397_v49 }
 0x9da   : > { %v3234_v29 = vsel %vm1229_vm1, %v17087_v52, 0.0 }
 0x9db   : > { %3235 = vadd.xlane.f32.xlu1 %v3234_v29  ;;  %v3231_v10 = vsel %vm1229_vm1, %v17089_v53, 0.0  ;;  %14830 = vmatprep.subr.bf16.mxu1 %v14829_v23 }
 0x9dc   : > { %3232 = vadd.xlane.f32.xlu0 %v3231_v10  ;;  %14832 = vmatpush3.bf16.msra.mxu1 %v14829_v23 }
 0xa68   : > { %v3236_v54 = vpop.xlane.xlu1 %3235 }
 0xa69   : > { %v3238_v42 = vmul.f32 0.03125, %v3236_v54  ;;  %v3233_v56 = vpop.xlane.xlu0 %3232 }
 0xa6a   : > { %v3237_v37 = vmul.f32 0.03125, %v3233_v56 }
 0xa6b   : > { %v3240_v39 = vsub.f32 %v17087_v52, %v3238_v42 }
 0xa6c   : > { %v3239_v57 = vsub.f32 %v17089_v53, %v3237_v37 }
 0xa6d   : > { %v3242_v34 = vmul.f32 %v3240_v39, %v3240_v39 }
 0xa6e   : > { %v3241_v58 = vmul.f32 %v3239_v57, %v3239_v57 }
 0xa6f   : > { %v3246_v38 = vsel %vm1229_vm1, %v3242_v34, 0.0 }
 0xa70   : > { %v3243_v59 = vsel %vm1229_vm1, %v3241_v58, 0.0 }
 0xa71   : > { %3244 = vadd.xlane.f32.xlu0 %v3243_v59 }
 0xa75   : > { %3247 = vadd.xlane.f32.xlu0 %v3246_v38 }
 0xafe   : > { %v3245_v13 = vpop.xlane.xlu0 %3244 }
 0xaff   : > { %v3249_v21 = vmul.f32 0.03125, %v3245_v13 }
 0xb01   : > { %v3251_v20 = vadd.f32 1e-05, %v3249_v21 }
 0xb02   : > { %v3248_v3 = vpop.xlane.xlu0 %3247 }
 0xb03   : > { %15981 = vrsqrt.f32 %v3251_v20  ;;  %v3250_v4 = vmul.f32 0.03125, %v3248_v3  ;;  %v12833_v3 = vld [vmem:[%s18963_s15] ss:$0 sm:$0xff] }
 0xb05   : > { %v3252_v7 = vadd.f32 1e-05, %v3250_v4 }
 0xb07   : > { %15983 = vrsqrt.f32 %v3252_v7 }
 0xb0d   : > { %v15982_v1 = vpop.eup %15981 }
 0xb0e   : > { %v3255_v8 = vmul.f32 %v15982_v1, %v3239_v57 }
 0xb10   : > { %v3263_v2 = vmul.f32 %v12828_v35, %v3255_v8 }
 0xb11   : > { %v15984_v14 = vpop.eup %15983 }
 0xb12   : > { %v3256_v16 = vmul.f32 %v15984_v14, %v3240_v39  ;;  %v3271_v17 = vadd.f32 %v12829_v11, %v3263_v2 }
 0xb14   : > { %v3264_v18 = vmul.f32 %v12828_v35, %v3256_v16  ;;  %13886 = vmatprep.mubr.msk.f32.mxu0 %vm1229_vm1, %v3271_v17 }
 0xb16   : > { %v3272_v5 = vadd.f32 %v12829_v11, %v3264_v18 }
 0xb18   : > { %13887 = vmatmul.mubr.msk.f32.vlgmr.msra.gmra.mrb[20].mxu0 %vm1229_vm1, %v3272_v5 }
 0xb19   : > { %14836 = vmatpush3.bf16.msra.mxu0 %v14833_v24 }
 0xb1a   : > { %14838 = vmatprep.subr.bf16.mxu0 %v14837_v63 }
 0xb1d   : > { %14840 = vmatpush3.bf16.msra.mxu0 %v14837_v63 }
 0xbeb   : > { %v13888_v51 = vpop.f32.mrb[20].mxu0 }
 0xbec   : > { %v3362_v46 = vadd.f32 %v13888_v51, %v12830_v33  ;;  %v3356_v29 = vpop.f32.mrb[21].mxu0  ;;  %v12843_v51 = vld [vmem:[%s16502_s19 + $0x1] ss:$0 sm:$0xff] }
 0xbed   : > { %v3357_v10 = vadd.f32 %v12830_v33, %v3356_v29 }
 0xbee   : > { %v3366_v54 = vmul.f32 %v3362_v46, %v3362_v46 }
 0xbef   : > { %v3365_v42 = vmul.f32 %v3357_v10, %v3357_v10 }
 0xbf0   : > { %v3368_v56 = vmul.f32 %v3366_v54, %v3362_v46 }
 0xbf1   : > { %v3367_v37 = vmul.f32 %v3365_v42, %v3357_v10 }
 0xbf2   : > { %v3370_v39 = vmul.f32 0.044715, %v3368_v56 }
 0xbf3   : > { %v3369_v57 = vmul.f32 0.044715, %v3367_v37 }
 0xbf4   : > { %v3372_v58 = vadd.f32 %v3370_v39, %v3362_v46 }
 0xbf5   : > { %v3371_v59 = vadd.f32 %v3369_v57, %v3357_v10 }
 0xbf6   : > { %v3374_v34 = vmul.f32 0.7978846, %v3372_v58 }
 0xbf7   : > { %v3373_v38 = vmul.f32 0.7978846, %v3371_v59 }
 0xbf8   : > { %15985 = vtanh.f32 %v3374_v34 }
 0xbf9   : > { %15987 = vtanh.f32 %v3373_v38 }
 0xc02   : > { %v15986_v45 = vpop.eup %15985 }
 0xc03   : > { %v15988_v40 = vpop.eup %15987  ;;  %v3378_v47 = vadd.f32 1.0, %v15986_v45 }
 0xc04   : > { %v3377_v60 = vadd.f32 1.0, %v15988_v40 }
 0xc05   : > { %v3380_v61 = vmul.f32 0.5, %v3378_v47 }
 0xc06   : > { %v3379_v62 = vmul.f32 0.5, %v3377_v60 }
 0xc07   : > { %v3382_v21 = vmul.f32 %v3380_v61, %v3362_v46 }
 0xc08   : > { %v3381_v13 = vmul.f32 %v3379_v62, %v3357_v10 }
 0xc0a   : > { %13921 = vmatprep.mubr.f32.mxu1 %v3381_v13 }
 0xc0b   : > { %13922 = vmatmul.mubr.f32.vlgmr.msra.gmra.mrb[18].mxu1 %v3382_v21 }
 0xcde   : > { %v13923_v20 = vpop.f32.mrb[18].mxu1 }
 0xcdf   : > { %v3475_v4 = vadd.f32 %v13923_v20, %v17087_v52  ;;  %v3465_v7 = vpop.f32.mrb[19].mxu1 }
 0xce0   : > { %v3474_v1 = vadd.f32 %v3465_v7, %v17089_v53 }
 0xce1   : > { %v17127_v35 = vadd.f32 %v12833_v3, %v3475_v4 }
 0xce2   : > { %v17129_v8 = vadd.f32 %v12833_v3, %v3474_v1 }
 0xce3   : > { %v3492_v11 = vsel %vm1229_vm1, %v17127_v35, 0.0 }
 0xce4   : > { %3493 = vadd.xlane.f32.xlu1 %v3492_v11  ;;  %v3489_v2 = vsel %vm1229_vm1, %v17129_v8, 0.0 }
 0xce5   : > { %3490 = vadd.xlane.f32.xlu0 %v3489_v2 }
 0xd71   : > { %v3494_v14 = vpop.xlane.xlu1 %3493 }
 0xd72   : > { %v3496_v52 = vmul.f32 0.03125, %v3494_v14  ;;  %v3491_v16 = vpop.xlane.xlu0 %3490 }
 0xd73   : > { %v3495_v53 = vmul.f32 0.03125, %v3491_v16 }
 0xd74   : > { %v3498_v17 = vsub.f32 %v17127_v35, %v3496_v52 }
 0xd75   : > { %v3497_v18 = vsub.f32 %v17129_v8, %v3495_v53 }
 0xd76   : > { %v3500_v5 = vmul.f32 %v3498_v17, %v3498_v17 }
 0xd77   : > { %v3499_v55 = vmul.f32 %v3497_v18, %v3497_v18 }
 0xd78   : > { %v3504_v19 = vsel %vm1229_vm1, %v3500_v5, 0.0 }
 0xd79   : > { %3505 = vadd.xlane.f32.xlu1 %v3504_v19  ;;  %v3501_v48 = vsel %vm1229_vm1, %v3499_v55, 0.0 }
 0xd7a   : > { %3502 = vadd.xlane.f32.xlu0 %v3501_v48 }
 0xe06   : > { %v3506_v25 = vpop.xlane.xlu1 %3505 }
 0xe07   : > { %v3508_v9 = vmul.f32 0.03125, %v3506_v25  ;;  %v3503_v26 = vpop.xlane.xlu0 %3502 }
 0xe08   : > { %v3507_v27 = vmul.f32 0.03125, %v3503_v26 }
 0xe09   : > { %v3510_v15 = vadd.f32 1e-05, %v3508_v9 }
 0xe0a   : > { %v3509_v12 = vadd.f32 1e-05, %v3507_v27 }
 0xe0b   : > { %15989 = vrsqrt.f32 %v3510_v15 }
 0xe0c   : > { %15991 = vrsqrt.f32 %v3509_v12 }
 0xe15   : > { %v15990_v28 = vpop.eup %15989 }
 0xe16   : > { %v15992_v31 = vpop.eup %15991  ;;  %v3514_v32 = vmul.f32 %v15990_v28, %v3498_v17 }
 0xe17   : > { %v3513_v41 = vmul.f32 %v15992_v31, %v3497_v18 }
 0xe18   : > { %v3522_v49 = vmul.f32 %v12836_v30, %v3514_v32 }
 0xe19   : > { %v3521_v50 = vmul.f32 %v12836_v30, %v3513_v41 }
 0xe1a   : > { %v3530_v33 = vadd.f32 %v12837_v43, %v3522_v49 }
 0xe1b   : > { %v3529_v23 = vadd.f32 %v12837_v43, %v3521_v50 }
 0xe1d   : > { %13932 = vmatprep.mubr.msk.f32.mxu0 %vm1229_vm1, %v3529_v23 }
 0xe1e   : > { %13933 = vmatmul.mubr.msk.f32.vlgmr.msra.gmra.mrb[22].mxu0 %vm1229_vm1, %v3530_v33 }
 0xef1   : > { %v13934_v46 = vpop.f32.mrb[22].mxu0 }
 0xef2   : > { %v3622_v29 = vadd.f32 %v13934_v46, %v12843_v51  ;;  %v3616_v10 = vpop.f32.mrb[23].mxu0 }
 0xef3   : > { %v3617_v54 = vadd.f32 %v12843_v51, %v3616_v10 }
 0xef4   : > { %3629 = vrot.lane.b32.xlu1 %v3622_v29, %s18964_s5  ;;  %v3670_v17 = vmul.f32 0.5, %v3622_v29 }
 0xef5   : > { %3627 = vrot.lane.b32.xlu0 %v3617_v54, %s18964_s5  ;;  %v3669_v42 = vmul.f32 0.5, %v3617_v54  ;;  %v15594_v56 = vpack.i.bf16 %v3622_v29, %v3617_v54 }
 0xef7   : > { %13939 = vmatprep.mubr.msk.f32.mxu0 %vm1477_vm2, %v3669_v42 }
 0xef8   : > { %3635 = vrot.lane.b32.xlu1 %v3622_v29, %s18965_s10 }
 0xef9   : > { %3639 = vrot.lane.b32.xlu0 %v3617_v54, %s18966_s21 }
 0xefc   : > { %3633 = vrot.lane.b32.xlu1 %v3617_v54, %s18965_s10 }
 0xefd   : > { %3645 = vrot.lane.b32.xlu0 %v3617_v54, %s18967_s25 }
 0xf00   : > { %3641 = vrot.lane.b32.xlu1 %v3622_v29, %s18966_s21 }
 0xf01   : > { %3651 = vrot.lane.b32.xlu0 %v3617_v54, %s18968_s29 }
 0xf04   : > { %3647 = vrot.lane.b32.xlu1 %v3622_v29, %s18967_s25 }
 0xf05   : > { %3657 = vrot.lane.b32.xlu0 %v3617_v54, %s18969_s18 }
 0xf08   : > { %3653 = vrot.lane.b32.xlu1 %v3622_v29, %s18968_s29 }
 0xf09   : > { %3663 = vrot.lane.b32.xlu0 %v3617_v54, %s18970_s2 }
 0xf0c   : > { %3659 = vrot.lane.b32.xlu1 %v3622_v29, %s18969_s18 }
 0xf0d   : > { %15595 = vrot.lane.b32.xlu0 %v15594_v56, %s18971_s11 }
 0xf10   : > { %3665 = vrot.lane.b32.xlu1 %v3622_v29, %s18970_s2 }
 0xf66   : > { %v3630_v37 = vpop.permute.xlu1 %3629 }
 0xf67   : > { %v3628_v39 = vpop.permute.xlu0 %3627  ;;  %v3672_v0 = vmul.f32 0.5, %v3630_v37 }
 0xf68   : > { %v15599_v57 = vpack.i.bf16 %v3630_v37, %v3628_v39  ;;  %v3671_v18 = vmul.f32 0.5, %v3628_v39 }
 0xf6a   : > { %v17164_v58 = vpop.permute.xlu1 %3635  ;;  %15600 = vrot.lane.b32.xlu1 %v15599_v57, %s18971_s11 }
 0xf6b   : > { %v3640_v59 = vpop.permute.xlu0 %3639  ;;  %v3674_v31 = vmul.f32 0.5, %v17164_v58 }
 0xf6c   : > { %v3675_v34 = vmul.f32 0.5, %v3640_v59 }
 0xf6e   : > { %v3634_v38 = vpop.permute.xlu1 %3633  ;;  %13960 = vmatprep.mubr.msk.f32.mxu1 %vm1477_vm2, %v3675_v34 }
 0xf6f   : > { %v15604_v45 = vpack.i.bf16 %v17164_v58, %v3634_v38  ;;  %v3646_v40 = vpop.permute.xlu0 %3645  ;;  %v3673_v25 = vmul.f32 0.5, %v3634_v38 }
 0xf70   : > { %v3677_v41 = vmul.f32 0.5, %v3646_v40 }
 0xf71   : > { %15605 = vrot.lane.b32.xlu0 %v15604_v45, %s18971_s11 }
 0xf72   : > { %v17170_v47 = vpop.permute.xlu1 %3641 }
 0xf73   : > { %v15609_v60 = vpack.i.bf16 %v17170_v47, %v3640_v59  ;;  %v17173_v61 = vpop.permute.xlu0 %3651  ;;  %v3676_v50 = vmul.f32 0.5, %v17170_v47 }
 0xf74   : > { %v3679_v33 = vmul.f32 0.5, %v17173_v61 }
 0xf75   : > { %15610 = vrot.lane.b32.xlu1 %v15609_v60, %s18971_s11 }
 0xf76   : > { %v17176_v62 = vpop.permute.xlu1 %3647 }
 0xf77   : > { %v17179_v13 = vpack.i.bf16 %v17176_v62, %v3646_v40  ;;  %v17181_v21 = vpop.permute.xlu0 %3657  ;;  %v3678_v54 = vmul.f32 0.5, %v17176_v62 }
 0xf78   : > { %v3681_v42 = vmul.f32 0.5, %v17181_v21 }
 0xf79   : > { %15615 = vrot.lane.b32.xlu0 %v17179_v13, %s18971_s11 }
 0xf7a   : > { %v17185_v20 = vpop.permute.xlu1 %3653 }
 0xf7b   : > { %v17189_v3 = vpack.i.bf16 %v17185_v20, %v17173_v61  ;;  %v17191_v4 = vpop.permute.xlu0 %3663  ;;  %v3680_v34 = vmul.f32 0.5, %v17185_v20 }
 0xf7c   : > { %v3683_v47 = vmul.f32 0.5, %v17191_v4 }
 0xf7d   : > { %15620 = vrot.lane.b32.xlu1 %v17189_v3, %s18971_s11 }
 0xf7e   : > { %v17195_v7 = vpop.permute.xlu1 %3659 }
 0xf7f   : > { %v17199_v1 = vpack.i.bf16 %v17195_v7, %v17181_v21  ;;  %v15596_v11 = vpop.permute.xlu0 %15595  ;;  %v3682_v62 = vmul.f32 0.5, %v17195_v7 }
 0xf80   : > { %v15598_v2 = vunpack.i.h.bf16 %v15596_v11  ;;  %v15597_v14 = vunpack.i.l.bf16 %v15596_v11 }
 0xf81   : > { %15625 = vrot.lane.b32.xlu0 %v17199_v1, %s18971_s11 }
 0xf82   : > { %v14841_v52 = vpack.c.bf16 %v15598_v2, %v15597_v14  ;;  %v17203_v16 = vpop.permute.xlu1 %3665 }
 0xf83   : > { %v17207_v53 = vpack.i.bf16 %v17203_v16, %v17191_v4  ;;  %v3684_v2 = vmul.f32 0.5, %v17203_v16 }
 0xf84   : > { %14843 = vmatprep.subr.msk.bf16.mxu0 %vm16793_vm3, %v14841_v52 }
 0xf85   : > { %15635 = vrot.lane.b32.xlu0 %v15594_v56, %s18972_s23  ;;  %15630 = vrot.lane.b32.xlu1 %v17207_v53, %s18971_s11 }
 0xf86   : > { %14846 = vmatpush3.bf16.xpose.msk.msra.mxu0 %vm16793_vm3, %v14841_v52 }
 0xf89   : > { %15640 = vrot.lane.b32.xlu1 %v15599_v57, %s18972_s23 }
 0xf8d   : > { %13940 = vmatmul.mubr.msk.f32.vlgmr.msra.gmra.mrb[24].mxu0 %vm1477_vm2, %v3670_v17  ;;  %15645 = vrot.lane.b32.xlu1 %v15604_v45, %s18972_s23 }
 0xf8e   : > { %13946 = vmatprep.mubr.msk.f32.mxu0 %vm1477_vm2, %v3671_v18 }
 0xf91   : > { %15650 = vrot.lane.b32.xlu1 %v15609_v60, %s18972_s23 }
 0xfdc   : > { %v15601_v5 = vpop.permute.xlu1 %15600 }
 0xfdd   : > { %v15603_v55 = vunpack.i.h.bf16 %v15601_v5  ;;  %v15602_v19 = vunpack.i.l.bf16 %v15601_v5 }
 0xfdf   : > { %v14847_v48 = vpack.c.bf16 %v15603_v55, %v15602_v19 }
 0xfe1   : > { %14849 = vmatprep.subr.msk.bf16.mxu0 %vm16793_vm3, %v14847_v48 }
 0xfe2   : > { %14852 = vmatpush3.bf16.xpose.msk.msra.mxu0 %vm16793_vm3, %v14847_v48 }
 0xfe3   : > { %v15606_v36 = vpop.permute.xlu0 %15605 }
 0xfe4   : > { %v15608_v6 = vunpack.i.h.bf16 %v15606_v36  ;;  %v15607_v22 = vunpack.i.l.bf16 %v15606_v36 }
 0xfe6   : > { %v14853_v24 = vpack.c.bf16 %v15608_v6, %v15607_v22 }
 0xfe7   : > { %v15611_v63 = vpop.permute.xlu1 %15610 }
 0xfe8   : > { %v15613_v9 = vunpack.i.h.bf16 %v15611_v63  ;;  %v15612_v26 = vunpack.i.l.bf16 %v15611_v63  ;;  %14855 = vmatprep.subr.msk.bf16.mxu0 %vm16793_vm3, %v14853_v24 }
 0xfe9   : > { %13947 = vmatmul.mubr.msk.f32.vlgmr.msra.gmra.mrb[26].mxu0 %vm1477_vm2, %v3672_v0 }
 0xfea   : > { %v14859_v27 = vpack.c.bf16 %v15613_v9, %v15612_v26  ;;  %14858 = vmatpush3.bf16.xpose.msk.msra.mxu0 %vm16793_vm3, %v14853_v24  ;;  %13953 = vmatprep.mubr.msk.f32.mxu0 %vm1477_vm2, %v3673_v25 }
 0xfeb   : > { %v15616_v15 = vpop.permute.xlu0 %15615 }
 0xfec   : > { %v15618_v12 = vunpack.i.h.bf16 %v15616_v15  ;;  %v15617_v28 = vunpack.i.l.bf16 %v15616_v15  ;;  %14861 = vmatprep.subr.msk.bf16.mxu1 %vm16793_vm3, %v14859_v27 }
 0xfed   : > { %14864 = vmatpush3.bf16.xpose.msk.msra.mxu1 %vm16793_vm3, %v14859_v27 }
 0xfee   : > { %v14865_v30 = vpack.c.bf16 %v15618_v12, %v15617_v28 }
 0xfef   : > { %v15621_v32 = vpop.permute.xlu1 %15620 }
 0xff0   : > { %v15623_v43 = vunpack.i.h.bf16 %v15621_v32  ;;  %v15622_v49 = vunpack.i.l.bf16 %v15621_v32  ;;  %14867 = vmatprep.subr.msk.bf16.mxu0 %vm16793_vm3, %v14865_v30 }
 0xff1   : > { %13954 = vmatmul.mubr.msk.f32.vlgmr.msra.gmra.mrb[28].mxu0 %vm1477_vm2, %v3674_v31 }
 0xff2   : > { %v14871_v23 = vpack.c.bf16 %v15623_v43, %v15622_v49  ;;  %14870 = vmatpush3.bf16.xpose.msk.msra.mxu0 %vm16793_vm3, %v14865_v30  ;;  %13967 = vmatprep.mubr.msk.f32.mxu0 %vm1477_vm2, %v3677_v41 }
 0xff3   : > { %v15626_v51 = vpop.permute.xlu0 %15625 }
 0xff4   : > { %v15628_v46 = vunpack.i.h.bf16 %v15626_v51  ;;  %v15627_v29 = vunpack.i.l.bf16 %v15626_v51  ;;  %13961 = vmatmul.mubr.msk.f32.vlgmr.msra.gmra.mrb[20].mxu1 %vm1477_vm2, %v3676_v50  ;;  %14873 = vmatprep.subr.msk.bf16.mxu1 %vm16793_vm3, %v14871_v23 }
 0xff5   : > { %14876 = vmatpush3.bf16.xpose.msk.msra.mxu1 %vm16793_vm3, %v14871_v23  ;;  %13974 = vmatprep.mubr.msk.f32.mxu1 %vm1477_vm2, %v3679_v33 }
 0xff6   : > { %v14877_v10 = vpack.c.bf16 %v15628_v46, %v15627_v29 }
 0xff7   : > { %v15631_v56 = vpop.permute.xlu1 %15630  ;;  %v15636_v37 = vpop.permute.xlu0 %15635 }
 0xff8   : > { %v15633_v39 = vunpack.i.h.bf16 %v15631_v56  ;;  %v15632_v57 = vunpack.i.l.bf16 %v15631_v56  ;;  %v15638_v58 = vunpack.i.h.bf16 %v15636_v37  ;;  %v15637_v59 = vunpack.i.l.bf16 %v15636_v37  ;;  %14879 = vmatprep.subr.msk.bf16.mxu0 %vm16793_vm3, %v14877_v10 }
 0xff9   : > { %13968 = vmatmul.mubr.msk.f32.vlgmr.msra.gmra.mrb[30].mxu0 %vm1477_vm2, %v3678_v54 }
 0xffa   : > { %v14883_v38 = vpack.c.bf16 %v15633_v39, %v15632_v57  ;;  %14882 = vmatpush3.bf16.xpose.msk.msra.mxu0 %vm16793_vm3, %v14877_v10  ;;  %13981 = vmatprep.mubr.msk.f32.mxu0 %vm1477_vm2, %v3681_v42  ;;  %v14889_v45 = vpack.c.bf16 %v15638_v58, %v15637_v59 }
 0xffb   : > { %v15641_v40 = vpop.permute.xlu1 %15640 }
 0xffc   : > { %13975 = vmatmul.mubr.msk.f32.vlgmr.msra.gmra.mrb[22].mxu1 %vm1477_vm2, %v3680_v34  ;;  %14885 = vmatprep.subr.msk.bf16.mxu1 %vm16793_vm3, %v14883_v38  ;;  %v15643_v60 = vunpack.i.h.bf16 %v15641_v40  ;;  %v15642_v61 = vunpack.i.l.bf16 %v15641_v40 }
 0xffd   : > { %14890 = vmatprep.subr.bf16.mxu0 %v14889_v45  ;;  %14888 = vmatpush3.bf16.xpose.msk.msra.mxu1 %vm16793_vm3, %v14883_v38 }
 0xffe   : > { %13988 = vmatprep.mubr.msk.f32.mxu1 %vm1477_vm2, %v3683_v47  ;;  %v17268_v4 = vpack.c.bf16 %v15643_v60, %v15642_v61 }
 0xfff   : > { %v15646_v21 = vpop.permute.xlu1 %15645 }
0x1000   : > { %v15648_v20 = vunpack.i.h.bf16 %v15646_v21  ;;  %v15647_v11 = vunpack.i.l.bf16 %v15646_v21 }
0x1001   : > { %13982 = vmatmul.mubr.msk.f32.vlgmr.msra.gmra.mrb[32].mxu0 %vm1477_vm2, %v3682_v62 }
0x1002   : > { %14892 = vmatpush3.bf16.msra.mxu0 %v14889_v45  ;;  %v14897_v14 = vpack.c.bf16 %v15648_v20, %v15647_v11 }
0x1003   : > { %14894 = vmatprep.subr.bf16.mxu0 %v17268_v4  ;;  %v17332_v46 = vpop.permute.xlu1 %15650 }
0x1004   : > { %13989 = vmatmul.mubr.msk.f32.vlgmr.msra.gmra.mrb[24].mxu1 %vm1477_vm2, %v3684_v2  ;;  %14898 = vmatprep.subr.bf16.mxu1 %v14897_v14 }
0x1005   : > { %14900 = vmatpush3.bf16.msra.mxu1 %v14897_v14 }
0x1060   : > { %v13941_v52 = vpop.f32.mrb[24].mxu0 }
0x1061   : > { %v3765_v17 = vpop.f32.mrb[25].mxu0  ;;  %v4400_v7 = vsel %vm1145_vm0, %v13941_v52, -inf }
0x1062   : > { %4401 = vmax.xlane.f32.xlu1 %v4400_v7  ;;  %v4397_v18 = vsel %vm1145_vm0, %v3765_v17, -inf }
0x1063   : > { %4398 = vmax.xlane.f32.xlu0 %v4397_v18 }
0x10bc   : > { %v13948_v5 = vpop.f32.mrb[26].mxu0 }
0x10bd   : > { %v17275_v55 = vpop.f32.mrb[27].mxu0  ;;  %v4406_v16 = vsel %vm1145_vm0, %v13948_v5, -inf }
0x10be   : > { %4407 = vmax.xlane.f32.xlu0 %v4406_v16  ;;  %v4403_v19 = vsel %vm1145_vm0, %v17275_v55, -inf }
0x10c2   : > { %4404 = vmax.xlane.f32.xlu0 %v4403_v19 }
0x10c4   : > { %v17280_v48 = vpop.f32.mrb[28].mxu0 }
0x10c5   : > { %v17282_v36 = vpop.f32.mrb[29].mxu0  ;;  %v4412_v25 = vsel %vm1145_vm0, %v17280_v48, -inf }
0x10c6   : > { %v4409_v26 = vsel %vm1145_vm0, %v17282_v36, -inf }
0x10c7   : > { %v17284_v6 = vpop.f32.mrb[20].mxu1 }
0x10c8   : > { %v17286_v22 = vpop.f32.mrb[21].mxu1  ;;  %v4418_v24 = vsel %vm1145_vm0, %v17284_v6, -inf }
0x10c9   : > { %4419 = vmax.xlane.f32.xlu1 %v4418_v24  ;;  %v4415_v0 = vsel %vm1145_vm0, %v17286_v22, -inf }
0x10ca   : > { %4416 = vmax.xlane.f32.xlu0 %v4415_v0 }
0x10cc   : > { %v17292_v63 = vpop.f32.mrb[30].mxu0 }
0x10cd   : > { %4413 = vmax.xlane.f32.xlu1 %v4412_v25  ;;  %v17296_v9 = vpop.f32.mrb[31].mxu0  ;;  %v4424_v31 = vsel %vm1145_vm0, %v17292_v63, -inf }
0x10ce   : > { %4410 = vmax.xlane.f32.xlu0 %v4409_v26  ;;  %v4421_v41 = vsel %vm1145_vm0, %v17296_v9, -inf }
0x10cf   : > { %v17300_v27 = vpop.f32.mrb[22].mxu1 }
0x10d0   : > { %v17302_v15 = vpop.f32.mrb[23].mxu1  ;;  %v4430_v12 = vsel %vm1145_vm0, %v17300_v27, -inf }
0x10d1   : > { %4431 = vmax.xlane.f32.xlu1 %v4430_v12  ;;  %v4427_v28 = vsel %vm1145_vm0, %v17302_v15, -inf }
0x10d2   : > { %4428 = vmax.xlane.f32.xlu0 %v4427_v28 }
0x10d4   : > { %v17308_v30 = vpop.f32.mrb[32].mxu0 }
0x10d5   : > { %4425 = vmax.xlane.f32.xlu1 %v4424_v31  ;;  %v17312_v32 = vpop.f32.mrb[33].mxu0  ;;  %v4436_v33 = vsel %vm1145_vm0, %v17308_v30, -inf }
0x10d6   : > { %4422 = vmax.xlane.f32.xlu0 %v4421_v41  ;;  %v4433_v51 = vsel %vm1145_vm0, %v17312_v32, -inf }
0x10d7   : > { %v17316_v43 = vpop.f32.mrb[24].mxu1 }
0x10d8   : > { %v17318_v49 = vpop.f32.mrb[25].mxu1  ;;  %v4442_v50 = vsel %vm1145_vm0, %v17316_v43, -inf }
0x10d9   : > { %4443 = vmax.xlane.f32.xlu1 %v4442_v50  ;;  %v4439_v23 = vsel %vm1145_vm0, %v17318_v49, -inf }
0x10da   : > { %4440 = vmax.xlane.f32.xlu0 %v4439_v23 }
0x10dd   : > { %4437 = vmax.xlane.f32.xlu1 %v4436_v33 }
0x10de   : > { %4434 = vmax.xlane.f32.xlu0 %v4433_v51 }
0x10ee   : > { %15660 = vrot.lane.b32.xlu1 %v17189_v3, %s18972_s23 }
0x10ef   : > { %v4402_v29 = vpop.xlane.xlu1 %4401 }
0x10f0   : > { %v4399_v10 = vpop.xlane.xlu0 %4398  ;;  %v4446_v54 = vsub.f32 %v13941_v52, %v4402_v29 }
0x10f1   : > { %v4445_v42 = vsub.f32 %v3765_v17, %v4399_v10 }
0x10f2   : > { %v4463_v56 = vmul.f32 1.442695, %v4446_v54 }
0x10f3   : > { %v4461_v37 = vmul.f32 1.442695, %v4445_v42 }
0x10f4   : > { %15655 = vrot.lane.b32.xlu0 %v17179_v13, %s18972_s23  ;;  %15993 = vpow2.f32 %v4463_v56 }
0x10f5   : > { %15995 = vpow2.f32 %v4461_v37 }
0x10fe   : > { %v17334_v39 = vpop.eup %15993 }
0x10ff   : > { %v17336_v57 = vpop.eup %15995  ;;  %v4496_v3 = vsel %vm1145_vm0, %v17334_v39, 0.0 }
0x1100   : > { %v4493_v13 = vsel %vm1145_vm0, %v17336_v57, 0.0 }
0x1112   : > { %4497 = vadd.xlane.f32.xlu1 %v4496_v3 }
0x1113   : > { %4494 = vadd.xlane.f32.xlu0 %v4493_v13 }
0x114b   : > { %v4408_v58 = vpop.xlane.xlu0 %4407 }
0x114c   : > { %v4448_v59 = vsub.f32 %v13948_v5, %v4408_v58 }
0x114e   : > { %v4467_v34 = vmul.f32 1.442695, %v4448_v59 }
0x114f   : > { %v4405_v38 = vpop.xlane.xlu0 %4404 }
0x1150   : > { %15997 = vpow2.f32 %v4467_v34  ;;  %v4447_v45 = vsub.f32 %v17275_v55, %v4405_v38 }
0x1152   : > { %v4465_v40 = vmul.f32 1.442695, %v4447_v45 }
0x1154   : > { %15999 = vpow2.f32 %v4465_v40 }
0x1156   : > { %v4420_v47 = vpop.xlane.xlu1 %4419 }
0x1157   : > { %v4452_v60 = vsub.f32 %v17284_v6, %v4420_v47  ;;  %v4417_v61 = vpop.xlane.xlu0 %4416 }
0x1158   : > { %v4451_v62 = vsub.f32 %v17286_v22, %v4417_v61 }
0x1159   : > { %v4475_v21 = vmul.f32 1.442695, %v4452_v60 }
0x115a   : > { %v17345_v20 = vpop.eup %15997  ;;  %v4473_v11 = vmul.f32 1.442695, %v4451_v62  ;;  %v4414_v2 = vpop.xlane.xlu1 %4413 }
0x115b   : > { %16001 = vpow2.f32 %v4475_v21  ;;  %v4450_v14 = vsub.f32 %v17280_v48, %v4414_v2  ;;  %v4411_v52 = vpop.xlane.xlu0 %4410  ;;  %v4502_v17 = vsel %vm1145_vm0, %v17345_v20, 0.0 }
0x115c   : > { %16003 = vpow2.f32 %v4473_v11  ;;  %v4449_v7 = vsub.f32 %v17282_v36, %v4411_v52  ;;  %4503 = vadd.xlane.f32.xlu1 %v4502_v17 }
0x115d   : > { %v4471_v18 = vmul.f32 1.442695, %v4450_v14 }
0x115e   : > { %v17351_v5 = vpop.eup %15999  ;;  %v4469_v55 = vmul.f32 1.442695, %v4449_v7  ;;  %v4432_v16 = vpop.xlane.xlu1 %4431 }
0x115f   : > { %16005 = vpow2.f32 %v4471_v18  ;;  %v4456_v19 = vsub.f32 %v17300_v27, %v4432_v16  ;;  %v4429_v6 = vpop.xlane.xlu0 %4428  ;;  %v4499_v48 = vsel %vm1145_vm0, %v17351_v5, 0.0 }
0x1160   : > { %16007 = vpow2.f32 %v4469_v55  ;;  %v4455_v22 = vsub.f32 %v17302_v15, %v4429_v6  ;;  %4500 = vadd.xlane.f32.xlu0 %v4499_v48 }
0x1161   : > { %v4483_v24 = vmul.f32 1.442695, %v4456_v19 }
0x1162   : > { %v4481_v0 = vmul.f32 1.442695, %v4455_v22  ;;  %v4426_v36 = vpop.xlane.xlu1 %4425 }
0x1163   : > { %16009 = vpow2.f32 %v4483_v24  ;;  %v4454_v25 = vsub.f32 %v17292_v63, %v4426_v36  ;;  %v4423_v26 = vpop.xlane.xlu0 %4422  ;;  %v15653_v24 = vunpack.i.h.bf16 %v17332_v46 }
0x1164   : > { %16011 = vpow2.f32 %v4481_v0  ;;  %v4453_v12 = vsub.f32 %v17296_v9, %v4423_v26  ;;  %v15652_v0 = vunpack.i.l.bf16 %v17332_v46 }
0x1165   : > { %v17359_v28 = vpop.eup %16001  ;;  %v4479_v27 = vmul.f32 1.442695, %v4454_v25 }
0x1166   : > { %v17361_v31 = vpop.eup %16003  ;;  %v4477_v41 = vmul.f32 1.442695, %v4453_v12  ;;  %v4444_v50 = vpop.xlane.xlu1 %4443  ;;  %v4514_v15 = vsel %vm1145_vm0, %v17359_v28, 0.0 }
0x1167   : > { %16013 = vpow2.f32 %v4479_v27  ;;  %v4460_v23 = vsub.f32 %v17316_v43, %v4444_v50  ;;  %v4441_v33 = vpop.xlane.xlu0 %4440  ;;  %4515 = vadd.xlane.f32.xlu1 %v4514_v15  ;;  %v4511_v63 = vsel %vm1145_vm0, %v17361_v31, 0.0 }
0x1168   : > { %16015 = vpow2.f32 %v4477_v41  ;;  %v4459_v9 = vsub.f32 %v17318_v49, %v4441_v33  ;;  %4512 = vadd.xlane.f32.xlu0 %v4511_v63 }
0x1169   : > { %v17369_v51 = vpop.eup %16005  ;;  %v4491_v29 = vmul.f32 1.442695, %v4460_v23 }
0x116a   : > { %v17371_v10 = vpop.eup %16007  ;;  %v4489_v54 = vmul.f32 1.442695, %v4459_v9  ;;  %v4438_v42 = vpop.xlane.xlu1 %4437  ;;  %v4508_v56 = vsel %vm1145_vm0, %v17369_v51, 0.0 }
0x116b   : > { %16017 = vpow2.f32 %v4491_v29  ;;  %v4458_v43 = vsub.f32 %v17308_v30, %v4438_v42  ;;  %4509 = vadd.xlane.f32.xlu1 %v4508_v56  ;;  %v4435_v37 = vpop.xlane.xlu0 %4434  ;;  %v4505_v3 = vsel %vm1145_vm0, %v17371_v10, 0.0 }
0x116c   : > { %16019 = vpow2.f32 %v4489_v54  ;;  %v4457_v49 = vsub.f32 %v17312_v32, %v4435_v37  ;;  %4506 = vadd.xlane.f32.xlu0 %v4505_v3 }
0x116d   : > { %v17379_v13 = vpop.eup %16009  ;;  %v4487_v58 = vmul.f32 1.442695, %v4458_v43 }
0x116e   : > { %v17381_v59 = vpop.eup %16011  ;;  %v4485_v34 = vmul.f32 1.442695, %v4457_v49  ;;  %v4526_v38 = vsel %vm1145_vm0, %v17379_v13, 0.0  ;;  %v15661_v16 = vpop.permute.xlu1 %15660 }
0x116f   : > { %16021 = vpow2.f32 %v4487_v58  ;;  %4527 = vadd.xlane.f32.xlu1 %v4526_v38  ;;  %v15656_v30 = vpop.permute.xlu0 %15655  ;;  %v4523_v45 = vsel %vm1145_vm0, %v17381_v59, 0.0  ;;  %v15663_v41 = vunpack.i.h.bf16 %v15661_v16 }
0x1170   : > { %16023 = vpow2.f32 %v4485_v34  ;;  %v15658_v40 = vunpack.i.h.bf16 %v15656_v30  ;;  %v15657_v47 = vunpack.i.l.bf16 %v15656_v30  ;;  %4524 = vadd.xlane.f32.xlu0 %v4523_v45 }
0x1171   : > { %v17387_v32 = vpop.eup %16013 }
0x1172   : > { %v17389_v60 = vpop.eup %16015  ;;  %v4520_v61 = vsel %vm1145_vm0, %v17387_v32, 0.0  ;;  %v17393_v62 = vpack.c.bf16 %v15658_v40, %v15657_v47 }
0x1173   : > { %4521 = vadd.xlane.f32.xlu1 %v4520_v61  ;;  %v4517_v21 = vsel %vm1145_vm0, %v17389_v60, 0.0 }
0x1174   : > { %4518 = vadd.xlane.f32.xlu0 %v4517_v21  ;;  %14906 = vmatprep.subr.bf16.mxu1 %v17393_v62 }
0x1175   : > { %v17398_v11 = vpop.eup %16017 }
0x1176   : > { %v17400_v2 = vpop.eup %16019  ;;  %v4538_v14 = vsel %vm1145_vm0, %v17398_v11, 0.0 }
0x1177   : > { %4539 = vadd.xlane.f32.xlu1 %v4538_v14  ;;  %v4535_v52 = vsel %vm1145_vm0, %v17400_v2, 0.0 }
0x1178   : > { %4536 = vadd.xlane.f32.xlu0 %v4535_v52 }
0x1179   : > { %v17406_v17 = vpop.eup %16021 }
0x117a   : > { %v17408_v7 = vpop.eup %16023  ;;  %v4532_v18 = vsel %vm1145_vm0, %v17406_v17, 0.0 }
0x117b   : > { %4533 = vadd.xlane.f32.xlu1 %v4532_v18  ;;  %v4529_v55 = vsel %vm1145_vm0, %v17408_v7, 0.0 }
0x117c   : > { %4530 = vadd.xlane.f32.xlu0 %v4529_v55 }
0x118c   : > { %15670 = vrot.lane.b32.xlu1 %v17207_v53, %s18972_s23 }
0x1192   : > { %15665 = vrot.lane.b32.xlu0 %v17199_v1, %s18972_s23  ;;  %v14901_v1 = vpack.c.bf16 %v15653_v24, %v15652_v0 }
0x119f   : > { %v4498_v19 = vpop.xlane.xlu1 %4497 }
0x11a0   : > { %16025 = vrcp.f32 %v4498_v19  ;;  %v4495_v6 = vpop.xlane.xlu0 %4494 }
0x11a1   : > { %16027 = vrcp.f32 %v4495_v6 }
0x11aa   : > { %v16026_v48 = vpop.eup %16025 }
0x11ab   : > { %v16028_v22 = vpop.eup %16027  ;;  %v4558_v25 = vmul.f32 %v16026_v48, %v17334_v39  ;;  %v15662_v39 = vunpack.i.l.bf16 %v15661_v16 }
0x11ac   : > { %v4557_v36 = vmul.f32 %v16028_v22, %v17336_v57 }
0x11ad   : > { %v14909_v63 = vpack.c.bf16 %v15663_v41, %v15662_v39  ;;  %v12897_v41 = vld [vmem:[%s16507_s24 + $0x38] sm:$0xff] }
0x11ae   : > { %13995 = vmatprep.mubr.msk.f32.mxu0 %vm1145_vm0, %v4557_v36 }
0x11af   : > { %13996 = vmatmul.mubr.msk.f32.vlgmr.msra.gmra.mrb[34].mxu0 %vm1145_vm0, %v4558_v25 }
0x11b0   : > { %14896 = vmatpush3.bf16.msra.mxu0 %v17268_v4 }
0x11b1   : > { %14902 = vmatprep.subr.bf16.mxu0 %v14901_v1 }
0x11e9   : > { %v4504_v53 = vpop.xlane.xlu1 %4503 }
0x11ea   : > { %16029 = vrcp.f32 %v4504_v53 }
0x11ed   : > { %v4501_v26 = vpop.xlane.xlu0 %4500 }
0x11ee   : > { %16031 = vrcp.f32 %v4501_v26 }
0x11f4   : > { %v4516_v12 = vpop.xlane.xlu1 %4515  ;;  %v16030_v46 = vpop.eup %16029 }
0x11f5   : > { %16033 = vrcp.f32 %v4516_v12  ;;  %v4513_v27 = vpop.xlane.xlu0 %4512  ;;  %v4560_v4 = vmul.f32 %v16030_v46, %v17345_v20 }
0x11f6   : > { %16035 = vrcp.f32 %v4513_v27 }
0x11f8   : > { %v16032_v57 = vpop.eup %16031  ;;  %v4510_v50 = vpop.xlane.xlu1 %4509 }
0x11f9   : > { %16037 = vrcp.f32 %v4510_v50  ;;  %v4507_v15 = vpop.xlane.xlu0 %4506  ;;  %v4559_v23 = vmul.f32 %v16032_v57, %v17351_v5  ;;  %v12896_v57 = vld [vmem:[%s16507_s24 + $0x30] sm:$0xff] }
0x11fa   : > { %16039 = vrcp.f32 %v4507_v15  ;;  %v14925_v39 = vpack.c.bf16 %v12897_v41, %v12896_v57 }
0x11fb   : > { %14002 = vmatprep.mubr.msk.f32.mxu0 %vm1145_vm0, %v4559_v23 }
0x11fc   : > { %v4528_v33 = vpop.xlane.xlu1 %4527  ;;  %14003 = vmatmul.mubr.msk.f32.vlgmr.msra.gmra.mrb[36].mxu0 %vm1145_vm0, %v4560_v4 }
0x11fd   : > { %16041 = vrcp.f32 %v4528_v33  ;;  %14904 = vmatpush3.bf16.msra.mxu0 %v14901_v1  ;;  %v4525_v9 = vpop.xlane.xlu0 %4524  ;;  %v12894_v1 = vld [vmem:[%s16507_s24 + $0x20] sm:$0xff] }
0x11fe   : > { %14910 = vmatprep.subr.bf16.mxu0 %v14909_v63  ;;  %16043 = vrcp.f32 %v4525_v9 }
0x11ff   : > { %v16034_v29 = vpop.eup %16033 }
0x1200   : > { %v16036_v54 = vpop.eup %16035  ;;  %v4522_v42 = vpop.xlane.xlu1 %4521  ;;  %v4564_v20 = vmul.f32 %v16034_v29, %v17359_v28 }
0x1201   : > { %16045 = vrcp.f32 %v4522_v42  ;;  %v4519_v56 = vpop.xlane.xlu0 %4518  ;;  %v4563_v5 = vmul.f32 %v16036_v54, %v17361_v31 }
0x1202   : > { %16047 = vrcp.f32 %v4519_v56 }
0x1203   : > { %v16038_v43 = vpop.eup %16037  ;;  %14016 = vmatprep.mubr.msk.f32.mxu0 %vm1145_vm0, %v4563_v5 }
0x1204   : > { %v16040_v37 = vpop.eup %16039  ;;  %v4540_v3 = vpop.xlane.xlu1 %4539  ;;  %14017 = vmatmul.mubr.msk.f32.vlgmr.msra.gmra.mrb[38].mxu0 %vm1145_vm0, %v4564_v20  ;;  %v4562_v34 = vmul.f32 %v16038_v43, %v17369_v51 }
0x1205   : > { %16049 = vrcp.f32 %v4540_v3  ;;  %14912 = vmatpush3.bf16.msra.mxu0 %v14909_v63  ;;  %v4537_v49 = vpop.xlane.xlu0 %4536  ;;  %v4561_v58 = vmul.f32 %v16040_v37, %v17371_v10 }
0x1206   : > { %16051 = vrcp.f32 %v4537_v49 }
0x1207   : > { %v16042_v38 = vpop.eup %16041  ;;  %14009 = vmatprep.mubr.msk.f32.mxu1 %vm1145_vm0, %v4561_v58 }
0x1208   : > { %v16044_v31 = vpop.eup %16043  ;;  %v4534_v28 = vpop.xlane.xlu1 %4533  ;;  %14010 = vmatmul.mubr.msk.f32.vlgmr.msra.gmra.mrb[26].mxu1 %vm1145_vm0, %v4562_v34  ;;  %v4568_v40 = vmul.f32 %v16042_v38, %v17379_v13 }
0x1209   : > { %16053 = vrcp.f32 %v4534_v28  ;;  %14908 = vmatpush3.bf16.msra.mxu1 %v17393_v62  ;;  %v4531_v30 = vpop.xlane.xlu0 %4530  ;;  %v4567_v45 = vmul.f32 %v16044_v31, %v17381_v59 }
0x120a   : > { %16055 = vrcp.f32 %v4531_v30 }
0x120b   : > { %v16046_v10 = vpop.eup %16045  ;;  %14030 = vmatprep.mubr.msk.f32.mxu0 %vm1145_vm0, %v4567_v45 }
0x120c   : > { %v16048_v51 = vpop.eup %16047  ;;  %v15671_v47 = vpop.permute.xlu1 %15670  ;;  %14031 = vmatmul.mubr.msk.f32.vlgmr.msra.gmra.mrb[40].mxu0 %vm1145_vm0, %v4568_v40  ;;  %v4566_v55 = vmul.f32 %v16046_v10, %v17387_v32 }
0x120d   : > { %v15673_v61 = vunpack.i.h.bf16 %v15671_v47  ;;  %v15672_v21 = vunpack.i.l.bf16 %v15671_v47  ;;  %v15666_v14 = vpop.permute.xlu0 %15665  ;;  %v4565_v52 = vmul.f32 %v16048_v51, %v17389_v60 }
0x120e   : > { %v15668_v18 = vunpack.i.h.bf16 %v15666_v14  ;;  %v15667_v62 = vunpack.i.l.bf16 %v15666_v14 }
0x120f   : > { %v16050_v59 = vpop.eup %16049  ;;  %14023 = vmatprep.mubr.msk.f32.mxu1 %vm1145_vm0, %v4565_v52  ;;  %v14917_v13 = vpack.c.bf16 %v15673_v61, %v15672_v21 }
0x1210   : > { %v16052_v16 = vpop.eup %16051  ;;  %14024 = vmatmul.mubr.msk.f32.vlgmr.msra.gmra.mrb[28].mxu1 %vm1145_vm0, %v4566_v55  ;;  %v14913_v19 = vpack.c.bf16 %v15668_v18, %v15667_v62  ;;  %v4572_v60 = vmul.f32 %v16050_v59, %v17398_v11  ;;  %v12901_v59 = vld [vmem:[%s16512_s30 + $0x1] ss:$0 sm:$0xff] }
0x1211   : > { %14918 = vmatprep.subr.bf16.mxu0 %v14917_v13  ;;  %v4571_v6 = vmul.f32 %v16052_v16, %v17400_v2 }
0x1212   : > { %14914 = vmatprep.subr.bf16.mxu1 %v14913_v19  ;;  %14920 = vmatpush3.bf16.msra.mxu0 %v14917_v13 }
0x1213   : > { %v16054_v48 = vpop.eup %16053  ;;  %14916 = vmatpush3.bf16.msra.mxu1 %v14913_v19  ;;  %14044 = vmatprep.mubr.msk.f32.mxu0 %vm1145_vm0, %v4571_v6 }
0x1214   : > { %v16056_v32 = vpop.eup %16055  ;;  %v4570_v24 = vmul.f32 %v16054_v48, %v17406_v17  ;;  %v12895_v17 = vld [vmem:[%s16507_s24 + $0x28] sm:$0xff] }
0x1215   : > { %14045 = vmatmul.mubr.msk.f32.vlgmr.msra.gmra.mrb[42].mxu0 %vm1145_vm0, %v4572_v60  ;;  %v4569_v22 = vmul.f32 %v16056_v32, %v17408_v7  ;;  %v14921_v53 = vpack.c.bf16 %v12895_v17, %v12894_v1  ;;  %v12906_v1 = vld [vmem:[%s16527_s20 + $0x20] sm:$0xff]  ;;  %v12907_v17 = vld [vmem:[%s16527_s20 + $0x28] sm:$0xff] }
0x1217   : > { %14037 = vmatprep.mubr.msk.f32.mxu1 %vm1145_vm0, %v4569_v22  ;;  %14922 = vmatprep.subr.bf16.mxu1 %v14921_v53 }
0x1218   : > { %14038 = vmatmul.mubr.msk.f32.vlgmr.msra.gmra.mrb[30].mxu1 %vm1145_vm0, %v4570_v24 }
0x1219   : > { %14924 = vmatpush3.bf16.msra.mxu1 %v14921_v53  ;;  %v12908_v53 = vld [vmem:[%s16527_s20 + $0x30] sm:$0xff] }
0x121a   : > { %14926 = vmatprep.subr.bf16.mxu1 %v14925_v39 }
0x121d   : > { %14928 = vmatpush3.bf16.msra.mxu1 %v14925_v39 }
0x1282   : > { %v13997_v2 = vpop.f32.mrb[34].mxu0 }
0x1283   : > { %v4651_v0 = vpop.f32.mrb[35].mxu0 }
0x12cf   : > { %v14004_v36 = vpop.f32.mrb[36].mxu0 }
0x12d0   : > { %5273 = vrot.lane.b32.xlu1 %v14004_v36, %s18973_s28  ;;  %v4738_v25 = vpop.f32.mrb[37].mxu0 }
0x12d1   : > { %5271 = vrot.lane.b32.xlu0 %v4738_v25, %s18973_s28 }
0x12d7   : > { %v14018_v11 = vpop.f32.mrb[38].mxu0 }
0x12d8   : > { %5289 = vrot.lane.b32.xlu1 %v14018_v11, %s18974_s7  ;;  %v4912_v7 = vpop.f32.mrb[39].mxu0 }
0x12d9   : > { %5287 = vrot.lane.b32.xlu0 %v4912_v7, %s18974_s7 }
0x12db   : > { %v14011_v26 = vpop.f32.mrb[26].mxu1 }
0x12dc   : > { %5281 = vrot.lane.b32.xlu1 %v14011_v26, %s18975_s12  ;;  %v4825_v12 = vpop.f32.mrb[27].mxu1  ;;  %v14929_v26 = vpack.c.bf16 %v12907_v17, %v12906_v1 }
0x12dd   : > { %5279 = vrot.lane.b32.xlu0 %v4825_v12, %s18975_s12  ;;  %v12909_v12 = vld [vmem:[%s16527_s20 + $0x38] sm:$0xff] }
0x12de   : > { %14930 = vmatprep.subr.bf16.mxu0 %v14929_v26 }
0x12df   : > { %v14032_v27 = vpop.f32.mrb[40].mxu0  ;;  %14932 = vmatpush3.bf16.msra.mxu0 %v14929_v26 }
0x12e0   : > { %5305 = vrot.lane.b32.xlu1 %v14032_v27, %s18976_s9  ;;  %v5086_v46 = vpop.f32.mrb[41].mxu0  ;;  %v14933_v27 = vpack.c.bf16 %v12909_v12, %v12908_v53 }
0x12e1   : > { %5303 = vrot.lane.b32.xlu0 %v5086_v46, %s18976_s9 }
0x12e2   : > { %14934 = vmatprep.subr.bf16.mxu0 %v14933_v27 }
0x12e3   : > { %v14025_v50 = vpop.f32.mrb[28].mxu1  ;;  %14936 = vmatpush3.bf16.msra.mxu0 %v14933_v27 }
0x12e4   : > { %5297 = vrot.lane.b32.xlu1 %v14025_v50, %s18977_s4  ;;  %v4999_v15 = vpop.f32.mrb[29].mxu1 }
0x12e5   : > { %5295 = vrot.lane.b32.xlu0 %v4999_v15, %s18977_s4 }
0x12e8   : > { %v14046_v23 = vpop.f32.mrb[42].mxu0 }
0x12e9   : > { %v5260_v4 = vpop.f32.mrb[43].mxu0 }
0x12eb   : > { %v14039_v33 = vpop.f32.mrb[30].mxu1 }
0x12ec   : > { %5313 = vrot.lane.b32.xlu1 %v14039_v33, %s18978_s22  ;;  %v5173_v63 = vpop.f32.mrb[31].mxu1 }
0x12ed   : > { %5311 = vrot.lane.b32.xlu0 %v5173_v63, %s18978_s22  ;;  %v12905_v63 = vld [vmem:[%s18960_s16 + $0x1] ss:$0 sm:$0xff] }
0x12f0   : > { %5321 = vrot.lane.b32.xlu1 %v14046_v23, %s18979_s27 }
0x12f1   : > { %5319 = vrot.lane.b32.xlu0 %v5260_v4, %s18979_s27  ;;  %v12904_v4 = vld [vmem:[%s18941_s6 + $0x1] ss:$0 sm:$0xff] }
0x1342   : > { %v5274_v9 = vpop.permute.xlu1 %5273 }
0x1343   : > { %v5272_v29 = vpop.permute.xlu0 %5271  ;;  %v5326_v49 = vsel %vm1477_vm2, %v13997_v2, %v5274_v9 }
0x1344   : > { %v5325_v37 = vsel %vm1477_vm2, %v4651_v0, %v5272_v29 }
0x134a   : > { %v5290_v54 = vpop.permute.xlu1 %5289 }
0x134b   : > { %v5288_v42 = vpop.permute.xlu0 %5287 }
0x134e   : > { %v5282_v56 = vpop.permute.xlu1 %5281 }
0x134f   : > { %v5280_v5 = vpop.permute.xlu0 %5279  ;;  %v5328_v38 = vsel %vm3116_vm4, %v5326_v49, %v5282_v56  ;;  %v12917_v49 = vld [vmem:[%s18961_s13 + $0x98] sm:$0xff] }
0x1350   : > { %v5327_v58 = vsel %vm3116_vm4, %v5325_v37, %v5280_v5  ;;  %v5330_v30 = vsel %vm3119_vm5, %v5328_v38, %v5290_v54  ;;  %v12919_v38 = vld [vmem:[%s18961_s13 + $0xa8] sm:$0xff] }
0x1351   : > { %v5329_v31 = vsel %vm3119_vm5, %v5327_v58, %v5288_v42 }
0x1352   : > { %v5306_v20 = vpop.permute.xlu1 %5305 }
0x1353   : > { %v5304_v43 = vpop.permute.xlu0 %5303 }
0x1356   : > { %v5298_v3 = vpop.permute.xlu1 %5297 }
0x1357   : > { %v5296_v34 = vpop.permute.xlu0 %5295  ;;  %v5332_v10 = vsel %vm1145_vm0, %v5330_v30, %v5298_v3  ;;  %v12916_v3 = vld [vmem:[%s18961_s13 + $0x90] sm:$0xff]  ;;  %v12921_v30 = vld [vmem:[%s18961_s13 + $0xb8] sm:$0xff] }
0x1358   : > { %v5331_v45 = vsel %vm1145_vm0, %v5329_v31, %v5296_v34  ;;  %v5334_v61 = vsel %vm3124_vm6, %v5332_v10, %v5306_v20  ;;  %v12914_v20 = vld [vmem:[%s18961_s13 + $0x80] sm:$0xff]  ;;  %v14941_v58 = vpack.c.bf16 %v12917_v49, %v12916_v3  ;;  %v12923_v10 = vld [vmem:[%s18961_s13 + $0xc8] sm:$0xff] }
0x1359   : > { %v5333_v51 = vsel %vm3124_vm6, %v5331_v45, %v5304_v43  ;;  %v12915_v43 = vld [vmem:[%s18961_s13 + $0x88] sm:$0xff]  ;;  %v12918_v34 = vld [vmem:[%s18961_s13 + $0xa0] sm:$0xff] }
0x135a   : > { %v14937_v37 = vpack.c.bf16 %v12915_v43, %v12914_v20  ;;  %v14945_v31 = vpack.c.bf16 %v12919_v38, %v12918_v34  ;;  %v12936_v3 = vld [vmem:[%s18939_s14 + $0x40] sm:$0xff]  ;;  %v12937_v49 = vld [vmem:[%s18939_s14 + $0x48] sm:$0xff]  ;;  %v12939_v38 = vld [vmem:[%s18939_s14 + $0x58] sm:$0xff] }
0x135b   : > { %v14969_v34 = vpack.c.bf16 %v12937_v49, %v12936_v3 }
0x135c   : > { %14938 = vmatprep.subr.bf16.mxu1 %v14937_v37 }
0x135d   : > { %14970 = vmatprep.subr.bf16.mxu0 %v14969_v34 }
0x135e   : > { %v5314_v28 = vpop.permute.xlu1 %5313 }
0x135f   : > { %v5312_v40 = vpop.permute.xlu0 %5311  ;;  %v5336_v52 = vsel %vm3127_vm7, %v5334_v61, %v5314_v28  ;;  %v12920_v28 = vld [vmem:[%s18961_s13 + $0xb0] sm:$0xff]  ;;  %v12925_v61 = vld [vmem:[%s18961_s13 + $0xd8] sm:$0xff] }
0x1360   : > { %v5335_v21 = vsel %vm3127_vm7, %v5333_v51, %v5312_v40  ;;  %v14949_v45 = vpack.c.bf16 %v12921_v30, %v12920_v28  ;;  %v12922_v40 = vld [vmem:[%s18961_s13 + $0xc0] sm:$0xff]  ;;  %v12924_v51 = vld [vmem:[%s18961_s13 + $0xd0] sm:$0xff] }
0x1362   : > { %v5322_v47 = vpop.permute.xlu1 %5321 }
0x1363   : > { %v5320_v14 = vpop.permute.xlu0 %5319  ;;  %v5338_v62 = vsel %vm3130_vm8, %v5336_v52, %v5322_v47  ;;  %v14953_v47 = vpack.c.bf16 %v12923_v10, %v12922_v40  ;;  %v12927_v52 = vld [vmem:[%s18961_s13 + $0xe8] sm:$0xff] }
0x1364   : > { %v5337_v18 = vsel %vm3130_vm8, %v5335_v21, %v5320_v14  ;;  %v14957_v21 = vpack.c.bf16 %v12925_v61, %v12924_v51  ;;  %v12926_v14 = vld [vmem:[%s18961_s13 + $0xe0] sm:$0xff] }
0x1365   : > { %14055 = vmatprep.mubr.msk.f32.mxu1 %vm1229_vm1, %v5337_v18  ;;  %v14961_v18 = vpack.c.bf16 %v12927_v52, %v12926_v14  ;;  %v12934_v61 = vld [vmem:[%s18942_s3 + $0x2] ss:$0 sm:$0xff] }
0x1366   : > { %14056 = vmatmul.mubr.msk.f32.vlgmr.msra.gmra.mrb[32].mxu1 %vm1229_vm1, %v5338_v62  ;;  %v12928_v62 = vld [vmem:[%s18961_s13 + $0xf0] sm:$0xff] }
0x1367   : > { %14940 = vmatpush3.bf16.msra.mxu1 %v14937_v37 }
0x1368   : > { %14942 = vmatprep.subr.bf16.mxu1 %v14941_v58 }
0x136b   : > { %14944 = vmatpush3.bf16.msra.mxu1 %v14941_v58  ;;  %v12938_v58 = vld [vmem:[%s18939_s14 + $0x50] sm:$0xff] }
0x136c   : > { %14946 = vmatprep.subr.bf16.mxu1 %v14945_v31 }
0x136f   : > { %14948 = vmatpush3.bf16.msra.mxu1 %v14945_v31  ;;  %v14973_v31 = vpack.c.bf16 %v12939_v38, %v12938_v58 }
0x1370   : > { %14950 = vmatprep.subr.bf16.mxu1 %v14949_v45 }
0x1373   : > { %14952 = vmatpush3.bf16.msra.mxu1 %v14949_v45 }
0x1374   : > { %14954 = vmatprep.subr.bf16.mxu1 %v14953_v47 }
0x1377   : > { %14956 = vmatpush3.bf16.msra.mxu1 %v14953_v47 }
0x1378   : > { %14958 = vmatprep.subr.bf16.mxu1 %v14957_v21 }
0x137b   : > { %14960 = vmatpush3.bf16.msra.mxu1 %v14957_v21 }
0x137c   : > { %14962 = vmatprep.subr.bf16.mxu1 %v14961_v18 }
0x137f   : > { %14964 = vmatpush3.bf16.msra.mxu1 %v14961_v18  ;;  %v12935_v18 = vld [vmem:[%s18940_s8 + $0x2] ss:$0 sm:$0xff] }
0x1439   : > { %v14057_v55 = vpop.f32.mrb[32].mxu1 }
0x143a   : > { %v5426_v13 = vadd.f32 %v14057_v55, %v17127_v35  ;;  %v5416_v16 = vpop.f32.mrb[33].mxu1  ;;  %v12929_v55 = vld [vmem:[%s18961_s13 + $0xf8] sm:$0xff] }
0x143b   : > { %v5425_v19 = vadd.f32 %v5416_v16, %v17129_v8 }
0x143c   : > { %v17491_v6 = vadd.f32 %v12901_v59, %v5426_v13  ;;  %v12911_v13 = vld [vmem:[%s18962_s17 + $0x1] ss:$0 sm:$0xff] }
0x143d   : > { %v17493_v48 = vadd.f32 %v12901_v59, %v5425_v19  ;;  %v14965_v59 = vpack.c.bf16 %v12929_v55, %v12928_v62 }
0x143e   : > { %v5444_v60 = vsel %vm1229_vm1, %v17491_v6, 0.0 }
0x143f   : > { %5445 = vadd.xlane.f32.xlu1 %v5444_v60  ;;  %v5441_v32 = vsel %vm1229_vm1, %v17493_v48, 0.0  ;;  %14966 = vmatprep.subr.bf16.mxu1 %v14965_v59 }
0x1440   : > { %5442 = vadd.xlane.f32.xlu0 %v5441_v32  ;;  %14968 = vmatpush3.bf16.msra.mxu1 %v14965_v59 }
0x14cc   : > { %v5446_v22 = vpop.xlane.xlu1 %5445 }
0x14cd   : > { %v5448_v35 = vmul.f32 0.03125, %v5446_v22  ;;  %v5443_v24 = vpop.xlane.xlu0 %5442 }
0x14ce   : > { %v5447_v8 = vmul.f32 0.03125, %v5443_v24 }
0x14cf   : > { %v5450_v2 = vsub.f32 %v17491_v6, %v5448_v35 }
0x14d0   : > { %v5449_v0 = vsub.f32 %v17493_v48, %v5447_v8 }
0x14d1   : > { %v5452_v11 = vmul.f32 %v5450_v2, %v5450_v2 }
0x14d2   : > { %v5451_v36 = vmul.f32 %v5449_v0, %v5449_v0 }
0x14d3   : > { %v5456_v7 = vsel %vm1229_vm1, %v5452_v11, 0.0 }
0x14d4   : > { %v5453_v25 = vsel %vm1229_vm1, %v5451_v36, 0.0 }
0x14d5   : > { %5454 = vadd.xlane.f32.xlu0 %v5453_v25 }
0x14d9   : > { %5457 = vadd.xlane.f32.xlu0 %v5456_v7 }
0x1562   : > { %v5455_v46 = vpop.xlane.xlu0 %5454 }
0x1563   : > { %v5459_v57 = vmul.f32 0.03125, %v5455_v46 }
0x1565   : > { %v5461_v41 = vadd.f32 1e-05, %v5459_v57 }
0x1566   : > { %v5458_v39 = vpop.xlane.xlu0 %5457 }
0x1567   : > { %16057 = vrsqrt.f32 %v5461_v41  ;;  %v5460_v50 = vmul.f32 0.03125, %v5458_v39  ;;  %v12931_v39 = vld [vmem:[%s18963_s15 + $0x1] ss:$0 sm:$0xff] }
0x1569   : > { %v5462_v15 = vadd.f32 1e-05, %v5460_v50 }
0x156b   : > { %16059 = vrsqrt.f32 %v5462_v15 }
0x1571   : > { %v16058_v23 = vpop.eup %16057 }
0x1572   : > { %v5465_v33 = vmul.f32 %v16058_v23, %v5449_v0 }
0x1574   : > { %v5473_v9 = vmul.f32 %v12904_v4, %v5465_v33 }
0x1575   : > { %v16060_v29 = vpop.eup %16059 }
0x1576   : > { %v5466_v54 = vmul.f32 %v16060_v29, %v5450_v2  ;;  %v5481_v42 = vadd.f32 %v12905_v63, %v5473_v9 }
0x1578   : > { %v5474_v56 = vmul.f32 %v12904_v4, %v5466_v54  ;;  %14066 = vmatprep.mubr.msk.f32.mxu0 %vm1229_vm1, %v5481_v42 }
0x157a   : > { %v5482_v5 = vadd.f32 %v12905_v63, %v5474_v56 }
0x157c   : > { %14067 = vmatmul.mubr.msk.f32.vlgmr.msra.gmra.mrb[44].mxu0 %vm1229_vm1, %v5482_v5 }
0x157d   : > { %14972 = vmatpush3.bf16.msra.mxu0 %v14969_v34 }
0x157e   : > { %14974 = vmatprep.subr.bf16.mxu0 %v14973_v31 }
0x1581   : > { %14976 = vmatpush3.bf16.msra.mxu0 %v14973_v31 }
0x164f   : > { %v14068_v16 = vpop.f32.mrb[44].mxu0 }
0x1650   : > { %v5574_v19 = vadd.f32 %v14068_v16, %v12911_v13  ;;  %v5568_v60 = vpop.f32.mrb[45].mxu0  ;;  %v12941_v16 = vld [vmem:[%s16502_s19 + $0x2] ss:$0 sm:$0xff] }
0x1651   : > { %v5569_v32 = vadd.f32 %v12911_v13, %v5568_v60 }
0x1652   : > { %v5578_v22 = vmul.f32 %v5574_v19, %v5574_v19 }
0x1653   : > { %v5577_v35 = vmul.f32 %v5569_v32, %v5569_v32 }
0x1654   : > { %v5580_v24 = vmul.f32 %v5578_v22, %v5574_v19 }
0x1655   : > { %v5579_v8 = vmul.f32 %v5577_v35, %v5569_v32 }
0x1656   : > { %v5582_v2 = vmul.f32 0.044715, %v5580_v24 }
0x1657   : > { %v5581_v0 = vmul.f32 0.044715, %v5579_v8 }
0x1658   : > { %v5584_v36 = vadd.f32 %v5582_v2, %v5574_v19 }
0x1659   : > { %v5583_v25 = vadd.f32 %v5581_v0, %v5569_v32 }
0x165a   : > { %v5586_v11 = vmul.f32 0.7978846, %v5584_v36 }
0x165b   : > { %v5585_v7 = vmul.f32 0.7978846, %v5583_v25 }
0x165c   : > { %16061 = vtanh.f32 %v5586_v11 }
0x165d   : > { %16063 = vtanh.f32 %v5585_v7 }
0x1666   : > { %v16062_v1 = vpop.eup %16061 }
0x1667   : > { %v16064_v17 = vpop.eup %16063  ;;  %v5590_v53 = vadd.f32 1.0, %v16062_v1 }
0x1668   : > { %v5589_v26 = vadd.f32 1.0, %v16064_v17 }
0x1669   : > { %v5592_v12 = vmul.f32 0.5, %v5590_v53 }
0x166a   : > { %v5591_v27 = vmul.f32 0.5, %v5589_v26 }
0x166b   : > { %v5594_v57 = vmul.f32 %v5592_v12, %v5574_v19 }
0x166c   : > { %v5593_v46 = vmul.f32 %v5591_v27, %v5569_v32 }
0x166e   : > { %14101 = vmatprep.mubr.f32.mxu1 %v5593_v46 }
0x166f   : > { %14102 = vmatmul.mubr.f32.vlgmr.msra.gmra.mrb[34].mxu1 %v5594_v57 }
0x1742   : > { %v14103_v41 = vpop.f32.mrb[34].mxu1 }
0x1743   : > { %v5688_v50 = vadd.f32 %v14103_v41, %v17491_v6  ;;  %v5678_v15 = vpop.f32.mrb[35].mxu1 }
0x1744   : > { %v5687_v23 = vadd.f32 %v5678_v15, %v17493_v48 }
0x1745   : > { %v17531_v4 = vadd.f32 %v12931_v39, %v5688_v50 }
0x1746   : > { %v17533_v33 = vadd.f32 %v12931_v39, %v5687_v23 }
0x1747   : > { %v5706_v63 = vsel %vm1229_vm1, %v17531_v4, 0.0 }
0x1748   : > { %5707 = vadd.xlane.f32.xlu1 %v5706_v63  ;;  %v5703_v9 = vsel %vm1229_vm1, %v17533_v33, 0.0 }
0x1749   : > { %5704 = vadd.xlane.f32.xlu0 %v5703_v9 }
0x17d5   : > { %v5708_v29 = vpop.xlane.xlu1 %5707 }
0x17d6   : > { %v5710_v6 = vmul.f32 0.03125, %v5708_v29  ;;  %v5705_v54 = vpop.xlane.xlu0 %5704 }
0x17d7   : > { %v5709_v48 = vmul.f32 0.03125, %v5705_v54 }
0x17d8   : > { %v5712_v42 = vsub.f32 %v17531_v4, %v5710_v6 }
0x17d9   : > { %v5711_v56 = vsub.f32 %v17533_v33, %v5709_v48 }
0x17da   : > { %v5714_v5 = vmul.f32 %v5712_v42, %v5712_v42 }
0x17db   : > { %v5713_v20 = vmul.f32 %v5711_v56, %v5711_v56 }
0x17dc   : > { %v5718_v43 = vsel %vm1229_vm1, %v5714_v5, 0.0 }
0x17dd   : > { %5719 = vadd.xlane.f32.xlu1 %v5718_v43  ;;  %v5715_v37 = vsel %vm1229_vm1, %v5713_v20, 0.0 }
0x17de   : > { %5716 = vadd.xlane.f32.xlu0 %v5715_v37 }
0x186a   : > { %v5720_v28 = vpop.xlane.xlu1 %5719 }
0x186b   : > { %v5722_v30 = vmul.f32 0.03125, %v5720_v28  ;;  %v5717_v45 = vpop.xlane.xlu0 %5716 }
0x186c   : > { %v5721_v40 = vmul.f32 0.03125, %v5717_v45 }
0x186d   : > { %v5724_v10 = vadd.f32 1e-05, %v5722_v30 }
0x186e   : > { %v5723_v51 = vadd.f32 1e-05, %v5721_v40 }
0x186f   : > { %16065 = vrsqrt.f32 %v5724_v10 }
0x1870   : > { %16067 = vrsqrt.f32 %v5723_v51 }
0x1879   : > { %v16066_v47 = vpop.eup %16065 }
0x187a   : > { %v16068_v21 = vpop.eup %16067  ;;  %v5728_v14 = vmul.f32 %v16066_v47, %v5712_v42 }
0x187b   : > { %v5727_v52 = vmul.f32 %v16068_v21, %v5711_v56 }
0x187c   : > { %v5736_v62 = vmul.f32 %v12934_v61, %v5728_v14 }
0x187d   : > { %v5735_v55 = vmul.f32 %v12934_v61, %v5727_v52 }
0x187e   : > { %v5744_v13 = vadd.f32 %v12935_v18, %v5736_v62 }
0x187f   : > { %v5743_v59 = vadd.f32 %v12935_v18, %v5735_v55 }
0x1881   : > { %14112 = vmatprep.mubr.msk.f32.mxu0 %vm1229_vm1, %v5743_v59 }
0x1882   : > { %14113 = vmatmul.mubr.msk.f32.vlgmr.msra.gmra.mrb[46].mxu0 %vm1229_vm1, %v5744_v13 }
0x1955   : > { %v14114_v19 = vpop.f32.mrb[46].mxu0 }
0x1956   : > { %v5836_v60 = vadd.f32 %v14114_v19, %v12941_v16  ;;  %v5830_v32 = vpop.f32.mrb[47].mxu0 }
0x1957   : > { %v5831_v22 = vadd.f32 %v12941_v16, %v5830_v32 }
0x1958   : > { %5843 = vrot.lane.b32.xlu1 %v5836_v60, %s18964_s5  ;;  %v5884_v42 = vmul.f32 0.5, %v5836_v60 }
0x1959   : > { %5841 = vrot.lane.b32.xlu0 %v5831_v22, %s18964_s5  ;;  %v5883_v35 = vmul.f32 0.5, %v5831_v22  ;;  %v15674_v24 = vpack.i.bf16 %v5836_v60, %v5831_v22 }
0x195b   : > { %14119 = vmatprep.mubr.msk.f32.mxu0 %vm1477_vm2, %v5883_v35 }
0x195c   : > { %5849 = vrot.lane.b32.xlu1 %v5836_v60, %s18965_s10 }
0x195d   : > { %5853 = vrot.lane.b32.xlu0 %v5831_v22, %s18966_s21 }
0x1960   : > { %5847 = vrot.lane.b32.xlu1 %v5831_v22, %s18965_s10 }
0x1961   : > { %5859 = vrot.lane.b32.xlu0 %v5831_v22, %s18967_s25 }
0x1964   : > { %5855 = vrot.lane.b32.xlu1 %v5836_v60, %s18966_s21 }
0x1965   : > { %5865 = vrot.lane.b32.xlu0 %v5831_v22, %s18968_s29 }
0x1968   : > { %5861 = vrot.lane.b32.xlu1 %v5836_v60, %s18967_s25 }
0x1969   : > { %5871 = vrot.lane.b32.xlu0 %v5831_v22, %s18969_s18 }
0x196c   : > { %5867 = vrot.lane.b32.xlu1 %v5836_v60, %s18968_s29 }
0x196d   : > { %5877 = vrot.lane.b32.xlu0 %v5831_v22, %s18970_s2 }
0x1970   : > { %5873 = vrot.lane.b32.xlu1 %v5836_v60, %s18969_s18 }
0x1971   : > { %15675 = vrot.lane.b32.xlu0 %v15674_v24, %s18971_s11 }
0x1974   : > { %5879 = vrot.lane.b32.xlu1 %v5836_v60, %s18970_s2 }
0x19ca   : > { %v5844_v8 = vpop.permute.xlu1 %5843 }
0x19cb   : > { %v5842_v2 = vpop.permute.xlu0 %5841  ;;  %v5886_v38 = vmul.f32 0.5, %v5844_v8 }
0x19cc   : > { %v15679_v0 = vpack.i.bf16 %v5844_v8, %v5842_v2  ;;  %v5885_v56 = vmul.f32 0.5, %v5842_v2 }
0x19ce   : > { %v17568_v36 = vpop.permute.xlu1 %5849  ;;  %15680 = vrot.lane.b32.xlu1 %v15679_v0, %s18971_s11 }
0x19cf   : > { %v5854_v25 = vpop.permute.xlu0 %5853  ;;  %v5888_v21 = vmul.f32 0.5, %v17568_v36 }
0x19d0   : > { %v5889_v11 = vmul.f32 0.5, %v5854_v25 }
0x19d2   : > { %v5848_v7 = vpop.permute.xlu1 %5847  ;;  %14140 = vmatprep.mubr.msk.f32.mxu1 %vm1477_vm2, %v5889_v11 }
0x19d3   : > { %v15684_v1 = vpack.i.bf16 %v17568_v36, %v5848_v7  ;;  %v5860_v17 = vpop.permute.xlu0 %5859  ;;  %v5887_v28 = vmul.f32 0.5, %v5848_v7 }
0x19d4   : > { %v5891_v52 = vmul.f32 0.5, %v5860_v17 }
0x19d5   : > { %15685 = vrot.lane.b32.xlu0 %v15684_v1, %s18971_s11 }
0x19d6   : > { %v17574_v53 = vpop.permute.xlu1 %5855 }
0x19d7   : > { %v15689_v26 = vpack.i.bf16 %v17574_v53, %v5854_v25  ;;  %v17577_v12 = vpop.permute.xlu0 %5865  ;;  %v5890_v55 = vmul.f32 0.5, %v17574_v53 }
0x19d8   : > { %v5893_v13 = vmul.f32 0.5, %v17577_v12 }
0x19d9   : > { %15690 = vrot.lane.b32.xlu1 %v15689_v26, %s18971_s11 }
0x19da   : > { %v17580_v27 = vpop.permute.xlu1 %5861 }
0x19db   : > { %v17583_v46 = vpack.i.bf16 %v17580_v27, %v5860_v17  ;;  %v17585_v57 = vpop.permute.xlu0 %5871  ;;  %v5892_v22 = vmul.f32 0.5, %v17580_v27 }
0x19dc   : > { %v5895_v35 = vmul.f32 0.5, %v17585_v57 }
0x19dd   : > { %15695 = vrot.lane.b32.xlu0 %v17583_v46, %s18971_s11 }
0x19de   : > { %v17589_v41 = vpop.permute.xlu1 %5867 }
0x19df   : > { %v17593_v39 = vpack.i.bf16 %v17589_v41, %v17577_v12  ;;  %v17595_v50 = vpop.permute.xlu0 %5877  ;;  %v5894_v11 = vmul.f32 0.5, %v17589_v41 }
0x19e0   : > { %v5897_v53 = vmul.f32 0.5, %v17595_v50 }
0x19e1   : > { %15700 = vrot.lane.b32.xlu1 %v17593_v39, %s18971_s11 }
0x19e2   : > { %v17599_v15 = vpop.permute.xlu1 %5873 }
0x19e3   : > { %v17603_v23 = vpack.i.bf16 %v17599_v15, %v17585_v57  ;;  %v15676_v63 = vpop.permute.xlu0 %15675  ;;  %v5896_v27 = vmul.f32 0.5, %v17599_v15 }
0x19e4   : > { %v15678_v9 = vunpack.i.h.bf16 %v15676_v63  ;;  %v15677_v29 = vunpack.i.l.bf16 %v15676_v63 }
0x19e5   : > { %15705 = vrot.lane.b32.xlu0 %v17603_v23, %s18971_s11 }
0x19e6   : > { %v14977_v6 = vpack.c.bf16 %v15678_v9, %v15677_v29  ;;  %v17607_v54 = vpop.permute.xlu1 %5879 }
0x19e7   : > { %v17611_v48 = vpack.i.bf16 %v17607_v54, %v17595_v50  ;;  %v5898_v9 = vmul.f32 0.5, %v17607_v54 }
0x19e8   : > { %14979 = vmatprep.subr.msk.bf16.mxu0 %vm16793_vm3, %v14977_v6 }
0x19e9   : > { %15715 = vrot.lane.b32.xlu0 %v15674_v24, %s18972_s23  ;;  %15710 = vrot.lane.b32.xlu1 %v17611_v48, %s18971_s11 }
0x19ea   : > { %14982 = vmatpush3.bf16.xpose.msk.msra.mxu0 %vm16793_vm3, %v14977_v6 }
0x19ed   : > { %15720 = vrot.lane.b32.xlu1 %v15679_v0, %s18972_s23 }
0x19f1   : > { %14120 = vmatmul.mubr.msk.f32.vlgmr.msra.gmra.mrb[48].mxu0 %vm1477_vm2, %v5884_v42  ;;  %15725 = vrot.lane.b32.xlu1 %v15684_v1, %s18972_s23 }
0x19f2   : > { %14126 = vmatprep.mubr.msk.f32.mxu0 %vm1477_vm2, %v5885_v56 }
0x19f5   : > { %15730 = vrot.lane.b32.xlu1 %v15689_v26, %s18972_s23 }
0x1a40   : > { %v15681_v5 = vpop.permute.xlu1 %15680 }
0x1a41   : > { %v15683_v20 = vunpack.i.h.bf16 %v15681_v5  ;;  %v15682_v43 = vunpack.i.l.bf16 %v15681_v5 }
0x1a43   : > { %v14983_v37 = vpack.c.bf16 %v15683_v20, %v15682_v43 }
0x1a45   : > { %14985 = vmatprep.subr.msk.bf16.mxu0 %vm16793_vm3, %v14983_v37 }
0x1a46   : > { %14988 = vmatpush3.bf16.xpose.msk.msra.mxu0 %vm16793_vm3, %v14983_v37 }
0x1a47   : > { %v15686_v3 = vpop.permute.xlu0 %15685 }
0x1a48   : > { %v15688_v49 = vunpack.i.h.bf16 %v15686_v3  ;;  %v15687_v58 = vunpack.i.l.bf16 %v15686_v3 }
0x1a4a   : > { %v14989_v34 = vpack.c.bf16 %v15688_v49, %v15687_v58 }
0x1a4b   : > { %v15691_v31 = vpop.permute.xlu1 %15690 }
0x1a4c   : > { %v15693_v30 = vunpack.i.h.bf16 %v15691_v31  ;;  %v15692_v45 = vunpack.i.l.bf16 %v15691_v31  ;;  %14991 = vmatprep.subr.msk.bf16.mxu0 %vm16793_vm3, %v14989_v34 }
0x1a4d   : > { %14127 = vmatmul.mubr.msk.f32.vlgmr.msra.gmra.mrb[50].mxu0 %vm1477_vm2, %v5886_v38 }
0x1a4e   : > { %v14995_v40 = vpack.c.bf16 %v15693_v30, %v15692_v45  ;;  %14994 = vmatpush3.bf16.xpose.msk.msra.mxu0 %vm16793_vm3, %v14989_v34  ;;  %14133 = vmatprep.mubr.msk.f32.mxu0 %vm1477_vm2, %v5887_v28 }
0x1a4f   : > { %v15696_v10 = vpop.permute.xlu0 %15695 }
0x1a50   : > { %v15698_v51 = vunpack.i.h.bf16 %v15696_v10  ;;  %v15697_v47 = vunpack.i.l.bf16 %v15696_v10  ;;  %14997 = vmatprep.subr.msk.bf16.mxu1 %vm16793_vm3, %v14995_v40 }
0x1a51   : > { %15000 = vmatpush3.bf16.xpose.msk.msra.mxu1 %vm16793_vm3, %v14995_v40 }
0x1a52   : > { %v15001_v61 = vpack.c.bf16 %v15698_v51, %v15697_v47 }
0x1a53   : > { %v15701_v14 = vpop.permute.xlu1 %15700 }
0x1a54   : > { %v15703_v18 = vunpack.i.h.bf16 %v15701_v14  ;;  %v15702_v62 = vunpack.i.l.bf16 %v15701_v14  ;;  %15003 = vmatprep.subr.msk.bf16.mxu0 %vm16793_vm3, %v15001_v61 }
0x1a55   : > { %14134 = vmatmul.mubr.msk.f32.vlgmr.msra.gmra.mrb[52].mxu0 %vm1477_vm2, %v5888_v21 }
0x1a56   : > { %v15007_v59 = vpack.c.bf16 %v15703_v18, %v15702_v62  ;;  %15006 = vmatpush3.bf16.xpose.msk.msra.mxu0 %vm16793_vm3, %v15001_v61  ;;  %14147 = vmatprep.mubr.msk.f32.mxu0 %vm1477_vm2, %v5891_v52 }
0x1a57   : > { %v15706_v16 = vpop.permute.xlu0 %15705 }
0x1a58   : > { %v15708_v19 = vunpack.i.h.bf16 %v15706_v16  ;;  %v15707_v60 = vunpack.i.l.bf16 %v15706_v16  ;;  %14141 = vmatmul.mubr.msk.f32.vlgmr.msra.gmra.mrb[36].mxu1 %vm1477_vm2, %v5890_v55  ;;  %15009 = vmatprep.subr.msk.bf16.mxu1 %vm16793_vm3, %v15007_v59 }
0x1a59   : > { %15012 = vmatpush3.bf16.xpose.msk.msra.mxu1 %vm16793_vm3, %v15007_v59  ;;  %14154 = vmatprep.mubr.msk.f32.mxu1 %vm1477_vm2, %v5893_v13 }
0x1a5a   : > { %v15013_v32 = vpack.c.bf16 %v15708_v19, %v15707_v60 }
0x1a5b   : > { %v15711_v24 = vpop.permute.xlu1 %15710  ;;  %v15716_v8 = vpop.permute.xlu0 %15715 }
0x1a5c   : > { %v15713_v2 = vunpack.i.h.bf16 %v15711_v24  ;;  %v15712_v0 = vunpack.i.l.bf16 %v15711_v24  ;;  %v15718_v36 = vunpack.i.h.bf16 %v15716_v8  ;;  %v15717_v25 = vunpack.i.l.bf16 %v15716_v8  ;;  %15015 = vmatprep.subr.msk.bf16.mxu0 %vm16793_vm3, %v15013_v32 }
0x1a5d   : > { %14148 = vmatmul.mubr.msk.f32.vlgmr.msra.gmra.mrb[54].mxu0 %vm1477_vm2, %v5892_v22 }
0x1a5e   : > { %v15019_v7 = vpack.c.bf16 %v15713_v2, %v15712_v0  ;;  %15018 = vmatpush3.bf16.xpose.msk.msra.mxu0 %vm16793_vm3, %v15013_v32  ;;  %14161 = vmatprep.mubr.msk.f32.mxu0 %vm1477_vm2, %v5895_v35  ;;  %v15025_v1 = vpack.c.bf16 %v15718_v36, %v15717_v25 }
0x1a5f   : > { %v15721_v17 = vpop.permute.xlu1 %15720 }
0x1a60   : > { %14155 = vmatmul.mubr.msk.f32.vlgmr.msra.gmra.mrb[38].mxu1 %vm1477_vm2, %v5894_v11  ;;  %15021 = vmatprep.subr.msk.bf16.mxu1 %vm16793_vm3, %v15019_v7  ;;  %v15723_v26 = vunpack.i.h.bf16 %v15721_v17  ;;  %v15722_v12 = vunpack.i.l.bf16 %v15721_v17 }
0x1a61   : > { %15026 = vmatprep.subr.bf16.mxu0 %v15025_v1  ;;  %15024 = vmatpush3.bf16.xpose.msk.msra.mxu1 %vm16793_vm3, %v15019_v7 }
0x1a62   : > { %14168 = vmatprep.mubr.msk.f32.mxu1 %vm1477_vm2, %v5897_v53  ;;  %v17672_v50 = vpack.c.bf16 %v15723_v26, %v15722_v12 }
0x1a63   : > { %v15726_v57 = vpop.permute.xlu1 %15725 }
0x1a64   : > { %v15728_v41 = vunpack.i.h.bf16 %v15726_v57  ;;  %v15727_v63 = vunpack.i.l.bf16 %v15726_v57 }
0x1a65   : > { %14162 = vmatmul.mubr.msk.f32.vlgmr.msra.gmra.mrb[56].mxu0 %vm1477_vm2, %v5896_v27 }
0x1a66   : > { %15028 = vmatpush3.bf16.msra.mxu0 %v15025_v1  ;;  %v15033_v29 = vpack.c.bf16 %v15728_v41, %v15727_v63 }
0x1a67   : > { %15030 = vmatprep.subr.bf16.mxu0 %v17672_v50  ;;  %v17736_v19 = vpop.permute.xlu1 %15730 }
0x1a68   : > { %14169 = vmatmul.mubr.msk.f32.vlgmr.msra.gmra.mrb[40].mxu1 %vm1477_vm2, %v5898_v9  ;;  %15034 = vmatprep.subr.bf16.mxu1 %v15033_v29 }
0x1a69   : > { %15036 = vmatpush3.bf16.msra.mxu1 %v15033_v29 }
0x1ac4   : > { %v14121_v6 = vpop.f32.mrb[48].mxu0 }
0x1ac5   : > { %v5979_v42 = vpop.f32.mrb[49].mxu0  ;;  %v6614_v15 = vsel %vm1145_vm0, %v14121_v6, -inf }
0x1ac6   : > { %6615 = vmax.xlane.f32.xlu1 %v6614_v15  ;;  %v6611_v56 = vsel %vm1145_vm0, %v5979_v42, -inf }
0x1ac7   : > { %6612 = vmax.xlane.f32.xlu0 %v6611_v56 }
0x1b20   : > { %v14128_v5 = vpop.f32.mrb[50].mxu0 }
0x1b21   : > { %v17679_v20 = vpop.f32.mrb[51].mxu0  ;;  %v6620_v54 = vsel %vm1145_vm0, %v14128_v5, -inf }
0x1b22   : > { %6621 = vmax.xlane.f32.xlu0 %v6620_v54  ;;  %v6617_v43 = vsel %vm1145_vm0, %v17679_v20, -inf }
0x1b26   : > { %6618 = vmax.xlane.f32.xlu0 %v6617_v43 }
0x1b28   : > { %v17684_v37 = vpop.f32.mrb[52].mxu0 }
0x1b29   : > { %v17686_v3 = vpop.f32.mrb[53].mxu0  ;;  %v6626_v28 = vsel %vm1145_vm0, %v17684_v37, -inf }
0x1b2a   : > { %v6623_v45 = vsel %vm1145_vm0, %v17686_v3, -inf }
0x1b2b   : > { %v17688_v49 = vpop.f32.mrb[36].mxu1 }
0x1b2c   : > { %v17690_v58 = vpop.f32.mrb[37].mxu1  ;;  %v6632_v34 = vsel %vm1145_vm0, %v17688_v49, -inf }
0x1b2d   : > { %6633 = vmax.xlane.f32.xlu1 %v6632_v34  ;;  %v6629_v38 = vsel %vm1145_vm0, %v17690_v58, -inf }
0x1b2e   : > { %6630 = vmax.xlane.f32.xlu0 %v6629_v38 }
0x1b30   : > { %v17696_v31 = vpop.f32.mrb[54].mxu0 }
0x1b31   : > { %6627 = vmax.xlane.f32.xlu1 %v6626_v28  ;;  %v17700_v30 = vpop.f32.mrb[55].mxu0  ;;  %v6638_v21 = vsel %vm1145_vm0, %v17696_v31, -inf }
0x1b32   : > { %6624 = vmax.xlane.f32.xlu0 %v6623_v45  ;;  %v6635_v52 = vsel %vm1145_vm0, %v17700_v30, -inf }
0x1b33   : > { %v17704_v40 = vpop.f32.mrb[38].mxu1 }
0x1b34   : > { %v17706_v10 = vpop.f32.mrb[39].mxu1  ;;  %v6644_v51 = vsel %vm1145_vm0, %v17704_v40, -inf }
0x1b35   : > { %6645 = vmax.xlane.f32.xlu1 %v6644_v51  ;;  %v6641_v47 = vsel %vm1145_vm0, %v17706_v10, -inf }
0x1b36   : > { %6642 = vmax.xlane.f32.xlu0 %v6641_v47 }
0x1b38   : > { %v17712_v61 = vpop.f32.mrb[56].mxu0 }
0x1b39   : > { %6639 = vmax.xlane.f32.xlu1 %v6638_v21  ;;  %v17716_v14 = vpop.f32.mrb[57].mxu0  ;;  %v6650_v13 = vsel %vm1145_vm0, %v17712_v61, -inf }
0x1b3a   : > { %6636 = vmax.xlane.f32.xlu0 %v6635_v52  ;;  %v6647_v16 = vsel %vm1145_vm0, %v17716_v14, -inf }
0x1b3b   : > { %v17720_v18 = vpop.f32.mrb[40].mxu1 }
0x1b3c   : > { %v17722_v62 = vpop.f32.mrb[41].mxu1  ;;  %v6656_v55 = vsel %vm1145_vm0, %v17720_v18, -inf }
0x1b3d   : > { %6657 = vmax.xlane.f32.xlu1 %v6656_v55  ;;  %v6653_v59 = vsel %vm1145_vm0, %v17722_v62, -inf }
0x1b3e   : > { %6654 = vmax.xlane.f32.xlu0 %v6653_v59 }
0x1b41   : > { %6651 = vmax.xlane.f32.xlu1 %v6650_v13 }
0x1b42   : > { %6648 = vmax.xlane.f32.xlu0 %v6647_v16 }
0x1b52   : > { %15740 = vrot.lane.b32.xlu1 %v17593_v39, %s18972_s23 }
0x1b53   : > { %v6616_v60 = vpop.xlane.xlu1 %6615 }
0x1b54   : > { %v6613_v32 = vpop.xlane.xlu0 %6612  ;;  %v6660_v22 = vsub.f32 %v14121_v6, %v6616_v60 }
0x1b55   : > { %v6659_v35 = vsub.f32 %v5979_v42, %v6613_v32 }
0x1b56   : > { %v6677_v24 = vmul.f32 1.442695, %v6660_v22 }
0x1b57   : > { %v6675_v8 = vmul.f32 1.442695, %v6659_v35 }
0x1b58   : > { %15735 = vrot.lane.b32.xlu0 %v17583_v46, %s18972_s23  ;;  %16069 = vpow2.f32 %v6677_v24 }
0x1b59   : > { %16071 = vpow2.f32 %v6675_v8 }
0x1b62   : > { %v17738_v2 = vpop.eup %16069 }
0x1b63   : > { %v17740_v0 = vpop.eup %16071  ;;  %v6710_v39 = vsel %vm1145_vm0, %v17738_v2, 0.0 }
0x1b64   : > { %v6707_v46 = vsel %vm1145_vm0, %v17740_v0, 0.0 }
0x1b76   : > { %6711 = vadd.xlane.f32.xlu1 %v6710_v39 }
0x1b77   : > { %6708 = vadd.xlane.f32.xlu0 %v6707_v46 }
0x1baf   : > { %v6622_v36 = vpop.xlane.xlu0 %6621 }
0x1bb0   : > { %v6662_v25 = vsub.f32 %v14128_v5, %v6622_v36 }
0x1bb2   : > { %v6681_v11 = vmul.f32 1.442695, %v6662_v25 }
0x1bb3   : > { %v6619_v7 = vpop.xlane.xlu0 %6618 }
0x1bb4   : > { %16073 = vpow2.f32 %v6681_v11  ;;  %v6661_v1 = vsub.f32 %v17679_v20, %v6619_v7 }
0x1bb6   : > { %v6679_v17 = vmul.f32 1.442695, %v6661_v1 }
0x1bb8   : > { %16075 = vpow2.f32 %v6679_v17 }
0x1bba   : > { %v6634_v53 = vpop.xlane.xlu1 %6633 }
0x1bbb   : > { %v6666_v26 = vsub.f32 %v17688_v49, %v6634_v53  ;;  %v6631_v12 = vpop.xlane.xlu0 %6630 }
0x1bbc   : > { %v6665_v27 = vsub.f32 %v17690_v58, %v6631_v12 }
0x1bbd   : > { %v6689_v57 = vmul.f32 1.442695, %v6666_v26 }
0x1bbe   : > { %v17749_v41 = vpop.eup %16073  ;;  %v6687_v63 = vmul.f32 1.442695, %v6665_v27  ;;  %v6628_v9 = vpop.xlane.xlu1 %6627 }
0x1bbf   : > { %16077 = vpow2.f32 %v6689_v57  ;;  %v6664_v29 = vsub.f32 %v17684_v37, %v6628_v9  ;;  %v6625_v6 = vpop.xlane.xlu0 %6624  ;;  %v6716_v42 = vsel %vm1145_vm0, %v17749_v41, 0.0 }
0x1bc0   : > { %16079 = vpow2.f32 %v6687_v63  ;;  %v6663_v15 = vsub.f32 %v17686_v3, %v6625_v6  ;;  %6717 = vadd.xlane.f32.xlu1 %v6716_v42 }
0x1bc1   : > { %v6685_v56 = vmul.f32 1.442695, %v6664_v29 }
0x1bc2   : > { %v17755_v5 = vpop.eup %16075  ;;  %v6683_v20 = vmul.f32 1.442695, %v6663_v15  ;;  %v6646_v54 = vpop.xlane.xlu1 %6645 }
0x1bc3   : > { %16081 = vpow2.f32 %v6685_v56  ;;  %v6670_v43 = vsub.f32 %v17704_v40, %v6646_v54  ;;  %v6643_v49 = vpop.xlane.xlu0 %6642  ;;  %v6713_v37 = vsel %vm1145_vm0, %v17755_v5, 0.0 }
0x1bc4   : > { %16083 = vpow2.f32 %v6683_v20  ;;  %v6669_v58 = vsub.f32 %v17706_v10, %v6643_v49  ;;  %6714 = vadd.xlane.f32.xlu0 %v6713_v37 }
0x1bc5   : > { %v6697_v34 = vmul.f32 1.442695, %v6670_v43 }
0x1bc6   : > { %v6695_v38 = vmul.f32 1.442695, %v6669_v58  ;;  %v6640_v3 = vpop.xlane.xlu1 %6639 }
0x1bc7   : > { %16085 = vpow2.f32 %v6697_v34  ;;  %v6668_v28 = vsub.f32 %v17696_v31, %v6640_v3  ;;  %v6637_v45 = vpop.xlane.xlu0 %6636  ;;  %v15733_v34 = vunpack.i.h.bf16 %v17736_v19 }
0x1bc8   : > { %16087 = vpow2.f32 %v6695_v38  ;;  %v6667_v51 = vsub.f32 %v17700_v30, %v6637_v45  ;;  %v15732_v38 = vunpack.i.l.bf16 %v17736_v19 }
0x1bc9   : > { %v17763_v47 = vpop.eup %16077  ;;  %v6693_v40 = vmul.f32 1.442695, %v6668_v28 }
0x1bca   : > { %v17765_v21 = vpop.eup %16079  ;;  %v6691_v52 = vmul.f32 1.442695, %v6667_v51  ;;  %v6658_v55 = vpop.xlane.xlu1 %6657  ;;  %v6728_v10 = vsel %vm1145_vm0, %v17763_v47, 0.0 }
0x1bcb   : > { %16089 = vpow2.f32 %v6693_v40  ;;  %v6674_v59 = vsub.f32 %v17720_v18, %v6658_v55  ;;  %v6655_v13 = vpop.xlane.xlu0 %6654  ;;  %6729 = vadd.xlane.f32.xlu1 %v6728_v10  ;;  %v6725_v31 = vsel %vm1145_vm0, %v17765_v21, 0.0 }
0x1bcc   : > { %16091 = vpow2.f32 %v6691_v52  ;;  %v6673_v30 = vsub.f32 %v17722_v62, %v6655_v13  ;;  %6726 = vadd.xlane.f32.xlu0 %v6725_v31 }
0x1bcd   : > { %v17773_v16 = vpop.eup %16081  ;;  %v6705_v60 = vmul.f32 1.442695, %v6674_v59 }
0x1bce   : > { %v17775_v32 = vpop.eup %16083  ;;  %v6703_v22 = vmul.f32 1.442695, %v6673_v30  ;;  %v6652_v35 = vpop.xlane.xlu1 %6651  ;;  %v6722_v24 = vsel %vm1145_vm0, %v17773_v16, 0.0 }
0x1bcf   : > { %16093 = vpow2.f32 %v6705_v60  ;;  %v6672_v18 = vsub.f32 %v17712_v61, %v6652_v35  ;;  %6723 = vadd.xlane.f32.xlu1 %v6722_v24  ;;  %v6649_v8 = vpop.xlane.xlu0 %6648  ;;  %v6719_v39 = vsel %vm1145_vm0, %v17775_v32, 0.0 }
0x1bd0   : > { %16095 = vpow2.f32 %v6703_v22  ;;  %v6671_v62 = vsub.f32 %v17716_v14, %v6649_v8  ;;  %6720 = vadd.xlane.f32.xlu0 %v6719_v39 }
0x1bd1   : > { %v17783_v46 = vpop.eup %16085  ;;  %v6701_v36 = vmul.f32 1.442695, %v6672_v18 }
0x1bd2   : > { %v17785_v25 = vpop.eup %16087  ;;  %v6699_v11 = vmul.f32 1.442695, %v6671_v62  ;;  %v6740_v7 = vsel %vm1145_vm0, %v17783_v46, 0.0  ;;  %v15741_v54 = vpop.permute.xlu1 %15740 }
0x1bd3   : > { %16097 = vpow2.f32 %v6701_v36  ;;  %6741 = vadd.xlane.f32.xlu1 %v6740_v7  ;;  %v15736_v61 = vpop.permute.xlu0 %15735  ;;  %v6737_v1 = vsel %vm1145_vm0, %v17785_v25, 0.0  ;;  %v15743_v52 = vunpack.i.h.bf16 %v15741_v54 }
0x1bd4   : > { %16099 = vpow2.f32 %v6699_v11  ;;  %v15738_v17 = vunpack.i.h.bf16 %v15736_v61  ;;  %v15737_v53 = vunpack.i.l.bf16 %v15736_v61  ;;  %6738 = vadd.xlane.f32.xlu0 %v6737_v1 }
0x1bd5   : > { %v17791_v14 = vpop.eup %16089 }
0x1bd6   : > { %v17793_v26 = vpop.eup %16091  ;;  %v6734_v12 = vsel %vm1145_vm0, %v17791_v14, 0.0  ;;  %v17797_v27 = vpack.c.bf16 %v15738_v17, %v15737_v53 }
0x1bd7   : > { %6735 = vadd.xlane.f32.xlu1 %v6734_v12  ;;  %v6731_v57 = vsel %vm1145_vm0, %v17793_v26, 0.0 }
0x1bd8   : > { %6732 = vadd.xlane.f32.xlu0 %v6731_v57  ;;  %15042 = vmatprep.subr.bf16.mxu1 %v17797_v27 }
0x1bd9   : > { %v17802_v63 = vpop.eup %16093 }
0x1bda   : > { %v17804_v9 = vpop.eup %16095  ;;  %v6752_v29 = vsel %vm1145_vm0, %v17802_v63, 0.0 }
0x1bdb   : > { %6753 = vadd.xlane.f32.xlu1 %v6752_v29  ;;  %v6749_v6 = vsel %vm1145_vm0, %v17804_v9, 0.0 }
0x1bdc   : > { %6750 = vadd.xlane.f32.xlu0 %v6749_v6 }
0x1bdd   : > { %v17810_v42 = vpop.eup %16097 }
0x1bde   : > { %v17812_v15 = vpop.eup %16099  ;;  %v6746_v56 = vsel %vm1145_vm0, %v17810_v42, 0.0 }
0x1bdf   : > { %6747 = vadd.xlane.f32.xlu1 %v6746_v56  ;;  %v6743_v20 = vsel %vm1145_vm0, %v17812_v15, 0.0 }
0x1be0   : > { %6744 = vadd.xlane.f32.xlu0 %v6743_v20 }
0x1bf0   : > { %15750 = vrot.lane.b32.xlu1 %v17611_v48, %s18972_s23 }
0x1bf6   : > { %15745 = vrot.lane.b32.xlu0 %v17603_v23, %s18972_s23  ;;  %v15037_v23 = vpack.c.bf16 %v15733_v34, %v15732_v38 }
0x1c03   : > { %v6712_v43 = vpop.xlane.xlu1 %6711 }
0x1c04   : > { %16101 = vrcp.f32 %v6712_v43  ;;  %v6709_v49 = vpop.xlane.xlu0 %6708 }
0x1c05   : > { %16103 = vrcp.f32 %v6709_v49 }
0x1c0e   : > { %v16102_v37 = vpop.eup %16101 }
0x1c0f   : > { %v16104_v58 = vpop.eup %16103  ;;  %v6772_v28 = vmul.f32 %v16102_v37, %v17738_v2  ;;  %v15742_v2 = vunpack.i.l.bf16 %v15741_v54 }
0x1c10   : > { %v6771_v3 = vmul.f32 %v16104_v58, %v17740_v0 }
0x1c11   : > { %v15045_v31 = vpack.c.bf16 %v15743_v52, %v15742_v2  ;;  %v12995_v52 = vld [vmem:[%s16507_s24 + $0x58] sm:$0xff] }
0x1c12   : > { %14175 = vmatprep.mubr.msk.f32.mxu0 %vm1145_vm0, %v6771_v3 }
0x1c13   : > { %14176 = vmatmul.mubr.msk.f32.vlgmr.msra.gmra.mrb[58].mxu0 %vm1145_vm0, %v6772_v28 }
0x1c14   : > { %15032 = vmatpush3.bf16.msra.mxu0 %v17672_v50 }
0x1c15   : > { %15038 = vmatprep.subr.bf16.mxu0 %v15037_v23 }
0x1c4d   : > { %v6718_v48 = vpop.xlane.xlu1 %6717 }
0x1c4e   : > { %16105 = vrcp.f32 %v6718_v48 }
0x1c51   : > { %v6715_v45 = vpop.xlane.xlu0 %6714 }
0x1c52   : > { %16107 = vrcp.f32 %v6715_v45 }
0x1c58   : > { %v6730_v51 = vpop.xlane.xlu1 %6729  ;;  %v16106_v19 = vpop.eup %16105 }
0x1c59   : > { %16109 = vrcp.f32 %v6730_v51  ;;  %v6727_v40 = vpop.xlane.xlu0 %6726  ;;  %v6774_v50 = vmul.f32 %v16106_v19, %v17749_v41 }
0x1c5a   : > { %16111 = vrcp.f32 %v6727_v40 }
0x1c5c   : > { %v16108_v0 = vpop.eup %16107  ;;  %v6724_v55 = vpop.xlane.xlu1 %6723 }
0x1c5d   : > { %16113 = vrcp.f32 %v6724_v55  ;;  %v6721_v10 = vpop.xlane.xlu0 %6720  ;;  %v6773_v59 = vmul.f32 %v16108_v0, %v17755_v5  ;;  %v12994_v0 = vld [vmem:[%s16507_s24 + $0x50] sm:$0xff] }
0x1c5e   : > { %16115 = vrcp.f32 %v6721_v10  ;;  %v15061_v2 = vpack.c.bf16 %v12995_v52, %v12994_v0 }
0x1c5f   : > { %14182 = vmatprep.mubr.msk.f32.mxu0 %vm1145_vm0, %v6773_v59 }
0x1c60   : > { %v6742_v13 = vpop.xlane.xlu1 %6741  ;;  %14183 = vmatmul.mubr.msk.f32.vlgmr.msra.gmra.mrb[60].mxu0 %vm1145_vm0, %v6774_v50 }
0x1c61   : > { %16117 = vrcp.f32 %v6742_v13  ;;  %15040 = vmatpush3.bf16.msra.mxu0 %v15037_v23  ;;  %v6739_v30 = vpop.xlane.xlu0 %6738  ;;  %v12992_v23 = vld [vmem:[%s16507_s24 + $0x40] sm:$0xff] }
0x1c62   : > { %15046 = vmatprep.subr.bf16.mxu0 %v15045_v31  ;;  %16119 = vrcp.f32 %v6739_v30 }
0x1c63   : > { %v16110_v60 = vpop.eup %16109 }
0x1c64   : > { %v16112_v22 = vpop.eup %16111  ;;  %v6736_v35 = vpop.xlane.xlu1 %6735  ;;  %v6778_v41 = vmul.f32 %v16110_v60, %v17763_v47 }
0x1c65   : > { %16121 = vrcp.f32 %v6736_v35  ;;  %v6733_v24 = vpop.xlane.xlu0 %6732  ;;  %v6777_v5 = vmul.f32 %v16112_v22, %v17765_v21 }
0x1c66   : > { %16123 = vrcp.f32 %v6733_v24 }
0x1c67   : > { %v16114_v18 = vpop.eup %16113  ;;  %14196 = vmatprep.mubr.msk.f32.mxu0 %vm1145_vm0, %v6777_v5 }
0x1c68   : > { %v16116_v8 = vpop.eup %16115  ;;  %v6754_v39 = vpop.xlane.xlu1 %6753  ;;  %14197 = vmatmul.mubr.msk.f32.vlgmr.msra.gmra.mrb[62].mxu0 %vm1145_vm0, %v6778_v41  ;;  %v6776_v11 = vmul.f32 %v16114_v18, %v17773_v16 }
0x1c69   : > { %16125 = vrcp.f32 %v6754_v39  ;;  %15048 = vmatpush3.bf16.msra.mxu0 %v15045_v31  ;;  %v6751_v62 = vpop.xlane.xlu0 %6750  ;;  %v6775_v36 = vmul.f32 %v16116_v8, %v17775_v32 }
0x1c6a   : > { %16127 = vrcp.f32 %v6751_v62 }
0x1c6b   : > { %v16118_v7 = vpop.eup %16117  ;;  %14189 = vmatprep.mubr.msk.f32.mxu1 %vm1145_vm0, %v6775_v36 }
0x1c6c   : > { %v16120_v21 = vpop.eup %16119  ;;  %v6748_v47 = vpop.xlane.xlu1 %6747  ;;  %14190 = vmatmul.mubr.msk.f32.vlgmr.msra.gmra.mrb[42].mxu1 %vm1145_vm0, %v6776_v11  ;;  %v6782_v17 = vmul.f32 %v16118_v7, %v17783_v46 }
0x1c6d   : > { %16129 = vrcp.f32 %v6748_v47  ;;  %15044 = vmatpush3.bf16.msra.mxu1 %v17797_v27  ;;  %v6745_v61 = vpop.xlane.xlu0 %6744  ;;  %v6781_v1 = vmul.f32 %v16120_v21, %v17785_v25 }
0x1c6e   : > { %16131 = vrcp.f32 %v6745_v61 }
0x1c6f   : > { %v16122_v32 = vpop.eup %16121  ;;  %14210 = vmatprep.mubr.msk.f32.mxu0 %vm1145_vm0, %v6781_v1 }
0x1c70   : > { %v16124_v16 = vpop.eup %16123  ;;  %v15751_v53 = vpop.permute.xlu1 %15750  ;;  %14211 = vmatmul.mubr.msk.f32.vlgmr.msra.gmra.mrb[64].mxu0 %vm1145_vm0, %v6782_v17  ;;  %v6780_v20 = vmul.f32 %v16122_v32, %v17791_v14 }
0x1c71   : > { %v15753_v12 = vunpack.i.h.bf16 %v15751_v53  ;;  %v15752_v57 = vunpack.i.l.bf16 %v15751_v53  ;;  %v15746_v29 = vpop.permute.xlu0 %15745  ;;  %v6779_v6 = vmul.f32 %v16124_v16, %v17793_v26 }
0x1c72   : > { %v15748_v56 = vunpack.i.h.bf16 %v15746_v29  ;;  %v15747_v27 = vunpack.i.l.bf16 %v15746_v29 }
0x1c73   : > { %v16126_v25 = vpop.eup %16125  ;;  %14203 = vmatprep.mubr.msk.f32.mxu1 %vm1145_vm0, %v6779_v6  ;;  %v15053_v46 = vpack.c.bf16 %v15753_v12, %v15752_v57 }
0x1c74   : > { %v16128_v54 = vpop.eup %16127  ;;  %14204 = vmatmul.mubr.msk.f32.vlgmr.msra.gmra.mrb[44].mxu1 %vm1145_vm0, %v6780_v20  ;;  %v15049_v43 = vpack.c.bf16 %v15748_v56, %v15747_v27  ;;  %v6786_v26 = vmul.f32 %v16126_v25, %v17802_v63  ;;  %v12999_v25 = vld [vmem:[%s16512_s30 + $0x2] ss:$0 sm:$0xff] }
0x1c75   : > { %15054 = vmatprep.subr.bf16.mxu0 %v15053_v46  ;;  %v6785_v49 = vmul.f32 %v16128_v54, %v17804_v9 }
0x1c76   : > { %15050 = vmatprep.subr.bf16.mxu1 %v15049_v43  ;;  %15056 = vmatpush3.bf16.msra.mxu0 %v15053_v46 }
0x1c77   : > { %v16130_v37 = vpop.eup %16129  ;;  %15052 = vmatpush3.bf16.msra.mxu1 %v15049_v43  ;;  %14224 = vmatprep.mubr.msk.f32.mxu0 %vm1145_vm0, %v6785_v49 }
0x1c78   : > { %v16132_v14 = vpop.eup %16131  ;;  %v6784_v34 = vmul.f32 %v16130_v37, %v17810_v42  ;;  %v12993_v42 = vld [vmem:[%s16507_s24 + $0x48] sm:$0xff] }
0x1c79   : > { %14225 = vmatmul.mubr.msk.f32.vlgmr.msra.gmra.mrb[66].mxu0 %vm1145_vm0, %v6786_v26  ;;  %v6783_v58 = vmul.f32 %v16132_v14, %v17812_v15  ;;  %v15057_v48 = vpack.c.bf16 %v12993_v42, %v12992_v23  ;;  %v13004_v23 = vld [vmem:[%s16527_s20 + $0x40] sm:$0xff]  ;;  %v13005_v42 = vld [vmem:[%s16527_s20 + $0x48] sm:$0xff] }
0x1c7b   : > { %14217 = vmatprep.mubr.msk.f32.mxu1 %vm1145_vm0, %v6783_v58  ;;  %15058 = vmatprep.subr.bf16.mxu1 %v15057_v48 }
0x1c7c   : > { %14218 = vmatmul.mubr.msk.f32.vlgmr.msra.gmra.mrb[46].mxu1 %vm1145_vm0, %v6784_v34 }
0x1c7d   : > { %15060 = vmatpush3.bf16.msra.mxu1 %v15057_v48  ;;  %v13006_v48 = vld [vmem:[%s16527_s20 + $0x50] sm:$0xff] }
0x1c7e   : > { %15062 = vmatprep.subr.bf16.mxu1 %v15061_v2 }
0x1c81   : > { %15064 = vmatpush3.bf16.msra.mxu1 %v15061_v2 }
0x1ce6   : > { %v14177_v9 = vpop.f32.mrb[58].mxu0 }
0x1ce7   : > { %v6865_v38 = vpop.f32.mrb[59].mxu0 }
0x1d33   : > { %v14184_v3 = vpop.f32.mrb[60].mxu0 }
0x1d34   : > { %7487 = vrot.lane.b32.xlu1 %v14184_v3, %s18973_s28  ;;  %v6952_v28 = vpop.f32.mrb[61].mxu0 }
0x1d35   : > { %7485 = vrot.lane.b32.xlu0 %v6952_v28, %s18973_s28 }
0x1d3b   : > { %v14198_v63 = vpop.f32.mrb[62].mxu0 }
0x1d3c   : > { %7503 = vrot.lane.b32.xlu1 %v14198_v63, %s18974_s7  ;;  %v7126_v15 = vpop.f32.mrb[63].mxu0 }
0x1d3d   : > { %7501 = vrot.lane.b32.xlu0 %v7126_v15, %s18974_s7 }
0x1d3f   : > { %v14191_v45 = vpop.f32.mrb[42].mxu1 }
0x1d40   : > { %7495 = vrot.lane.b32.xlu1 %v14191_v45, %s18975_s12  ;;  %v7039_v51 = vpop.f32.mrb[43].mxu1  ;;  %v15065_v45 = vpack.c.bf16 %v13005_v42, %v13004_v23 }
0x1d41   : > { %7493 = vrot.lane.b32.xlu0 %v7039_v51, %s18975_s12  ;;  %v13007_v51 = vld [vmem:[%s16527_s20 + $0x58] sm:$0xff] }
0x1d42   : > { %15066 = vmatprep.subr.bf16.mxu0 %v15065_v45 }
0x1d43   : > { %v14212_v40 = vpop.f32.mrb[64].mxu0  ;;  %15068 = vmatpush3.bf16.msra.mxu0 %v15065_v45 }
0x1d44   : > { %7519 = vrot.lane.b32.xlu1 %v14212_v40, %s18976_s9  ;;  %v7300_v19 = vpop.f32.mrb[65].mxu0  ;;  %v15069_v40 = vpack.c.bf16 %v13007_v51, %v13006_v48 }
0x1d45   : > { %7517 = vrot.lane.b32.xlu0 %v7300_v19, %s18976_s9 }
0x1d46   : > { %15070 = vmatprep.subr.bf16.mxu0 %v15069_v40 }
0x1d47   : > { %v14205_v55 = vpop.f32.mrb[44].mxu1  ;;  %15072 = vmatpush3.bf16.msra.mxu0 %v15069_v40 }
0x1d48   : > { %7511 = vrot.lane.b32.xlu1 %v14205_v55, %s18977_s4  ;;  %v7213_v10 = vpop.f32.mrb[45].mxu1 }
0x1d49   : > { %7509 = vrot.lane.b32.xlu0 %v7213_v10, %s18977_s4 }
0x1d4c   : > { %v14226_v59 = vpop.f32.mrb[66].mxu0 }
0x1d4d   : > { %v7474_v50 = vpop.f32.mrb[67].mxu0 }
0x1d4f   : > { %v14219_v13 = vpop.f32.mrb[46].mxu1 }
0x1d50   : > { %7527 = vrot.lane.b32.xlu1 %v14219_v13, %s18978_s22  ;;  %v7387_v31 = vpop.f32.mrb[47].mxu1 }
0x1d51   : > { %7525 = vrot.lane.b32.xlu0 %v7387_v31, %s18978_s22  ;;  %v13003_v31 = vld [vmem:[%s18960_s16 + $0x2] ss:$0 sm:$0xff] }
0x1d54   : > { %7535 = vrot.lane.b32.xlu1 %v14226_v59, %s18979_s27 }
0x1d55   : > { %7533 = vrot.lane.b32.xlu0 %v7474_v50, %s18979_s27  ;;  %v13002_v50 = vld [vmem:[%s18941_s6 + $0x2] ss:$0 sm:$0xff] }
0x1da6   : > { %v7488_v30 = vpop.permute.xlu1 %7487 }
0x1da7   : > { %v7486_v60 = vpop.permute.xlu0 %7485  ;;  %v7540_v62 = vsel %vm1477_vm2, %v14177_v9, %v7488_v30 }
0x1da8   : > { %v7539_v8 = vsel %vm1477_vm2, %v6865_v38, %v7486_v60 }
0x1dae   : > { %v7504_v22 = vpop.permute.xlu1 %7503 }
0x1daf   : > { %v7502_v35 = vpop.permute.xlu0 %7501 }
0x1db2   : > { %v7496_v24 = vpop.permute.xlu1 %7495 }
0x1db3   : > { %v7494_v5 = vpop.permute.xlu0 %7493  ;;  %v7542_v7 = vsel %vm3116_vm4, %v7540_v62, %v7496_v24  ;;  %v13015_v62 = vld [vmem:[%s18961_s13 + $0x118] sm:$0xff] }
0x1db4   : > { %v7541_v36 = vsel %vm3116_vm4, %v7539_v8, %v7494_v5  ;;  %v7544_v61 = vsel %vm3119_vm5, %v7542_v7, %v7504_v22  ;;  %v13017_v7 = vld [vmem:[%s18961_s13 + $0x128] sm:$0xff] }
0x1db5   : > { %v7543_v21 = vsel %vm3119_vm5, %v7541_v36, %v7502_v35 }
0x1db6   : > { %v7520_v41 = vpop.permute.xlu1 %7519 }
0x1db7   : > { %v7518_v18 = vpop.permute.xlu0 %7517 }
0x1dba   : > { %v7512_v39 = vpop.permute.xlu1 %7511 }
0x1dbb   : > { %v7510_v11 = vpop.permute.xlu0 %7509  ;;  %v7546_v32 = vsel %vm1145_vm0, %v7544_v61, %v7512_v39  ;;  %v13014_v39 = vld [vmem:[%s18961_s13 + $0x110] sm:$0xff]  ;;  %v13019_v61 = vld [vmem:[%s18961_s13 + $0x138] sm:$0xff] }
0x1dbc   : > { %v7545_v1 = vsel %vm1145_vm0, %v7543_v21, %v7510_v11  ;;  %v7548_v12 = vsel %vm3124_vm6, %v7546_v32, %v7520_v41  ;;  %v13012_v41 = vld [vmem:[%s18961_s13 + $0x100] sm:$0xff]  ;;  %v15077_v36 = vpack.c.bf16 %v13015_v62, %v13014_v39  ;;  %v13021_v32 = vld [vmem:[%s18961_s13 + $0x148] sm:$0xff] }
0x1dbd   : > { %v7547_v16 = vsel %vm3124_vm6, %v7545_v1, %v7518_v18  ;;  %v13013_v18 = vld [vmem:[%s18961_s13 + $0x108] sm:$0xff]  ;;  %v13016_v11 = vld [vmem:[%s18961_s13 + $0x120] sm:$0xff] }
0x1dbe   : > { %v15073_v8 = vpack.c.bf16 %v13013_v18, %v13012_v41  ;;  %v15081_v21 = vpack.c.bf16 %v13017_v7, %v13016_v11  ;;  %v13034_v39 = vld [vmem:[%s18939_s14 + $0x60] sm:$0xff]  ;;  %v13035_v62 = vld [vmem:[%s18939_s14 + $0x68] sm:$0xff]  ;;  %v13037_v7 = vld [vmem:[%s18939_s14 + $0x78] sm:$0xff] }
0x1dbf   : > { %v15105_v11 = vpack.c.bf16 %v13035_v62, %v13034_v39 }
0x1dc0   : > { %15074 = vmatprep.subr.bf16.mxu1 %v15073_v8 }
0x1dc1   : > { %15106 = vmatprep.subr.bf16.mxu0 %v15105_v11 }
0x1dc2   : > { %v7528_v47 = vpop.permute.xlu1 %7527 }
0x1dc3   : > { %v7526_v17 = vpop.permute.xlu0 %7525  ;;  %v7550_v6 = vsel %vm3127_vm7, %v7548_v12, %v7528_v47  ;;  %v13018_v47 = vld [vmem:[%s18961_s13 + $0x130] sm:$0xff]  ;;  %v13023_v12 = vld [vmem:[%s18961_s13 + $0x158] sm:$0xff] }
0x1dc4   : > { %v7549_v57 = vsel %vm3127_vm7, %v7547_v16, %v7526_v17  ;;  %v15085_v1 = vpack.c.bf16 %v13019_v61, %v13018_v47  ;;  %v13020_v17 = vld [vmem:[%s18961_s13 + $0x140] sm:$0xff]  ;;  %v13022_v16 = vld [vmem:[%s18961_s13 + $0x150] sm:$0xff] }
0x1dc6   : > { %v7536_v53 = vpop.permute.xlu1 %7535 }
0x1dc7   : > { %v7534_v29 = vpop.permute.xlu0 %7533  ;;  %v7552_v27 = vsel %vm3130_vm8, %v7550_v6, %v7536_v53  ;;  %v15089_v53 = vpack.c.bf16 %v13021_v32, %v13020_v17  ;;  %v13025_v6 = vld [vmem:[%s18961_s13 + $0x168] sm:$0xff] }
0x1dc8   : > { %v7551_v56 = vsel %vm3130_vm8, %v7549_v57, %v7534_v29  ;;  %v15093_v57 = vpack.c.bf16 %v13023_v12, %v13022_v16  ;;  %v13024_v29 = vld [vmem:[%s18961_s13 + $0x160] sm:$0xff] }
0x1dc9   : > { %14235 = vmatprep.mubr.msk.f32.mxu1 %vm1229_vm1, %v7551_v56  ;;  %v15097_v56 = vpack.c.bf16 %v13025_v6, %v13024_v29  ;;  %v13032_v12 = vld [vmem:[%s18942_s3 + $0x3] ss:$0 sm:$0xff]  ;;  %s18981_s3 = sld [smem:[#allocation25_spill]] }
0x1dca   : > { %14236 = vmatmul.mubr.msk.f32.vlgmr.msra.gmra.mrb[48].mxu1 %vm1229_vm1, %v7552_v27  ;;  %v13026_v27 = vld [vmem:[%s18961_s13 + $0x170] sm:$0xff] }
0x1dcb   : > { %15076 = vmatpush3.bf16.msra.mxu1 %v15073_v8 }
0x1dcc   : > { %15078 = vmatprep.subr.bf16.mxu1 %v15077_v36 }
0x1dcf   : > { %15080 = vmatpush3.bf16.msra.mxu1 %v15077_v36  ;;  %v13036_v36 = vld [vmem:[%s18939_s14 + $0x70] sm:$0xff] }
0x1dd0   : > { %15082 = vmatprep.subr.bf16.mxu1 %v15081_v21 }
0x1dd3   : > { %15084 = vmatpush3.bf16.msra.mxu1 %v15081_v21  ;;  %v15109_v21 = vpack.c.bf16 %v13037_v7, %v13036_v36 }
0x1dd4   : > { %15086 = vmatprep.subr.bf16.mxu1 %v15085_v1 }
0x1dd7   : > { %15088 = vmatpush3.bf16.msra.mxu1 %v15085_v1 }
0x1dd8   : > { %15090 = vmatprep.subr.bf16.mxu1 %v15089_v53 }
0x1ddb   : > { %15092 = vmatpush3.bf16.msra.mxu1 %v15089_v53 }
0x1ddc   : > { %15094 = vmatprep.subr.bf16.mxu1 %v15093_v57 }
0x1ddf   : > { %15096 = vmatpush3.bf16.msra.mxu1 %v15093_v57 }
0x1de0   : > { %15098 = vmatprep.subr.bf16.mxu1 %v15097_v56 }
0x1de3   : > { %15100 = vmatpush3.bf16.msra.mxu1 %v15097_v56  ;;  %v13033_v56 = vld [vmem:[%s18940_s8 + $0x3] ss:$0 sm:$0xff]  ;;  %s18983_s8 = sld [smem:[#allocation27_spill]] }
0x1e9d   : > { %v14237_v20 = vpop.f32.mrb[48].mxu1 }
0x1e9e   : > { %v7640_v46 = vadd.f32 %v14237_v20, %v17531_v4  ;;  %v7630_v54 = vpop.f32.mrb[49].mxu1  ;;  %v13027_v20 = vld [vmem:[%s18961_s13 + $0x178] sm:$0xff] }
0x1e9f   : > { %v7639_v43 = vadd.f32 %v7630_v54, %v17533_v33 }
0x1ea0   : > { %v17895_v49 = vadd.f32 %v12999_v25, %v7640_v46  ;;  %v13009_v46 = vld [vmem:[%s18962_s17 + $0x2] ss:$0 sm:$0xff] }
0x1ea1   : > { %v17897_v37 = vadd.f32 %v12999_v25, %v7639_v43  ;;  %v15101_v25 = vpack.c.bf16 %v13027_v20, %v13026_v27 }
0x1ea2   : > { %v7658_v26 = vsel %vm1229_vm1, %v17895_v49, 0.0 }
0x1ea3   : > { %7659 = vadd.xlane.f32.xlu1 %v7658_v26  ;;  %v7655_v14 = vsel %vm1229_vm1, %v17897_v37, 0.0  ;;  %15102 = vmatprep.subr.bf16.mxu1 %v15101_v25 }
0x1ea4   : > { %7656 = vadd.xlane.f32.xlu0 %v7655_v14  ;;  %15104 = vmatpush3.bf16.msra.mxu1 %v15101_v25 }
0x1f30   : > { %v7660_v58 = vpop.xlane.xlu1 %7659 }
0x1f31   : > { %v7662_v4 = vmul.f32 0.03125, %v7660_v58  ;;  %v7657_v34 = vpop.xlane.xlu0 %7656 }
0x1f32   : > { %v7661_v33 = vmul.f32 0.03125, %v7657_v34 }
0x1f33   : > { %v7664_v9 = vsub.f32 %v17895_v49, %v7662_v4 }
0x1f34   : > { %v7663_v38 = vsub.f32 %v17897_v37, %v7661_v33 }
0x1f35   : > { %v7666_v63 = vmul.f32 %v7664_v9, %v7664_v9 }
0x1f36   : > { %v7665_v3 = vmul.f32 %v7663_v38, %v7663_v38 }
0x1f37   : > { %v7670_v15 = vsel %vm1229_vm1, %v7666_v63, 0.0 }
0x1f38   : > { %v7667_v28 = vsel %vm1229_vm1, %v7665_v3, 0.0 }
0x1f39   : > { %7668 = vadd.xlane.f32.xlu0 %v7667_v28 }
0x1f3d   : > { %7671 = vadd.xlane.f32.xlu0 %v7670_v15 }
0x1fc6   : > { %v7669_v19 = vpop.xlane.xlu0 %7668 }
0x1fc7   : > { %v7673_v0 = vmul.f32 0.03125, %v7669_v19 }
0x1fc9   : > { %v7675_v52 = vadd.f32 1e-05, %v7673_v0 }
0x1fca   : > { %v7672_v2 = vpop.xlane.xlu0 %7671 }
0x1fcb   : > { %16133 = vrsqrt.f32 %v7675_v52  ;;  %v7674_v55 = vmul.f32 0.03125, %v7672_v2  ;;  %v13029_v2 = vld [vmem:[%s18963_s15 + $0x2] ss:$0 sm:$0xff] }
0x1fcd   : > { %v7676_v10 = vadd.f32 1e-05, %v7674_v55 }
0x1fcf   : > { %16135 = vrsqrt.f32 %v7676_v10 }
0x1fd5   : > { %v16134_v59 = vpop.eup %16133 }
0x1fd6   : > { %v7679_v13 = vmul.f32 %v16134_v59, %v7663_v38 }
0x1fd8   : > { %v7687_v30 = vmul.f32 %v13002_v50, %v7679_v13 }
0x1fd9   : > { %v16136_v60 = vpop.eup %16135 }
0x1fda   : > { %v7680_v22 = vmul.f32 %v16136_v60, %v7664_v9  ;;  %v7695_v35 = vadd.f32 %v13003_v31, %v7687_v30 }
0x1fdc   : > { %v7688_v24 = vmul.f32 %v13002_v50, %v7680_v22  ;;  %14246 = vmatprep.mubr.msk.f32.mxu0 %vm1229_vm1, %v7695_v35 }
0x1fde   : > { %v7696_v5 = vadd.f32 %v13003_v31, %v7688_v24 }
0x1fe0   : > { %14247 = vmatmul.mubr.msk.f32.vlgmr.msra.gmra.mrb[68].mxu0 %vm1229_vm1, %v7696_v5 }
0x1fe1   : > { %15108 = vmatpush3.bf16.msra.mxu0 %v15105_v11 }
0x1fe2   : > { %15110 = vmatprep.subr.bf16.mxu0 %v15109_v21 }
0x1fe5   : > { %15112 = vmatpush3.bf16.msra.mxu0 %v15109_v21 }
0x20b3   : > { %v14248_v54 = vpop.f32.mrb[68].mxu0 }
0x20b4   : > { %v7788_v43 = vadd.f32 %v14248_v54, %v13009_v46  ;;  %v7782_v26 = vpop.f32.mrb[69].mxu0  ;;  %v13039_v54 = vld [vmem:[%s16502_s19 + $0x3] ss:$0 sm:$0xff] }
0x20b5   : > { %v7783_v14 = vadd.f32 %v13009_v46, %v7782_v26 }
0x20b6   : > { %v7792_v58 = vmul.f32 %v7788_v43, %v7788_v43 }
0x20b7   : > { %v7791_v4 = vmul.f32 %v7783_v14, %v7783_v14 }
0x20b8   : > { %v7794_v34 = vmul.f32 %v7792_v58, %v7788_v43 }
0x20b9   : > { %v7793_v33 = vmul.f32 %v7791_v4, %v7783_v14 }
0x20ba   : > { %v7796_v9 = vmul.f32 0.044715, %v7794_v34 }
0x20bb   : > { %v7795_v38 = vmul.f32 0.044715, %v7793_v33 }
0x20bc   : > { %v7798_v3 = vadd.f32 %v7796_v9, %v7788_v43 }
0x20bd   : > { %v7797_v28 = vadd.f32 %v7795_v38, %v7783_v14 }
0x20be   : > { %v7800_v63 = vmul.f32 0.7978846, %v7798_v3 }
0x20bf   : > { %v7799_v15 = vmul.f32 0.7978846, %v7797_v28 }
0x20c0   : > { %16137 = vtanh.f32 %v7800_v63 }
0x20c1   : > { %16139 = vtanh.f32 %v7799_v15 }
0x20ca   : > { %v16138_v23 = vpop.eup %16137 }
0x20cb   : > { %v16140_v42 = vpop.eup %16139  ;;  %v7804_v48 = vadd.f32 1.0, %v16138_v23 }
0x20cc   : > { %v7803_v45 = vadd.f32 1.0, %v16140_v42 }
0x20cd   : > { %v7806_v51 = vmul.f32 0.5, %v7804_v48 }
0x20ce   : > { %v7805_v40 = vmul.f32 0.5, %v7803_v45 }
0x20cf   : > { %v7808_v0 = vmul.f32 %v7806_v51, %v7788_v43 }
0x20d0   : > { %v7807_v19 = vmul.f32 %v7805_v40, %v7783_v14 }
0x20d2   : > { %14281 = vmatprep.mubr.f32.mxu1 %v7807_v19 }
0x20d3   : > { %14282 = vmatmul.mubr.f32.vlgmr.msra.gmra.mrb[50].mxu1 %v7808_v0 }
0x21a6   : > { %v14283_v52 = vpop.f32.mrb[50].mxu1 }
0x21a7   : > { %v7902_v55 = vadd.f32 %v14283_v52, %v17895_v49  ;;  %v7892_v10 = vpop.f32.mrb[51].mxu1 }
0x21a8   : > { %v7901_v59 = vadd.f32 %v7892_v10, %v17897_v37 }
0x21a9   : > { %v17935_v50 = vadd.f32 %v13029_v2, %v7902_v55 }
0x21aa   : > { %v17937_v13 = vadd.f32 %v13029_v2, %v7901_v59 }
0x21ab   : > { %v7920_v31 = vsel %vm1229_vm1, %v17935_v50, 0.0 }
0x21ac   : > { %7921 = vadd.xlane.f32.xlu1 %v7920_v31  ;;  %v7917_v30 = vsel %vm1229_vm1, %v17937_v13, 0.0 }
0x21ad   : > { %7918 = vadd.xlane.f32.xlu0 %v7917_v30 }
0x2239   : > { %v7922_v60 = vpop.xlane.xlu1 %7921 }
0x223a   : > { %v7924_v49 = vmul.f32 0.03125, %v7922_v60  ;;  %v7919_v22 = vpop.xlane.xlu0 %7918 }
0x223b   : > { %v7923_v37 = vmul.f32 0.03125, %v7919_v22 }
0x223c   : > { %v7926_v35 = vsub.f32 %v17935_v50, %v7924_v49 }
0x223d   : > { %v7925_v24 = vsub.f32 %v17937_v13, %v7923_v37 }
0x223e   : > { %v7928_v5 = vmul.f32 %v7926_v35, %v7926_v35 }
0x223f   : > { %v7927_v41 = vmul.f32 %v7925_v24, %v7925_v24 }
0x2240   : > { %v7932_v18 = vsel %vm1229_vm1, %v7928_v5, 0.0 }
0x2241   : > { %7933 = vadd.xlane.f32.xlu1 %v7932_v18  ;;  %v7929_v8 = vsel %vm1229_vm1, %v7927_v41, 0.0 }
0x2242   : > { %7930 = vadd.xlane.f32.xlu0 %v7929_v8 }
0x22ce   : > { %v7934_v47 = vpop.xlane.xlu1 %7933 }
0x22cf   : > { %v7936_v61 = vmul.f32 0.03125, %v7934_v47  ;;  %v7931_v1 = vpop.xlane.xlu0 %7930 }
0x22d0   : > { %v7935_v17 = vmul.f32 0.03125, %v7931_v1 }
0x22d1   : > { %v7938_v32 = vadd.f32 1e-05, %v7936_v61 }
0x22d2   : > { %v7937_v16 = vadd.f32 1e-05, %v7935_v17 }
0x22d3   : > { %16141 = vrsqrt.f32 %v7938_v32 }
0x22d4   : > { %16143 = vrsqrt.f32 %v7937_v16 }
0x22dd   : > { %v16142_v53 = vpop.eup %16141 }
0x22de   : > { %v16144_v57 = vpop.eup %16143  ;;  %v7942_v29 = vmul.f32 %v16142_v53, %v7926_v35 }
0x22df   : > { %v7941_v6 = vmul.f32 %v16144_v57, %v7925_v24 }
0x22e0   : > { %v7950_v27 = vmul.f32 %v13032_v12, %v7942_v29 }
0x22e1   : > { %v7949_v20 = vmul.f32 %v13032_v12, %v7941_v6 }
0x22e2   : > { %v7958_v46 = vadd.f32 %v13033_v56, %v7950_v27 }
0x22e3   : > { %v7957_v25 = vadd.f32 %v13033_v56, %v7949_v20 }
0x22e5   : > { %14292 = vmatprep.mubr.msk.f32.mxu0 %vm1229_vm1, %v7957_v25 }
0x22e6   : > { %14293 = vmatmul.mubr.msk.f32.vlgmr.msra.gmra.mrb[70].mxu0 %vm1229_vm1, %v7958_v46 }
0x23b9   : > { %v14294_v43 = vpop.f32.mrb[70].mxu0 }
0x23ba   : > { %v8050_v26 = vadd.f32 %v14294_v43, %v13039_v54  ;;  %v8044_v14 = vpop.f32.mrb[71].mxu0 }
0x23bb   : > { %v8045_v58 = vadd.f32 %v13039_v54, %v8044_v14 }
0x23bc   : > { %8057 = vrot.lane.b32.xlu1 %v8050_v26, %s18964_s5  ;;  %v8098_v35 = vmul.f32 0.5, %v8050_v26 }
0x23bd   : > { %8055 = vrot.lane.b32.xlu0 %v8045_v58, %s18964_s5  ;;  %v8097_v4 = vmul.f32 0.5, %v8045_v58  ;;  %v15754_v34 = vpack.i.bf16 %v8050_v26, %v8045_v58 }
0x23bf   : > { %14299 = vmatprep.mubr.msk.f32.mxu0 %vm1477_vm2, %v8097_v4 }
0x23c0   : > { %8063 = vrot.lane.b32.xlu1 %v8050_v26, %s18965_s10 }
0x23c1   : > { %8067 = vrot.lane.b32.xlu0 %v8045_v58, %s18966_s21 }
0x23c4   : > { %8061 = vrot.lane.b32.xlu1 %v8045_v58, %s18965_s10 }
0x23c5   : > { %8073 = vrot.lane.b32.xlu0 %v8045_v58, %s18967_s25 }
0x23c8   : > { %8069 = vrot.lane.b32.xlu1 %v8050_v26, %s18966_s21 }
0x23c9   : > { %8079 = vrot.lane.b32.xlu0 %v8045_v58, %s18968_s29 }
0x23cc   : > { %8075 = vrot.lane.b32.xlu1 %v8050_v26, %s18967_s25 }
0x23cd   : > { %8085 = vrot.lane.b32.xlu0 %v8045_v58, %s18969_s18 }
0x23d0   : > { %8081 = vrot.lane.b32.xlu1 %v8050_v26, %s18968_s29 }
0x23d1   : > { %8091 = vrot.lane.b32.xlu0 %v8045_v58, %s18970_s2 }
0x23d4   : > { %8087 = vrot.lane.b32.xlu1 %v8050_v26, %s18969_s18 }
0x23d5   : > { %15755 = vrot.lane.b32.xlu0 %v15754_v34, %s18971_s11 }
0x23d8   : > { %8093 = vrot.lane.b32.xlu1 %v8050_v26, %s18970_s2 }
0x242e   : > { %v8058_v33 = vpop.permute.xlu1 %8057 }
0x242f   : > { %v8056_v9 = vpop.permute.xlu0 %8055  ;;  %v8100_v7 = vmul.f32 0.5, %v8058_v33 }
0x2430   : > { %v15759_v38 = vpack.i.bf16 %v8058_v33, %v8056_v9  ;;  %v8099_v24 = vmul.f32 0.5, %v8056_v9 }
0x2432   : > { %v17972_v3 = vpop.permute.xlu1 %8063  ;;  %15760 = vrot.lane.b32.xlu1 %v15759_v38, %s18971_s11 }
0x2433   : > { %v8068_v28 = vpop.permute.xlu0 %8067  ;;  %v8102_v57 = vmul.f32 0.5, %v17972_v3 }
0x2434   : > { %v8103_v63 = vmul.f32 0.5, %v8068_v28 }
0x2436   : > { %v8062_v15 = vpop.permute.xlu1 %8061  ;;  %14320 = vmatprep.mubr.msk.f32.mxu1 %vm1477_vm2, %v8103_v63 }
0x2437   : > { %v15764_v23 = vpack.i.bf16 %v17972_v3, %v8062_v15  ;;  %v8074_v42 = vpop.permute.xlu0 %8073  ;;  %v8101_v47 = vmul.f32 0.5, %v8062_v15 }
0x2438   : > { %v8105_v6 = vmul.f32 0.5, %v8074_v42 }
0x2439   : > { %15765 = vrot.lane.b32.xlu0 %v15764_v23, %s18971_s11 }
0x243a   : > { %v17978_v48 = vpop.permute.xlu1 %8069 }
0x243b   : > { %v15769_v45 = vpack.i.bf16 %v17978_v48, %v8068_v28  ;;  %v17981_v51 = vpop.permute.xlu0 %8079  ;;  %v8104_v20 = vmul.f32 0.5, %v17978_v48 }
0x243c   : > { %v8107_v46 = vmul.f32 0.5, %v17981_v51 }
0x243d   : > { %15770 = vrot.lane.b32.xlu1 %v15769_v45, %s18971_s11 }
0x243e   : > { %v17984_v40 = vpop.permute.xlu1 %8075 }
0x243f   : > { %v17987_v19 = vpack.i.bf16 %v17984_v40, %v8074_v42  ;;  %v17989_v0 = vpop.permute.xlu0 %8085  ;;  %v8106_v58 = vmul.f32 0.5, %v17984_v40 }
0x2440   : > { %v8109_v4 = vmul.f32 0.5, %v17989_v0 }
0x2441   : > { %15775 = vrot.lane.b32.xlu0 %v17987_v19, %s18971_s11 }
0x2442   : > { %v17993_v52 = vpop.permute.xlu1 %8081 }
0x2443   : > { %v17997_v2 = vpack.i.bf16 %v17993_v52, %v17981_v51  ;;  %v17999_v55 = vpop.permute.xlu0 %8091  ;;  %v8108_v63 = vmul.f32 0.5, %v17993_v52 }
0x2444   : > { %v8111_v48 = vmul.f32 0.5, %v17999_v55 }
0x2445   : > { %15780 = vrot.lane.b32.xlu1 %v17997_v2, %s18971_s11 }
0x2446   : > { %v18003_v10 = vpop.permute.xlu1 %8087 }
0x2447   : > { %v18007_v59 = vpack.i.bf16 %v18003_v10, %v17989_v0  ;;  %v15756_v31 = vpop.permute.xlu0 %15755  ;;  %v8110_v40 = vmul.f32 0.5, %v18003_v10 }
0x2448   : > { %v15758_v30 = vunpack.i.h.bf16 %v15756_v31  ;;  %v15757_v60 = vunpack.i.l.bf16 %v15756_v31 }
0x2449   : > { %15785 = vrot.lane.b32.xlu0 %v18007_v59, %s18971_s11 }
0x244a   : > { %v15113_v49 = vpack.c.bf16 %v15758_v30, %v15757_v60  ;;  %v18011_v22 = vpop.permute.xlu1 %8093 }
0x244b   : > { %v18015_v37 = vpack.i.bf16 %v18011_v22, %v17999_v55  ;;  %v8112_v30 = vmul.f32 0.5, %v18011_v22 }
0x244c   : > { %15115 = vmatprep.subr.msk.bf16.mxu0 %vm16793_vm3, %v15113_v49 }
0x244d   : > { %15795 = vrot.lane.b32.xlu0 %v15754_v34, %s18972_s23  ;;  %15790 = vrot.lane.b32.xlu1 %v18015_v37, %s18971_s11 }
0x244e   : > { %15118 = vmatpush3.bf16.xpose.msk.msra.mxu0 %vm16793_vm3, %v15113_v49 }
0x2451   : > { %15800 = vrot.lane.b32.xlu1 %v15759_v38, %s18972_s23 }
0x2455   : > { %14300 = vmatmul.mubr.msk.f32.vlgmr.msra.gmra.mrb[72].mxu0 %vm1477_vm2, %v8098_v35  ;;  %15805 = vrot.lane.b32.xlu1 %v15764_v23, %s18972_s23 }
0x2456   : > { %14306 = vmatprep.mubr.msk.f32.mxu0 %vm1477_vm2, %v8099_v24 }
0x2459   : > { %15810 = vrot.lane.b32.xlu1 %v15769_v45, %s18972_s23 }
0x24a4   : > { %v15761_v5 = vpop.permute.xlu1 %15760 }
0x24a5   : > { %v15763_v41 = vunpack.i.h.bf16 %v15761_v5  ;;  %v15762_v18 = vunpack.i.l.bf16 %v15761_v5 }
0x24a7   : > { %v15119_v8 = vpack.c.bf16 %v15763_v41, %v15762_v18 }
0x24a9   : > { %15121 = vmatprep.subr.msk.bf16.mxu0 %vm16793_vm3, %v15119_v8 }
0x24aa   : > { %15124 = vmatpush3.bf16.xpose.msk.msra.mxu0 %vm16793_vm3, %v15119_v8 }
0x24ab   : > { %v15766_v39 = vpop.permute.xlu0 %15765 }
0x24ac   : > { %v15768_v62 = vunpack.i.h.bf16 %v15766_v39  ;;  %v15767_v36 = vunpack.i.l.bf16 %v15766_v39 }
0x24ae   : > { %v15125_v11 = vpack.c.bf16 %v15768_v62, %v15767_v36 }
0x24af   : > { %v15771_v21 = vpop.permute.xlu1 %15770 }
0x24b0   : > { %v15773_v61 = vunpack.i.h.bf16 %v15771_v21  ;;  %v15772_v1 = vunpack.i.l.bf16 %v15771_v21  ;;  %15127 = vmatprep.subr.msk.bf16.mxu0 %vm16793_vm3, %v15125_v11 }
0x24b1   : > { %14307 = vmatmul.mubr.msk.f32.vlgmr.msra.gmra.mrb[74].mxu0 %vm1477_vm2, %v8100_v7 }
0x24b2   : > { %v15131_v17 = vpack.c.bf16 %v15773_v61, %v15772_v1  ;;  %15130 = vmatpush3.bf16.xpose.msk.msra.mxu0 %vm16793_vm3, %v15125_v11  ;;  %14313 = vmatprep.mubr.msk.f32.mxu0 %vm1477_vm2, %v8101_v47 }
0x24b3   : > { %v15776_v32 = vpop.permute.xlu0 %15775 }
0x24b4   : > { %v15778_v16 = vunpack.i.h.bf16 %v15776_v32  ;;  %v15777_v53 = vunpack.i.l.bf16 %v15776_v32  ;;  %15133 = vmatprep.subr.msk.bf16.mxu1 %vm16793_vm3, %v15131_v17 }
0x24b5   : > { %15136 = vmatpush3.bf16.xpose.msk.msra.mxu1 %vm16793_vm3, %v15131_v17 }
0x24b6   : > { %v15137_v12 = vpack.c.bf16 %v15778_v16, %v15777_v53 }
0x24b7   : > { %v15781_v29 = vpop.permute.xlu1 %15780 }
0x24b8   : > { %v15783_v56 = vunpack.i.h.bf16 %v15781_v29  ;;  %v15782_v27 = vunpack.i.l.bf16 %v15781_v29  ;;  %15139 = vmatprep.subr.msk.bf16.mxu0 %vm16793_vm3, %v15137_v12 }
0x24b9   : > { %14314 = vmatmul.mubr.msk.f32.vlgmr.msra.gmra.mrb[76].mxu0 %vm1477_vm2, %v8102_v57 }
0x24ba   : > { %v15143_v25 = vpack.c.bf16 %v15783_v56, %v15782_v27  ;;  %15142 = vmatpush3.bf16.xpose.msk.msra.mxu0 %vm16793_vm3, %v15137_v12  ;;  %14327 = vmatprep.mubr.msk.f32.mxu0 %vm1477_vm2, %v8105_v6 }
0x24bb   : > { %v15786_v54 = vpop.permute.xlu0 %15785 }
0x24bc   : > { %v15788_v43 = vunpack.i.h.bf16 %v15786_v54  ;;  %v15787_v26 = vunpack.i.l.bf16 %v15786_v54  ;;  %14321 = vmatmul.mubr.msk.f32.vlgmr.msra.gmra.mrb[52].mxu1 %vm1477_vm2, %v8104_v20  ;;  %15145 = vmatprep.subr.msk.bf16.mxu1 %vm16793_vm3, %v15143_v25 }
0x24bd   : > { %15148 = vmatpush3.bf16.xpose.msk.msra.mxu1 %vm16793_vm3, %v15143_v25  ;;  %14334 = vmatprep.mubr.msk.f32.mxu1 %vm1477_vm2, %v8107_v46 }
0x24be   : > { %v15149_v14 = vpack.c.bf16 %v15788_v43, %v15787_v26 }
0x24bf   : > { %v15791_v34 = vpop.permute.xlu1 %15790  ;;  %v15796_v33 = vpop.permute.xlu0 %15795 }
0x24c0   : > { %v15793_v9 = vunpack.i.h.bf16 %v15791_v34  ;;  %v15792_v38 = vunpack.i.l.bf16 %v15791_v34  ;;  %v15798_v3 = vunpack.i.h.bf16 %v15796_v33  ;;  %v15797_v28 = vunpack.i.l.bf16 %v15796_v33  ;;  %15151 = vmatprep.subr.msk.bf16.mxu0 %vm16793_vm3, %v15149_v14 }
0x24c1   : > { %14328 = vmatmul.mubr.msk.f32.vlgmr.msra.gmra.mrb[78].mxu0 %vm1477_vm2, %v8106_v58 }
0x24c2   : > { %v15155_v15 = vpack.c.bf16 %v15793_v9, %v15792_v38  ;;  %15154 = vmatpush3.bf16.xpose.msk.msra.mxu0 %vm16793_vm3, %v15149_v14  ;;  %14341 = vmatprep.mubr.msk.f32.mxu0 %vm1477_vm2, %v8109_v4  ;;  %v15161_v23 = vpack.c.bf16 %v15798_v3, %v15797_v28 }
0x24c3   : > { %v15801_v42 = vpop.permute.xlu1 %15800 }
0x24c4   : > { %14335 = vmatmul.mubr.msk.f32.vlgmr.msra.gmra.mrb[54].mxu1 %vm1477_vm2, %v8108_v63  ;;  %15157 = vmatprep.subr.msk.bf16.mxu1 %vm16793_vm3, %v15155_v15  ;;  %v15803_v45 = vunpack.i.h.bf16 %v15801_v42  ;;  %v15802_v51 = vunpack.i.l.bf16 %v15801_v42 }
0x24c5   : > { %15162 = vmatprep.subr.bf16.mxu0 %v15161_v23  ;;  %15160 = vmatpush3.bf16.xpose.msk.msra.mxu1 %vm16793_vm3, %v15155_v15 }
0x24c6   : > { %14348 = vmatprep.mubr.msk.f32.mxu1 %vm1477_vm2, %v8111_v48  ;;  %v18076_v55 = vpack.c.bf16 %v15803_v45, %v15802_v51 }
0x24c7   : > { %v15806_v0 = vpop.permute.xlu1 %15805 }
0x24c8   : > { %v15808_v52 = vunpack.i.h.bf16 %v15806_v0  ;;  %v15807_v31 = vunpack.i.l.bf16 %v15806_v0 }
0x24c9   : > { %14342 = vmatmul.mubr.msk.f32.vlgmr.msra.gmra.mrb[80].mxu0 %vm1477_vm2, %v8110_v40 }
0x24ca   : > { %15164 = vmatpush3.bf16.msra.mxu0 %v15161_v23  ;;  %v15169_v60 = vpack.c.bf16 %v15808_v52, %v15807_v31 }
0x24cb   : > { %15166 = vmatprep.subr.bf16.mxu0 %v18076_v55  ;;  %v18140_v43 = vpop.permute.xlu1 %15810 }
0x24cc   : > { %14349 = vmatmul.mubr.msk.f32.vlgmr.msra.gmra.mrb[56].mxu1 %vm1477_vm2, %v8112_v30  ;;  %15170 = vmatprep.subr.bf16.mxu1 %v15169_v60 }
0x24cd   : > { %15172 = vmatpush3.bf16.msra.mxu1 %v15169_v60 }
0x2528   : > { %v14301_v49 = vpop.f32.mrb[72].mxu0 }
0x2529   : > { %v8193_v35 = vpop.f32.mrb[73].mxu0  ;;  %v8828_v10 = vsel %vm1145_vm0, %v14301_v49, -inf }
0x252a   : > { %8829 = vmax.xlane.f32.xlu1 %v8828_v10  ;;  %v8825_v24 = vsel %vm1145_vm0, %v8193_v35, -inf }
0x252b   : > { %8826 = vmax.xlane.f32.xlu0 %v8825_v24 }
0x2584   : > { %v14308_v5 = vpop.f32.mrb[74].mxu0 }
0x2585   : > { %v18083_v41 = vpop.f32.mrb[75].mxu0  ;;  %v8834_v22 = vsel %vm1145_vm0, %v14308_v5, -inf }
0x2586   : > { %8835 = vmax.xlane.f32.xlu0 %v8834_v22  ;;  %v8831_v18 = vsel %vm1145_vm0, %v18083_v41, -inf }
0x258a   : > { %8832 = vmax.xlane.f32.xlu0 %v8831_v18 }
0x258c   : > { %v18088_v8 = vpop.f32.mrb[76].mxu0 }
0x258d   : > { %v18090_v39 = vpop.f32.mrb[77].mxu0  ;;  %v8840_v47 = vsel %vm1145_vm0, %v18088_v8, -inf }
0x258e   : > { %v8837_v1 = vsel %vm1145_vm0, %v18090_v39, -inf }
0x258f   : > { %v18092_v62 = vpop.f32.mrb[52].mxu1 }
0x2590   : > { %v18094_v36 = vpop.f32.mrb[53].mxu1  ;;  %v8846_v11 = vsel %vm1145_vm0, %v18092_v62, -inf }
0x2591   : > { %8847 = vmax.xlane.f32.xlu1 %v8846_v11  ;;  %v8843_v7 = vsel %vm1145_vm0, %v18094_v36, -inf }
0x2592   : > { %8844 = vmax.xlane.f32.xlu0 %v8843_v7 }
0x2594   : > { %v18100_v21 = vpop.f32.mrb[78].mxu0 }
0x2595   : > { %8841 = vmax.xlane.f32.xlu1 %v8840_v47  ;;  %v18104_v61 = vpop.f32.mrb[79].mxu0  ;;  %v8852_v57 = vsel %vm1145_vm0, %v18100_v21, -inf }
0x2596   : > { %8838 = vmax.xlane.f32.xlu0 %v8837_v1  ;;  %v8849_v6 = vsel %vm1145_vm0, %v18104_v61, -inf }
0x2597   : > { %v18108_v17 = vpop.f32.mrb[54].mxu1 }
0x2598   : > { %v18110_v32 = vpop.f32.mrb[55].mxu1  ;;  %v8858_v16 = vsel %vm1145_vm0, %v18108_v17, -inf }
0x2599   : > { %8859 = vmax.xlane.f32.xlu1 %v8858_v16  ;;  %v8855_v53 = vsel %vm1145_vm0, %v18110_v32, -inf }
0x259a   : > { %8856 = vmax.xlane.f32.xlu0 %v8855_v53 }
0x259c   : > { %v18116_v12 = vpop.f32.mrb[80].mxu0 }
0x259d   : > { %8853 = vmax.xlane.f32.xlu1 %v8852_v57  ;;  %v18120_v29 = vpop.f32.mrb[81].mxu0  ;;  %v8864_v46 = vsel %vm1145_vm0, %v18116_v12, -inf }
0x259e   : > { %8850 = vmax.xlane.f32.xlu0 %v8849_v6  ;;  %v8861_v54 = vsel %vm1145_vm0, %v18120_v29, -inf }
0x259f   : > { %v18124_v56 = vpop.f32.mrb[56].mxu1 }
0x25a0   : > { %v18126_v27 = vpop.f32.mrb[57].mxu1  ;;  %v8870_v20 = vsel %vm1145_vm0, %v18124_v56, -inf }
0x25a1   : > { %8871 = vmax.xlane.f32.xlu1 %v8870_v20  ;;  %v8867_v25 = vsel %vm1145_vm0, %v18126_v27, -inf }
0x25a2   : > { %8868 = vmax.xlane.f32.xlu0 %v8867_v25 }
0x25a5   : > { %8865 = vmax.xlane.f32.xlu1 %v8864_v46 }
0x25a6   : > { %8862 = vmax.xlane.f32.xlu0 %v8861_v54 }
0x25b6   : > { %15820 = vrot.lane.b32.xlu1 %v17997_v2, %s18972_s23 }
0x25b7   : > { %v8830_v26 = vpop.xlane.xlu1 %8829 }
0x25b8   : > { %v8827_v14 = vpop.xlane.xlu0 %8826  ;;  %v8874_v58 = vsub.f32 %v14301_v49, %v8830_v26 }
0x25b9   : > { %v8873_v4 = vsub.f32 %v8193_v35, %v8827_v14 }
0x25ba   : > { %v8891_v34 = vmul.f32 1.442695, %v8874_v58 }
0x25bb   : > { %v8889_v33 = vmul.f32 1.442695, %v8873_v4 }
0x25bc   : > { %15815 = vrot.lane.b32.xlu0 %v17987_v19, %s18972_s23  ;;  %16145 = vpow2.f32 %v8891_v34 }
0x25bd   : > { %16147 = vpow2.f32 %v8889_v33 }
0x25c6   : > { %v18142_v9 = vpop.eup %16145 }
0x25c7   : > { %v18144_v38 = vpop.eup %16147  ;;  %v8924_v2 = vsel %vm1145_vm0, %v18142_v9, 0.0 }
0x25c8   : > { %v8921_v19 = vsel %vm1145_vm0, %v18144_v38, 0.0 }
0x25da   : > { %8925 = vadd.xlane.f32.xlu1 %v8924_v2 }
0x25db   : > { %8922 = vadd.xlane.f32.xlu0 %v8921_v19 }
0x2613   : > { %v8836_v3 = vpop.xlane.xlu0 %8835 }
0x2614   : > { %v8876_v28 = vsub.f32 %v14308_v5, %v8836_v3 }
0x2616   : > { %v8895_v63 = vmul.f32 1.442695, %v8876_v28 }
0x2617   : > { %v8833_v15 = vpop.xlane.xlu0 %8832 }
0x2618   : > { %16149 = vpow2.f32 %v8895_v63  ;;  %v8875_v23 = vsub.f32 %v18083_v41, %v8833_v15 }
0x261a   : > { %v8893_v42 = vmul.f32 1.442695, %v8875_v23 }
0x261c   : > { %16151 = vpow2.f32 %v8893_v42 }
0x261e   : > { %v8848_v48 = vpop.xlane.xlu1 %8847 }
0x261f   : > { %v8880_v45 = vsub.f32 %v18092_v62, %v8848_v48  ;;  %v8845_v51 = vpop.xlane.xlu0 %8844 }
0x2620   : > { %v8879_v40 = vsub.f32 %v18094_v36, %v8845_v51 }
0x2621   : > { %v8903_v0 = vmul.f32 1.442695, %v8880_v45 }
0x2622   : > { %v18153_v52 = vpop.eup %16149  ;;  %v8901_v31 = vmul.f32 1.442695, %v8879_v40  ;;  %v8842_v30 = vpop.xlane.xlu1 %8841 }
0x2623   : > { %16153 = vpow2.f32 %v8903_v0  ;;  %v8878_v60 = vsub.f32 %v18088_v8, %v8842_v30  ;;  %v8839_v49 = vpop.xlane.xlu0 %8838  ;;  %v8930_v35 = vsel %vm1145_vm0, %v18153_v52, 0.0 }
0x2624   : > { %16155 = vpow2.f32 %v8901_v31  ;;  %v8877_v10 = vsub.f32 %v18090_v39, %v8839_v49  ;;  %8931 = vadd.xlane.f32.xlu1 %v8930_v35 }
0x2625   : > { %v8899_v24 = vmul.f32 1.442695, %v8878_v60 }
0x2626   : > { %v18159_v5 = vpop.eup %16151  ;;  %v8897_v41 = vmul.f32 1.442695, %v8877_v10  ;;  %v8860_v22 = vpop.xlane.xlu1 %8859 }
0x2627   : > { %16157 = vpow2.f32 %v8899_v24  ;;  %v8884_v18 = vsub.f32 %v18108_v17, %v8860_v22  ;;  %v8857_v62 = vpop.xlane.xlu0 %8856  ;;  %v8927_v8 = vsel %vm1145_vm0, %v18159_v5, 0.0 }
0x2628   : > { %16159 = vpow2.f32 %v8897_v41  ;;  %v8883_v36 = vsub.f32 %v18110_v32, %v8857_v62  ;;  %8928 = vadd.xlane.f32.xlu0 %v8927_v8 }
0x2629   : > { %v8911_v11 = vmul.f32 1.442695, %v8884_v18 }
0x262a   : > { %v8909_v7 = vmul.f32 1.442695, %v8883_v36  ;;  %v8854_v39 = vpop.xlane.xlu1 %8853 }
0x262b   : > { %16161 = vpow2.f32 %v8911_v11  ;;  %v8882_v47 = vsub.f32 %v18100_v21, %v8854_v39  ;;  %v8851_v1 = vpop.xlane.xlu0 %8850  ;;  %v15813_v11 = vunpack.i.h.bf16 %v18140_v43 }
0x262c   : > { %16163 = vpow2.f32 %v8909_v7  ;;  %v8881_v16 = vsub.f32 %v18104_v61, %v8851_v1  ;;  %v15812_v7 = vunpack.i.l.bf16 %v18140_v43 }
0x262d   : > { %v18167_v53 = vpop.eup %16153  ;;  %v8907_v17 = vmul.f32 1.442695, %v8882_v47 }
0x262e   : > { %v18169_v57 = vpop.eup %16155  ;;  %v8905_v6 = vmul.f32 1.442695, %v8881_v16  ;;  %v8872_v20 = vpop.xlane.xlu1 %8871  ;;  %v8942_v32 = vsel %vm1145_vm0, %v18167_v53, 0.0 }
0x262f   : > { %16165 = vpow2.f32 %v8907_v17  ;;  %v8888_v25 = vsub.f32 %v18124_v56, %v8872_v20  ;;  %v8869_v46 = vpop.xlane.xlu0 %8868  ;;  %8943 = vadd.xlane.f32.xlu1 %v8942_v32  ;;  %v8939_v21 = vsel %vm1145_vm0, %v18169_v57, 0.0 }
0x2630   : > { %16167 = vpow2.f32 %v8905_v6  ;;  %v8887_v61 = vsub.f32 %v18126_v27, %v8869_v46  ;;  %8940 = vadd.xlane.f32.xlu0 %v8939_v21 }
0x2631   : > { %v18177_v54 = vpop.eup %16157  ;;  %v8919_v26 = vmul.f32 1.442695, %v8888_v25 }
0x2632   : > { %v18179_v14 = vpop.eup %16159  ;;  %v8917_v58 = vmul.f32 1.442695, %v8887_v61  ;;  %v8866_v4 = vpop.xlane.xlu1 %8865  ;;  %v8936_v34 = vsel %vm1145_vm0, %v18177_v54, 0.0 }
0x2633   : > { %16169 = vpow2.f32 %v8919_v26  ;;  %v8886_v56 = vsub.f32 %v18116_v12, %v8866_v4  ;;  %8937 = vadd.xlane.f32.xlu1 %v8936_v34  ;;  %v8863_v33 = vpop.xlane.xlu0 %8862  ;;  %v8933_v2 = vsel %vm1145_vm0, %v18179_v14, 0.0 }
0x2634   : > { %16171 = vpow2.f32 %v8917_v58  ;;  %v8885_v27 = vsub.f32 %v18120_v29, %v8863_v33  ;;  %8934 = vadd.xlane.f32.xlu0 %v8933_v2 }
0x2635   : > { %v18187_v19 = vpop.eup %16161  ;;  %v8915_v3 = vmul.f32 1.442695, %v8886_v56 }
0x2636   : > { %v18189_v28 = vpop.eup %16163  ;;  %v8913_v63 = vmul.f32 1.442695, %v8885_v27  ;;  %v8954_v15 = vsel %vm1145_vm0, %v18187_v19, 0.0  ;;  %v15821_v22 = vpop.permute.xlu1 %15820 }
0x2637   : > { %16173 = vpow2.f32 %v8915_v3  ;;  %8955 = vadd.xlane.f32.xlu1 %v8954_v15  ;;  %v15816_v12 = vpop.permute.xlu0 %15815  ;;  %v8951_v23 = vsel %vm1145_vm0, %v18189_v28, 0.0  ;;  %v15823_v6 = vunpack.i.h.bf16 %v15821_v22 }
0x2638   : > { %16175 = vpow2.f32 %v8913_v63  ;;  %v15818_v42 = vunpack.i.h.bf16 %v15816_v12  ;;  %v15817_v48 = vunpack.i.l.bf16 %v15816_v12  ;;  %8952 = vadd.xlane.f32.xlu0 %v8951_v23 }
0x2639   : > { %v18195_v29 = vpop.eup %16165 }
0x263a   : > { %v18197_v45 = vpop.eup %16167  ;;  %v8948_v51 = vsel %vm1145_vm0, %v18195_v29, 0.0  ;;  %v18201_v40 = vpack.c.bf16 %v15818_v42, %v15817_v48 }
0x263b   : > { %8949 = vadd.xlane.f32.xlu1 %v8948_v51  ;;  %v8945_v0 = vsel %vm1145_vm0, %v18197_v45, 0.0 }
0x263c   : > { %8946 = vadd.xlane.f32.xlu0 %v8945_v0  ;;  %15178 = vmatprep.subr.bf16.mxu1 %v18201_v40 }
0x263d   : > { %v18206_v31 = vpop.eup %16169 }
0x263e   : > { %v18208_v30 = vpop.eup %16171  ;;  %v8966_v60 = vsel %vm1145_vm0, %v18206_v31, 0.0 }
0x263f   : > { %8967 = vadd.xlane.f32.xlu1 %v8966_v60  ;;  %v8963_v49 = vsel %vm1145_vm0, %v18208_v30, 0.0 }
0x2640   : > { %8964 = vadd.xlane.f32.xlu0 %v8963_v49 }
0x2641   : > { %v18214_v35 = vpop.eup %16173 }
0x2642   : > { %v18216_v10 = vpop.eup %16175  ;;  %v8960_v24 = vsel %vm1145_vm0, %v18214_v35, 0.0 }
0x2643   : > { %8961 = vadd.xlane.f32.xlu1 %v8960_v24  ;;  %v8957_v41 = vsel %vm1145_vm0, %v18216_v10, 0.0 }
0x2644   : > { %8958 = vadd.xlane.f32.xlu0 %v8957_v41 }
0x2654   : > { %15830 = vrot.lane.b32.xlu1 %v18015_v37, %s18972_s23 }
0x265a   : > { %15825 = vrot.lane.b32.xlu0 %v18007_v59, %s18972_s23  ;;  %v15173_v59 = vpack.c.bf16 %v15813_v11, %v15812_v7  ;;  %s18980_s23 = sld [smem:[#allocation23_spill]] }
0x2667   : > { %v8926_v18 = vpop.xlane.xlu1 %8925 }
0x2668   : > { %16177 = vrcp.f32 %v8926_v18  ;;  %v8923_v62 = vpop.xlane.xlu0 %8922 }
0x2669   : > { %16179 = vrcp.f32 %v8923_v62 }
0x2672   : > { %v16178_v8 = vpop.eup %16177 }
0x2673   : > { %v16180_v36 = vpop.eup %16179  ;;  %v8986_v47 = vmul.f32 %v16178_v8, %v18142_v9  ;;  %v15822_v9 = vunpack.i.l.bf16 %v15821_v22 }
0x2674   : > { %v8985_v39 = vmul.f32 %v16180_v36, %v18144_v38 }
0x2675   : > { %v15181_v21 = vpack.c.bf16 %v15823_v6, %v15822_v9  ;;  %v13093_v6 = vld [vmem:[%s16507_s24 + $0x78] sm:$0xff] }
0x2676   : > { %14355 = vmatprep.mubr.msk.f32.mxu0 %vm1145_vm0, %v8985_v39 }
0x2677   : > { %14356 = vmatmul.mubr.msk.f32.vlgmr.msra.gmra.mrb[82].mxu0 %vm1145_vm0, %v8986_v47 }
0x2678   : > { %15168 = vmatpush3.bf16.msra.mxu0 %v18076_v55 }
0x2679   : > { %15174 = vmatprep.subr.bf16.mxu0 %v15173_v59 }
0x26b1   : > { %v8932_v37 = vpop.xlane.xlu1 %8931 }
0x26b2   : > { %16181 = vrcp.f32 %v8932_v37 }
0x26b5   : > { %v8929_v1 = vpop.xlane.xlu0 %8928 }
0x26b6   : > { %16183 = vrcp.f32 %v8929_v1 }
0x26bc   : > { %v8944_v16 = vpop.xlane.xlu1 %8943  ;;  %v16182_v43 = vpop.eup %16181 }
0x26bd   : > { %16185 = vrcp.f32 %v8944_v16  ;;  %v8941_v17 = vpop.xlane.xlu0 %8940  ;;  %v8988_v55 = vmul.f32 %v16182_v43, %v18153_v52 }
0x26be   : > { %16187 = vrcp.f32 %v8941_v17 }
0x26c0   : > { %v16184_v38 = vpop.eup %16183  ;;  %v8938_v20 = vpop.xlane.xlu1 %8937 }
0x26c1   : > { %16189 = vrcp.f32 %v8938_v20  ;;  %v8935_v32 = vpop.xlane.xlu0 %8934  ;;  %v8987_v25 = vmul.f32 %v16184_v38, %v18159_v5  ;;  %v13092_v38 = vld [vmem:[%s16507_s24 + $0x70] sm:$0xff] }
0x26c2   : > { %16191 = vrcp.f32 %v8935_v32  ;;  %v15197_v9 = vpack.c.bf16 %v13093_v6, %v13092_v38 }
0x26c3   : > { %14362 = vmatprep.mubr.msk.f32.mxu0 %vm1145_vm0, %v8987_v25 }
0x26c4   : > { %v8956_v46 = vpop.xlane.xlu1 %8955  ;;  %14363 = vmatmul.mubr.msk.f32.vlgmr.msra.gmra.mrb[84].mxu0 %vm1145_vm0, %v8988_v55 }
0x26c5   : > { %16193 = vrcp.f32 %v8956_v46  ;;  %15176 = vmatpush3.bf16.msra.mxu0 %v15173_v59  ;;  %v8953_v61 = vpop.xlane.xlu0 %8952  ;;  %v13090_v59 = vld [vmem:[%s16507_s24 + $0x60] sm:$0xff] }
0x26c6   : > { %15182 = vmatprep.subr.bf16.mxu0 %v15181_v21  ;;  %16195 = vrcp.f32 %v8953_v61 }
0x26c7   : > { %v16186_v26 = vpop.eup %16185 }
0x26c8   : > { %v16188_v58 = vpop.eup %16187  ;;  %v8950_v4 = vpop.xlane.xlu1 %8949  ;;  %v8992_v52 = vmul.f32 %v16186_v26, %v18167_v53 }
0x26c9   : > { %16197 = vrcp.f32 %v8950_v4  ;;  %v8947_v34 = vpop.xlane.xlu0 %8946  ;;  %v8991_v5 = vmul.f32 %v16188_v58, %v18169_v57 }
0x26ca   : > { %16199 = vrcp.f32 %v8947_v34 }
0x26cb   : > { %v16190_v56 = vpop.eup %16189  ;;  %14376 = vmatprep.mubr.msk.f32.mxu0 %vm1145_vm0, %v8991_v5 }
0x26cc   : > { %v16192_v33 = vpop.eup %16191  ;;  %v8968_v2 = vpop.xlane.xlu1 %8967  ;;  %14377 = vmatmul.mubr.msk.f32.vlgmr.msra.gmra.mrb[86].mxu0 %vm1145_vm0, %v8992_v52  ;;  %v8990_v63 = vmul.f32 %v16190_v56, %v18177_v54 }
0x26cd   : > { %16201 = vrcp.f32 %v8968_v2  ;;  %15184 = vmatpush3.bf16.msra.mxu0 %v15181_v21  ;;  %v8965_v27 = vpop.xlane.xlu0 %8964  ;;  %v8989_v3 = vmul.f32 %v16192_v33, %v18179_v14 }
0x26ce   : > { %16203 = vrcp.f32 %v8965_v27 }
0x26cf   : > { %v16194_v15 = vpop.eup %16193  ;;  %14369 = vmatprep.mubr.msk.f32.mxu1 %vm1145_vm0, %v8989_v3 }
0x26d0   : > { %v16196_v57 = vpop.eup %16195  ;;  %v8962_v53 = vpop.xlane.xlu1 %8961  ;;  %14370 = vmatmul.mubr.msk.f32.vlgmr.msra.gmra.mrb[58].mxu1 %vm1145_vm0, %v8990_v63  ;;  %v8996_v42 = vmul.f32 %v16194_v15, %v18187_v19 }
0x26d1   : > { %16205 = vrcp.f32 %v8962_v53  ;;  %15180 = vmatpush3.bf16.msra.mxu1 %v18201_v40  ;;  %v8959_v12 = vpop.xlane.xlu0 %8958  ;;  %v8995_v23 = vmul.f32 %v16196_v57, %v18189_v28 }
0x26d2   : > { %16207 = vrcp.f32 %v8959_v12 }
0x26d3   : > { %v16198_v14 = vpop.eup %16197  ;;  %14390 = vmatprep.mubr.msk.f32.mxu0 %vm1145_vm0, %v8995_v23 }
0x26d4   : > { %v16200_v54 = vpop.eup %16199  ;;  %v15831_v48 = vpop.permute.xlu1 %15830  ;;  %14391 = vmatmul.mubr.msk.f32.vlgmr.msra.gmra.mrb[88].mxu0 %vm1145_vm0, %v8996_v42  ;;  %v8994_v41 = vmul.f32 %v16198_v14, %v18195_v29 }
0x26d5   : > { %v15833_v51 = vunpack.i.h.bf16 %v15831_v48  ;;  %v15832_v0 = vunpack.i.l.bf16 %v15831_v48  ;;  %v15826_v60 = vpop.permute.xlu0 %15825  ;;  %v8993_v49 = vmul.f32 %v16200_v54, %v18197_v45 }
0x26d6   : > { %v15828_v24 = vunpack.i.h.bf16 %v15826_v60  ;;  %v15827_v40 = vunpack.i.l.bf16 %v15826_v60 }
0x26d7   : > { %v16202_v28 = vpop.eup %16201  ;;  %v15189_v22 = vpack.c.bf16 %v15833_v51, %v15832_v0  ;;  %14383 = vmatprep.mubr.msk.f32.mxu1 %vm1145_vm0, %v8993_v49 }
0x26d8   : > { %v16204_v19 = vpop.eup %16203  ;;  %14384 = vmatmul.mubr.msk.f32.vlgmr.msra.gmra.mrb[60].mxu1 %vm1145_vm0, %v8994_v41  ;;  %v15185_v18 = vpack.c.bf16 %v15828_v24, %v15827_v40  ;;  %v9000_v45 = vmul.f32 %v16202_v28, %v18206_v31  ;;  %v13097_v28 = vld [vmem:[%s16512_s30 + $0x3] ss:$0 sm:$0xff] }
0x26d9   : > { %15190 = vmatprep.subr.bf16.mxu0 %v15189_v22  ;;  %v8999_v62 = vmul.f32 %v16204_v19, %v18208_v30 }
0x26da   : > { %15186 = vmatprep.subr.bf16.mxu1 %v15185_v18  ;;  %15192 = vmatpush3.bf16.msra.mxu0 %v15189_v22 }
0x26db   : > { %v16206_v8 = vpop.eup %16205  ;;  %15188 = vmatpush3.bf16.msra.mxu1 %v15185_v18  ;;  %14404 = vmatprep.mubr.msk.f32.mxu0 %vm1145_vm0, %v8999_v62 }
0x26dc   : > { %v16208_v29 = vpop.eup %16207  ;;  %v8998_v11 = vmul.f32 %v16206_v8, %v18214_v35  ;;  %v13091_v35 = vld [vmem:[%s16507_s24 + $0x68] sm:$0xff] }
0x26dd   : > { %14405 = vmatmul.mubr.msk.f32.vlgmr.msra.gmra.mrb[90].mxu0 %vm1145_vm0, %v9000_v45  ;;  %v8997_v36 = vmul.f32 %v16208_v29, %v18216_v10  ;;  %v15193_v37 = vpack.c.bf16 %v13091_v35, %v13090_v59  ;;  %v13102_v59 = vld [vmem:[%s16527_s20 + $0x60] sm:$0xff]  ;;  %v13103_v35 = vld [vmem:[%s16527_s20 + $0x68] sm:$0xff] }
0x26df   : > { %14397 = vmatprep.mubr.msk.f32.mxu1 %vm1145_vm0, %v8997_v36  ;;  %15194 = vmatprep.subr.bf16.mxu1 %v15193_v37 }
0x26e0   : > { %14398 = vmatmul.mubr.msk.f32.vlgmr.msra.gmra.mrb[62].mxu1 %vm1145_vm0, %v8998_v11 }
0x26e1   : > { %15196 = vmatpush3.bf16.msra.mxu1 %v15193_v37  ;;  %v15201_v37 = vpack.c.bf16 %v13103_v35, %v13102_v59 }
0x26e2   : > { %15198 = vmatprep.subr.bf16.mxu1 %v15197_v9 }
0x26e3   : > { %15202 = vmatprep.subr.bf16.mxu0 %v15201_v37 }
0x26e4   : > { %15204 = vmatpush3.bf16.msra.mxu0 %v15201_v37 }
0x26e5   : > { %15200 = vmatpush3.bf16.msra.mxu1 %v15197_v9 }
0x274a   : > { %v14357_v30 = vpop.f32.mrb[82].mxu0 }
0x274b   : > { %v9079_v7 = vpop.f32.mrb[83].mxu0 }
0x2797   : > { %v14364_v39 = vpop.f32.mrb[84].mxu0 }
0x2798   : > { %9701 = vrot.lane.b32.xlu1 %v14364_v39, %s18973_s28  ;;  %v9166_v47 = vpop.f32.mrb[85].mxu0 }
0x2799   : > { %9699 = vrot.lane.b32.xlu0 %v9166_v47, %s18973_s28 }
0x279f   : > { %v14378_v31 = vpop.f32.mrb[86].mxu0 }
0x27a0   : > { %9717 = vrot.lane.b32.xlu1 %v14378_v31, %s18974_s7  ;;  %v9340_v10 = vpop.f32.mrb[87].mxu0 }
0x27a1   : > { %9715 = vrot.lane.b32.xlu0 %v9340_v10, %s18974_s7 }
0x27a3   : > { %v14371_v1 = vpop.f32.mrb[58].mxu1 }
0x27a4   : > { %9709 = vrot.lane.b32.xlu1 %v14371_v1, %s18975_s12  ;;  %v9253_v16 = vpop.f32.mrb[59].mxu1  ;;  %v13104_v1 = vld [vmem:[%s16527_s20 + $0x70] sm:$0xff] }
0x27a5   : > { %9707 = vrot.lane.b32.xlu0 %v9253_v16, %s18975_s12  ;;  %v13105_v16 = vld [vmem:[%s16527_s20 + $0x78] sm:$0xff] }
0x27a7   : > { %v14392_v17 = vpop.f32.mrb[88].mxu0 }
0x27a8   : > { %9733 = vrot.lane.b32.xlu1 %v14392_v17, %s18976_s9  ;;  %v9514_v43 = vpop.f32.mrb[89].mxu0  ;;  %v15205_v17 = vpack.c.bf16 %v13105_v16, %v13104_v1 }
0x27a9   : > { %9731 = vrot.lane.b32.xlu0 %v9514_v43, %s18976_s9 }
0x27aa   : > { %15206 = vmatprep.subr.bf16.mxu0 %v15205_v17 }
0x27ab   : > { %v14385_v20 = vpop.f32.mrb[60].mxu1  ;;  %15208 = vmatpush3.bf16.msra.mxu0 %v15205_v17 }
0x27ac   : > { %9725 = vrot.lane.b32.xlu1 %v14385_v20, %s18977_s4  ;;  %v9427_v32 = vpop.f32.mrb[61].mxu1 }
0x27ad   : > { %9723 = vrot.lane.b32.xlu0 %v9427_v32, %s18977_s4 }
0x27b0   : > { %v14406_v25 = vpop.f32.mrb[90].mxu0 }
0x27b1   : > { %v9688_v55 = vpop.f32.mrb[91].mxu0 }
0x27b3   : > { %v14399_v46 = vpop.f32.mrb[62].mxu1 }
0x27b4   : > { %9741 = vrot.lane.b32.xlu1 %v14399_v46, %s18978_s22  ;;  %v9601_v21 = vpop.f32.mrb[63].mxu1 }
0x27b5   : > { %9739 = vrot.lane.b32.xlu0 %v9601_v21, %s18978_s22  ;;  %v13101_v21 = vld [vmem:[%s18960_s16 + $0x3] ss:$0 sm:$0xff] }
0x27b8   : > { %9749 = vrot.lane.b32.xlu1 %v14406_v25, %s18979_s27 }
0x27b9   : > { %9747 = vrot.lane.b32.xlu0 %v9688_v55, %s18979_s27  ;;  %v13100_v55 = vld [vmem:[%s18941_s6 + $0x3] ss:$0 sm:$0xff]  ;;  %s18982_s6 = sld [smem:[#allocation24_spill]] }
0x280a   : > { %v9702_v61 = vpop.permute.xlu1 %9701 }
0x280b   : > { %v9700_v26 = vpop.permute.xlu0 %9699  ;;  %v9754_v27 = vsel %vm1477_vm2, %v14357_v30, %v9702_v61 }
0x280c   : > { %v9753_v33 = vsel %vm1477_vm2, %v9079_v7, %v9700_v26 }
0x2812   : > { %v9718_v58 = vpop.permute.xlu1 %9717 }
0x2813   : > { %v9716_v4 = vpop.permute.xlu0 %9715 }
0x2816   : > { %v9710_v34 = vpop.permute.xlu1 %9709 }
0x2817   : > { %v9708_v5 = vpop.permute.xlu0 %9707  ;;  %v9756_v15 = vsel %vm3116_vm4, %v9754_v27, %v9710_v34  ;;  %v13113_v27 = vld [vmem:[%s18961_s13 + $0x198] sm:$0xff] }
0x2818   : > { %v9755_v3 = vsel %vm3116_vm4, %v9753_v33, %v9708_v5  ;;  %v9758_v12 = vsel %vm3119_vm5, %v9756_v15, %v9718_v58  ;;  %v13115_v15 = vld [vmem:[%s18961_s13 + $0x1a8] sm:$0xff] }
0x2819   : > { %v9757_v57 = vsel %vm3119_vm5, %v9755_v3, %v9716_v4 }
0x281a   : > { %v9734_v52 = vpop.permute.xlu1 %9733 }
0x281b   : > { %v9732_v56 = vpop.permute.xlu0 %9731 }
0x281e   : > { %v9726_v2 = vpop.permute.xlu1 %9725 }
0x281f   : > { %v9724_v63 = vpop.permute.xlu0 %9723  ;;  %v9760_v14 = vsel %vm1145_vm0, %v9758_v12, %v9726_v2  ;;  %v13112_v2 = vld [vmem:[%s18961_s13 + $0x190] sm:$0xff]  ;;  %v13117_v12 = vld [vmem:[%s18961_s13 + $0x1b8] sm:$0xff] }
0x2820   : > { %v9759_v23 = vsel %vm1145_vm0, %v9757_v57, %v9724_v63  ;;  %v9762_v51 = vsel %vm3124_vm6, %v9760_v14, %v9734_v52  ;;  %v13110_v52 = vld [vmem:[%s18961_s13 + $0x180] sm:$0xff]  ;;  %v15213_v3 = vpack.c.bf16 %v13113_v27, %v13112_v2  ;;  %v13119_v14 = vld [vmem:[%s18961_s13 + $0x1c8] sm:$0xff] }
0x2821   : > { %v9761_v54 = vsel %vm3124_vm6, %v9759_v23, %v9732_v56  ;;  %v13111_v56 = vld [vmem:[%s18961_s13 + $0x188] sm:$0xff]  ;;  %v13114_v63 = vld [vmem:[%s18961_s13 + $0x1a0] sm:$0xff] }
0x2822   : > { %v15209_v33 = vpack.c.bf16 %v13111_v56, %v13110_v52  ;;  %v15217_v57 = vpack.c.bf16 %v13115_v15, %v13114_v63  ;;  %v10240_v56 = vld [vmem:[%s18981_s3 + $0x18] sm:$0xff]  ;;  %v10241_v2 = vld [vmem:[%s18981_s3 + $0x20] sm:$0xff]  ;;  %v10242_v27 = vld [vmem:[%s18981_s3 + $0x28] sm:$0xff] }
0x2823   : > { %v10243_v63 = vld [vmem:[%s18981_s3 + $0x30] sm:$0xff]  ;;  %v10244_v15 = vld [vmem:[%s18981_s3 + $0x38] sm:$0xff] }
0x2824   : > { %15210 = vmatprep.subr.bf16.mxu1 %v15209_v33 }
0x2826   : > { %v9742_v53 = vpop.permute.xlu1 %9741 }
0x2827   : > { %v9740_v42 = vpop.permute.xlu0 %9739  ;;  %v9764_v49 = vsel %vm3127_vm7, %v9762_v51, %v9742_v53  ;;  %v13116_v53 = vld [vmem:[%s18961_s13 + $0x1b0] sm:$0xff]  ;;  %v13121_v51 = vld [vmem:[%s18961_s13 + $0x1d8] sm:$0xff] }
0x2828   : > { %v9763_v0 = vsel %vm3127_vm7, %v9761_v54, %v9740_v42  ;;  %v15221_v23 = vpack.c.bf16 %v13117_v12, %v13116_v53  ;;  %v13118_v42 = vld [vmem:[%s18961_s13 + $0x1c0] sm:$0xff]  ;;  %v13120_v54 = vld [vmem:[%s18961_s13 + $0x1d0] sm:$0xff]  ;;  %v10246_v12 = vld [vmem:[%s18981_s3 + $0x48] sm:$0xff] }
0x2829   : > { %v10245_v53 = vld [vmem:[%s18981_s3 + $0x40] sm:$0xff] }
0x282a   : > { %v9750_v48 = vpop.permute.xlu1 %9749 }
0x282b   : > { %v9748_v60 = vpop.permute.xlu0 %9747  ;;  %v9766_v40 = vsel %vm3130_vm8, %v9764_v49, %v9750_v48  ;;  %v15225_v48 = vpack.c.bf16 %v13119_v14, %v13118_v42  ;;  %v13123_v49 = vld [vmem:[%s18961_s13 + $0x1e8] sm:$0xff]  ;;  %v15265_v42 = vpack.c.bf16 %v10246_v12, %v10245_v53  ;;  %v10248_v14 = vld [vmem:[%s18981_s3 + $0x58] sm:$0xff] }
0x282c   : > { %v9765_v24 = vsel %vm3130_vm8, %v9763_v0, %v9748_v60  ;;  %v15229_v0 = vpack.c.bf16 %v13121_v51, %v13120_v54  ;;  %v13122_v60 = vld [vmem:[%s18961_s13 + $0x1e0] sm:$0xff]  ;;  %v10250_v51 = vld [vmem:[%s18981_s3 + $0x68] sm:$0xff] }
0x282d   : > { %14415 = vmatprep.mubr.msk.f32.mxu1 %vm1229_vm1, %v9765_v24  ;;  %v15233_v24 = vpack.c.bf16 %v13123_v49, %v13122_v60  ;;  %v10251_v60 = vld [vmem:[%s18981_s3 + $0x70] sm:$0xff]  ;;  %v10252_v49 = vld [vmem:[%s18981_s3 + $0x78] sm:$0xff] }
0x282e   : > { %14416 = vmatmul.mubr.msk.f32.vlgmr.msra.gmra.mrb[64].mxu1 %vm1229_vm1, %v9766_v40  ;;  %v13124_v40 = vld [vmem:[%s18961_s13 + $0x1f0] sm:$0xff] }
0x282f   : > { %15212 = vmatpush3.bf16.msra.mxu1 %v15209_v33 }
0x2830   : > { %15214 = vmatprep.subr.bf16.mxu1 %v15213_v3 }
0x2833   : > { %15216 = vmatpush3.bf16.msra.mxu1 %v15213_v3  ;;  %v15257_v3 = vpack.c.bf16 %v10242_v27, %v10241_v2 }
0x2834   : > { %15218 = vmatprep.subr.bf16.mxu1 %v15217_v57 }
0x2837   : > { %15220 = vmatpush3.bf16.msra.mxu1 %v15217_v57  ;;  %v15261_v57 = vpack.c.bf16 %v10244_v15, %v10243_v63 }
0x2838   : > { %15222 = vmatprep.subr.bf16.mxu1 %v15221_v23 }
0x283b   : > { %15224 = vmatpush3.bf16.msra.mxu1 %v15221_v23  ;;  %v10247_v23 = vld [vmem:[%s18981_s3 + $0x50] sm:$0xff] }
0x283c   : > { %15226 = vmatprep.subr.bf16.mxu1 %v15225_v48  ;;  %v15269_v54 = vpack.c.bf16 %v10248_v14, %v10247_v23 }
0x283f   : > { %15228 = vmatpush3.bf16.msra.mxu1 %v15225_v48  ;;  %v10249_v48 = vld [vmem:[%s18981_s3 + $0x60] sm:$0xff] }
0x2840   : > { %15230 = vmatprep.subr.bf16.mxu1 %v15229_v0 }
0x2843   : > { %15232 = vmatpush3.bf16.msra.mxu1 %v15229_v0  ;;  %v15273_v0 = vpack.c.bf16 %v10250_v51, %v10249_v48 }
0x2844   : > { %15234 = vmatprep.subr.bf16.mxu1 %v15233_v24 }
0x2847   : > { %15236 = vmatpush3.bf16.msra.mxu1 %v15233_v24  ;;  %v15277_v24 = vpack.c.bf16 %v10252_v49, %v10251_v60 }
0x2901   : > { %v14417_v41 = vpop.f32.mrb[64].mxu1 }
0x2902   : > { %v9854_v22 = vadd.f32 %v14417_v41, %v17935_v50  ;;  %v9844_v19 = vpop.f32.mrb[65].mxu1  ;;  %v13125_v41 = vld [vmem:[%s18961_s13 + $0x1f8] sm:$0xff]  ;;  %s18986_s13 = sld [smem:[#allocation9_spill]] }
0x2903   : > { %v9853_v18 = vadd.f32 %v9844_v19, %v17937_v13  ;;  %v10128_v19 = vld [vmem:[%s18980_s23 + $0x8] sm:$0xff] }
0x2904   : > { %v18299_v62 = vadd.f32 %v13097_v28, %v9854_v22  ;;  %v10127_v22 = vld [vmem:[%s18980_s23] sm:$0xff] }
0x2905   : > { %v18301_v8 = vadd.f32 %v13097_v28, %v9853_v18  ;;  %v15237_v28 = vpack.c.bf16 %v13125_v41, %v13124_v40  ;;  %v15241_v18 = vpack.c.bf16 %v10128_v19, %v10127_v22  ;;  %v13128_v40 = vld [vmem:[%s18982_s6] ss:$0 sm:$0xff]  ;;  %s18984_s6 = sld [smem:[#allocation29_spill]] }
0x2906   : > { %v9872_v45 = vsel %vm1229_vm1, %v18299_v62, 0.0 }
0x2907   : > { %9873 = vadd.xlane.f32.xlu1 %v9872_v45  ;;  %v9869_v29 = vsel %vm1229_vm1, %v18301_v8, 0.0  ;;  %15238 = vmatprep.subr.bf16.mxu1 %v15237_v28  ;;  %v13107_v45 = vld [vmem:[%s18962_s17 + $0x3] ss:$0 sm:$0xff] }
0x2908   : > { %9870 = vadd.xlane.f32.xlu0 %v9869_v29  ;;  %15240 = vmatpush3.bf16.msra.mxu1 %v15237_v28 }
0x2909   : > { %15242 = vmatprep.subr.bf16.mxu0 %v15241_v18 }
0x290b   : > { %v10451_v14 = vld [vmem:[%s18984_s6 + $0x10] sm:$0xff]  ;;  %v10453_v49 = vld [vmem:[%s18984_s6 + $0x20] sm:$0xff] }
0x2994   : > { %v9874_v36 = vpop.xlane.xlu1 %9873 }
0x2995   : > { %v9876_v11 = vmul.f32 0.03125, %v9874_v36  ;;  %v9871_v50 = vpop.xlane.xlu0 %9870 }
0x2996   : > { %v9875_v13 = vmul.f32 0.03125, %v9871_v50 }
0x2997   : > { %v9878_v30 = vsub.f32 %v18299_v62, %v9876_v11 }
0x2998   : > { %v9877_v7 = vsub.f32 %v18301_v8, %v9875_v13 }
0x2999   : > { %v9880_v31 = vmul.f32 %v9878_v30, %v9878_v30 }
0x299a   : > { %v9879_v39 = vmul.f32 %v9877_v7, %v9877_v7 }
0x299b   : > { %v9884_v10 = vsel %vm1229_vm1, %v9880_v31, 0.0 }
0x299c   : > { %v9881_v47 = vsel %vm1229_vm1, %v9879_v39, 0.0 }
0x299d   : > { %9882 = vadd.xlane.f32.xlu0 %v9881_v47 }
0x29a1   : > { %9885 = vadd.xlane.f32.xlu0 %v9884_v10 }
0x2a2a   : > { %v9883_v43 = vpop.xlane.xlu0 %9882 }
0x2a2b   : > { %v9887_v38 = vmul.f32 0.03125, %v9883_v43 }
0x2a2d   : > { %v9889_v6 = vadd.f32 1e-05, %v9887_v38 }
0x2a2e   : > { %v9886_v9 = vpop.xlane.xlu0 %9885 }
0x2a2f   : > { %16209 = vrsqrt.f32 %v9889_v6  ;;  %v9888_v20 = vmul.f32 0.03125, %v9886_v9 }
0x2a31   : > { %v9890_v32 = vadd.f32 1e-05, %v9888_v20 }
0x2a33   : > { %16211 = vrsqrt.f32 %v9890_v32  ;;  %v10129_v32 = vld [vmem:[%s18980_s23 + $0x10] sm:$0xff] }
0x2a39   : > { %v16210_v25 = vpop.eup %16209 }
0x2a3a   : > { %v9893_v46 = vmul.f32 %v16210_v25, %v9877_v7  ;;  %v10130_v25 = vld [vmem:[%s18980_s23 + $0x18] sm:$0xff] }
0x2a3c   : > { %v9901_v61 = vmul.f32 %v13100_v55, %v9893_v46 }
0x2a3d   : > { %v16212_v26 = vpop.eup %16211 }
0x2a3e   : > { %v9894_v58 = vmul.f32 %v16212_v26, %v9878_v30  ;;  %v9909_v4 = vadd.f32 %v13101_v21, %v9901_v61  ;;  %v13127_v61 = vld [vmem:[%s18963_s15 + $0x3] ss:$0 sm:$0xff]  ;;  %s18992_s15 = sld [smem:[#allocation32_spill]] }
0x2a40   : > { %v9902_v34 = vmul.f32 %v13100_v55, %v9894_v58  ;;  %14426 = vmatprep.mubr.msk.f32.mxu0 %vm1229_vm1, %v9909_v4  ;;  %v15245_v55 = vpack.c.bf16 %v10130_v25, %v10129_v32  ;;  %v10449_v32 = vld [vmem:[%s18984_s6] sm:$0xff]  ;;  %v10450_v25 = vld [vmem:[%s18984_s6 + $0x8] sm:$0xff] }
0x2a42   : > { %v9910_v5 = vadd.f32 %v13101_v21, %v9902_v34 }
0x2a44   : > { %14427 = vmatmul.mubr.msk.f32.vlgmr.msra.gmra.mrb[92].mxu0 %vm1229_vm1, %v9910_v5  ;;  %v10237_v5 = vld [vmem:[%s18981_s3] sm:$0xff] }
0x2a45   : > { %15244 = vmatpush3.bf16.msra.mxu0 %v15241_v18 }
0x2a46   : > { %15246 = vmatprep.subr.bf16.mxu0 %v15245_v55 }
0x2a49   : > { %15248 = vmatpush3.bf16.msra.mxu0 %v15245_v55  ;;  %v15289_v55 = vpack.c.bf16 %v10450_v25, %v10449_v32 }
0x2b17   : > { %v14428_v29 = vpop.f32.mrb[92].mxu0 }
0x2b18   : > { %v10002_v36 = vadd.f32 %v14428_v29, %v13107_v45  ;;  %v9996_v11 = vpop.f32.mrb[93].mxu0 }
0x2b19   : > { %v9997_v50 = vadd.f32 %v13107_v45, %v9996_v11 }
0x2b1a   : > { %v10006_v13 = vmul.f32 %v10002_v36, %v10002_v36 }
0x2b1b   : > { %v10005_v30 = vmul.f32 %v9997_v50, %v9997_v50 }
0x2b1c   : > { %v10008_v7 = vmul.f32 %v10006_v13, %v10002_v36 }
0x2b1d   : > { %v10007_v39 = vmul.f32 %v10005_v30, %v9997_v50 }
0x2b1e   : > { %v10010_v47 = vmul.f32 0.044715, %v10008_v7 }
0x2b1f   : > { %v10009_v31 = vmul.f32 0.044715, %v10007_v39 }
0x2b20   : > { %v10012_v10 = vadd.f32 %v10010_v47, %v10002_v36 }
0x2b21   : > { %v10011_v59 = vadd.f32 %v10009_v31, %v9997_v50 }
0x2b22   : > { %v10014_v35 = vmul.f32 0.7978846, %v10012_v10 }
0x2b23   : > { %v10013_v37 = vmul.f32 0.7978846, %v10011_v59 }
0x2b24   : > { %16213 = vtanh.f32 %v10014_v35 }
0x2b25   : > { %16215 = vtanh.f32 %v10013_v37 }
0x2b2e   : > { %v16214_v1 = vpop.eup %16213 }
0x2b2f   : > { %v16216_v16 = vpop.eup %16215  ;;  %v10018_v17 = vadd.f32 1.0, %v16214_v1 }
0x2b30   : > { %v10017_v43 = vadd.f32 1.0, %v16216_v16 }
0x2b31   : > { %v10020_v38 = vmul.f32 0.5, %v10018_v17  ;;  %v10353_v17 = vld [vmem:[%s18983_s8] sm:$0xff] }
0x2b32   : > { %v10019_v6 = vmul.f32 0.5, %v10017_v43  ;;  %v10354_v43 = vld [vmem:[%s18983_s8 + $0x8] sm:$0xff] }
0x2b33   : > { %v10022_v20 = vmul.f32 %v10020_v38, %v10002_v36  ;;  %v15281_v38 = vpack.c.bf16 %v10354_v43, %v10353_v17 }
0x2b34   : > { %v10021_v9 = vmul.f32 %v10019_v6, %v9997_v50  ;;  %v10355_v6 = vld [vmem:[%s18983_s8 + $0x10] sm:$0xff] }
0x2b35   : > { %15282 = vmatprep.subr.bf16.mxu1 %v15281_v38 }
0x2b36   : > { %14461 = vmatprep.mubr.f32.mxu1 %v10021_v9  ;;  %v10356_v9 = vld [vmem:[%s18983_s8 + $0x18] sm:$0xff] }
0x2b37   : > { %14462 = vmatmul.mubr.f32.vlgmr.msra.gmra.mrb[66].mxu1 %v10022_v20  ;;  %v15285_v20 = vpack.c.bf16 %v10356_v9, %v10355_v6 }
0x2b38   : > { %15284 = vmatpush3.bf16.msra.mxu1 %v15281_v38 }
0x2b39   : > { %15286 = vmatprep.subr.bf16.mxu1 %v15285_v20 }
0x2b3c   : > { %15288 = vmatpush3.bf16.msra.mxu1 %v15285_v20 }
0x2b3d   : > { %15290 = vmatprep.subr.bf16.mxu1 %v15289_v55 }
0x2c0a   : > { %v14463_v46 = vpop.f32.mrb[66].mxu1 }
0x2c0b   : > { %v10116_v21 = vadd.f32 %v14463_v46, %v18299_v62  ;;  %v10106_v26 = vpop.f32.mrb[67].mxu1  ;;  %v10238_v62 = vld [vmem:[%s18981_s3 + $0x8] sm:$0xff] }
0x2c0c   : > { %v10115_v58 = vadd.f32 %v10106_v26, %v18301_v8  ;;  %v15249_v52 = vpack.c.bf16 %v10238_v62, %v10237_v5  ;;  %v10239_v8 = vld [vmem:[%s18981_s3 + $0x10] sm:$0xff]  ;;  %s18985_s3 = sld [smem:[#allocation26_spill]] }
0x2c0d   : > { %v18345_v34 = vadd.f32 %v13127_v61, %v10116_v21  ;;  %v15253_v33 = vpack.c.bf16 %v10240_v56, %v10239_v8 }
0x2c0e   : > { %v18343_v4 = vadd.f32 %v13127_v61, %v10115_v58  ;;  %15250 = vmatprep.subr.bf16.mxu0 %v15249_v52 }
0x2c10   : > { %14472 = vmatprep.mubr.msk.f32.mxu0 %vm1229_vm1, %v18343_v4 }
0x2c11   : > { %14473 = vmatmul.mubr.msk.f32.vlgmr.msra.gmra.mrb[94].mxu0 %vm1229_vm1, %v18345_v34 }
0x2c12   : > { %15252 = vmatpush3.bf16.msra.mxu0 %v15249_v52  ;;  %v13131_v46 = vld [vmem:[%s18985_s3] ss:$0 sm:$0xff]  ;;  %s18987_s3 = sshll.u32 %s19010_s26, 3  ;;  %s18989_s26 = sld [smem:[#allocation33_spill]] }
0x2c13   : > { %15254 = vmatprep.subr.bf16.mxu0 %v15253_v33  ;;  %s18378_s8 = scalar_lea.vmem %s18986_s13, %s18987_s3  ;;  %s18988_s13 = sld [smem:[#allocation31_spill]] }
0x2c14   : > { %v10447_v60 = vld [vmem:[%s18378_s8] sm:$0xff]  ;;  %s18990_s3 = sld [smem:[#allocation28_spill]] }
0x2c16   : > { %15256 = vmatpush3.bf16.msra.mxu0 %v15253_v33 }
0x2c17   : > { %15258 = vmatprep.subr.bf16.mxu0 %v15257_v3 }
0x2c18   : > { %v10644_v9 = vld [vmem:[%s18989_s26 + $0x10] sm:$0xff]  ;;  %v10645_v20 = vld [vmem:[%s18989_s26 + $0x18] sm:$0xff] }
0x2c1a   : > { %15260 = vmatpush3.bf16.msra.mxu0 %v15257_v3 }
0x2c1b   : > { %15262 = vmatprep.subr.bf16.mxu0 %v15261_v57 }
0x2c1e   : > { %15264 = vmatpush3.bf16.msra.mxu0 %v15261_v57 }
0x2c1f   : > { %15266 = vmatprep.subr.bf16.mxu0 %v15265_v42 }
0x2c22   : > { %15268 = vmatpush3.bf16.msra.mxu0 %v15265_v42 }
0x2c23   : > { %15270 = vmatprep.subr.bf16.mxu0 %v15269_v54 }
0x2c26   : > { %15272 = vmatpush3.bf16.msra.mxu0 %v15269_v54  ;;  %v10452_v54 = vld [vmem:[%s18984_s6 + $0x18] sm:$0xff] }
0x2c27   : > { %15274 = vmatprep.subr.bf16.mxu0 %v15273_v0 }
0x2c2a   : > { %15276 = vmatpush3.bf16.msra.mxu0 %v15273_v0  ;;  %v15293_v0 = vpack.c.bf16 %v10452_v54, %v10451_v14 }
0x2c2b   : > { %15278 = vmatprep.subr.bf16.mxu0 %v15277_v24 }
0x2c2e   : > { %15280 = vmatpush3.bf16.msra.mxu0 %v15277_v24  ;;  %v10454_v24 = vld [vmem:[%s18984_s6 + $0x28] sm:$0xff] }
0x2ce4   : > { %v14474_v41 = vpop.f32.mrb[94].mxu0 }
0x2ce5   : > { %v10216_v28 = vadd.f32 %v14474_v41, %v13128_v40  ;;  %v10210_v22 = vpop.f32.mrb[95].mxu0  ;;  %v10455_v41 = vld [vmem:[%s18984_s6 + $0x30] sm:$0xff] }
0x2ce6   : > { %v10211_v19 = vadd.f32 %v13128_v40, %v10210_v22  ;;  %v15297_v40 = vpack.c.bf16 %v10454_v24, %v10453_v49 }
0x2ce7   : > { %v10220_v18 = vmul.f32 %v10216_v28, %v10216_v28 }
0x2ce8   : > { %v10219_v45 = vmul.f32 %v10211_v19, %v10211_v19 }
0x2ce9   : > { %v10222_v29 = vmul.f32 %v10220_v18, %v10216_v28  ;;  %v10458_v18 = vld [vmem:[%s18984_s6 + $0x48] sm:$0xff] }
0x2cea   : > { %v10221_v36 = vmul.f32 %v10219_v45, %v10211_v19 }
0x2ceb   : > { %v10224_v11 = vmul.f32 0.044715, %v10222_v29  ;;  %v10459_v29 = vld [vmem:[%s18984_s6 + $0x50] sm:$0xff] }
0x2cec   : > { %v10223_v50 = vmul.f32 0.044715, %v10221_v36  ;;  %v10460_v36 = vld [vmem:[%s18984_s6 + $0x58] sm:$0xff] }
0x2ced   : > { %v10226_v13 = vadd.f32 %v10224_v11, %v10216_v28  ;;  %v15309_v11 = vpack.c.bf16 %v10460_v36, %v10459_v29 }
0x2cee   : > { %v10225_v30 = vadd.f32 %v10223_v50, %v10211_v19  ;;  %v10448_v50 = vld [vmem:[%s18378_s8 + $0x8] sm:$0xff]  ;;  %s18403_s8 = sand.u32 1, %s16379_s1  }
0x2cef   : > { %v10228_v7 = vmul.f32 0.7978846, %v10226_v13  ;;  %v10550_v13 = vld [vmem:[%s18988_s13] sm:$0xff]  ;;  %s12761_s14 = sshll.u32 %s18403_s8, 4 }
0x2cf0   : > { %v10227_v39 = vmul.f32 0.7978846, %v10225_v30  ;;  %v10551_v30 = vld [vmem:[%s18988_s13 + $0x8] sm:$0xff] }
0x2cf1   : > { %16217 = vtanh.f32 %v10228_v7  ;;  %v15313_v7 = vpack.c.bf16 %v10551_v30, %v10550_v13 }
0x2cf2   : > { %16219 = vtanh.f32 %v10227_v39  ;;  %v10552_v39 = vld [vmem:[%s18988_s13 + $0x10] sm:$0xff] }
0x2cf3   : > { %15314 = vmatprep.subr.bf16.mxu0 %v15313_v7 }
0x2cfb   : > { %v16218_v47 = vpop.eup %16217 }
0x2cfc   : > { %v16220_v31 = vpop.eup %16219  ;;  %v10232_v10 = vadd.f32 1.0, %v16218_v47  ;;  %v10553_v47 = vld [vmem:[%s18988_s13 + $0x18] sm:$0xff]  ;;  %s18409_s13 = scalar_lea.vmem [#allocation4], %s12761_s14 }
0x2cfd   : > { %v10231_v59 = vadd.f32 1.0, %v16220_v31  ;;  %v15317_v31 = vpack.c.bf16 %v10553_v47, %v10552_v39 }
0x2cfe   : > { %v10234_v35 = vmul.f32 0.5, %v10232_v10  ;;  %v10642_v10 = vld [vmem:[%s18989_s26] sm:$0xff] }
0x2cff   : > { %v10233_v37 = vmul.f32 0.5, %v10231_v59  ;;  %v10643_v59 = vld [vmem:[%s18989_s26 + $0x8] sm:$0xff] }
0x2d00   : > { %v10236_v16 = vmul.f32 %v10234_v35, %v10216_v28  ;;  %v10456_v28 = vld [vmem:[%s18984_s6 + $0x38] sm:$0xff]  ;;  %v15321_v35 = vpack.c.bf16 %v10643_v59, %v10642_v10 }
0x2d01   : > { %v10235_v1 = vmul.f32 %v10233_v37, %v10211_v19  ;;  %v15301_v22 = vpack.c.bf16 %v10456_v28, %v10455_v41  ;;  %v10457_v19 = vld [vmem:[%s18984_s6 + $0x40] sm:$0xff]  ;;  %s18991_s6 = sld [smem:[#allocation30_spill]] }
0x2d02   : > { %v15305_v45 = vpack.c.bf16 %v10458_v18, %v10457_v19  ;;  %v13132_v37 = vld [vmem:[%s18990_s3] ss:$0 sm:$0xff]  ;;  %s18993_s3 = sld [smem:[#allocation34_spill]] }
0x2d03   : > { %14507 = vmatprep.mubr.f32.mxu0 %v10235_v1 }
0x2d04   : > { %14508 = vmatmul.mubr.f32.vlgmr.msra.gmra.mrb[96].mxu0 %v10236_v16 }
0x2d05   : > { %15316 = vmatpush3.bf16.msra.mxu0 %v15313_v7 }
0x2d06   : > { %15318 = vmatprep.subr.bf16.mxu0 %v15317_v31 }
0x2d07   : > { %v13135_v38 = vld [vmem:[%s18991_s6] ss:$0 sm:$0xff] }
0x2d09   : > { %15320 = vmatpush3.bf16.msra.mxu0 %v15317_v31 }
0x2d0a   : > { %15322 = vmatprep.subr.bf16.mxu0 %v15321_v35 }
0x2dd7   : > { %v14509_v21 = vpop.f32.mrb[96].mxu0 }
0x2dd8   : > { %v10332_v61 = vadd.f32 %v14509_v21, %v13131_v46  ;;  %v10326_v26 = vpop.f32.mrb[97].mxu0  ;;  %v13138_v21 = vld [vmem:[%s18992_s15] ss:$0 sm:$0xff] }
0x2dd9   : > { %v10327_v58 = vadd.f32 %v13131_v46, %v10326_v26  ;;  %v15325_v46 = vpack.c.bf16 %v10645_v20, %v10644_v9 }
0x2dda   : > { %v10336_v5 = vmul.f32 %v10332_v61, %v10332_v61 }
0x2ddb   : > { %v10335_v62 = vmul.f32 %v10327_v58, %v10327_v58 }
0x2ddc   : > { %v10338_v52 = vmul.f32 %v10336_v5, %v10332_v61 }
0x2ddd   : > { %v10337_v8 = vmul.f32 %v10335_v62, %v10327_v58 }
0x2dde   : > { %v10340_v56 = vmul.f32 0.044715, %v10338_v52  ;;  %v13141_v52 = vld [vmem:[%s18993_s3] ss:$0 sm:$0xff] }
0x2ddf   : > { %v10339_v33 = vmul.f32 0.044715, %v10337_v8 }
0x2de0   : > { %v10342_v2 = vadd.f32 %v10340_v56, %v10332_v61 }
0x2de1   : > { %v10341_v27 = vadd.f32 %v10339_v33, %v10327_v58 }
0x2de2   : > { %v10344_v3 = vmul.f32 0.7978846, %v10342_v2 }
0x2de3   : > { %v10343_v63 = vmul.f32 0.7978846, %v10341_v27 }
0x2de4   : > { %16221 = vtanh.f32 %v10344_v3 }
0x2de5   : > { %16223 = vtanh.f32 %v10343_v63 }
0x2dee   : > { %v16222_v15 = vpop.eup %16221 }
0x2def   : > { %v16224_v57 = vpop.eup %16223  ;;  %v10348_v53 = vadd.f32 1.0, %v16222_v15 }
0x2df0   : > { %v10347_v12 = vadd.f32 1.0, %v16224_v57 }
0x2df1   : > { %v10350_v23 = vmul.f32 0.5, %v10348_v53 }
0x2df2   : > { %v10349_v42 = vmul.f32 0.5, %v10347_v12 }
0x2df3   : > { %v10352_v51 = vmul.f32 %v10350_v23, %v10332_v61 }
0x2df4   : > { %v10351_v48 = vmul.f32 %v10349_v42, %v10327_v58 }
0x2df6   : > { %14518 = vmatprep.mubr.msk.f32.mxu1 %vm1229_vm1, %v10351_v48 }
0x2df7   : > { %14519 = vmatmul.mubr.msk.f32.vlgmr.msra.gmra.mrb[68].mxu1 %vm1229_vm1, %v10352_v51 }
0x2df8   : > { %15292 = vmatpush3.bf16.msra.mxu1 %v15289_v55  ;;  %14545 = vmatprep.mubr.msk.f32.mxu1 %vm10468_vm9, %v10447_v60 }
0x2df9   : > { %15294 = vmatprep.subr.bf16.mxu1 %v15293_v0 }
0x2dfc   : > { %15296 = vmatpush3.bf16.msra.mxu1 %v15293_v0 }
0x2dfd   : > { %15298 = vmatprep.subr.bf16.mxu1 %v15297_v40 }
0x2e00   : > { %15300 = vmatpush3.bf16.msra.mxu1 %v15297_v40 }
0x2e01   : > { %15302 = vmatprep.subr.bf16.mxu1 %v15301_v22 }
0x2e04   : > { %15304 = vmatpush3.bf16.msra.mxu1 %v15301_v22 }
0x2e05   : > { %15306 = vmatprep.subr.bf16.mxu1 %v15305_v45 }
0x2e08   : > { %15308 = vmatpush3.bf16.msra.mxu1 %v15305_v45 }
0x2e09   : > { %15310 = vmatprep.subr.bf16.mxu1 %v15309_v11 }
0x2e0c   : > { %15312 = vmatpush3.bf16.msra.mxu1 %v15309_v11 }
0x2e0f   : > { %14546 = vmatmul.mubr.msk.f32.vlgmr.msra.gmra.mrb[70].mxu1 %vm10468_vm9, %v10448_v50 }
0x2eca   : > { %v14520_v1 = vpop.f32.mrb[68].mxu1 }
0x2ecb   : > { %v10442_v16 = vadd.f32 %v14520_v1, %v13132_v37  ;;  %v10436_v17 = vpop.f32.mrb[69].mxu1 }
0x2ecc   : > { %v10437_v43 = vadd.f32 %v13132_v37, %v10436_v17 }
0x2ecd   : > { %10446 = vst.msk [vmem:[%s18409_s13 + $0x8] sm:$0xff] %vm1229_vm1, %v10442_v16 }
0x2ece   : > { %10445 = vst.msk [vmem:[%s18409_s13] sm:$0xff] %vm1229_vm1, %v10437_v43 }
0x2ee2   : > { %v14547_v6 = vpop.f32.mrb[70].mxu1 }
0x2ee3   : > { %v10541_v32 = vpop.f32.mrb[71].mxu1  ;;  %v18420_v55 = vadd.f32 %v14547_v6, %v13135_v38 }
0x2ee4   : > { %v18418_v25 = vadd.f32 %v13135_v38, %v10541_v32 }
0x2ee6   : > { %14556 = vmatprep.mubr.msk.f32.mxu0 %vm1229_vm1, %v18418_v25 }
0x2ee7   : > { %14557 = vmatmul.mubr.msk.f32.vlgmr.msra.gmra.mrb[98].mxu0 %vm1229_vm1, %v18420_v55 }
0x2ee8   : > { %15324 = vmatpush3.bf16.msra.mxu0 %v15321_v35  ;;  %14567 = vmatprep.mubr.msk.f32.mxu0 %vm1229_vm1, %v18343_v4 }
0x2ee9   : > { %15326 = vmatprep.subr.bf16.mxu0 %v15325_v46 }
0x2eec   : > { %15328 = vmatpush3.bf16.msra.mxu0 %v15325_v46 }
0x2eef   : > { %14568 = vmatmul.mubr.msk.f32.vlgmr.msra.gmra.mrb[100].mxu0 %vm1229_vm1, %v18345_v34 }
0x2fba   : > { %v14558_v61 = vpop.f32.mrb[98].mxu0 }
0x2fbb   : > { %v10639_v26 = vadd.f32 %v14558_v61, %v13138_v21  ;;  %v10633_v58 = vpop.f32.mrb[99].mxu0 }
0x2fbc   : > { %v10634_v5 = vadd.f32 %v13138_v21, %v10633_v58 }
0x2fbd   : > { %10738 = vrot.lane.b32.xlu1 %v10639_v26, %s18965_s10  ;;  %10732 = vrot.lane.b32.xlu0 %v10639_v26, %s18964_s5  ;;  %v10773_v27 = vmul.f32 0.5, %v10639_v26 }
0x2fbe   : > { %v10772_v62 = vmul.f32 0.5, %v10634_v5 }
0x2fc0   : > { %14574 = vmatprep.mubr.msk.f32.mxu0 %vm1477_vm2, %v10772_v62 }
0x2fc1   : > { %10730 = vrot.lane.b32.xlu1 %v10634_v5, %s18964_s5 }
0x2fc2   : > { %v14569_v4 = vpop.f32.mrb[100].mxu0 }
0x2fc3   : > { %v10725_v8 = vadd.f32 %v14569_v4, %v13141_v52  ;;  %v10719_v56 = vpop.f32.mrb[101].mxu0 }
0x2fc4   : > { %v10720_v33 = vadd.f32 %v13141_v52, %v10719_v56 }
0x2fc5   : > { %10736 = vrot.lane.b32.xlu1 %v10634_v5, %s18965_s10 }
0x2fc6   : > { %v15834_v34 = vpack.i.bf16 %v10725_v8, %v10720_v33  ;;  %v15329_v2 = vpack.c.bf16 %v10725_v8, %v10720_v33 }
0x2fc8   : > { %15835 = vrot.lane.b32.xlu0 %v15834_v34, %s18964_s5  ;;  %15331 = vmatprep.subr.msk.bf16.mxu0 %vm16793_vm3, %v15329_v2  ;;  %s18994_s5 = sld [smem:[#allocation35_spill]] }
0x2fc9   : > { %15334 = vmatpush3.bf16.xpose.msk.msra.mxu0 %vm16793_vm3, %v15329_v2  ;;  %15840 = vrot.lane.b32.xlu1 %v15834_v34, %s18965_s10 }
0x2fcc   : > { %10742 = vrot.lane.b32.xlu0 %v10634_v5, %s18966_s21 }
0x2fcd   : > { %15845 = vrot.lane.b32.xlu1 %v15834_v34, %s18966_s21 }
0x2fd0   : > { %10744 = vrot.lane.b32.xlu0 %v10639_v26, %s18966_s21  ;;  %14575 = vmatmul.mubr.msk.f32.vlgmr.msra.gmra.mrb[102].mxu0 %vm1477_vm2, %v10773_v27  ;;  %s18996_s21 = sld [smem:[#allocation40_spill]] }
0x2fd1   : > { %10748 = vrot.lane.b32.xlu1 %v10634_v5, %s18967_s25 }
0x2fd4   : > { %15850 = vrot.lane.b32.xlu0 %v15834_v34, %s18967_s25 }
0x2fd5   : > { %15855 = vrot.lane.b32.xlu1 %v15834_v34, %s18968_s29 }
0x2fd8   : > { %10754 = vrot.lane.b32.xlu0 %v10634_v5, %s18968_s29 }
0x2fd9   : > { %10750 = vrot.lane.b32.xlu1 %v10639_v26, %s18967_s25 }
0x2fdc   : > { %15860 = vrot.lane.b32.xlu0 %v15834_v34, %s18969_s18 }
0x2fdd   : > { %15865 = vrot.lane.b32.xlu1 %v15834_v34, %s18970_s2 }
0x2fe0   : > { %10756 = vrot.lane.b32.xlu0 %v10639_v26, %s18968_s29  ;;  %s12615_s29 = sshll.u32 %s18409_s13, 4  ;;  %s18756_s29 = int_to_ptr.vmem [resolvable:$true] %s12615_s29 }
0x2fe1   : > { %10760 = vrot.lane.b32.xlu1 %v10634_v5, %s18969_s18 }
0x2fe4   : > { %10762 = vrot.lane.b32.xlu0 %v10639_v26, %s18969_s18 }
0x2fe5   : > { %10766 = vrot.lane.b32.xlu1 %v10634_v5, %s18970_s2 }
0x2fe8   : > { %10768 = vrot.lane.b32.xlu0 %v10639_v26, %s18970_s2  ;;  %s16293_s2 = scalar_lea.vmem %s18756_s29, 256 }
0x2fe9   : > { %15870 = vrot.lane.b32.xlu1 %v15834_v34, %s18971_s11  ;;  %p16294_p11 = scmp.ne.s32.totalorder %s18756_s29, %s16293_s2 }
0x2feb   : > { %p16295_p12 = pnand %p16294_p11, %p16672_p5 }
0x2fed   : > { %p16296_p13 = pneg %p16295_p12 }
0x302f   : > { %v10739_v3 = vpop.permute.xlu1 %10738  ;;  %v10733_v57 = vpop.permute.xlu0 %10732 }
0x3030   : > { %v10775_v18 = vmul.f32 0.5, %v10733_v57  ;;  %v10777_v36 = vmul.f32 0.5, %v10739_v3 }
0x3033   : > { %v10731_v63 = vpop.permute.xlu1 %10730 }
0x3034   : > { %v10774_v15 = vmul.f32 0.5, %v10731_v63 }
0x3036   : > { %14581 = vmatprep.mubr.msk.f32.mxu1 %vm1477_vm2, %v10774_v15 }
0x3037   : > { %v10737_v53 = vpop.permute.xlu1 %10736 }
0x3038   : > { %v10776_v12 = vmul.f32 0.5, %v10737_v53 }
0x303a   : > { %v15836_v23 = vpop.permute.xlu0 %15835  ;;  %14588 = vmatprep.mubr.msk.f32.mxu0 %vm1477_vm2, %v10776_v12 }
0x303b   : > { %v15838_v42 = vunpack.i.h.bf16 %v15836_v23  ;;  %v15837_v14 = vunpack.i.l.bf16 %v15836_v23  ;;  %v15841_v54 = vpop.permute.xlu1 %15840  ;;  %15875 = vrot.lane.b32.xlu0 %v15836_v23, %s18971_s11 }
0x303c   : > { %v15843_v48 = vunpack.i.h.bf16 %v15841_v54  ;;  %v15842_v51 = vunpack.i.l.bf16 %v15841_v54  ;;  %15880 = vrot.lane.b32.xlu1 %v15841_v54, %s18971_s11 }
0x303d   : > { %v15335_v0 = vpack.c.bf16 %v15838_v42, %v15837_v14 }
0x303e   : > { %v15341_v60 = vpack.c.bf16 %v15843_v48, %v15842_v51  ;;  %v10743_v49 = vpop.permute.xlu0 %10742 }
0x303f   : > { %15337 = vmatprep.subr.msk.bf16.mxu1 %vm16793_vm3, %v15335_v0  ;;  %v15846_v24 = vpop.permute.xlu1 %15845  ;;  %v10778_v45 = vmul.f32 0.5, %v10743_v49 }
0x3040   : > { %15340 = vmatpush3.bf16.xpose.msk.msra.mxu1 %vm16793_vm3, %v15335_v0  ;;  %v15848_v40 = vunpack.i.h.bf16 %v15846_v24  ;;  %v15847_v41 = vunpack.i.l.bf16 %v15846_v24  ;;  %15343 = vmatprep.subr.msk.bf16.mxu0 %vm16793_vm3, %v15341_v60 }
0x3041   : > { %15346 = vmatpush3.bf16.xpose.msk.msra.mxu0 %vm16793_vm3, %v15341_v60  ;;  %15885 = vrot.lane.b32.xlu1 %v15846_v24, %s18971_s11 }
0x3042   : > { %v15347_v28 = vpack.c.bf16 %v15848_v40, %v15847_v41  ;;  %v10745_v22 = vpop.permute.xlu0 %10744 }
0x3043   : > { %v10749_v19 = vpop.permute.xlu1 %10748  ;;  %v10779_v35 = vmul.f32 0.5, %v10745_v22 }
0x3044   : > { %15349 = vmatprep.subr.msk.bf16.mxu1 %vm16793_vm3, %v15347_v28  ;;  %v10780_v30 = vmul.f32 0.5, %v10749_v19 }
0x3046   : > { %v18475_v29 = vpop.permute.xlu0 %15850 }
0x3047   : > { %v15853_v11 = vunpack.i.h.bf16 %v18475_v29  ;;  %v15852_v50 = vunpack.i.l.bf16 %v18475_v29  ;;  %14582 = vmatmul.mubr.msk.f32.vlgmr.msra.gmra.mrb[72].mxu1 %vm1477_vm2, %v10775_v18  ;;  %v18480_v13 = vpop.permute.xlu1 %15855 }
0x3048   : > { %14595 = vmatprep.mubr.msk.f32.mxu1 %vm1477_vm2, %v10778_v45  ;;  %v15858_v7 = vunpack.i.h.bf16 %v18480_v13  ;;  %v15857_v39 = vunpack.i.l.bf16 %v18480_v13  ;;  %15352 = vmatpush3.bf16.xpose.msk.msra.mxu1 %vm16793_vm3, %v15347_v28 }
0x3049   : > { %v15353_v47 = vpack.c.bf16 %v15853_v11, %v15852_v50  ;;  %14589 = vmatmul.mubr.msk.f32.vlgmr.msra.gmra.mrb[104].mxu0 %vm1477_vm2, %v10777_v36 }
0x304a   : > { %v15359_v31 = vpack.c.bf16 %v15858_v7, %v15857_v39  ;;  %v10755_v10 = vpop.permute.xlu0 %10754  ;;  %14602 = vmatprep.mubr.msk.f32.mxu0 %vm1477_vm2, %v10780_v30 }
0x304b   : > { %15355 = vmatprep.subr.msk.bf16.mxu0 %vm16793_vm3, %v15353_v47  ;;  %v10751_v59 = vpop.permute.xlu1 %10750  ;;  %v10782_v37 = vmul.f32 0.5, %v10755_v10 }
0x304c   : > { %15358 = vmatpush3.bf16.xpose.msk.msra.mxu0 %vm16793_vm3, %v15353_v47  ;;  %15361 = vmatprep.subr.msk.bf16.mxu1 %vm16793_vm3, %v15359_v31  ;;  %v10781_v9 = vmul.f32 0.5, %v10751_v59 }
0x304e   : > { %v18495_v1 = vpop.permute.xlu0 %15860 }
0x304f   : > { %v15863_v16 = vunpack.i.h.bf16 %v18495_v1  ;;  %v15862_v17 = vunpack.i.l.bf16 %v18495_v1  ;;  %14596 = vmatmul.mubr.msk.f32.vlgmr.msra.gmra.mrb[74].mxu1 %vm1477_vm2, %v10779_v35  ;;  %v18500_v43 = vpop.permute.xlu1 %15865 }
0x3050   : > { %v15868_v38 = vunpack.i.h.bf16 %v18500_v43  ;;  %v15867_v6 = vunpack.i.l.bf16 %v18500_v43  ;;  %15364 = vmatpush3.bf16.xpose.msk.msra.mxu1 %vm16793_vm3, %v15359_v31  ;;  %14609 = vmatprep.mubr.msk.f32.mxu1 %vm1477_vm2, %v10782_v37 }
0x3051   : > { %v15365_v20 = vpack.c.bf16 %v15863_v16, %v15862_v17 }
0x3052   : > { %v15371_v32 = vpack.c.bf16 %v15868_v38, %v15867_v6  ;;  %v10757_v46 = vpop.permute.xlu0 %10756 }
0x3053   : > { %14603 = vmatmul.mubr.msk.f32.vlgmr.msra.gmra.mrb[106].mxu0 %vm1477_vm2, %v10781_v9  ;;  %15367 = vmatprep.subr.msk.bf16.mxu0 %vm16793_vm3, %v15365_v20  ;;  %v10761_v21 = vpop.permute.xlu1 %10760  ;;  %v10783_v26 = vmul.f32 0.5, %v10757_v46 }
0x3054   : > { %v10784_v61 = vmul.f32 0.5, %v10761_v21  ;;  %15370 = vmatpush3.bf16.xpose.msk.msra.mxu0 %vm16793_vm3, %v15365_v20  ;;  %15373 = vmatprep.subr.msk.bf16.mxu1 %vm16793_vm3, %v15371_v32 }
0x3056   : > { %v10763_v58 = vpop.permute.xlu0 %10762  ;;  %14616 = vmatprep.mubr.msk.f32.mxu0 %vm1477_vm2, %v10784_v61 }
0x3057   : > { %14610 = vmatmul.mubr.msk.f32.vlgmr.msra.gmra.mrb[76].mxu1 %vm1477_vm2, %v10783_v26  ;;  %v10767_v5 = vpop.permute.xlu1 %10766  ;;  %v10785_v52 = vmul.f32 0.5, %v10763_v58 }
0x3058   : > { %v10786_v62 = vmul.f32 0.5, %v10767_v5  ;;  %15376 = vmatpush3.bf16.xpose.msk.msra.mxu1 %vm16793_vm3, %v15371_v32 }
0x305a   : > { %v10769_v4 = vpop.permute.xlu0 %10768  ;;  %14623 = vmatprep.mubr.msk.f32.mxu1 %vm1477_vm2, %v10786_v62 }
0x305b   : > { %14617 = vmatmul.mubr.msk.f32.vlgmr.msra.gmra.mrb[108].mxu0 %vm1477_vm2, %v10785_v52  ;;  %v15871_v8 = vpop.permute.xlu1 %15870  ;;  %v10787_v34 = vmul.f32 0.5, %v10769_v4 }
0x305c   : > { %v15873_v56 = vunpack.i.h.bf16 %v15871_v8  ;;  %v15872_v33 = vunpack.i.l.bf16 %v15871_v8 }
0x305e   : > { %v15377_v2 = vpack.c.bf16 %v15873_v56, %v15872_v33 }
0x305f   : > { %14624 = vmatmul.mubr.msk.f32.vlgmr.msra.gmra.mrb[78].mxu1 %vm1477_vm2, %v10787_v34 }
0x3060   : > { %15378 = vmatprep.subr.bf16.mxu0 %v15377_v2 }
0x3061   : > { %15380 = vmatpush3.bf16.msra.mxu0 %v15377_v2 }
0x30a3   : > { %v18521_v27 = vpop.f32.mrb[102].mxu0 }
0x30a4   : > { %v18523_v3 = vpop.f32.mrb[103].mxu0  ;;  %v11501_v44 = vsel %vm1145_vm0, %v18521_v27, -inf }
0x30a5   : > { %11502 = vmax.xlane.f32.xlu0 %v11501_v44  ;;  %v11498_v63 = vsel %vm1145_vm0, %v18523_v3, -inf }
0x30a6   : > { %11499 = vmax.xlane.f32.xlu1 %v11498_v63 }
0x30ad   : > { %v15876_v15 = vpop.permute.xlu0 %15875 }
0x30ae   : > { %v15878_v57 = vunpack.i.h.bf16 %v15876_v15  ;;  %v15877_v53 = vunpack.i.l.bf16 %v15876_v15  ;;  %v15881_v12 = vpop.permute.xlu1 %15880 }
0x30af   : > { %v15883_v42 = vunpack.i.h.bf16 %v15881_v12  ;;  %v15882_v14 = vunpack.i.l.bf16 %v15881_v12 }
0x30b0   : > { %v18529_v23 = vpack.c.bf16 %v15878_v57, %v15877_v53 }
0x30b1   : > { %v15385_v54 = vpack.c.bf16 %v15883_v42, %v15882_v14 }
0x30b2   : > { %15382 = vmatprep.subr.bf16.mxu0 %v18529_v23 }
0x30b3   : > { %15386 = vmatprep.subr.bf16.mxu1 %v15385_v54  ;;  %v18587_v6 = vpop.permute.xlu1 %15885 }
0x30b4   : > { %15388 = vmatpush3.bf16.msra.mxu1 %v15385_v54 }
0x311a   : > { %v14583_v48 = vpop.f32.mrb[72].mxu1 }
0x311b   : > { %v18532_v51 = vpop.f32.mrb[73].mxu1  ;;  %v11507_v0 = vsel %vm1145_vm0, %v14583_v48, -inf }
0x311c   : > { %11508 = vmax.xlane.f32.xlu0 %v11507_v0  ;;  %v18535_v60 = vpop.f32.mrb[104].mxu0  ;;  %v11504_v22 = vsel %vm1145_vm0, %v18532_v51, -inf }
0x311d   : > { %v18537_v49 = vpop.f32.mrb[105].mxu0  ;;  %v11513_v40 = vsel %vm1145_vm0, %v18535_v60, -inf }
0x311e   : > { %v11510_v24 = vsel %vm1145_vm0, %v18537_v49, -inf }
0x311f   : > { %11511 = vmax.xlane.f32.xlu1 %v11510_v24 }
0x3120   : > { %11514 = vmax.xlane.f32.xlu0 %v11513_v40 }
0x3122   : > { %v18543_v41 = vpop.f32.mrb[74].mxu1 }
0x3123   : > { %v18545_v28 = vpop.f32.mrb[75].mxu1  ;;  %v11519_v36 = vsel %vm1145_vm0, %v18543_v41, -inf }
0x3124   : > { %11505 = vmax.xlane.f32.xlu0 %v11504_v22  ;;  %v11516_v19 = vsel %vm1145_vm0, %v18545_v28, -inf }
0x3125   : > { %11517 = vmax.xlane.f32.xlu1 %v11516_v19 }
0x3126   : > { %v18551_v18 = vpop.f32.mrb[106].mxu0 }
0x3127   : > { %v18553_v45 = vpop.f32.mrb[107].mxu0  ;;  %v11525_v7 = vsel %vm1145_vm0, %v18551_v18, -inf }
0x3128   : > { %11520 = vmax.xlane.f32.xlu0 %v11519_v36  ;;  %v11522_v11 = vsel %vm1145_vm0, %v18553_v45, -inf }
0x3129   : > { %11523 = vmax.xlane.f32.xlu1 %v11522_v11 }
0x312a   : > { %v18559_v50 = vpop.f32.mrb[76].mxu1 }
0x312b   : > { %v18561_v30 = vpop.f32.mrb[77].mxu1  ;;  %v11531_v10 = vsel %vm1145_vm0, %v18559_v50, -inf }
0x312c   : > { %11526 = vmax.xlane.f32.xlu0 %v11525_v7  ;;  %v11528_v39 = vsel %vm1145_vm0, %v18561_v30, -inf }
0x312d   : > { %11529 = vmax.xlane.f32.xlu1 %v11528_v39 }
0x312e   : > { %v18567_v47 = vpop.f32.mrb[108].mxu0 }
0x312f   : > { %v18569_v31 = vpop.f32.mrb[109].mxu0  ;;  %v11537_v16 = vsel %vm1145_vm0, %v18567_v47, -inf }
0x3130   : > { %11532 = vmax.xlane.f32.xlu0 %v11531_v10  ;;  %v11534_v59 = vsel %vm1145_vm0, %v18569_v31, -inf }
0x3131   : > { %11535 = vmax.xlane.f32.xlu1 %v11534_v59 }
0x3132   : > { %v18575_v35 = vpop.f32.mrb[78].mxu1  ;;  %v11503_v20 = vpop.xlane.xlu0 %11502 }
0x3133   : > { %v18577_v37 = vpop.f32.mrb[79].mxu1  ;;  %v11543_v38 = vsel %vm1145_vm0, %v18575_v35, -inf  ;;  %v11500_v9 = vpop.xlane.xlu1 %11499  ;;  %v11547_v46 = vsub.f32 %v18521_v27, %v11503_v20 }
0x3134   : > { %11538 = vmax.xlane.f32.xlu0 %v11537_v16  ;;  %v11540_v17 = vsel %vm1145_vm0, %v18577_v37, -inf  ;;  %v11546_v32 = vsub.f32 %v18523_v3, %v11500_v9 }
0x3135   : > { %11541 = vmax.xlane.f32.xlu1 %v11540_v17  ;;  %v11564_v61 = vmul.f32 1.442695, %v11547_v46 }
0x3136   : > { %v11562_v21 = vmul.f32 1.442695, %v11546_v32 }
0x3138   : > { %11544 = vmax.xlane.f32.xlu0 %v11543_v38  ;;  %16225 = vpow2.f32 %v11562_v21 }
0x3139   : > { %16227 = vpow2.f32 %v11564_v61 }
0x3142   : > { %v18593_v26 = vpop.eup %16225 }
0x3143   : > { %v18595_v58 = vpop.eup %16227 }
0x3146   : > { %15890 = vrot.lane.b32.xlu1 %v18475_v29, %s18971_s11  ;;  %v11594_v29 = vsel %vm1145_vm0, %v18593_v26, 0.0 }
0x314e   : > { %15895 = vrot.lane.b32.xlu0 %v18480_v13, %s18971_s11  ;;  %v11597_v13 = vsel %vm1145_vm0, %v18595_v58, 0.0 }
0x316a   : > { %11595 = vadd.xlane.f32.xlu1 %v11594_v29 }
0x316d   : > { %11598 = vadd.xlane.f32.xlu0 %v11597_v13 }
0x31a9   : > { %v11509_v5 = vpop.xlane.xlu0 %11508 }
0x31aa   : > { %v11549_v62 = vsub.f32 %v14583_v48, %v11509_v5 }
0x31ac   : > { %v11568_v52 = vmul.f32 1.442695, %v11549_v62  ;;  %v11512_v4 = vpop.xlane.xlu1 %11511 }
0x31ad   : > { %v11515_v8 = vpop.xlane.xlu0 %11514  ;;  %v11550_v33 = vsub.f32 %v18537_v49, %v11512_v4 }
0x31ae   : > { %16229 = vpow2.f32 %v11568_v52  ;;  %v11551_v56 = vsub.f32 %v18535_v60, %v11515_v8 }
0x31af   : > { %v11570_v44 = vmul.f32 1.442695, %v11550_v33 }
0x31b0   : > { %v11572_v34 = vmul.f32 1.442695, %v11551_v56 }
0x31b1   : > { %v11506_v2 = vpop.xlane.xlu0 %11505 }
0x31b2   : > { %16231 = vpow2.f32 %v11572_v34  ;;  %v11548_v27 = vsub.f32 %v18532_v51, %v11506_v2  ;;  %v11518_v3 = vpop.xlane.xlu1 %11517 }
0x31b3   : > { %v11552_v15 = vsub.f32 %v18545_v28, %v11518_v3 }
0x31b4   : > { %v11566_v63 = vmul.f32 1.442695, %v11548_v27 }
0x31b5   : > { %v11521_v57 = vpop.xlane.xlu0 %11520  ;;  %v11574_v14 = vmul.f32 1.442695, %v11552_v15 }
0x31b6   : > { %16233 = vpow2.f32 %v11566_v63  ;;  %v11553_v53 = vsub.f32 %v18543_v41, %v11521_v57  ;;  %v11524_v12 = vpop.xlane.xlu1 %11523 }
0x31b7   : > { %16235 = vpow2.f32 %v11570_v44  ;;  %v11554_v48 = vsub.f32 %v18553_v45, %v11524_v12 }
0x31b8   : > { %v18606_v42 = vpop.eup %16229  ;;  %v11576_v54 = vmul.f32 1.442695, %v11553_v53 }
0x31b9   : > { %v11527_v0 = vpop.xlane.xlu0 %11526  ;;  %v11603_v51 = vsel %vm1145_vm0, %v18606_v42, 0.0  ;;  %v11578_v40 = vmul.f32 1.442695, %v11554_v48 }
0x31ba   : > { %16237 = vpow2.f32 %v11576_v54  ;;  %v11555_v60 = vsub.f32 %v18551_v18, %v11527_v0  ;;  %v11530_v49 = vpop.xlane.xlu1 %11529  ;;  %11604 = vadd.xlane.f32.xlu0 %v11603_v51 }
0x31bb   : > { %16239 = vpow2.f32 %v11574_v14  ;;  %v11556_v28 = vsub.f32 %v18561_v30, %v11530_v49  ;;  %v15888_v49 = vunpack.i.h.bf16 %v18587_v6 }
0x31bc   : > { %v18612_v24 = vpop.eup %16231  ;;  %v11580_v41 = vmul.f32 1.442695, %v11555_v60 }
0x31bd   : > { %v11533_v22 = vpop.xlane.xlu0 %11532  ;;  %v11609_v19 = vsel %vm1145_vm0, %v18612_v24, 0.0  ;;  %v11582_v18 = vmul.f32 1.442695, %v11556_v28 }
0x31be   : > { %16241 = vpow2.f32 %v11580_v41  ;;  %v11557_v45 = vsub.f32 %v18559_v50, %v11533_v22  ;;  %11610 = vadd.xlane.f32.xlu0 %v11609_v19  ;;  %v11536_v36 = vpop.xlane.xlu1 %11535 }
0x31bf   : > { %16243 = vpow2.f32 %v11578_v40  ;;  %v11558_v39 = vsub.f32 %v18569_v31, %v11536_v36  ;;  %v15887_v40 = vunpack.i.l.bf16 %v18587_v6 }
0x31c0   : > { %v18618_v11 = vpop.eup %16233  ;;  %v11584_v7 = vmul.f32 1.442695, %v11557_v45 }
0x31c1   : > { %v11539_v10 = vpop.xlane.xlu0 %11538  ;;  %v11600_v30 = vsel %vm1145_vm0, %v18618_v11, 0.0  ;;  %v18623_v59 = vpop.eup %16235  ;;  %v11586_v38 = vmul.f32 1.442695, %v11558_v39  ;;  %v15389_v28 = vpack.c.bf16 %v15888_v49, %v15887_v40 }
0x31c2   : > { %16245 = vpow2.f32 %v11584_v7  ;;  %v11559_v16 = vsub.f32 %v18567_v47, %v11539_v10  ;;  %11601 = vadd.xlane.f32.xlu1 %v11600_v30  ;;  %v11542_v50 = vpop.xlane.xlu1 %11541  ;;  %v11606_v46 = vsel %vm1145_vm0, %v18623_v59, 0.0 }
0x31c3   : > { %16247 = vpow2.f32 %v11582_v18  ;;  %v11560_v20 = vsub.f32 %v18577_v37, %v11542_v50 }
0x31c4   : > { %v18626_v17 = vpop.eup %16237  ;;  %v11588_v9 = vmul.f32 1.442695, %v11559_v16 }
0x31c5   : > { %v11545_v32 = vpop.xlane.xlu0 %11544  ;;  %v11615_v31 = vsel %vm1145_vm0, %v18626_v17, 0.0  ;;  %v18633_v21 = vpop.eup %16239  ;;  %v11590_v37 = vmul.f32 1.442695, %v11560_v20 }
0x31c6   : > { %16249 = vpow2.f32 %v11588_v9  ;;  %v11561_v47 = vsub.f32 %v18575_v35, %v11545_v32  ;;  %11616 = vadd.xlane.f32.xlu0 %v11615_v31  ;;  %11607 = vadd.xlane.f32.xlu1 %v11606_v46  ;;  %v15891_v61 = vpop.permute.xlu1 %15890  ;;  %v11612_v8 = vsel %vm1145_vm0, %v18633_v21, 0.0 }
0x31c7   : > { %v15893_v29 = vunpack.i.h.bf16 %v15891_v61  ;;  %v15892_v13 = vunpack.i.l.bf16 %v15891_v61  ;;  %16251 = vpow2.f32 %v11586_v38 }
0x31c8   : > { %v18636_v5 = vpop.eup %16241  ;;  %v11592_v62 = vmul.f32 1.442695, %v11561_v47 }
0x31c9   : > { %v18638_v52 = vpack.c.bf16 %v15893_v29, %v15892_v13  ;;  %v11621_v4 = vsel %vm1145_vm0, %v18636_v5, 0.0  ;;  %v18644_v56 = vpop.eup %16243  ;;  %v15896_v54 = vpop.permute.xlu0 %15895 }
0x31ca   : > { %16253 = vpow2.f32 %v11592_v62  ;;  %11622 = vadd.xlane.f32.xlu0 %v11621_v4  ;;  %11613 = vadd.xlane.f32.xlu1 %v11612_v8  ;;  %v11618_v34 = vsel %vm1145_vm0, %v18644_v56, 0.0  ;;  %v15898_v7 = vunpack.i.h.bf16 %v15896_v54  ;;  %v15897_v39 = vunpack.i.l.bf16 %v15896_v54 }
0x31cb   : > { %15394 = vmatprep.subr.bf16.mxu1 %v18638_v52  ;;  %16255 = vpow2.f32 %v11590_v37 }
0x31cc   : > { %v18647_v35 = vpop.eup %16245  ;;  %v15397_v38 = vpack.c.bf16 %v15898_v7, %v15897_v39 }
0x31cd   : > { %v11627_v33 = vsel %vm1145_vm0, %v18647_v35, 0.0  ;;  %v18653_v2 = vpop.eup %16247 }
0x31ce   : > { %11628 = vadd.xlane.f32.xlu0 %v11627_v33  ;;  %11619 = vadd.xlane.f32.xlu1 %v11618_v34  ;;  %v11624_v44 = vsel %vm1145_vm0, %v18653_v2, 0.0 }
0x31d0   : > { %v18655_v27 = vpop.eup %16249 }
0x31d1   : > { %v11633_v3 = vsel %vm1145_vm0, %v18655_v27, 0.0  ;;  %v18661_v63 = vpop.eup %16251 }
0x31d2   : > { %11634 = vadd.xlane.f32.xlu0 %v11633_v3  ;;  %11625 = vadd.xlane.f32.xlu1 %v11624_v44  ;;  %v11630_v53 = vsel %vm1145_vm0, %v18661_v63, 0.0 }
0x31d4   : > { %v18663_v15 = vpop.eup %16253 }
0x31d5   : > { %v11639_v57 = vsel %vm1145_vm0, %v18663_v15, 0.0  ;;  %v18669_v12 = vpop.eup %16255 }
0x31d6   : > { %11640 = vadd.xlane.f32.xlu0 %v11639_v57  ;;  %11631 = vadd.xlane.f32.xlu1 %v11630_v53  ;;  %v11636_v14 = vsel %vm1145_vm0, %v18669_v12, 0.0 }
0x31da   : > { %11637 = vadd.xlane.f32.xlu1 %v11636_v14 }
0x31eb   : > { %15900 = vrot.lane.b32.xlu1 %v18495_v1, %s18971_s11 }
0x31ec   : > { %15905 = vrot.lane.b32.xlu0 %v18500_v43, %s18971_s11 }
0x31f7   : > { %v11596_v48 = vpop.xlane.xlu1 %11595 }
0x31f8   : > { %16257 = vrcp.f32 %v11596_v48 }
0x31fa   : > { %v11599_v0 = vpop.xlane.xlu0 %11598 }
0x31fb   : > { %16259 = vrcp.f32 %v11599_v0 }
0x3202   : > { %v16258_v51 = vpop.eup %16257 }
0x3203   : > { %v11658_v60 = vmul.f32 %v16258_v51, %v18593_v26 }
0x3205   : > { %v16260_v41 = vpop.eup %16259  ;;  %14630 = vmatprep.mubr.msk.f32.mxu0 %vm1145_vm0, %v11658_v60 }
0x3206   : > { %v11659_v1 = vmul.f32 %v16260_v41, %v18595_v58 }
0x3208   : > { %14631 = vmatmul.mubr.msk.f32.vlgmr.msra.gmra.mrb[110].mxu0 %vm1145_vm0, %v11659_v1  ;;  %v12441_v1 = vld [vmem:[%s18994_s5 + $0x8] sm:$0xff] }
0x3209   : > { %15384 = vmatpush3.bf16.msra.mxu0 %v18529_v23 }
0x320a   : > { %15390 = vmatprep.subr.bf16.mxu0 %v15389_v28 }
0x3247   : > { %v11605_v43 = vpop.xlane.xlu0 %11604 }
0x3248   : > { %16261 = vrcp.f32 %v11605_v43 }
0x324b   : > { %v11611_v22 = vpop.xlane.xlu0 %11610 }
0x324f   : > { %v11602_v19 = vpop.xlane.xlu1 %11601 }
0x3250   : > { %16263 = vrcp.f32 %v11602_v19  ;;  %v12442_v19 = vld [vmem:[%s18994_s5 + $0x10] sm:$0xff] }
0x3251   : > { %16265 = vrcp.f32 %v11611_v22 }
0x3252   : > { %v16262_v18 = vpop.eup %16261 }
0x3253   : > { %v11617_v26 = vpop.xlane.xlu0 %11616  ;;  %v11608_v45 = vpop.xlane.xlu1 %11607  ;;  %v11661_v16 = vmul.f32 %v16262_v18, %v18606_v42 }
0x3254   : > { %16267 = vrcp.f32 %v11608_v45 }
0x3255   : > { %16269 = vrcp.f32 %v11617_v26  ;;  %v12443_v26 = vld [vmem:[%s18994_s5 + $0x18] sm:$0xff] }
0x3256   : > { %v15413_v45 = vpack.c.bf16 %v12443_v26, %v12442_v19 }
0x3257   : > { %v11623_v6 = vpop.xlane.xlu0 %11622  ;;  %v11614_v36 = vpop.xlane.xlu1 %11613 }
0x3258   : > { %16271 = vrcp.f32 %v11614_v36 }
0x3259   : > { %16273 = vrcp.f32 %v11623_v6 }
0x325a   : > { %v16264_v58 = vpop.eup %16263 }
0x325b   : > { %v11629_v10 = vpop.xlane.xlu0 %11628  ;;  %v11620_v23 = vpop.xlane.xlu1 %11619  ;;  %v11660_v30 = vmul.f32 %v16264_v58, %v18618_v11 }
0x325c   : > { %16275 = vrcp.f32 %v11620_v23  ;;  %v16266_v50 = vpop.eup %16265 }
0x325d   : > { %14637 = vmatprep.mubr.msk.f32.mxu0 %vm1145_vm0, %v11660_v30  ;;  %16277 = vrcp.f32 %v11629_v10  ;;  %v11663_v11 = vmul.f32 %v16266_v50, %v18612_v24 }
0x325e   : > { %14638 = vmatmul.mubr.msk.f32.vlgmr.msra.gmra.mrb[112].mxu0 %vm1145_vm0, %v11661_v16  ;;  %v16268_v9 = vpop.eup %16267 }
0x325f   : > { %15392 = vmatpush3.bf16.msra.mxu0 %v15389_v28  ;;  %v11635_v20 = vpop.xlane.xlu0 %11634  ;;  %v11626_v32 = vpop.xlane.xlu1 %11625  ;;  %v11662_v31 = vmul.f32 %v16268_v9, %v18623_v59 }
0x3260   : > { %15398 = vmatprep.subr.bf16.mxu0 %v15397_v38  ;;  %16279 = vrcp.f32 %v11626_v32  ;;  %v16270_v42 = vpop.eup %16269 }
0x3261   : > { %14644 = vmatprep.mubr.msk.f32.mxu1 %vm1145_vm0, %v11662_v31  ;;  %16281 = vrcp.f32 %v11635_v20  ;;  %v11665_v13 = vmul.f32 %v16270_v42, %v18626_v17 }
0x3262   : > { %v16272_v46 = vpop.eup %16271  ;;  %14645 = vmatmul.mubr.msk.f32.vlgmr.msra.gmra.mrb[80].mxu1 %vm1145_vm0, %v11663_v11 }
0x3263   : > { %v11641_v47 = vpop.xlane.xlu0 %11640  ;;  %v11632_v61 = vpop.xlane.xlu1 %11631  ;;  %15396 = vmatpush3.bf16.msra.mxu1 %v18638_v52  ;;  %v11664_v29 = vmul.f32 %v16272_v46, %v18633_v21 }
0x3264   : > { %16283 = vrcp.f32 %v11632_v61  ;;  %v16274_v59 = vpop.eup %16273 }
0x3265   : > { %14651 = vmatprep.mubr.msk.f32.mxu0 %vm1145_vm0, %v11664_v29  ;;  %16285 = vrcp.f32 %v11641_v47  ;;  %v11667_v21 = vmul.f32 %v16274_v59, %v18636_v5 }
0x3266   : > { %v16276_v24 = vpop.eup %16275  ;;  %14652 = vmatmul.mubr.msk.f32.vlgmr.msra.gmra.mrb[114].mxu0 %vm1145_vm0, %v11665_v13 }
0x3267   : > { %v15906_v37 = vpop.permute.xlu0 %15905  ;;  %v11638_v62 = vpop.xlane.xlu1 %11637  ;;  %15400 = vmatpush3.bf16.msra.mxu0 %v15397_v38  ;;  %v11666_v52 = vmul.f32 %v16276_v24, %v18644_v56 }
0x3268   : > { %v15908_v4 = vunpack.i.h.bf16 %v15906_v37  ;;  %v15907_v8 = vunpack.i.l.bf16 %v15906_v37  ;;  %16287 = vrcp.f32 %v11638_v62  ;;  %v16278_v33 = vpop.eup %16277 }
0x3269   : > { %14658 = vmatprep.mubr.msk.f32.mxu1 %vm1145_vm0, %v11666_v52  ;;  %v11669_v14 = vmul.f32 %v16278_v33, %v18647_v35 }
0x326a   : > { %v15405_v17 = vpack.c.bf16 %v15908_v4, %v15907_v8  ;;  %v16280_v34 = vpop.eup %16279  ;;  %14659 = vmatmul.mubr.msk.f32.vlgmr.msra.gmra.mrb[82].mxu1 %vm1145_vm0, %v11667_v21 }
0x326b   : > { %v15901_v3 = vpop.permute.xlu1 %15900  ;;  %v11668_v53 = vmul.f32 %v16280_v34, %v18653_v2  ;;  %v16282_v54 = vpop.eup %16281 }
0x326c   : > { %v15903_v44 = vunpack.i.h.bf16 %v15901_v3  ;;  %v15902_v57 = vunpack.i.l.bf16 %v15901_v3  ;;  %15406 = vmatprep.subr.bf16.mxu0 %v15405_v17  ;;  %v11671_v60 = vmul.f32 %v16282_v54, %v18655_v27 }
0x326d   : > { %14665 = vmatprep.mubr.msk.f32.mxu0 %vm1145_vm0, %v11668_v53 }
0x326e   : > { %v15401_v48 = vpack.c.bf16 %v15903_v44, %v15902_v57  ;;  %v16284_v5 = vpop.eup %16283  ;;  %14666 = vmatmul.mubr.msk.f32.vlgmr.msra.gmra.mrb[116].mxu0 %vm1145_vm0, %v11669_v14 }
0x326f   : > { %15408 = vmatpush3.bf16.msra.mxu0 %v15405_v17  ;;  %v11670_v56 = vmul.f32 %v16284_v5, %v18661_v63  ;;  %v16286_v0 = vpop.eup %16285 }
0x3270   : > { %15402 = vmatprep.subr.bf16.mxu1 %v15401_v48  ;;  %v11673_v2 = vmul.f32 %v16286_v0, %v18663_v15 }
0x3271   : > { %15404 = vmatpush3.bf16.msra.mxu1 %v15401_v48  ;;  %14672 = vmatprep.mubr.msk.f32.mxu1 %vm1145_vm0, %v11670_v56 }
0x3272   : > { %v16288_v51 = vpop.eup %16287 }
0x3273   : > { %v11672_v35 = vmul.f32 %v16288_v51, %v18669_v12  ;;  %v12440_v12 = vld [vmem:[%s18994_s5] sm:$0xff] }
0x3274   : > { %14673 = vmatmul.mubr.msk.f32.vlgmr.msra.gmra.mrb[84].mxu1 %vm1145_vm0, %v11671_v60  ;;  %v15409_v28 = vpack.c.bf16 %v12441_v1, %v12440_v12 }
0x3275   : > { %14679 = vmatprep.mubr.msk.f32.mxu0 %vm1145_vm0, %v11672_v35 }
0x3276   : > { %14680 = vmatmul.mubr.msk.f32.vlgmr.msra.gmra.mrb[118].mxu0 %vm1145_vm0, %v11673_v2  ;;  %15410 = vmatprep.subr.bf16.mxu1 %v15409_v28 }
0x3277   : > { %15412 = vmatpush3.bf16.msra.mxu1 %v15409_v28 }
0x3278   : > { %15414 = vmatprep.subr.bf16.mxu1 %v15413_v45 }
0x327b   : > { %15416 = vmatpush3.bf16.msra.mxu1 %v15413_v45 }
0x32db   : > { %v14632_v63 = vpop.f32.mrb[110].mxu0 }
0x32dc   : > { %v11752_v49 = vpop.f32.mrb[111].mxu0 }
0x3331   : > { %v14639_v40 = vpop.f32.mrb[112].mxu0 }
0x3332   : > { %12374 = vrot.lane.b32.xlu0 %v14639_v40, %s18973_s28  ;;  %v11839_v27 = vpop.f32.mrb[113].mxu0 }
0x3333   : > { %12372 = vrot.lane.b32.xlu1 %v11839_v27, %s18973_s28  ;;  %s12586_s28 = scalar_lea.sflag [#allocation5], %s18403_s8 }
0x3335   : > { %v14646_v41 = vpop.f32.mrb[80].mxu1 }
0x3336   : > { %12382 = vrot.lane.b32.xlu0 %v14646_v41, %s18975_s12  ;;  %v11926_v15 = vpop.f32.mrb[81].mxu1 }
0x3337   : > { %12380 = vrot.lane.b32.xlu1 %v11926_v15, %s18975_s12 }
0x3339   : > { %v14653_v43 = vpop.f32.mrb[114].mxu0 }
0x333a   : > { %12390 = vrot.lane.b32.xlu0 %v14653_v43, %s18974_s7  ;;  %v12013_v22 = vpop.f32.mrb[115].mxu0 }
0x333b   : > { %12388 = vrot.lane.b32.xlu1 %v12013_v22, %s18974_s7  ;;  %s16441_s7 = smov [#allocation4]  }
0x333c   : > { %s16297_s11 = sshll.u32 %s16441_s7, 4  ;;  %s16298_s11 = int_to_ptr.vmem [resolvable:$false] %s16297_s11 }
0x333d   : > { %v14660_v6 = vpop.f32.mrb[82].mxu1  ;;  %s16299_s18 = scalar_lea.vmem %s16298_s11, 512  ;;  %p16300_p0 = scmp.lt.s32.totalorder %s18756_s29, %s16298_s11 }
0x333e   : > { %12398 = vrot.lane.b32.xlu0 %v14660_v6, %s18977_s4  ;;  %v12100_v36 = vpop.f32.mrb[83].mxu1  ;;  %p16301_p1 = scmp.lt.s32.totalorder %s16299_s18, %s16293_s2 }
0x333f   : > { %12396 = vrot.lane.b32.xlu1 %v12100_v36, %s18977_s4 }
0x3340   : > { %p16302_p2 = por %p16301_p1, %p16300_p0 }
0x3341   : > { %v14667_v18 = vpop.f32.mrb[116].mxu0 }
0x3342   : > { %v12187_v58 = vpop.f32.mrb[117].mxu0  ;;  %12406 = vrot.lane.b32.xlu0 %v14667_v18, %s18976_s9  ;;  %p16303_p3 = pnand %p16302_p2, %p16296_p13 }
0x3343   : > { %12404 = vrot.lane.b32.xlu1 %v12187_v58, %s18976_s9  ;;  %s18995_s9 = sld [smem:[#allocation36_spill]] }
0x3347   : > { %v14674_v7 = vpop.f32.mrb[84].mxu1 }
0x3348   : > { %12414 = vrot.lane.b32.xlu0 %v14674_v7, %s18978_s22  ;;  %v12274_v39 = vpop.f32.mrb[85].mxu1 }
0x3349   : > { %v14681_v10 = vpop.f32.mrb[118].mxu0  ;;  %12412 = vrot.lane.b32.xlu1 %v12274_v39, %s18978_s22  ;;  %v13192_v57 = vld [vmem:[%s18995_s9] ss:$0 sm:$0xff] }
0x334a   : > { %v12361_v23 = vpop.f32.mrb[119].mxu0 }
0x334c   : > { %12422 = vrot.lane.b32.xlu0 %v14681_v10, %s18979_s27 }
0x334d   : > { %12420 = vrot.lane.b32.xlu1 %v12361_v23, %s18979_s27  ;;  %s13205_s27 = sshll.u32 %s16655_s0, 8 }
0x334e   : > { %s18761_s4 = scalar_lea.hbm %s18996_s21, %s13205_s27 }
0x33a4   : > { %v12375_v30 = vpop.permute.xlu0 %12374 }
0x33a5   : > { %v12373_v16 = vpop.permute.xlu1 %12372  ;;  %v12427_v61 = vsel %vm1477_vm2, %v14632_v63, %v12375_v30 }
0x33a6   : > { %v12426_v46 = vsel %vm1477_vm2, %v11752_v49, %v12373_v16 }
0x33a8   : > { %v12383_v50 = vpop.permute.xlu0 %12382 }
0x33a9   : > { %v12381_v38 = vpop.permute.xlu1 %12380  ;;  %v12429_v59 = vsel %vm3116_vm4, %v12427_v61, %v12383_v50 }
0x33aa   : > { %v12428_v29 = vsel %vm3116_vm4, %v12426_v46, %v12381_v38 }
0x33ac   : > { %v12391_v9 = vpop.permute.xlu0 %12390 }
0x33ad   : > { %v12389_v20 = vpop.permute.xlu1 %12388  ;;  %v12431_v37 = vsel %vm3119_vm5, %v12429_v59, %v12391_v9 }
0x33ae   : > { %v12430_v24 = vsel %vm3119_vm5, %v12428_v29, %v12389_v20 }
0x33b0   : > { %v12399_v32 = vpop.permute.xlu0 %12398 }
0x33b1   : > { %v12397_v31 = vpop.permute.xlu1 %12396  ;;  %v12433_v4 = vsel %vm1145_vm0, %v12431_v37, %v12399_v32 }
0x33b2   : > { %v12432_v62 = vsel %vm1145_vm0, %v12430_v24, %v12397_v31 }
0x33b4   : > { %v12407_v11 = vpop.permute.xlu0 %12406 }
0x33b5   : > { %v12405_v42 = vpop.permute.xlu1 %12404  ;;  %v12435_v21 = vsel %vm3124_vm6, %v12433_v4, %v12407_v11 }
0x33b6   : > { %v12434_v8 = vsel %vm3124_vm6, %v12432_v62, %v12405_v42 }
0x33ba   : > { %v12415_v47 = vpop.permute.xlu0 %12414 }
0x33bb   : > { %v12413_v13 = vpop.permute.xlu1 %12412  ;;  %v12437_v34 = vsel %vm3127_vm7, %v12435_v21, %v12415_v47 }
0x33bc   : > { %v12436_v33 = vsel %vm3127_vm7, %v12434_v8, %v12413_v13 }
0x33be   : > { %v12423_v52 = vpop.permute.xlu0 %12422 }
0x33bf   : > { %v12421_v17 = vpop.permute.xlu1 %12420  ;;  %v12439_v44 = vsel %vm3130_vm8, %v12437_v34, %v12423_v52 }
0x33c0   : > { %v12438_v3 = vsel %vm3130_vm8, %v12436_v33, %v12421_v17 }
0x33c1   : > { %14690 = vmatprep.mubr.msk.f32.mxu1 %vm1229_vm1, %v12438_v3 }
0x33c2   : > { %14691 = vmatmul.mubr.msk.f32.vlgmr.msra.gmra.mrb[86].mxu1 %vm1229_vm1, %v12439_v44 }
0x3495   : > { %v14692_v53 = vpop.f32.mrb[86].mxu1 }
0x3496   : > { %v12529_v14 = vadd.f32 %v14692_v53, %v13192_v57  ;;  %v12523_v54 = vpop.f32.mrb[87].mxu1 }
0x3497   : > { %v12524_v48 = vadd.f32 %v13192_v57, %v12523_v54 }
0x3498   : > { %v12533_v5 = vadd.f32 %v12529_v14, %v18420_v55 }
0x3499   : > { %v12532_v56 = vadd.f32 %v12524_v48, %v18418_v25 }
0x349a   : > { %v12539_v0 = vsel %vm1229_vm1, %v12533_v5, 0.0 }
0x349b   : > { %12540 = vadd.xlane.f32.xlu0 %v12539_v0  ;;  %v12536_v51 = vsel %vm1229_vm1, %v12532_v56, 0.0 }
0x349c   : > { %12537 = vadd.xlane.f32.xlu1 %v12536_v51 }
0x3528   : > { %v12541_v60 = vpop.xlane.xlu0 %12540 }
0x3529   : > { %v12543_v35 = vmul.f32 0.03125, %v12541_v60  ;;  %v12538_v2 = vpop.xlane.xlu1 %12537 }
0x352a   : > { %v12542_v63 = vmul.f32 0.03125, %v12538_v2 }
0x352b   : > { %v12545_v49 = vsub.f32 %v12533_v5, %v12543_v35 }
0x352c   : > { %v12544_v55 = vsub.f32 %v12532_v56, %v12542_v63 }
0x352d   : > { %v12547_v27 = vmul.f32 %v12545_v49, %v12545_v49 }
0x352e   : > { %v12546_v40 = vmul.f32 %v12544_v55, %v12544_v55 }
0x352f   : > { %v12551_v41 = vsel %vm1229_vm1, %v12547_v27, 0.0 }
0x3530   : > { %v12548_v25 = vsel %vm1229_vm1, %v12546_v40, 0.0 }
0x3531   : > { %12549 = vadd.xlane.f32.xlu0 %v12548_v25 }
0x3535   : > { %12552 = vadd.xlane.f32.xlu0 %v12551_v41 }
0x3536   : > { %16306 = shalt.err (!%p16303_p3)
}
0x3537   : > { %s16307_s22 = scalar_lea.hbm %s18761_s4, 256  ;;  %s16311_s10 = scalar_lea.hbm %s18996_s21, 512 }
0x3538   : > { %p16308_p4 = scmp.ne.s32.totalorder %s18761_s4, %s16307_s22  ;;  %p16312_p9 = scmp.lt.u32.totalorder %s18761_s4, %s18996_s21 }
0x3539   : > { %p16313_p10 = scmp.lt.u32.totalorder %s16311_s10, %s16307_s22  ;;  %p16315_p12 = scmp.lt.u32.totalorder %s16307_s22, %s18761_s4 }
0x353a   : > { %p16309_p7 = pnand %p16308_p4, %p16672_p5 }
0x353b   : > { %p16314_p11 = por %p16313_p10, %p16312_p9 }
0x353c   : > { %p16310_p8 = pneg %p16309_p7 }
0x353d   : > { %p16316_p0 = por %p16315_p12, %p16314_p11 }
0x353f   : > { %p16317_p13 = pnand %p16316_p0, %p16310_p8 }
0x3541   : > { %16320 = shalt.err (!%p16317_p13)
}
0x3542   : > { %s16442_s15 = smov 128   ;;  %s18998_s6 = sld [smem:[#allocation37_spill]] }
0x3543   : > { %s18999_s13 = sld [smem:[#allocation38_spill]]  ;;  %s19000_s3 = sld [smem:[#allocation39_spill]] }
0x3544   : > { %15418 = dma.vmem_to_hbm [thread:$0]  (%p16672_p5), %s18756_s29, 256, %s18761_s4, %s12586_s28, %s16442_s15, %s16442_s15, %s18975_s12  }
0x3545   : > { %s1112_s9 = scalar_lea.vmem [#allocation2], %s12761_s14  ;;  %s12581_s28 = scalar_lea.sflag [#allocation3], %s18403_s8 }
0x3546   : > { %s12599_s29 = sshll.u32 %s1112_s9, 4  ;;  %s16443_s14 = smov [#allocation2]   ;;  %s18796_s29 = int_to_ptr.vmem [resolvable:$true] %s12599_s29 }
0x3547   : > { %s16321_s2 = scalar_lea.vmem %s18796_s29, 256  ;;  %s16325_s7 = sshll.u32 %s16443_s14, 4  ;;  %s16326_s7 = int_to_ptr.vmem [resolvable:$false] %s16325_s7 }
0x3548   : > { %v13195_v26 = vld [vmem:[%s18998_s6] ss:$0 sm:$0xff]  ;;  %p16322_p1 = scmp.ne.s32.totalorder %s18796_s29, %s16321_s2  ;;  %s16327_s11 = scalar_lea.vmem %s16326_s7, 512 }
0x3549   : > { %v13196_v6 = vld [vmem:[%s18999_s13] ss:$0 sm:$0xff]  ;;  %s18794_s4 = scalar_lea.hbm %s19000_s3, %s13205_s27  ;;  %p16328_p4 = scmp.lt.s32.totalorder %s18796_s29, %s16326_s7 }
0x354a   : > { %p16323_p2 = pnand %p16322_p1, %p16672_p5  ;;  %p16329_p7 = scmp.lt.s32.totalorder %s16327_s11, %s16321_s2 }
0x354c   : > { %p16324_p3 = pneg %p16323_p2  ;;  %p16330_p8 = por %p16329_p7, %p16328_p4 }
0x354e   : > { %p16331_p9 = pnand %p16330_p8, %p16324_p3 }
0x35be   : > { %v12550_v15 = vpop.xlane.xlu0 %12549 }
0x35bf   : > { %v12554_v12 = vmul.f32 0.03125, %v12550_v15 }
0x35c1   : > { %v12556_v1 = vadd.f32 1e-05, %v12554_v12 }
0x35c2   : > { %v12553_v28 = vpop.xlane.xlu0 %12552 }
0x35c3   : > { %16289 = vrsqrt.f32 %v12556_v1  ;;  %v12555_v43 = vmul.f32 0.03125, %v12553_v28 }
0x35c5   : > { %v12557_v22 = vadd.f32 1e-05, %v12555_v43 }
0x35c7   : > { %16291 = vrsqrt.f32 %v12557_v22 }
0x35cd   : > { %v16290_v19 = vpop.eup %16289 }
0x35ce   : > { %v12560_v45 = vmul.f32 %v16290_v19, %v12544_v55 }
0x35d0   : > { %v12568_v36 = vmul.f32 %v13195_v26, %v12560_v45 }
0x35d1   : > { %v16292_v18 = vpop.eup %16291 }
0x35d2   : > { %v12561_v58 = vmul.f32 %v16292_v18, %v12545_v49  ;;  %v12576_v7 = vadd.f32 %v13196_v6, %v12568_v36 }
0x35d4   : > { %v12569_v39 = vmul.f32 %v13195_v26, %v12561_v58  ;;  %12578 = vst.msk [vmem:[%s1112_s9] sm:$0xff] %vm1229_vm1, %v12576_v7 }
0x35d6   : > { %v12577_v10 = vadd.f32 %v13196_v6, %v12569_v39 }
0x35d8   : > { %12579 = vst.msk [vmem:[%s1112_s9 + $0x8] sm:$0xff] %vm1229_vm1, %v12577_v10 }
0x35d9   : > { %16334 = shalt.err (!%p16331_p9)
}
0x35da   : > { %s16335_s0 = scalar_lea.hbm %s18794_s4, 256  ;;  %s16339_s27 = scalar_lea.hbm %s19000_s3, 512 }
0x35db   : > { %p16336_p10 = scmp.ne.s32.totalorder %s18794_s4, %s16335_s0  ;;  %p16340_p0 = scmp.lt.u32.totalorder %s18794_s4, %s19000_s3 }
0x35dc   : > { %p16341_p13 = scmp.lt.u32.totalorder %s16339_s27, %s16335_s0  ;;  %p16343_p2 = scmp.lt.u32.totalorder %s16335_s0, %s18794_s4 }
0x35dd   : > { %p16337_p11 = pnand %p16336_p10, %p16672_p5 }
0x35de   : > { %p16342_p1 = por %p16341_p13, %p16340_p0 }
0x35df   : > { %p16338_p12 = pneg %p16337_p11 }
0x35e0   : > { %p16344_p4 = por %p16343_p2, %p16342_p1 }
0x35e2   : > { %p16345_p3 = pnand %p16344_p4, %p16338_p12 }
0x35e4   : > { %16348 = shalt.err (!%p16345_p3)
}
0x35e5   : > { %15417 = dma.vmem_to_hbm [thread:$0]  (%p16672_p5), %s18796_s29, 256, %s18794_s4, %s12581_s28, %s16442_s15, %s16442_s15, %s18975_s12  }
0x35e6 PF: > { %s19001_s18 = sld [smem:[#allocation43_spill]]  ;;  %s19002_s22 = sld [smem:[#allocation41_spill]] }
0x35ec   : > { %p15428_p7 = scmp.ge.s32.totalorder %s19001_s18, 2  ;;  %s12630_s6 = sand.u32 1, %s19002_s22  }
0x35ed   : > { %s12631_s13 = scalar_lea.sflag [#allocation3], %s12630_s6 }
0x35ee   : > { %p15422_p8 = pnand %p15428_p7, %p16676_p6 }
0x35f0   : > { %16366 = dma.done.wait (!%p15422_p8), %s12631_s13, 256  }
0x35f1   : > { %16368 = vsyncadd (!%p15422_p8), %s12631_s13, 4294967040  ;;  %s12640_s25 = scalar_lea.sflag [#allocation5], %s12630_s6 }
0x35f2   : > { %16370 = dma.done.wait (!%p15422_p8), %s12640_s25, 256  }
0x35f3   : > { %16372 = vsyncadd (!%p15422_p8), %s12640_s25, 4294967040  ;;  %s19004_s7 = sld [smem:[#allocation44_spill]]  ;;  %s19005_s8 = sld [smem:[#allocation42_spill]] }
0x35f4   : > { %s19006_s2 = sld [smem:[#allocation45_spill]]  ;;  %s19007_s28 = smov %s16379_s1 }
0x35f9   : > { %p87_p5 = scmp.ge.s32.totalorder %s19004_s7, 4   ;;  %s19008_s1 = smov %s19005_s8 }
0x35fb   :  { %89 = sbr.rel (!%p87_p5) target bundleno = 82 (0x52), region = 287 }
0x3602   :  { %12645 = vsyncpa [#allocation3], 1 }
0x3603   :  { %12647 = vsyncpa [#allocation3 + $0x1], 1 }
0x3604   :  { %12648 = vsyncpa [#allocation5], 1 }
0x3605   :  { %12650 = vsyncpa [#allocation5 + $0x1], 1 }

</bundles_post_ra>
